<compile_context>
chip_gen: v7x
topology: tpu7x:2x2x1
jax: 0.10.0
libtpu: 0.0.40
codegen_flags: <defaults>
</compile_context>

<pallas_src>
import functools

import jax
import jax.numpy as jnp
from jax.experimental import pallas as pl
from jax.experimental.pallas import tpu as pltpu

DTYPE = jnp.bfloat16            # activation / matmul-operand dtype (accumulation stays f32)
W_BUDGET_ELEMS = 2 * 1024 * 1024        # per weight block (bf16 -> 4 MB, 8 MB double-buffered)
CONV_W_BUDGET_ELEMS = 2 * 1024 * 1024   # conv weight block budget (fits v5e 16 MiB default)


# ----------------------------------------------------------------------------------
# tile choosers
# ----------------------------------------------------------------------------------
def _pick_tile_m(M, cap=256):
    """Row (sublane) tile: whole M if small, else largest multiple-of-8 divisor <= cap."""
    if M <= cap:
        return M
    t = cap - (cap % 8)
    while t >= 8:
        if M % t == 0:
            return t
        t -= 8
    return M  # rare fallback: keep the BlockSpec legal (full dim)


def _pick_lane_tile(N, elem_cap):
    """Lane (last-dim) tile: largest multiple of 128 dividing N under elem_cap, else N."""
    best = 0
    t = 128
    lim = min(N, elem_cap)
    while t <= lim:
        if N % t == 0:
            best = t
        t += 128
    return best if best else N


def _erf_f32(x):
    # Abramowitz & Stegun 7.1.26, |error| < 1.5e-7 (~f32 eps).
    p = 0.3275911
    a1, a2, a3, a4, a5 = 0.254829592, -0.284496736, 1.421413741, -1.453152027, 1.061405429
    ax = jnp.abs(x)
    t = 1.0 / (1.0 + p * ax)
    poly = t * (a1 + t * (a2 + t * (a3 + t * (a4 + t * a5))))
    e = 1.0 - poly * jnp.exp(-ax * ax)
    return jnp.where(x >= 0, e, -e)


def _gelu_exact(x):
    return x * 0.5 * (1.0 + _erf_f32(x * 0.7071067811865476))


# ----------------------------------------------------------------------------------
# Tiled matmul: y = act_in(x) @ W [+ b] [+ residual]
# Whole-K block when it fits (no acc scratch); otherwise (tm, tn, tk) grid with f32 acc.
# ----------------------------------------------------------------------------------
def matmul_pallas(x, w, b=None, residual=None, act_in="none", out_dtype=None):
    out_dtype = DTYPE if out_dtype is None else out_dtype
    x = x.astype(DTYPE)
    M, K = x.shape
    N = w.shape[1]
    tm = _pick_tile_m(M)
    tn = _pick_lane_tile(N, max(128, W_BUDGET_ELEMS // max(K, 1)))
    if K * tn <= W_BUDGET_ELEMS:
        tk = K
    else:
        tk = _pick_lane_tile(K, max(128, W_BUDGET_ELEMS // tn))
    nm, nn_, nk = M // tm, N // tn, K // tk
    has_bias = b is not None
    has_res = residual is not None

    inputs = [x, w.astype(DTYPE)]
    if nk == 1:
        in_specs = [pl.BlockSpec((tm, K), lambda i, j: (i, 0)),
                    pl.BlockSpec((K, tn), lambda i, j: (0, j))]
        if has_bias:
            inputs.append(b.reshape(1, N).astype(jnp.float32))
            in_specs.append(pl.BlockSpec((1, tn), lambda i, j: (0, j)))
        io_aliases = {}
        if has_res:
            io_aliases = {len(inputs): 0}
            inputs.append(residual.astype(out_dtype))
            in_specs.append(pl.BlockSpec((tm, tn), lambda i, j: (i, j)))

        def kernel(*refs):
            x_ref, w_ref = refs[0], refs[1]
            idx = 2
            b_ref = None
            if has_bias:
                b_ref = refs[idx]
                idx += 1
            r_ref = refs[idx] if has_res else None
            o_ref = refs[-1]
            xv = x_ref[...]
            if act_in == "silu":
                xf = xv.astype(jnp.float32)
                xv = (xf * jax.nn.sigmoid(xf)).astype(DTYPE)
            y = jnp.dot(xv, w_ref[...], preferred_element_type=jnp.float32)
            if has_bias:
                y = y + b_ref[...]
            if has_res:
                y = y + r_ref[...].astype(jnp.float32)
            o_ref[...] = y.astype(o_ref.dtype)

        return pl.pallas_call(
            kernel,
            grid=(nm, nn_),
            in_specs=in_specs,
            out_specs=pl.BlockSpec((tm, tn), lambda i, j: (i, j)),
            out_shape=jax.ShapeDtypeStruct((M, N), out_dtype),
            input_output_aliases=io_aliases,
            compiler_params=pltpu.CompilerParams(
                dimension_semantics=("parallel", "parallel")),
        )(*inputs)

    # K-tiled path (large K that does not fit a single weight block)
    in_specs = [pl.BlockSpec((tm, tk), lambda i, j, k: (i, k)),
                pl.BlockSpec((tk, tn), lambda i, j, k: (k, j))]
    if has_bias:
        inputs.append(b.reshape(1, N).astype(jnp.float32))
        in_specs.append(pl.BlockSpec((1, tn), lambda i, j, k: (0, j)))
    io_aliases = {}
    if has_res:
        io_aliases = {len(inputs): 0}
        inputs.append(residual.astype(out_dtype))
        in_specs.append(pl.BlockSpec((tm, tn), lambda i, j, k: (i, j)))

    def kernel_k(*refs):
        x_ref, w_ref = refs[0], refs[1]
        idx = 2
        b_ref = None
        if has_bias:
            b_ref = refs[idx]
            idx += 1
        r_ref = refs[idx] if has_res else None
        o_ref, acc_ref = refs[-2], refs[-1]

        @pl.when(pl.program_id(2) == 0)
        def _init():
            acc_ref[...] = jnp.zeros_like(acc_ref)

        xv = x_ref[...]
        if act_in == "silu":
            xf = xv.astype(jnp.float32)
            xv = (xf * jax.nn.sigmoid(xf)).astype(DTYPE)
        acc_ref[...] += jnp.dot(xv, w_ref[...], preferred_element_type=jnp.float32)

        @pl.when(pl.program_id(2) == nk - 1)
        def _finalize():
            y = acc_ref[...]
            if has_bias:
                y = y + b_ref[...]
            if has_res:
                y = y + r_ref[...].astype(jnp.float32)
            o_ref[...] = y.astype(o_ref.dtype)

    return pl.pallas_call(
        kernel_k,
        grid=(nm, nn_, nk),
        in_specs=in_specs,
        out_specs=pl.BlockSpec((tm, tn), lambda i, j, k: (i, j)),
        out_shape=jax.ShapeDtypeStruct((M, N), out_dtype),
        scratch_shapes=[pltpu.VMEM((tm, tn), jnp.float32)],
        input_output_aliases=io_aliases,
        compiler_params=pltpu.CompilerParams(
            dimension_semantics=("parallel", "parallel", "arbitrary")),
    )(*inputs)


# ----------------------------------------------------------------------------------
# Fused LayerNorm + matmul: y = LN(x) @ W [+ b].  LN result cached in VMEM at j == 0.
# ----------------------------------------------------------------------------------
def ln_matmul_pallas(x, gamma, beta, w, b=None, eps=1e-5, out_dtype=None):
    out_dtype = DTYPE if out_dtype is None else out_dtype
    x = x.astype(DTYPE)
    M, K = x.shape
    N = w.shape[1]
    tm = _pick_tile_m(M)
    tn = _pick_lane_tile(N, max(128, W_BUDGET_ELEMS // max(K, 1)))
    nm, nn_ = M // tm, N // tn
    has_bias = b is not None

    inputs = [x, gamma.reshape(1, K).astype(jnp.float32),
              beta.reshape(1, K).astype(jnp.float32), w.astype(DTYPE)]
    in_specs = [pl.BlockSpec((tm, K), lambda i, j: (i, 0)),
                pl.BlockSpec((1, K), lambda i, j: (0, 0)),
                pl.BlockSpec((1, K), lambda i, j: (0, 0)),
                pl.BlockSpec((K, tn), lambda i, j: (0, j))]
    if has_bias:
        inputs.append(b.reshape(1, N).astype(jnp.float32))
        in_specs.append(pl.BlockSpec((1, tn), lambda i, j: (0, j)))

    def kernel(*refs):
        x_ref, g_ref, be_ref, w_ref = refs[0], refs[1], refs[2], refs[3]
        b_ref = refs[4] if has_bias else None
        o_ref, xn_ref = refs[-2], refs[-1]

        @pl.when(pl.program_id(1) == 0)
        def _cache_ln():
            xv = x_ref[...].astype(jnp.float32)
            mean = jnp.mean(xv, axis=-1, keepdims=True)
            xc = xv - mean
            var = jnp.mean(xc * xc, axis=-1, keepdims=True)
            xn = xc * jax.lax.rsqrt(var + eps) * g_ref[...] + be_ref[...]
            xn_ref[...] = xn.astype(DTYPE)

        y = jnp.dot(xn_ref[...], w_ref[...], preferred_element_type=jnp.float32)
        if has_bias:
            y = y + b_ref[...]
        o_ref[...] = y.astype(o_ref.dtype)

    return pl.pallas_call(
        kernel,
        grid=(nm, nn_),
        in_specs=in_specs,
        out_specs=pl.BlockSpec((tm, tn), lambda i, j: (i, j)),
        out_shape=jax.ShapeDtypeStruct((M, N), out_dtype),
        scratch_shapes=[pltpu.VMEM((tm, K), DTYPE)],
        compiler_params=pltpu.CompilerParams(
            dimension_semantics=("parallel", "arbitrary")),
    )(*inputs)


# ----------------------------------------------------------------------------------
# Fused LayerNorm + GEGLU:  out = (LN(x) @ Wv + bv) * GELU(LN(x) @ Wg + bg)
# LN result cached in VMEM at j == 0; FF2 then consumes an already-gated (M, 4C) input.
# ----------------------------------------------------------------------------------
def ln_geglu_matmul_pallas(x, gamma, beta, w_val, b_val, w_gate, b_gate,
                           eps=1e-5, out_dtype=None):
    out_dtype = DTYPE if out_dtype is None else out_dtype
    x = x.astype(DTYPE)
    M, K = x.shape
    N = w_val.shape[1]
    tm = _pick_tile_m(M)
    tn = _pick_lane_tile(N, max(128, (W_BUDGET_ELEMS // 2) // max(K, 1)))  # two weight streams
    nm, nn_ = M // tm, N // tn

    def kernel(x_ref, g_ref, be_ref, wv_ref, wg_ref, bv_ref, bg_ref, o_ref, xn_ref):
        @pl.when(pl.program_id(1) == 0)
        def _cache_ln():
            xv = x_ref[...].astype(jnp.float32)
            mean = jnp.mean(xv, axis=-1, keepdims=True)
            xc = xv - mean
            var = jnp.mean(xc * xc, axis=-1, keepdims=True)
            xn = xc * jax.lax.rsqrt(var + eps) * g_ref[...] + be_ref[...]
            xn_ref[...] = xn.astype(DTYPE)

        xn = xn_ref[...]
        val = jnp.dot(xn, wv_ref[...], preferred_element_type=jnp.float32) + bv_ref[...]
        gate = jnp.dot(xn, wg_ref[...], preferred_element_type=jnp.float32) + bg_ref[...]
        o_ref[...] = (val * _gelu_exact(gate)).astype(o_ref.dtype)

    return pl.pallas_call(
        kernel,
        grid=(nm, nn_),
        in_specs=[pl.BlockSpec((tm, K), lambda i, j: (i, 0)),
                  pl.BlockSpec((1, K), lambda i, j: (0, 0)),
                  pl.BlockSpec((1, K), lambda i, j: (0, 0)),
                  pl.BlockSpec((K, tn), lambda i, j: (0, j)),
                  pl.BlockSpec((K, tn), lambda i, j: (0, j)),
                  pl.BlockSpec((1, tn), lambda i, j: (0, j)),
                  pl.BlockSpec((1, tn), lambda i, j: (0, j))],
        out_specs=pl.BlockSpec((tm, tn), lambda i, j: (i, j)),
        out_shape=jax.ShapeDtypeStruct((M, N), out_dtype),
        scratch_shapes=[pltpu.VMEM((tm, K), DTYPE)],
        compiler_params=pltpu.CompilerParams(
            dimension_semantics=("parallel", "arbitrary")),
    )(x, gamma.reshape(1, K).astype(jnp.float32), beta.reshape(1, K).astype(jnp.float32),
      w_val.astype(DTYPE), w_gate.astype(DTYPE),
      b_val.reshape(1, N).astype(jnp.float32), b_gate.reshape(1, N).astype(jnp.float32))


# ----------------------------------------------------------------------------------
# GroupNorm (+ optional broadcast add) (+ optional SiLU) (+ optional fused 1x1 proj).
# With a projection, the normalized activations are cached in VMEM at j == 0 so the
# one-hot stat matmuls / normalize / SiLU run once per image, not once per output tile.
# ----------------------------------------------------------------------------------
def group_norm_pallas(x, gamma, beta, groups, eps, act="none", add=None,
                      proj_w=None, proj_b=None, out_dtype=None):
    out_dtype = DTYPE if out_dtype is None else out_dtype
    B, HW, C = x.shape
    cg = C // groups
    inv_n = 1.0 / float(HW * cg)
    oh = (jnp.arange(C)[:, None] // cg == jnp.arange(groups)[None, :]).astype(jnp.float32)
    ohT = jnp.transpose(oh)
    has_add = add is not None
    has_proj = proj_w is not None
    if has_proj:
        N = proj_w.shape[1]
        tn = _pick_lane_tile(N, max(128, W_BUDGET_ELEMS // C))
    else:
        N, tn = C, C
    nn_ = N // tn
    use_cache = has_proj

    inputs = [x.astype(DTYPE)]
    in_specs = [pl.BlockSpec((1, HW, C), lambda b, j: (b, 0, 0))]
    if has_add:
        inputs.append(add.astype(jnp.float32))
        in_specs.append(pl.BlockSpec((1, 1, C), lambda b, j: (b, 0, 0)))
    inputs += [oh, ohT,
               gamma.reshape(1, C).astype(jnp.float32),
               beta.reshape(1, C).astype(jnp.float32)]
    in_specs += [pl.BlockSpec((C, groups), lambda b, j: (0, 0)),
                 pl.BlockSpec((groups, C), lambda b, j: (0, 0)),
                 pl.BlockSpec((1, C), lambda b, j: (0, 0)),
                 pl.BlockSpec((1, C), lambda b, j: (0, 0))]
    if has_proj:
        inputs += [proj_w.astype(DTYPE), proj_b.reshape(1, N).astype(jnp.float32)]
        in_specs += [pl.BlockSpec((C, tn), lambda b, j: (0, j)),
                     pl.BlockSpec((1, tn), lambda b, j: (0, j))]

    def kernel(*refs):
        i = 0
        x_ref = refs[i]; i += 1
        add_ref = None
        if has_add:
            add_ref = refs[i]; i += 1
        oh_ref, ohT_ref, g_ref, b_ref = refs[i:i + 4]; i += 4
        if has_proj:
            w_ref, pb_ref = refs[i:i + 2]; i += 2
        if use_cache:
            o_ref, cache_ref = refs[-2], refs[-1]
        else:
            o_ref = refs[-1]

        def compute_norm():
            xv = x_ref[0].astype(jnp.float32)                       # (HW, C)
            if has_add:
                xv = xv + add_ref[0]
            ohv = oh_ref[...]
            s1 = jnp.sum(jnp.dot(xv, ohv, preferred_element_type=jnp.float32),
                         axis=0, keepdims=True)                     # (1, G)
            mean_c = jnp.dot(s1 * inv_n, ohT_ref[...],
                             preferred_element_type=jnp.float32)    # (1, C)
            xc = xv - mean_c
            s2 = jnp.sum(jnp.dot(xc * xc, ohv, preferred_element_type=jnp.float32),
                         axis=0, keepdims=True)
            var_c = jnp.dot(s2 * inv_n, ohT_ref[...],
                            preferred_element_type=jnp.float32)
            y = xc * jax.lax.rsqrt(var_c + eps)
            y = y * g_ref[...] + b_ref[...]
            if act == "silu":
                y = y * jax.nn.sigmoid(y)
            return y

        if use_cache:
            @pl.when(pl.program_id(1) == 0)
            def _cache():
                cache_ref[...] = compute_norm().astype(DTYPE)
            yv = cache_ref[...]
            o_ref[0] = (jnp.dot(yv, w_ref[...], preferred_element_type=jnp.float32)
                        + pb_ref[...]).astype(o_ref.dtype)
        else:
            o_ref[0] = compute_norm().astype(o_ref.dtype)

    scratch = [pltpu.VMEM((HW, C), DTYPE)] if use_cache else []
    return pl.pallas_call(
        kernel,
        grid=(B, nn_),
        in_specs=in_specs,
        out_specs=pl.BlockSpec((1, HW, tn), lambda b, j: (b, 0, j)),
        out_shape=jax.ShapeDtypeStruct((B, HW, N), out_dtype),
        scratch_shapes=scratch,
        compiler_params=pltpu.CompilerParams(
            dimension_semantics=("parallel", "arbitrary")),
    )(*inputs)


# ----------------------------------------------------------------------------------
# Attention: head-major (B*heads, S, d) layout, one grid step per (batch, head).
# ----------------------------------------------------------------------------------
def attention_pallas(q, k, v):
    BH, Sq, d = q.shape
    Sk = k.shape[1]
    scale = float(d) ** -0.5

    def kernel(q_ref, k_ref, v_ref, o_ref):
        qb = q_ref[0]
        kb = k_ref[0]
        vb = v_ref[0]
        s = jax.lax.dot_general(qb, kb, (((1,), (1,)), ((), ())),
                                preferred_element_type=jnp.float32) * scale
        m = jnp.max(s, axis=-1, keepdims=True)
        e = jnp.exp(s - m)
        p_ = e * pl.reciprocal(jnp.sum(e, axis=-1, keepdims=True), approx=True)
        o_ref[0] = jnp.dot(p_.astype(vb.dtype), vb,
                           preferred_element_type=jnp.float32).astype(o_ref.dtype)

    return pl.pallas_call(
        kernel,
        grid=(BH,),
        in_specs=[pl.BlockSpec((1, Sq, d), lambda b: (b, 0, 0)),
                  pl.BlockSpec((1, Sk, d), lambda b: (b, 0, 0)),
                  pl.BlockSpec((1, Sk, d), lambda b: (b, 0, 0))],
        out_specs=pl.BlockSpec((1, Sq, d), lambda b: (b, 0, 0)),
        out_shape=jax.ShapeDtypeStruct((BH, Sq, d), DTYPE),
        compiler_params=pltpu.CompilerParams(dimension_semantics=("parallel",)),
    )(q, k, v)
    # TODO(synk): switch to a tiled-KV online-softmax loop once S grows beyond ~512
    # (the full (Sq, Sk) f32 score buffer would otherwise hit v7x's 32 MiB scoped VMEM).


def _split_heads(x, B, S, heads, d):
    # (B*S, heads*d) -> (B*heads, S, d)
    return x.reshape(B, S, heads, d).transpose(0, 2, 1, 3).reshape(B * heads, S, d)


def _merge_heads(x, B, S, heads, d):
    # (B*heads, S, d) -> (B*S, heads*d)
    return x.reshape(B, heads, S, d).transpose(0, 2, 1, 3).reshape(B * S, heads * d)


# ----------------------------------------------------------------------------------
# 3x3 conv (padding=1) as 9 shifted in-kernel matmuls over an H-padded flattened image.
# grid = (Cout tiles, B), batch innermost -> weight tile stays VMEM-resident across batch.
# ----------------------------------------------------------------------------------
def conv3x3_pallas(x_hwc, H, W, weight, bias, residual=None, out_dtype=None):
    out_dtype = DTYPE if out_dtype is None else out_dtype
    B, HW, Cin = x_hwc.shape
    Cout = weight.shape[-1]
    xh = x_hwc.astype(DTYPE).reshape(B, H, W, Cin)
    xh = jnp.pad(xh, ((0, 0), (1, 1), (0, 0), (0, 0)))      # zero-pad rows only
    xh = xh.reshape(B, (H + 2) * W, Cin)
    xh = jnp.pad(xh, ((0, 0), (1, 1), (0, 0)))              # +1 guard element each side
    pad_rows = (H + 2) * W + 2
    tn = _pick_lane_tile(Cout, max(128, CONV_W_BUDGET_ELEMS // (9 * Cin)))
    nco = Cout // tn
    b2 = bias.reshape(1, Cout).astype(jnp.float32)
    has_res = residual is not None

    inputs = [xh, weight.astype(DTYPE), b2]
    in_specs = [pl.BlockSpec((1, pad_rows, Cin), lambda j, bb: (bb, 0, 0)),
                pl.BlockSpec((3, 3, Cin, tn), lambda j, bb: (0, 0, 0, j)),  # resident across bb
                pl.BlockSpec((1, tn), lambda j, bb: (0, j))]
    io_aliases = {}
    if has_res:
        io_aliases = {len(inputs): 0}
        inputs.append(residual.astype(out_dtype))
        in_specs.append(pl.BlockSpec((1, HW, tn), lambda j, bb: (bb, 0, j)))

    def kernel(*refs):
        x_ref, w_ref, b_ref = refs[0], refs[1], refs[2]
        r_ref = refs[3] if has_res else None
        o_ref = refs[-1]

        col = jax.lax.broadcasted_iota(jnp.int32, (HW, tn), 0) % W
        acc = jnp.zeros((HW, tn), jnp.float32)
        for kx in range(3):
            part = jnp.zeros((HW, tn), jnp.float32)
            for ky in range(3):
                start = ky * W + kx
                xs = x_ref[0, start:start + HW, :]           # (HW, Cin) shifted window
                part = part + jnp.dot(xs, w_ref[ky, kx],
                                      preferred_element_type=jnp.float32)
            if kx == 0:
                part = jnp.where(col == 0, 0.0, part)        # left neighbour out of image
            elif kx == 2:
                part = jnp.where(col == W - 1, 0.0, part)    # right neighbour out of image
            acc = acc + part
        y = acc + b_ref[...]
        if has_res:
            y = y + r_ref[0].astype(jnp.float32)
        o_ref[0] = y.astype(o_ref.dtype)

    return pl.pallas_call(
        kernel,
        grid=(nco, B),
        in_specs=in_specs,
        out_specs=pl.BlockSpec((1, HW, tn), lambda j, bb: (bb, 0, j)),
        out_shape=jax.ShapeDtypeStruct((B, HW, Cout), out_dtype),
        input_output_aliases=io_aliases,
        compiler_params=pltpu.CompilerParams(
            dimension_semantics=("parallel", "parallel")),
    )(*inputs)


# ----------------------------------------------------------------------------------
# Module building blocks
# ----------------------------------------------------------------------------------
def resnet_block(x_hwc, H, W, temb, p, groups, eps=1e-6):
    # diffusers ResnetBlock2D (pre_norm, swish, 'default' time-embedding norm, scale=1.0).
    B, HW, C = x_hwc.shape
    temb_proj = matmul_pallas(temb, p["temb_w"], p["temb_b"],
                              act_in="silu", out_dtype=jnp.float32)          # (B, C)
    h = group_norm_pallas(x_hwc, p["n1_g"], p["n1_b"], groups, eps, act="silu")
    h = conv3x3_pallas(h, H, W, p["conv1_w"], p["conv1_b"])
    h = group_norm_pallas(h, p["n2_g"], p["n2_b"], groups, eps, act="silu",
                          add=temb_proj.reshape(B, 1, C))
    # dropout = 0.0 (identity); out = (x + conv2(h)) / output_scale_factor(=1.0)
    h = conv3x3_pallas(h, H, W, p["conv2_w"], p["conv2_b"], residual=x_hwc)
    return h


def transformer_block(x_hwc, ehs, p, groups, heads):
    # diffusers Transformer2DModel (use_linear_projection=False), 1 BasicTransformerBlock.
    B, HW, C = x_hwc.shape
    d = C // heads
    res = x_hwc.reshape(B * HW, C)

    # GroupNorm + proj_in (1x1 conv) fused
    hs = group_norm_pallas(x_hwc, p["gn_g"], p["gn_b"], groups, 1e-6,
                           proj_w=p["proj_in_w"], proj_b=p["proj_in_b"])     # (B, HW, C)
    hs = hs.reshape(B * HW, C)

    # self-attention: fused LN1 + packed QKV projection (bias-free), head-major attention
    qkv = ln_matmul_pallas(hs, p["ln1_g"], p["ln1_b"], p["a1_qkv"])          # (B*HW, 3C)
    q = _split_heads(qkv[:, :C], B, HW, heads, d)
    k = _split_heads(qkv[:, C:2 * C], B, HW, heads, d)
    v = _split_heads(qkv[:, 2 * C:], B, HW, heads, d)
    o = attention_pallas(q, k, v)                                            # (B*heads, HW, d)
    hs = matmul_pallas(_merge_heads(o, B, HW, heads, d),
                       p["a1_o_w"], p["a1_o_b"], residual=hs)

    # cross-attention: fused [K|V] projection of the context, fused LN2 + Q
    Bc, Se, Dc = ehs.shape
    kv = matmul_pallas(ehs.reshape(B * Se, Dc), p["a2_kv"])                  # (B*Se, 2C)
    qx = ln_matmul_pallas(hs, p["ln2_g"], p["ln2_b"], p["a2_q"])             # (B*HW, C)
    q = _split_heads(qx, B, HW, heads, d)
    k = _split_heads(kv[:, :C], B, Se, heads, d)
    v = _split_heads(kv[:, C:], B, Se, heads, d)
    o = attention_pallas(q, k, v)
    hs = matmul_pallas(_merge_heads(o, B, HW, heads, d),
                       p["a2_o_w"], p["a2_o_b"], residual=hs)

    # feed-forward: LN3 + GEGLU (value/gate matmuls + gating) fused; FF2 plain matmul + residual
    g = ln_geglu_matmul_pallas(hs, p["ln3_g"], p["ln3_b"],
                               p["ff1_v_w"], p["ff1_v_b"],
                               p["ff1_g_w"], p["ff1_g_b"])                   # (B*HW, 4C)
    hs = matmul_pallas(g, p["ff2_w"], p["ff2_b"], residual=hs)

    # proj_out (1x1 conv) + outer residual
    hs = matmul_pallas(hs, p["proj_out_w"], p["proj_out_b"], residual=res)
    return hs.reshape(B, HW, C)


def unet_mid_block_cross_attn(params, hidden_states_nchw, temb, encoder_hidden_states,
                              groups=8, heads=4):
    B, C, H, W = hidden_states_nchw.shape
    x = jnp.transpose(hidden_states_nchw, (0, 2, 3, 1)).reshape(B, H * W, C).astype(DTYPE)
    temb = temb.astype(DTYPE)
    ehs = encoder_hidden_states.astype(DTYPE)
    h = resnet_block(x, H, W, temb, params["resnet0"], groups)
    h = transformer_block(h, ehs, params["attn0"], groups, heads)
    h = resnet_block(h, H, W, temb, params["resnet1"], groups)
    h = h.reshape(B, H, W, C)
    return jnp.transpose(h, (0, 3, 1, 2)).astype(jnp.float32)                # NHWC -> NCHW


# ----------------------------------------------------------------------------------
# Deterministic parameter init (synthetic weights; shapes follow the PyTorch module).
# Matmul/conv weights stored in bf16; biases and norm affine params in f32.
# ----------------------------------------------------------------------------------
def init_params(key, C, temb_ch, cross_dim):
    ks = iter(jax.random.split(key, 64))

    def w(shape, scale=0.02, dtype=DTYPE):
        return (scale * jax.random.normal(next(ks), shape, jnp.float32)).astype(dtype)

    def resnet():
        return dict(
            n1_g=jnp.ones((C,), jnp.float32), n1_b=jnp.zeros((C,), jnp.float32),
            conv1_w=w((3, 3, C, C)), conv1_b=w((C,), dtype=jnp.float32),
            temb_w=w((temb_ch, C)), temb_b=w((C,), dtype=jnp.float32),
            n2_g=jnp.ones((C,), jnp.float32), n2_b=jnp.zeros((C,), jnp.float32),
            conv2_w=w((3, 3, C, C)), conv2_b=w((C,), dtype=jnp.float32),
        )

    ff_inner = 4 * C
    attn = dict(
        gn_g=jnp.ones((C,), jnp.float32), gn_b=jnp.zeros((C,), jnp.float32),
        proj_in_w=w((C, C)), proj_in_b=w((C,), dtype=jnp.float32),
        ln1_g=jnp.ones((C,), jnp.float32), ln1_b=jnp.zeros((C,), jnp.float32),
        a1_qkv=w((C, 3 * C)),                       # fused [Wq | Wk | Wv], bias-free
        a1_o_w=w((C, C)), a1_o_b=w((C,), dtype=jnp.float32),
        ln2_g=jnp.ones((C,), jnp.float32), ln2_b=jnp.zeros((C,), jnp.float32),
        a2_q=w((C, C)),
        a2_kv=w((cross_dim, 2 * C)),                # fused [Wk | Wv], bias-free
        a2_o_w=w((C, C)), a2_o_b=w((C,), dtype=jnp.float32),
        ln3_g=jnp.ones((C,), jnp.float32), ln3_b=jnp.zeros((C,), jnp.float32),
        ff1_v_w=w((C, ff_inner)), ff1_v_b=w((ff_inner,), dtype=jnp.float32),   # GEGLU value
        ff1_g_w=w((C, ff_inner)), ff1_g_b=w((ff_inner,), dtype=jnp.float32),   # GEGLU gate
        ff2_w=w((ff_inner, C)), ff2_b=w((C,), dtype=jnp.float32),
        proj_out_w=w((C, C)), proj_out_b=w((C,), dtype=jnp.float32),
    )
    return dict(resnet0=resnet(), attn0=attn, resnet1=resnet())


if __name__ == "__main__":
    key = jax.random.PRNGKey(0)
    kx, kt, ke, kp = jax.random.split(key, 4)

    # small config: in_channels=32, temb=32, groups=8, heads=4 (head_dim=8),
    # cross_attention_dim=32, spatial 8x8, encoder seq 8, batch 2.
    # NOTE: this toy config only uses 32 of 128 lanes; production mid-block sizes
    # (C~1280) fill the lane dimension and exercise the tiled grids / cached-LN paths.
    B, C, H, W = 2, 32, 8, 8
    temb_ch, cross_dim, Se = 32, 32, 8
    groups, heads = 8, 4

    x = jax.random.normal(kx, (B, C, H, W), jnp.float32)          # NCHW like PyTorch
    temb = jax.random.normal(kt, (B, temb_ch), jnp.float32)
    ehs = jax.random.normal(ke, (B, Se, cross_dim), jnp.float32)
    params = init_params(kp, C, temb_ch, cross_dim)

    fwd = jax.jit(functools.partial(unet_mid_block_cross_attn, groups=groups, heads=heads))
    out = fwd(params, x, temb, ehs)
    jax.block_until_ready(out)
    assert out.shape == (B, C, H, W) and out.dtype == jnp.float32
    print("KERNEL_OK")
</pallas_src>

<mosaic_0001>
module attributes {stable_mosaic.version = 11 : i64} {
  func.func @kernel(%arg0: i32, %arg1: i32, %arg2: memref<1x64x32xbf16, #tpu.memory_space<vmem>>, %arg3: memref<32x8xf32, #tpu.memory_space<vmem>>, %arg4: memref<8x32xf32, #tpu.memory_space<vmem>>, %arg5: memref<1x32xf32, #tpu.memory_space<vmem>>, %arg6: memref<1x32xf32, #tpu.memory_space<vmem>>, %arg7: memref<1x64x32xbf16, #tpu.memory_space<vmem>>) attributes {dimension_semantics = [#tpu.dimension_semantics<parallel>, #tpu.dimension_semantics<arbitrary>], iteration_bounds = array<i64: 2, 1>, scalar_prefetch = 0 : i64, scratch_operands = 0 : i64, tpu.core_type = #tpu.core_type<tc>, window_params = [{transform_indices = @transform_0, window_bounds = array<i64: 1, 64, 32>}, {pipeline_mode = #tpu.pipeline_mode<synchronous>, transform_indices = @transform_1, window_bounds = array<i64: 32, 8>}, {pipeline_mode = #tpu.pipeline_mode<synchronous>, transform_indices = @transform_2, window_bounds = array<i64: 8, 32>}, {pipeline_mode = #tpu.pipeline_mode<synchronous>, transform_indices = @transform_3, window_bounds = array<i64: 1, 32>}, {pipeline_mode = #tpu.pipeline_mode<synchronous>, transform_indices = @transform_4, window_bounds = array<i64: 1, 32>}, {transform_indices = @transform_5, window_bounds = array<i64: 1, 64, 32>}]} {
    %c0 = arith.constant 0 : index
    %c0_0 = arith.constant 0 : index
    %c0_1 = arith.constant 0 : index
    %0 = vector.load %arg2[%c0, %c0_0, %c0_1] : memref<1x64x32xbf16, #tpu.memory_space<vmem>>, vector<1x64x32xbf16>
    %1 = vector.shape_cast %0 : vector<1x64x32xbf16> to vector<64x32xbf16>
    %2 = arith.extf %1 : vector<64x32xbf16> to vector<64x32xf32>
    %c0_2 = arith.constant 0 : index
    %c0_3 = arith.constant 0 : index
    %3 = vector.load %arg3[%c0_2, %c0_3] : memref<32x8xf32, #tpu.memory_space<vmem>>, vector<32x8xf32>
    %cst = arith.constant dense<0.000000e+00> : vector<64x8xf32>
    %4 = tpu.matmul %2, %3, %cst {dimension_numbers = #tpu.dot_dimension_numbers<[1], [0], [0], [1], [0, 0, 1, 1], [], []>} : vector<64x32xf32>, vector<32x8xf32>, vector<64x8xf32> -> vector<64x8xf32>
    %cst_4 = arith.constant dense<0.000000e+00> : vector<8xf32>
    %5 = vector.multi_reduction <add>, %4, %cst_4 [0] : vector<64x8xf32> to vector<8xf32>
    %6 = vector.shape_cast %5 : vector<8xf32> to vector<1x8xf32>
    %cst_5 = arith.constant 3.906250e-03 : f32
    %7 = vector.broadcast %cst_5 : f32 to vector<1x8xf32>
    %8 = arith.mulf %6, %7 : vector<1x8xf32>
    %c0_6 = arith.constant 0 : index
    %c0_7 = arith.constant 0 : index
    %9 = vector.load %arg4[%c0_6, %c0_7] : memref<8x32xf32, #tpu.memory_space<vmem>>, vector<8x32xf32>
    %cst_8 = arith.constant dense<0.000000e+00> : vector<1x32xf32>
    %10 = tpu.matmul %8, %9, %cst_8 {dimension_numbers = #tpu.dot_dimension_numbers<[1], [0], [0], [1], [0, 0, 1, 1], [], []>} : vector<1x8xf32>, vector<8x32xf32>, vector<1x32xf32> -> vector<1x32xf32>
    %11 = vector.broadcast %10 : vector<1x32xf32> to vector<64x32xf32>
    %12 = arith.subf %2, %11 : vector<64x32xf32>
    %13 = arith.mulf %12, %12 : vector<64x32xf32>
    %cst_9 = arith.constant dense<0.000000e+00> : vector<64x8xf32>
    %14 = tpu.matmul %13, %3, %cst_9 {dimension_numbers = #tpu.dot_dimension_numbers<[1], [0], [0], [1], [0, 0, 1, 1], [], []>} : vector<64x32xf32>, vector<32x8xf32>, vector<64x8xf32> -> vector<64x8xf32>
    %cst_10 = arith.constant dense<0.000000e+00> : vector<8xf32>
    %15 = vector.multi_reduction <add>, %14, %cst_10 [0] : vector<64x8xf32> to vector<8xf32>
    %16 = vector.shape_cast %15 : vector<8xf32> to vector<1x8xf32>
    %cst_11 = arith.constant 3.906250e-03 : f32
    %17 = vector.broadcast %cst_11 : f32 to vector<1x8xf32>
    %18 = arith.mulf %16, %17 : vector<1x8xf32>
    %c0_12 = arith.constant 0 : index
    %c0_13 = arith.constant 0 : index
    %19 = vector.load %arg4[%c0_12, %c0_13] : memref<8x32xf32, #tpu.memory_space<vmem>>, vector<8x32xf32>
    %cst_14 = arith.constant dense<0.000000e+00> : vector<1x32xf32>
    %20 = tpu.matmul %18, %19, %cst_14 {dimension_numbers = #tpu.dot_dimension_numbers<[1], [0], [0], [1], [0, 0, 1, 1], [], []>} : vector<1x8xf32>, vector<8x32xf32>, vector<1x32xf32> -> vector<1x32xf32>
    %cst_15 = arith.constant 9.99999997E-7 : f32
    %21 = vector.broadcast %cst_15 : f32 to vector<1x32xf32>
    %22 = arith.addf %20, %21 : vector<1x32xf32>
    %23 = math.rsqrt %22 : vector<1x32xf32>
    %24 = vector.broadcast %23 : vector<1x32xf32> to vector<64x32xf32>
    %25 = arith.mulf %12, %24 : vector<64x32xf32>
    %c0_16 = arith.constant 0 : index
    %c0_17 = arith.constant 0 : index
    %26 = vector.load %arg5[%c0_16, %c0_17] : memref<1x32xf32, #tpu.memory_space<vmem>>, vector<1x32xf32>
    %27 = vector.broadcast %26 : vector<1x32xf32> to vector<64x32xf32>
    %28 = arith.mulf %25, %27 : vector<64x32xf32>
    %c0_18 = arith.constant 0 : index
    %c0_19 = arith.constant 0 : index
    %29 = vector.load %arg6[%c0_18, %c0_19] : memref<1x32xf32, #tpu.memory_space<vmem>>, vector<1x32xf32>
    %30 = vector.broadcast %29 : vector<1x32xf32> to vector<64x32xf32>
    %31 = arith.addf %28, %30 : vector<64x32xf32>
    %32 = arith.negf %31 : vector<64x32xf32>
    %33 = math.exp %32 : vector<64x32xf32>
    %cst_20 = arith.constant 1.000000e+00 : f32
    %34 = vector.broadcast %cst_20 : f32 to vector<64x32xf32>
    %35 = arith.addf %34, %33 : vector<64x32xf32>
    %36 = arith.divf %34, %35 : vector<64x32xf32>
    %37 = arith.mulf %31, %36 : vector<64x32xf32>
    %38 = arith.truncf %37 : vector<64x32xf32> to vector<64x32xbf16>
    %c0_21 = arith.constant 0 : index
    %c0_22 = arith.constant 0 : index
    %c0_23 = arith.constant 0 : index
    %39 = vector.load %arg7[%c0_21, %c0_22, %c0_23] : memref<1x64x32xbf16, #tpu.memory_space<vmem>>, vector<1x64x32xbf16>
    %40 = vector.shape_cast %39 : vector<1x64x32xbf16> to vector<64x32xbf16>
    %41 = vector.shape_cast %38 : vector<64x32xbf16> to vector<1x64x32xbf16>
    tpu.vector_store %arg7[%c0_21, %c0_22, %c0_23], %41 {strides = array<i32>} : memref<1x64x32xbf16, #tpu.memory_space<vmem>>, vector<1x64x32xbf16>,
    return
  }
  func.func @transform_0(%arg0: i32, %arg1: i32) -> (i32, i32, i32) {
    %c0_i32 = arith.constant 0 : i32
    %c0_i32_0 = arith.constant 0 : i32
    %c0_i32_1 = arith.constant 0 : i32
    return %arg0, %c0_i32, %c0_i32_0 : i32, i32, i32
  }
  func.func @transform_1(%arg0: i32, %arg1: i32) -> (i32, i32) {
    %c0_i32 = arith.constant 0 : i32
    %c0_i32_0 = arith.constant 0 : i32
    %c0_i32_1 = arith.constant 0 : i32
    return %c0_i32, %c0_i32_0 : i32, i32
  }
  func.func @transform_2(%arg0: i32, %arg1: i32) -> (i32, i32) {
    %c0_i32 = arith.constant 0 : i32
    %c0_i32_0 = arith.constant 0 : i32
    %c0_i32_1 = arith.constant 0 : i32
    return %c0_i32, %c0_i32_0 : i32, i32
  }
  func.func @transform_3(%arg0: i32, %arg1: i32) -> (i32, i32) {
    %c0_i32 = arith.constant 0 : i32
    %c0_i32_0 = arith.constant 0 : i32
    %c0_i32_1 = arith.constant 0 : i32
    return %c0_i32, %c0_i32_0 : i32, i32
  }
  func.func @transform_4(%arg0: i32, %arg1: i32) -> (i32, i32) {
    %c0_i32 = arith.constant 0 : i32
    %c0_i32_0 = arith.constant 0 : i32
    %c0_i32_1 = arith.constant 0 : i32
    return %c0_i32, %c0_i32_0 : i32, i32
  }
  func.func @transform_5(%arg0: i32, %arg1: i32) -> (i32, i32, i32) {
    %c0_i32 = arith.constant 0 : i32
    %c0_i32_0 = arith.constant 0 : i32
    return %arg0, %c0_i32, %arg1 : i32, i32, i32
  }
}

module attributes {stable_mosaic.version = 11 : i64} {
  func.func @kernel(%arg0: i32, %arg1: i32, %arg2: memref<1x82x32xbf16, #tpu.memory_space<vmem>>, %arg3: memref<3x3x32x32xbf16, #tpu.memory_space<vmem>>, %arg4: memref<1x32xf32, #tpu.memory_space<vmem>>, %arg5: memref<1x64x32xbf16, #tpu.memory_space<vmem>>) attributes {dimension_semantics = [#tpu.dimension_semantics<parallel>, #tpu.dimension_semantics<parallel>], iteration_bounds = array<i64: 1, 2>, scalar_prefetch = 0 : i64, scratch_operands = 0 : i64, tpu.core_type = #tpu.core_type<tc>, window_params = [{transform_indices = @transform_0, window_bounds = array<i64: 1, 82, 32>}, {transform_indices = @transform_1, window_bounds = array<i64: 3, 3, 32, 32>}, {transform_indices = @transform_2, window_bounds = array<i64: 1, 32>}, {transform_indices = @transform_3, window_bounds = array<i64: 1, 64, 32>}]} {
    %0 = tpu.iota {dimensions = array<i32: 0>} : vector<64x32xi32>
    %c8_i32 = arith.constant 8 : i32
    %c0_i32 = arith.constant 0 : i32
    %1 = arith.cmpi eq, %c8_i32, %c0_i32 : i32
    %c1_i32 = arith.constant 1 : i32
    %2 = arith.select %1, %c1_i32, %c8_i32 : i32
    %3 = vector.broadcast %2 : i32 to vector<64x32xi32>
    %4 = arith.remsi %0, %3 : vector<64x32xi32>
    %c0_i32_0 = arith.constant 0 : i32
    %5 = vector.broadcast %c0_i32_0 : i32 to vector<64x32xi32>
    %6 = arith.cmpi ne, %4, %5 : vector<64x32xi32>
    %c0_i32_1 = arith.constant 0 : i32
    %7 = vector.broadcast %c0_i32_1 : i32 to vector<64x32xi32>
    %8 = arith.cmpi slt, %4, %7 : vector<64x32xi32>
    %c0_i32_2 = arith.constant 0 : i32
    %9 = arith.cmpi slt, %2, %c0_i32_2 : i32
    %10 = vector.broadcast %9 : i1 to vector<64x32xi1>
    %11 = vector.broadcast %10 : vector<64x32xi1> to vector<64x32xi1>
    %12 = arith.xori %8, %11 : vector<64x32xi1>
    %13 = arith.andi %12, %6 : vector<64x32xi1>
    %14 = vector.broadcast %2 : i32 to vector<64x32xi32>
    %15 = arith.addi %4, %14 : vector<64x32xi32>
    %16 = arith.select %13, %15, %4 : vector<64x32xi1>, vector<64x32xi32>
    %cst = arith.constant 0.000000e+00 : f32
    %17 = vector.broadcast %cst : f32 to vector<64x32xf32>
    %cst_3 = arith.constant 0.000000e+00 : f32
    %18 = vector.broadcast %cst_3 : f32 to vector<64x32xf32>
    %c0 = arith.constant 0 : index
    %c0_4 = arith.constant 0 : index
    %c0_5 = arith.constant 0 : index
    %19 = vector.load %arg2[%c0, %c0_4, %c0_5] : memref<1x82x32xbf16, #tpu.memory_space<vmem>>, vector<1x64x32xbf16>
    %20 = vector.shape_cast %19 : vector<1x64x32xbf16> to vector<64x32xbf16>
    %c0_6 = arith.constant 0 : index
    %c0_7 = arith.constant 0 : index
    %c0_8 = arith.constant 0 : index
    %c0_9 = arith.constant 0 : index
    %21 = vector.load %arg3[%c0_6, %c0_7, %c0_8, %c0_9] : memref<3x3x32x32xbf16, #tpu.memory_space<vmem>>, vector<1x1x32x32xbf16>
    %22 = vector.shape_cast %21 : vector<1x1x32x32xbf16> to vector<32x32xbf16>
    %cst_10 = arith.constant dense<0.000000e+00> : vector<64x32xf32>
    %23 = tpu.matmul %20, %22, %cst_10 {dimension_numbers = #tpu.dot_dimension_numbers<[1], [0], [0], [1], [0, 0, 1, 1], [], []>} : vector<64x32xbf16>, vector<32x32xbf16>, vector<64x32xf32> -> vector<64x32xf32>
    %24 = arith.addf %18, %23 : vector<64x32xf32>
    %c0_11 = arith.constant 0 : index
    %c8 = arith.constant 8 : index
    %c0_12 = arith.constant 0 : index
    %25 = vector.load %arg2[%c0_11, %c8, %c0_12] : memref<1x82x32xbf16, #tpu.memory_space<vmem>>, vector<1x64x32xbf16>
    %26 = vector.shape_cast %25 : vector<1x64x32xbf16> to vector<64x32xbf16>
    %c1 = arith.constant 1 : index
    %c0_13 = arith.constant 0 : index
    %c0_14 = arith.constant 0 : index
    %c0_15 = arith.constant 0 : index
    %27 = vector.load %arg3[%c1, %c0_13, %c0_14, %c0_15] : memref<3x3x32x32xbf16, #tpu.memory_space<vmem>>, vector<1x1x32x32xbf16>
    %28 = vector.shape_cast %27 : vector<1x1x32x32xbf16> to vector<32x32xbf16>
    %cst_16 = arith.constant dense<0.000000e+00> : vector<64x32xf32>
    %29 = tpu.matmul %26, %28, %cst_16 {dimension_numbers = #tpu.dot_dimension_numbers<[1], [0], [0], [1], [0, 0, 1, 1], [], []>} : vector<64x32xbf16>, vector<32x32xbf16>, vector<64x32xf32> -> vector<64x32xf32>
    %30 = arith.addf %24, %29 : vector<64x32xf32>
    %c0_17 = arith.constant 0 : index
    %c16 = arith.constant 16 : index
    %c0_18 = arith.constant 0 : index
    %31 = vector.load %arg2[%c0_17, %c16, %c0_18] : memref<1x82x32xbf16, #tpu.memory_space<vmem>>, vector<1x64x32xbf16>
    %32 = vector.shape_cast %31 : vector<1x64x32xbf16> to vector<64x32xbf16>
    %c2 = arith.constant 2 : index
    %c0_19 = arith.constant 0 : index
    %c0_20 = arith.constant 0 : index
    %c0_21 = arith.constant 0 : index
    %33 = vector.load %arg3[%c2, %c0_19, %c0_20, %c0_21] : memref<3x3x32x32xbf16, #tpu.memory_space<vmem>>, vector<1x1x32x32xbf16>
    %34 = vector.shape_cast %33 : vector<1x1x32x32xbf16> to vector<32x32xbf16>
    %cst_22 = arith.constant dense<0.000000e+00> : vector<64x32xf32>
    %35 = tpu.matmul %32, %34, %cst_22 {dimension_numbers = #tpu.dot_dimension_numbers<[1], [0], [0], [1], [0, 0, 1, 1], [], []>} : vector<64x32xbf16>, vector<32x32xbf16>, vector<64x32xf32> -> vector<64x32xf32>
    %36 = arith.addf %30, %35 : vector<64x32xf32>
    %c0_i32_23 = arith.constant 0 : i32
    %37 = vector.broadcast %c0_i32_23 : i32 to vector<64x32xi32>
    %38 = arith.cmpi eq, %16, %37 : vector<64x32xi32>
    %cst_24 = arith.constant 0.000000e+00 : f32
    %39 = vector.broadcast %cst_24 : f32 to vector<64x32xf32>
    %40 = arith.select %38, %39, %36 : vector<64x32xi1>, vector<64x32xf32>
    %41 = arith.addf %17, %40 : vector<64x32xf32>
    %cst_25 = arith.constant 0.000000e+00 : f32
    %42 = vector.broadcast %cst_25 : f32 to vector<64x32xf32>
    %c0_26 = arith.constant 0 : index
    %c1_27 = arith.constant 1 : index
    %c0_28 = arith.constant 0 : index
    %43 = vector.load %arg2[%c0_26, %c1_27, %c0_28] : memref<1x82x32xbf16, #tpu.memory_space<vmem>>, vector<1x64x32xbf16>
    %44 = vector.shape_cast %43 : vector<1x64x32xbf16> to vector<64x32xbf16>
    %c0_29 = arith.constant 0 : index
    %c1_30 = arith.constant 1 : index
    %c0_31 = arith.constant 0 : index
    %c0_32 = arith.constant 0 : index
    %45 = vector.load %arg3[%c0_29, %c1_30, %c0_31, %c0_32] : memref<3x3x32x32xbf16, #tpu.memory_space<vmem>>, vector<1x1x32x32xbf16>
    %46 = vector.shape_cast %45 : vector<1x1x32x32xbf16> to vector<32x32xbf16>
    %cst_33 = arith.constant dense<0.000000e+00> : vector<64x32xf32>
    %47 = tpu.matmul %44, %46, %cst_33 {dimension_numbers = #tpu.dot_dimension_numbers<[1], [0], [0], [1], [0, 0, 1, 1], [], []>} : vector<64x32xbf16>, vector<32x32xbf16>, vector<64x32xf32> -> vector<64x32xf32>
    %48 = arith.addf %42, %47 : vector<64x32xf32>
    %c0_34 = arith.constant 0 : index
    %c9 = arith.constant 9 : index
    %c0_35 = arith.constant 0 : index
    %49 = vector.load %arg2[%c0_34, %c9, %c0_35] : memref<1x82x32xbf16, #tpu.memory_space<vmem>>, vector<1x64x32xbf16>
    %50 = vector.shape_cast %49 : vector<1x64x32xbf16> to vector<64x32xbf16>
    %c1_36 = arith.constant 1 : index
    %c1_37 = arith.constant 1 : index
    %c0_38 = arith.constant 0 : index
    %c0_39 = arith.constant 0 : index
    %51 = vector.load %arg3[%c1_36, %c1_37, %c0_38, %c0_39] : memref<3x3x32x32xbf16, #tpu.memory_space<vmem>>, vector<1x1x32x32xbf16>
    %52 = vector.shape_cast %51 : vector<1x1x32x32xbf16> to vector<32x32xbf16>
    %cst_40 = arith.constant dense<0.000000e+00> : vector<64x32xf32>
    %53 = tpu.matmul %50, %52, %cst_40 {dimension_numbers = #tpu.dot_dimension_numbers<[1], [0], [0], [1], [0, 0, 1, 1], [], []>} : vector<64x32xbf16>, vector<32x32xbf16>, vector<64x32xf32> -> vector<64x32xf32>
    %54 = arith.addf %48, %53 : vector<64x32xf32>
    %c0_41 = arith.constant 0 : index
    %c17 = arith.constant 17 : index
    %c0_42 = arith.constant 0 : index
    %55 = vector.load %arg2[%c0_41, %c17, %c0_42] : memref<1x82x32xbf16, #tpu.memory_space<vmem>>, vector<1x64x32xbf16>
    %56 = vector.shape_cast %55 : vector<1x64x32xbf16> to vector<64x32xbf16>
    %c2_43 = arith.constant 2 : index
    %c1_44 = arith.constant 1 : index
    %c0_45 = arith.constant 0 : index
    %c0_46 = arith.constant 0 : index
    %57 = vector.load %arg3[%c2_43, %c1_44, %c0_45, %c0_46] : memref<3x3x32x32xbf16, #tpu.memory_space<vmem>>, vector<1x1x32x32xbf16>
    %58 = vector.shape_cast %57 : vector<1x1x32x32xbf16> to vector<32x32xbf16>
    %cst_47 = arith.constant dense<0.000000e+00> : vector<64x32xf32>
    %59 = tpu.matmul %56, %58, %cst_47 {dimension_numbers = #tpu.dot_dimension_numbers<[1], [0], [0], [1], [0, 0, 1, 1], [], []>} : vector<64x32xbf16>, vector<32x32xbf16>, vector<64x32xf32> -> vector<64x32xf32>
    %60 = arith.addf %54, %59 : vector<64x32xf32>
    %61 = arith.addf %41, %60 : vector<64x32xf32>
    %cst_48 = arith.constant 0.000000e+00 : f32
    %62 = vector.broadcast %cst_48 : f32 to vector<64x32xf32>
    %c0_49 = arith.constant 0 : index
    %c2_50 = arith.constant 2 : index
    %c0_51 = arith.constant 0 : index
    %63 = vector.load %arg2[%c0_49, %c2_50, %c0_51] : memref<1x82x32xbf16, #tpu.memory_space<vmem>>, vector<1x64x32xbf16>
    %64 = vector.shape_cast %63 : vector<1x64x32xbf16> to vector<64x32xbf16>
    %c0_52 = arith.constant 0 : index
    %c2_53 = arith.constant 2 : index
    %c0_54 = arith.constant 0 : index
    %c0_55 = arith.constant 0 : index
    %65 = vector.load %arg3[%c0_52, %c2_53, %c0_54, %c0_55] : memref<3x3x32x32xbf16, #tpu.memory_space<vmem>>, vector<1x1x32x32xbf16>
    %66 = vector.shape_cast %65 : vector<1x1x32x32xbf16> to vector<32x32xbf16>
    %cst_56 = arith.constant dense<0.000000e+00> : vector<64x32xf32>
    %67 = tpu.matmul %64, %66, %cst_56 {dimension_numbers = #tpu.dot_dimension_numbers<[1], [0], [0], [1], [0, 0, 1, 1], [], []>} : vector<64x32xbf16>, vector<32x32xbf16>, vector<64x32xf32> -> vector<64x32xf32>
    %68 = arith.addf %62, %67 : vector<64x32xf32>
    %c0_57 = arith.constant 0 : index
    %c10 = arith.constant 10 : index
    %c0_58 = arith.constant 0 : index
    %69 = vector.load %arg2[%c0_57, %c10, %c0_58] : memref<1x82x32xbf16, #tpu.memory_space<vmem>>, vector<1x64x32xbf16>
    %70 = vector.shape_cast %69 : vector<1x64x32xbf16> to vector<64x32xbf16>
    %c1_59 = arith.constant 1 : index
    %c2_60 = arith.constant 2 : index
    %c0_61 = arith.constant 0 : index
    %c0_62 = arith.constant 0 : index
    %71 = vector.load %arg3[%c1_59, %c2_60, %c0_61, %c0_62] : memref<3x3x32x32xbf16, #tpu.memory_space<vmem>>, vector<1x1x32x32xbf16>
    %72 = vector.shape_cast %71 : vector<1x1x32x32xbf16> to vector<32x32xbf16>
    %cst_63 = arith.constant dense<0.000000e+00> : vector<64x32xf32>
    %73 = tpu.matmul %70, %72, %cst_63 {dimension_numbers = #tpu.dot_dimension_numbers<[1], [0], [0], [1], [0, 0, 1, 1], [], []>} : vector<64x32xbf16>, vector<32x32xbf16>, vector<64x32xf32> -> vector<64x32xf32>
    %74 = arith.addf %68, %73 : vector<64x32xf32>
    %c0_64 = arith.constant 0 : index
    %c18 = arith.constant 18 : index
    %c0_65 = arith.constant 0 : index
    %75 = vector.load %arg2[%c0_64, %c18, %c0_65] : memref<1x82x32xbf16, #tpu.memory_space<vmem>>, vector<1x64x32xbf16>
    %76 = vector.shape_cast %75 : vector<1x64x32xbf16> to vector<64x32xbf16>
    %c2_66 = arith.constant 2 : index
    %c2_67 = arith.constant 2 : index
    %c0_68 = arith.constant 0 : index
    %c0_69 = arith.constant 0 : index
    %77 = vector.load %arg3[%c2_66, %c2_67, %c0_68, %c0_69] : memref<3x3x32x32xbf16, #tpu.memory_space<vmem>>, vector<1x1x32x32xbf16>
    %78 = vector.shape_cast %77 : vector<1x1x32x32xbf16> to vector<32x32xbf16>
    %cst_70 = arith.constant dense<0.000000e+00> : vector<64x32xf32>
    %79 = tpu.matmul %76, %78, %cst_70 {dimension_numbers = #tpu.dot_dimension_numbers<[1], [0], [0], [1], [0, 0, 1, 1], [], []>} : vector<64x32xbf16>, vector<32x32xbf16>, vector<64x32xf32> -> vector<64x32xf32>
    %80 = arith.addf %74, %79 : vector<64x32xf32>
    %c7_i32 = arith.constant 7 : i32
    %81 = vector.broadcast %c7_i32 : i32 to vector<64x32xi32>
    %82 = arith.cmpi eq, %16, %81 : vector<64x32xi32>
    %cst_71 = arith.constant 0.000000e+00 : f32
    %83 = vector.broadcast %cst_71 : f32 to vector<64x32xf32>
    %84 = arith.select %82, %83, %80 : vector<64x32xi1>, vector<64x32xf32>
    %85 = arith.addf %61, %84 : vector<64x32xf32>
    %c0_72 = arith.constant 0 : index
    %c0_73 = arith.constant 0 : index
    %86 = vector.load %arg4[%c0_72, %c0_73] : memref<1x32xf32, #tpu.memory_space<vmem>>, vector<1x32xf32>
    %87 = vector.broadcast %86 : vector<1x32xf32> to vector<64x32xf32>
    %88 = arith.addf %85, %87 : vector<64x32xf32>
    %89 = arith.truncf %88 : vector<64x32xf32> to vector<64x32xbf16>
    %c0_74 = arith.constant 0 : index
    %c0_75 = arith.constant 0 : index
    %c0_76 = arith.constant 0 : index
    %90 = vector.load %arg5[%c0_74, %c0_75, %c0_76] : memref<1x64x32xbf16, #tpu.memory_space<vmem>>, vector<1x64x32xbf16>
    %91 = vector.shape_cast %90 : vector<1x64x32xbf16> to vector<64x32xbf16>
    %92 = vector.shape_cast %89 : vector<64x32xbf16> to vector<1x64x32xbf16>
    tpu.vector_store %arg5[%c0_74, %c0_75, %c0_76], %92 {strides = array<i32>} : memref<1x64x32xbf16, #tpu.memory_space<vmem>>, vector<1x64x32xbf16>,
    return
  }
  func.func @transform_0(%arg0: i32, %arg1: i32) -> (i32, i32, i32) {
    %c0_i32 = arith.constant 0 : i32
    %c0_i32_0 = arith.constant 0 : i32
    %c0_i32_1 = arith.constant 0 : i32
    return %arg1, %c0_i32, %c0_i32_0 : i32, i32, i32
  }
  func.func @transform_1(%arg0: i32, %arg1: i32) -> (i32, i32, i32, i32) {
    %c0_i32 = arith.constant 0 : i32
    %c0_i32_0 = arith.constant 0 : i32
    %c0_i32_1 = arith.constant 0 : i32
    %c0_i32_2 = arith.constant 0 : i32
    return %c0_i32, %c0_i32_0, %c0_i32_1, %arg0 : i32, i32, i32, i32
  }
  func.func @transform_2(%arg0: i32, %arg1: i32) -> (i32, i32) {
    %c0_i32 = arith.constant 0 : i32
    %c0_i32_0 = arith.constant 0 : i32
    return %c0_i32, %arg0 : i32, i32
  }
  func.func @transform_3(%arg0: i32, %arg1: i32) -> (i32, i32, i32) {
    %c0_i32 = arith.constant 0 : i32
    %c0_i32_0 = arith.constant 0 : i32
    return %arg1, %c0_i32, %arg0 : i32, i32, i32
  }
}

module attributes {stable_mosaic.version = 11 : i64} {
  func.func @kernel(%arg0: i32, %arg1: i32, %arg2: memref<1x64x32xbf16, #tpu.memory_space<vmem>>, %arg3: memref<1x1x32xf32, #tpu.memory_space<vmem>>, %arg4: memref<32x8xf32, #tpu.memory_space<vmem>>, %arg5: memref<8x32xf32, #tpu.memory_space<vmem>>, %arg6: memref<1x32xf32, #tpu.memory_space<vmem>>, %arg7: memref<1x32xf32, #tpu.memory_space<vmem>>, %arg8: memref<1x64x32xbf16, #tpu.memory_space<vmem>>) attributes {dimension_semantics = [#tpu.dimension_semantics<parallel>, #tpu.dimension_semantics<arbitrary>], iteration_bounds = array<i64: 2, 1>, scalar_prefetch = 0 : i64, scratch_operands = 0 : i64, tpu.core_type = #tpu.core_type<tc>, window_params = [{transform_indices = @transform_0, window_bounds = array<i64: 1, 64, 32>}, {transform_indices = @transform_1, window_bounds = array<i64: 1, 1, 32>}, {pipeline_mode = #tpu.pipeline_mode<synchronous>, transform_indices = @transform_2, window_bounds = array<i64: 32, 8>}, {pipeline_mode = #tpu.pipeline_mode<synchronous>, transform_indices = @transform_3, window_bounds = array<i64: 8, 32>}, {pipeline_mode = #tpu.pipeline_mode<synchronous>, transform_indices = @transform_4, window_bounds = array<i64: 1, 32>}, {pipeline_mode = #tpu.pipeline_mode<synchronous>, transform_indices = @transform_5, window_bounds = array<i64: 1, 32>}, {transform_indices = @transform_6, window_bounds = array<i64: 1, 64, 32>}]} {
    %c0 = arith.constant 0 : index
    %c0_0 = arith.constant 0 : index
    %c0_1 = arith.constant 0 : index
    %0 = vector.load %arg2[%c0, %c0_0, %c0_1] : memref<1x64x32xbf16, #tpu.memory_space<vmem>>, vector<1x64x32xbf16>
    %1 = vector.shape_cast %0 : vector<1x64x32xbf16> to vector<64x32xbf16>
    %2 = arith.extf %1 : vector<64x32xbf16> to vector<64x32xf32>
    %c0_2 = arith.constant 0 : index
    %c0_3 = arith.constant 0 : index
    %c0_4 = arith.constant 0 : index
    %3 = vector.load %arg3[%c0_2, %c0_3, %c0_4] : memref<1x1x32xf32, #tpu.memory_space<vmem>>, vector<1x1x32xf32>
    %4 = vector.shape_cast %3 : vector<1x1x32xf32> to vector<1x32xf32>
    %5 = vector.broadcast %4 : vector<1x32xf32> to vector<64x32xf32>
    %6 = arith.addf %2, %5 : vector<64x32xf32>
    %c0_5 = arith.constant 0 : index
    %c0_6 = arith.constant 0 : index
    %7 = vector.load %arg4[%c0_5, %c0_6] : memref<32x8xf32, #tpu.memory_space<vmem>>, vector<32x8xf32>
    %cst = arith.constant dense<0.000000e+00> : vector<64x8xf32>
    %8 = tpu.matmul %6, %7, %cst {dimension_numbers = #tpu.dot_dimension_numbers<[1], [0], [0], [1], [0, 0, 1, 1], [], []>} : vector<64x32xf32>, vector<32x8xf32>, vector<64x8xf32> -> vector<64x8xf32>
    %cst_7 = arith.constant dense<0.000000e+00> : vector<8xf32>
    %9 = vector.multi_reduction <add>, %8, %cst_7 [0] : vector<64x8xf32> to vector<8xf32>
    %10 = vector.shape_cast %9 : vector<8xf32> to vector<1x8xf32>
    %cst_8 = arith.constant 3.906250e-03 : f32
    %11 = vector.broadcast %cst_8 : f32 to vector<1x8xf32>
    %12 = arith.mulf %10, %11 : vector<1x8xf32>
    %c0_9 = arith.constant 0 : index
    %c0_10 = arith.constant 0 : index
    %13 = vector.load %arg5[%c0_9, %c0_10] : memref<8x32xf32, #tpu.memory_space<vmem>>, vector<8x32xf32>
    %cst_11 = arith.constant dense<0.000000e+00> : vector<1x32xf32>
    %14 = tpu.matmul %12, %13, %cst_11 {dimension_numbers = #tpu.dot_dimension_numbers<[1], [0], [0], [1], [0, 0, 1, 1], [], []>} : vector<1x8xf32>, vector<8x32xf32>, vector<1x32xf32> -> vector<1x32xf32>
    %15 = vector.broadcast %14 : vector<1x32xf32> to vector<64x32xf32>
    %16 = arith.subf %6, %15 : vector<64x32xf32>
    %17 = arith.mulf %16, %16 : vector<64x32xf32>
    %cst_12 = arith.constant dense<0.000000e+00> : vector<64x8xf32>
    %18 = tpu.matmul %17, %7, %cst_12 {dimension_numbers = #tpu.dot_dimension_numbers<[1], [0], [0], [1], [0, 0, 1, 1], [], []>} : vector<64x32xf32>, vector<32x8xf32>, vector<64x8xf32> -> vector<64x8xf32>
    %cst_13 = arith.constant dense<0.000000e+00> : vector<8xf32>
    %19 = vector.multi_reduction <add>, %18, %cst_13 [0] : vector<64x8xf32> to vector<8xf32>
    %20 = vector.shape_cast %19 : vector<8xf32> to vector<1x8xf32>
    %cst_14 = arith.constant 3.906250e-03 : f32
    %21 = vector.broadcast %cst_14 : f32 to vector<1x8xf32>
    %22 = arith.mulf %20, %21 : vector<1x8xf32>
    %c0_15 = arith.constant 0 : index
    %c0_16 = arith.constant 0 : index
    %23 = vector.load %arg5[%c0_15, %c0_16] : memref<8x32xf32, #tpu.memory_space<vmem>>, vector<8x32xf32>
    %cst_17 = arith.constant dense<0.000000e+00> : vector<1x32xf32>
    %24 = tpu.matmul %22, %23, %cst_17 {dimension_numbers = #tpu.dot_dimension_numbers<[1], [0], [0], [1], [0, 0, 1, 1], [], []>} : vector<1x8xf32>, vector<8x32xf32>, vector<1x32xf32> -> vector<1x32xf32>
    %cst_18 = arith.constant 9.99999997E-7 : f32
    %25 = vector.broadcast %cst_18 : f32 to vector<1x32xf32>
    %26 = arith.addf %24, %25 : vector<1x32xf32>
    %27 = math.rsqrt %26 : vector<1x32xf32>
    %28 = vector.broadcast %27 : vector<1x32xf32> to vector<64x32xf32>
    %29 = arith.mulf %16, %28 : vector<64x32xf32>
    %c0_19 = arith.constant 0 : index
    %c0_20 = arith.constant 0 : index
    %30 = vector.load %arg6[%c0_19, %c0_20] : memref<1x32xf32, #tpu.memory_space<vmem>>, vector<1x32xf32>
    %31 = vector.broadcast %30 : vector<1x32xf32> to vector<64x32xf32>
    %32 = arith.mulf %29, %31 : vector<64x32xf32>
    %c0_21 = arith.constant 0 : index
    %c0_22 = arith.constant 0 : index
    %33 = vector.load %arg7[%c0_21, %c0_22] : memref<1x32xf32, #tpu.memory_space<vmem>>, vector<1x32xf32>
    %34 = vector.broadcast %33 : vector<1x32xf32> to vector<64x32xf32>
    %35 = arith.addf %32, %34 : vector<64x32xf32>
    %36 = arith.negf %35 : vector<64x32xf32>
    %37 = math.exp %36 : vector<64x32xf32>
    %cst_23 = arith.constant 1.000000e+00 : f32
    %38 = vector.broadcast %cst_23 : f32 to vector<64x32xf32>
    %39 = arith.addf %38, %37 : vector<64x32xf32>
    %40 = arith.divf %38, %39 : vector<64x32xf32>
    %41 = arith.mulf %35, %40 : vector<64x32xf32>
    %42 = arith.truncf %41 : vector<64x32xf32> to vector<64x32xbf16>
    %c0_24 = arith.constant 0 : index
    %c0_25 = arith.constant 0 : index
    %c0_26 = arith.constant 0 : index
    %43 = vector.load %arg8[%c0_24, %c0_25, %c0_26] : memref<1x64x32xbf16, #tpu.memory_space<vmem>>, vector<1x64x32xbf16>
    %44 = vector.shape_cast %43 : vector<1x64x32xbf16> to vector<64x32xbf16>
    %45 = vector.shape_cast %42 : vector<64x32xbf16> to vector<1x64x32xbf16>
    tpu.vector_store %arg8[%c0_24, %c0_25, %c0_26], %45 {strides = array<i32>} : memref<1x64x32xbf16, #tpu.memory_space<vmem>>, vector<1x64x32xbf16>,
    return
  }
  func.func @transform_0(%arg0: i32, %arg1: i32) -> (i32, i32, i32) {
    %c0_i32 = arith.constant 0 : i32
    %c0_i32_0 = arith.constant 0 : i32
    %c0_i32_1 = arith.constant 0 : i32
    return %arg0, %c0_i32, %c0_i32_0 : i32, i32, i32
  }
  func.func @transform_1(%arg0: i32, %arg1: i32) -> (i32, i32, i32) {
    %c0_i32 = arith.constant 0 : i32
    %c0_i32_0 = arith.constant 0 : i32
    %c0_i32_1 = arith.constant 0 : i32
    return %arg0, %c0_i32, %c0_i32_0 : i32, i32, i32
  }
  func.func @transform_2(%arg0: i32, %arg1: i32) -> (i32, i32) {
    %c0_i32 = arith.constant 0 : i32
    %c0_i32_0 = arith.constant 0 : i32
    %c0_i32_1 = arith.constant 0 : i32
    return %c0_i32, %c0_i32_0 : i32, i32
  }
  func.func @transform_3(%arg0: i32, %arg1: i32) -> (i32, i32) {
    %c0_i32 = arith.constant 0 : i32
    %c0_i32_0 = arith.constant 0 : i32
    %c0_i32_1 = arith.constant 0 : i32
    return %c0_i32, %c0_i32_0 : i32, i32
  }
  func.func @transform_4(%arg0: i32, %arg1: i32) -> (i32, i32) {
    %c0_i32 = arith.constant 0 : i32
    %c0_i32_0 = arith.constant 0 : i32
    %c0_i32_1 = arith.constant 0 : i32
    return %c0_i32, %c0_i32_0 : i32, i32
  }
  func.func @transform_5(%arg0: i32, %arg1: i32) -> (i32, i32) {
    %c0_i32 = arith.constant 0 : i32
    %c0_i32_0 = arith.constant 0 : i32
    %c0_i32_1 = arith.constant 0 : i32
    return %c0_i32, %c0_i32_0 : i32, i32
  }
  func.func @transform_6(%arg0: i32, %arg1: i32) -> (i32, i32, i32) {
    %c0_i32 = arith.constant 0 : i32
    %c0_i32_0 = arith.constant 0 : i32
    return %arg0, %c0_i32, %arg1 : i32, i32, i32
  }
}

module attributes {stable_mosaic.version = 11 : i64} {
  func.func @kernel(%arg0: i32, %arg1: i32, %arg2: memref<2x32xbf16, #tpu.memory_space<vmem>>, %arg3: memref<32x32xbf16, #tpu.memory_space<vmem>>, %arg4: memref<1x32xf32, #tpu.memory_space<vmem>>, %arg5: memref<2x32xf32, #tpu.memory_space<vmem>>) attributes {dimension_semantics = [#tpu.dimension_semantics<parallel>, #tpu.dimension_semantics<parallel>], iteration_bounds = array<i64: 1, 1>, scalar_prefetch = 0 : i64, scratch_operands = 0 : i64, tpu.core_type = #tpu.core_type<tc>, window_params = [{transform_indices = @transform_0, window_bounds = array<i64: 2, 32>}, {transform_indices = @transform_1, window_bounds = array<i64: 32, 32>}, {transform_indices = @transform_2, window_bounds = array<i64: 1, 32>}, {transform_indices = @transform_3, window_bounds = array<i64: 2, 32>}]} {
    %c0 = arith.constant 0 : index
    %c0_0 = arith.constant 0 : index
    %0 = vector.load %arg2[%c0, %c0_0] : memref<2x32xbf16, #tpu.memory_space<vmem>>, vector<2x32xbf16>
    %1 = arith.extf %0 : vector<2x32xbf16> to vector<2x32xf32>
    %2 = arith.negf %1 : vector<2x32xf32>
    %3 = math.exp %2 : vector<2x32xf32>
    %cst = arith.constant 1.000000e+00 : f32
    %4 = vector.broadcast %cst : f32 to vector<2x32xf32>
    %5 = arith.addf %4, %3 : vector<2x32xf32>
    %6 = arith.divf %4, %5 : vector<2x32xf32>
    %7 = arith.mulf %1, %6 : vector<2x32xf32>
    %8 = arith.truncf %7 : vector<2x32xf32> to vector<2x32xbf16>
    %c0_1 = arith.constant 0 : index
    %c0_2 = arith.constant 0 : index
    %9 = vector.load %arg3[%c0_1, %c0_2] : memref<32x32xbf16, #tpu.memory_space<vmem>>, vector<32x32xbf16>
    %cst_3 = arith.constant dense<0.000000e+00> : vector<2x32xf32>
    %10 = tpu.matmul %8, %9, %cst_3 {dimension_numbers = #tpu.dot_dimension_numbers<[1], [0], [0], [1], [0, 0, 1, 1], [], []>} : vector<2x32xbf16>, vector<32x32xbf16>, vector<2x32xf32> -> vector<2x32xf32>
    %c0_4 = arith.constant 0 : index
    %c0_5 = arith.constant 0 : index
    %11 = vector.load %arg4[%c0_4, %c0_5] : memref<1x32xf32, #tpu.memory_space<vmem>>, vector<1x32xf32>
    %12 = vector.broadcast %11 : vector<1x32xf32> to vector<2x32xf32>
    %13 = arith.addf %10, %12 : vector<2x32xf32>
    %c0_6 = arith.constant 0 : index
    %c0_7 = arith.constant 0 : index
    %14 = vector.load %arg5[%c0_6, %c0_7] : memref<2x32xf32, #tpu.memory_space<vmem>>, vector<2x32xf32>
    tpu.vector_store %arg5[%c0_6, %c0_7], %13 {strides = array<i32>} : memref<2x32xf32, #tpu.memory_space<vmem>>, vector<2x32xf32>,
    return
  }
  func.func @transform_0(%arg0: i32, %arg1: i32) -> (i32, i32) {
    %c0_i32 = arith.constant 0 : i32
    %c0_i32_0 = arith.constant 0 : i32
    return %arg0, %c0_i32 : i32, i32
  }
  func.func @transform_1(%arg0: i32, %arg1: i32) -> (i32, i32) {
    %c0_i32 = arith.constant 0 : i32
    %c0_i32_0 = arith.constant 0 : i32
    return %c0_i32, %arg1 : i32, i32
  }
  func.func @transform_2(%arg0: i32, %arg1: i32) -> (i32, i32) {
    %c0_i32 = arith.constant 0 : i32
    %c0_i32_0 = arith.constant 0 : i32
    return %c0_i32, %arg1 : i32, i32
  }
  func.func @transform_3(%arg0: i32, %arg1: i32) -> (i32, i32) {
    %c0_i32 = arith.constant 0 : i32
    return %arg0, %arg1 : i32, i32
  }
}

module attributes {stable_mosaic.version = 11 : i64} {
  func.func @kernel(%arg0: i32, %arg1: i32, %arg2: memref<1x82x32xbf16, #tpu.memory_space<vmem>>, %arg3: memref<3x3x32x32xbf16, #tpu.memory_space<vmem>>, %arg4: memref<1x32xf32, #tpu.memory_space<vmem>>, %arg5: memref<1x64x32xbf16, #tpu.memory_space<vmem>>, %arg6: memref<1x64x32xbf16, #tpu.memory_space<vmem>>) attributes {dimension_semantics = [#tpu.dimension_semantics<parallel>, #tpu.dimension_semantics<parallel>], iteration_bounds = array<i64: 1, 2>, scalar_prefetch = 0 : i64, scratch_operands = 0 : i64, tpu.core_type = #tpu.core_type<tc>, window_params = [{transform_indices = @transform_0, window_bounds = array<i64: 1, 82, 32>}, {transform_indices = @transform_1, window_bounds = array<i64: 3, 3, 32, 32>}, {transform_indices = @transform_2, window_bounds = array<i64: 1, 32>}, {transform_indices = @transform_3, window_bounds = array<i64: 1, 64, 32>}, {transform_indices = @transform_4, window_bounds = array<i64: 1, 64, 32>}]} {
    %0 = tpu.iota {dimensions = array<i32: 0>} : vector<64x32xi32>
    %c8_i32 = arith.constant 8 : i32
    %c0_i32 = arith.constant 0 : i32
    %1 = arith.cmpi eq, %c8_i32, %c0_i32 : i32
    %c1_i32 = arith.constant 1 : i32
    %2 = arith.select %1, %c1_i32, %c8_i32 : i32
    %3 = vector.broadcast %2 : i32 to vector<64x32xi32>
    %4 = arith.remsi %0, %3 : vector<64x32xi32>
    %c0_i32_0 = arith.constant 0 : i32
    %5 = vector.broadcast %c0_i32_0 : i32 to vector<64x32xi32>
    %6 = arith.cmpi ne, %4, %5 : vector<64x32xi32>
    %c0_i32_1 = arith.constant 0 : i32
    %7 = vector.broadcast %c0_i32_1 : i32 to vector<64x32xi32>
    %8 = arith.cmpi slt, %4, %7 : vector<64x32xi32>
    %c0_i32_2 = arith.constant 0 : i32
    %9 = arith.cmpi slt, %2, %c0_i32_2 : i32
    %10 = vector.broadcast %9 : i1 to vector<64x32xi1>
    %11 = vector.broadcast %10 : vector<64x32xi1> to vector<64x32xi1>
    %12 = arith.xori %8, %11 : vector<64x32xi1>
    %13 = arith.andi %12, %6 : vector<64x32xi1>
    %14 = vector.broadcast %2 : i32 to vector<64x32xi32>
    %15 = arith.addi %4, %14 : vector<64x32xi32>
    %16 = arith.select %13, %15, %4 : vector<64x32xi1>, vector<64x32xi32>
    %cst = arith.constant 0.000000e+00 : f32
    %17 = vector.broadcast %cst : f32 to vector<64x32xf32>
    %cst_3 = arith.constant 0.000000e+00 : f32
    %18 = vector.broadcast %cst_3 : f32 to vector<64x32xf32>
    %c0 = arith.constant 0 : index
    %c0_4 = arith.constant 0 : index
    %c0_5 = arith.constant 0 : index
    %19 = vector.load %arg2[%c0, %c0_4, %c0_5] : memref<1x82x32xbf16, #tpu.memory_space<vmem>>, vector<1x64x32xbf16>
    %20 = vector.shape_cast %19 : vector<1x64x32xbf16> to vector<64x32xbf16>
    %c0_6 = arith.constant 0 : index
    %c0_7 = arith.constant 0 : index
    %c0_8 = arith.constant 0 : index
    %c0_9 = arith.constant 0 : index
    %21 = vector.load %arg3[%c0_6, %c0_7, %c0_8, %c0_9] : memref<3x3x32x32xbf16, #tpu.memory_space<vmem>>, vector<1x1x32x32xbf16>
    %22 = vector.shape_cast %21 : vector<1x1x32x32xbf16> to vector<32x32xbf16>
    %cst_10 = arith.constant dense<0.000000e+00> : vector<64x32xf32>
    %23 = tpu.matmul %20, %22, %cst_10 {dimension_numbers = #tpu.dot_dimension_numbers<[1], [0], [0], [1], [0, 0, 1, 1], [], []>} : vector<64x32xbf16>, vector<32x32xbf16>, vector<64x32xf32> -> vector<64x32xf32>
    %24 = arith.addf %18, %23 : vector<64x32xf32>
    %c0_11 = arith.constant 0 : index
    %c8 = arith.constant 8 : index
    %c0_12 = arith.constant 0 : index
    %25 = vector.load %arg2[%c0_11, %c8, %c0_12] : memref<1x82x32xbf16, #tpu.memory_space<vmem>>, vector<1x64x32xbf16>
    %26 = vector.shape_cast %25 : vector<1x64x32xbf16> to vector<64x32xbf16>
    %c1 = arith.constant 1 : index
    %c0_13 = arith.constant 0 : index
    %c0_14 = arith.constant 0 : index
    %c0_15 = arith.constant 0 : index
    %27 = vector.load %arg3[%c1, %c0_13, %c0_14, %c0_15] : memref<3x3x32x32xbf16, #tpu.memory_space<vmem>>, vector<1x1x32x32xbf16>
    %28 = vector.shape_cast %27 : vector<1x1x32x32xbf16> to vector<32x32xbf16>
    %cst_16 = arith.constant dense<0.000000e+00> : vector<64x32xf32>
    %29 = tpu.matmul %26, %28, %cst_16 {dimension_numbers = #tpu.dot_dimension_numbers<[1], [0], [0], [1], [0, 0, 1, 1], [], []>} : vector<64x32xbf16>, vector<32x32xbf16>, vector<64x32xf32> -> vector<64x32xf32>
    %30 = arith.addf %24, %29 : vector<64x32xf32>
    %c0_17 = arith.constant 0 : index
    %c16 = arith.constant 16 : index
    %c0_18 = arith.constant 0 : index
    %31 = vector.load %arg2[%c0_17, %c16, %c0_18] : memref<1x82x32xbf16, #tpu.memory_space<vmem>>, vector<1x64x32xbf16>
    %32 = vector.shape_cast %31 : vector<1x64x32xbf16> to vector<64x32xbf16>
    %c2 = arith.constant 2 : index
    %c0_19 = arith.constant 0 : index
    %c0_20 = arith.constant 0 : index
    %c0_21 = arith.constant 0 : index
    %33 = vector.load %arg3[%c2, %c0_19, %c0_20, %c0_21] : memref<3x3x32x32xbf16, #tpu.memory_space<vmem>>, vector<1x1x32x32xbf16>
    %34 = vector.shape_cast %33 : vector<1x1x32x32xbf16> to vector<32x32xbf16>
    %cst_22 = arith.constant dense<0.000000e+00> : vector<64x32xf32>
    %35 = tpu.matmul %32, %34, %cst_22 {dimension_numbers = #tpu.dot_dimension_numbers<[1], [0], [0], [1], [0, 0, 1, 1], [], []>} : vector<64x32xbf16>, vector<32x32xbf16>, vector<64x32xf32> -> vector<64x32xf32>
    %36 = arith.addf %30, %35 : vector<64x32xf32>
    %c0_i32_23 = arith.constant 0 : i32
    %37 = vector.broadcast %c0_i32_23 : i32 to vector<64x32xi32>
    %38 = arith.cmpi eq, %16, %37 : vector<64x32xi32>
    %cst_24 = arith.constant 0.000000e+00 : f32
    %39 = vector.broadcast %cst_24 : f32 to vector<64x32xf32>
    %40 = arith.select %38, %39, %36 : vector<64x32xi1>, vector<64x32xf32>
    %41 = arith.addf %17, %40 : vector<64x32xf32>
    %cst_25 = arith.constant 0.000000e+00 : f32
    %42 = vector.broadcast %cst_25 : f32 to vector<64x32xf32>
    %c0_26 = arith.constant 0 : index
    %c1_27 = arith.constant 1 : index
    %c0_28 = arith.constant 0 : index
    %43 = vector.load %arg2[%c0_26, %c1_27, %c0_28] : memref<1x82x32xbf16, #tpu.memory_space<vmem>>, vector<1x64x32xbf16>
    %44 = vector.shape_cast %43 : vector<1x64x32xbf16> to vector<64x32xbf16>
    %c0_29 = arith.constant 0 : index
    %c1_30 = arith.constant 1 : index
    %c0_31 = arith.constant 0 : index
    %c0_32 = arith.constant 0 : index
    %45 = vector.load %arg3[%c0_29, %c1_30, %c0_31, %c0_32] : memref<3x3x32x32xbf16, #tpu.memory_space<vmem>>, vector<1x1x32x32xbf16>
    %46 = vector.shape_cast %45 : vector<1x1x32x32xbf16> to vector<32x32xbf16>
    %cst_33 = arith.constant dense<0.000000e+00> : vector<64x32xf32>
    %47 = tpu.matmul %44, %46, %cst_33 {dimension_numbers = #tpu.dot_dimension_numbers<[1], [0], [0], [1], [0, 0, 1, 1], [], []>} : vector<64x32xbf16>, vector<32x32xbf16>, vector<64x32xf32> -> vector<64x32xf32>
    %48 = arith.addf %42, %47 : vector<64x32xf32>
    %c0_34 = arith.constant 0 : index
    %c9 = arith.constant 9 : index
    %c0_35 = arith.constant 0 : index
    %49 = vector.load %arg2[%c0_34, %c9, %c0_35] : memref<1x82x32xbf16, #tpu.memory_space<vmem>>, vector<1x64x32xbf16>
    %50 = vector.shape_cast %49 : vector<1x64x32xbf16> to vector<64x32xbf16>
    %c1_36 = arith.constant 1 : index
    %c1_37 = arith.constant 1 : index
    %c0_38 = arith.constant 0 : index
    %c0_39 = arith.constant 0 : index
    %51 = vector.load %arg3[%c1_36, %c1_37, %c0_38, %c0_39] : memref<3x3x32x32xbf16, #tpu.memory_space<vmem>>, vector<1x1x32x32xbf16>
    %52 = vector.shape_cast %51 : vector<1x1x32x32xbf16> to vector<32x32xbf16>
    %cst_40 = arith.constant dense<0.000000e+00> : vector<64x32xf32>
    %53 = tpu.matmul %50, %52, %cst_40 {dimension_numbers = #tpu.dot_dimension_numbers<[1], [0], [0], [1], [0, 0, 1, 1], [], []>} : vector<64x32xbf16>, vector<32x32xbf16>, vector<64x32xf32> -> vector<64x32xf32>
    %54 = arith.addf %48, %53 : vector<64x32xf32>
    %c0_41 = arith.constant 0 : index
    %c17 = arith.constant 17 : index
    %c0_42 = arith.constant 0 : index
    %55 = vector.load %arg2[%c0_41, %c17, %c0_42] : memref<1x82x32xbf16, #tpu.memory_space<vmem>>, vector<1x64x32xbf16>
    %56 = vector.shape_cast %55 : vector<1x64x32xbf16> to vector<64x32xbf16>
    %c2_43 = arith.constant 2 : index
    %c1_44 = arith.constant 1 : index
    %c0_45 = arith.constant 0 : index
    %c0_46 = arith.constant 0 : index
    %57 = vector.load %arg3[%c2_43, %c1_44, %c0_45, %c0_46] : memref<3x3x32x32xbf16, #tpu.memory_space<vmem>>, vector<1x1x32x32xbf16>
    %58 = vector.shape_cast %57 : vector<1x1x32x32xbf16> to vector<32x32xbf16>
    %cst_47 = arith.constant dense<0.000000e+00> : vector<64x32xf32>
    %59 = tpu.matmul %56, %58, %cst_47 {dimension_numbers = #tpu.dot_dimension_numbers<[1], [0], [0], [1], [0, 0, 1, 1], [], []>} : vector<64x32xbf16>, vector<32x32xbf16>, vector<64x32xf32> -> vector<64x32xf32>
    %60 = arith.addf %54, %59 : vector<64x32xf32>
    %61 = arith.addf %41, %60 : vector<64x32xf32>
    %cst_48 = arith.constant 0.000000e+00 : f32
    %62 = vector.broadcast %cst_48 : f32 to vector<64x32xf32>
    %c0_49 = arith.constant 0 : index
    %c2_50 = arith.constant 2 : index
    %c0_51 = arith.constant 0 : index
    %63 = vector.load %arg2[%c0_49, %c2_50, %c0_51] : memref<1x82x32xbf16, #tpu.memory_space<vmem>>, vector<1x64x32xbf16>
    %64 = vector.shape_cast %63 : vector<1x64x32xbf16> to vector<64x32xbf16>
    %c0_52 = arith.constant 0 : index
    %c2_53 = arith.constant 2 : index
    %c0_54 = arith.constant 0 : index
    %c0_55 = arith.constant 0 : index
    %65 = vector.load %arg3[%c0_52, %c2_53, %c0_54, %c0_55] : memref<3x3x32x32xbf16, #tpu.memory_space<vmem>>, vector<1x1x32x32xbf16>
    %66 = vector.shape_cast %65 : vector<1x1x32x32xbf16> to vector<32x32xbf16>
    %cst_56 = arith.constant dense<0.000000e+00> : vector<64x32xf32>
    %67 = tpu.matmul %64, %66, %cst_56 {dimension_numbers = #tpu.dot_dimension_numbers<[1], [0], [0], [1], [0, 0, 1, 1], [], []>} : vector<64x32xbf16>, vector<32x32xbf16>, vector<64x32xf32> -> vector<64x32xf32>
    %68 = arith.addf %62, %67 : vector<64x32xf32>
    %c0_57 = arith.constant 0 : index
    %c10 = arith.constant 10 : index
    %c0_58 = arith.constant 0 : index
    %69 = vector.load %arg2[%c0_57, %c10, %c0_58] : memref<1x82x32xbf16, #tpu.memory_space<vmem>>, vector<1x64x32xbf16>
    %70 = vector.shape_cast %69 : vector<1x64x32xbf16> to vector<64x32xbf16>
    %c1_59 = arith.constant 1 : index
    %c2_60 = arith.constant 2 : index
    %c0_61 = arith.constant 0 : index
    %c0_62 = arith.constant 0 : index
    %71 = vector.load %arg3[%c1_59, %c2_60, %c0_61, %c0_62] : memref<3x3x32x32xbf16, #tpu.memory_space<vmem>>, vector<1x1x32x32xbf16>
    %72 = vector.shape_cast %71 : vector<1x1x32x32xbf16> to vector<32x32xbf16>
    %cst_63 = arith.constant dense<0.000000e+00> : vector<64x32xf32>
    %73 = tpu.matmul %70, %72, %cst_63 {dimension_numbers = #tpu.dot_dimension_numbers<[1], [0], [0], [1], [0, 0, 1, 1], [], []>} : vector<64x32xbf16>, vector<32x32xbf16>, vector<64x32xf32> -> vector<64x32xf32>
    %74 = arith.addf %68, %73 : vector<64x32xf32>
    %c0_64 = arith.constant 0 : index
    %c18 = arith.constant 18 : index
    %c0_65 = arith.constant 0 : index
    %75 = vector.load %arg2[%c0_64, %c18, %c0_65] : memref<1x82x32xbf16, #tpu.memory_space<vmem>>, vector<1x64x32xbf16>
    %76 = vector.shape_cast %75 : vector<1x64x32xbf16> to vector<64x32xbf16>
    %c2_66 = arith.constant 2 : index
    %c2_67 = arith.constant 2 : index
    %c0_68 = arith.constant 0 : index
    %c0_69 = arith.constant 0 : index
    %77 = vector.load %arg3[%c2_66, %c2_67, %c0_68, %c0_69] : memref<3x3x32x32xbf16, #tpu.memory_space<vmem>>, vector<1x1x32x32xbf16>
    %78 = vector.shape_cast %77 : vector<1x1x32x32xbf16> to vector<32x32xbf16>
    %cst_70 = arith.constant dense<0.000000e+00> : vector<64x32xf32>
    %79 = tpu.matmul %76, %78, %cst_70 {dimension_numbers = #tpu.dot_dimension_numbers<[1], [0], [0], [1], [0, 0, 1, 1], [], []>} : vector<64x32xbf16>, vector<32x32xbf16>, vector<64x32xf32> -> vector<64x32xf32>
    %80 = arith.addf %74, %79 : vector<64x32xf32>
    %c7_i32 = arith.constant 7 : i32
    %81 = vector.broadcast %c7_i32 : i32 to vector<64x32xi32>
    %82 = arith.cmpi eq, %16, %81 : vector<64x32xi32>
    %cst_71 = arith.constant 0.000000e+00 : f32
    %83 = vector.broadcast %cst_71 : f32 to vector<64x32xf32>
    %84 = arith.select %82, %83, %80 : vector<64x32xi1>, vector<64x32xf32>
    %85 = arith.addf %61, %84 : vector<64x32xf32>
    %c0_72 = arith.constant 0 : index
    %c0_73 = arith.constant 0 : index
    %86 = vector.load %arg4[%c0_72, %c0_73] : memref<1x32xf32, #tpu.memory_space<vmem>>, vector<1x32xf32>
    %87 = vector.broadcast %86 : vector<1x32xf32> to vector<64x32xf32>
    %88 = arith.addf %85, %87 : vector<64x32xf32>
    %c0_74 = arith.constant 0 : index
    %c0_75 = arith.constant 0 : index
    %c0_76 = arith.constant 0 : index
    %89 = vector.load %arg5[%c0_74, %c0_75, %c0_76] : memref<1x64x32xbf16, #tpu.memory_space<vmem>>, vector<1x64x32xbf16>
    %90 = vector.shape_cast %89 : vector<1x64x32xbf16> to vector<64x32xbf16>
    %91 = arith.extf %90 : vector<64x32xbf16> to vector<64x32xf32>
    %92 = arith.addf %88, %91 : vector<64x32xf32>
    %93 = arith.truncf %92 : vector<64x32xf32> to vector<64x32xbf16>
    %c0_77 = arith.constant 0 : index
    %c0_78 = arith.constant 0 : index
    %c0_79 = arith.constant 0 : index
    %94 = vector.load %arg6[%c0_77, %c0_78, %c0_79] : memref<1x64x32xbf16, #tpu.memory_space<vmem>>, vector<1x64x32xbf16>
    %95 = vector.shape_cast %94 : vector<1x64x32xbf16> to vector<64x32xbf16>
    %96 = vector.shape_cast %93 : vector<64x32xbf16> to vector<1x64x32xbf16>
    tpu.vector_store %arg6[%c0_77, %c0_78, %c0_79], %96 {strides = array<i32>} : memref<1x64x32xbf16, #tpu.memory_space<vmem>>, vector<1x64x32xbf16>,
    return
  }
  func.func @transform_0(%arg0: i32, %arg1: i32) -> (i32, i32, i32) {
    %c0_i32 = arith.constant 0 : i32
    %c0_i32_0 = arith.constant 0 : i32
    %c0_i32_1 = arith.constant 0 : i32
    return %arg1, %c0_i32, %c0_i32_0 : i32, i32, i32
  }
  func.func @transform_1(%arg0: i32, %arg1: i32) -> (i32, i32, i32, i32) {
    %c0_i32 = arith.constant 0 : i32
    %c0_i32_0 = arith.constant 0 : i32
    %c0_i32_1 = arith.constant 0 : i32
    %c0_i32_2 = arith.constant 0 : i32
    return %c0_i32, %c0_i32_0, %c0_i32_1, %arg0 : i32, i32, i32, i32
  }
  func.func @transform_2(%arg0: i32, %arg1: i32) -> (i32, i32) {
    %c0_i32 = arith.constant 0 : i32
    %c0_i32_0 = arith.constant 0 : i32
    return %c0_i32, %arg0 : i32, i32
  }
  func.func @transform_3(%arg0: i32, %arg1: i32) -> (i32, i32, i32) {
    %c0_i32 = arith.constant 0 : i32
    %c0_i32_0 = arith.constant 0 : i32
    return %arg1, %c0_i32, %arg0 : i32, i32, i32
  }
  func.func @transform_4(%arg0: i32, %arg1: i32) -> (i32, i32, i32) {
    %c0_i32 = arith.constant 0 : i32
    %c0_i32_0 = arith.constant 0 : i32
    return %arg1, %c0_i32, %arg0 : i32, i32, i32
  }
}

module attributes {stable_mosaic.version = 11 : i64} {
  func.func @kernel(%arg0: i32, %arg1: i32, %arg2: memref<1x64x32xbf16, #tpu.memory_space<vmem>>, %arg3: memref<32x8xf32, #tpu.memory_space<vmem>>, %arg4: memref<8x32xf32, #tpu.memory_space<vmem>>, %arg5: memref<1x32xf32, #tpu.memory_space<vmem>>, %arg6: memref<1x32xf32, #tpu.memory_space<vmem>>, %arg7: memref<32x32xbf16, #tpu.memory_space<vmem>>, %arg8: memref<1x32xf32, #tpu.memory_space<vmem>>, %arg9: memref<1x64x32xbf16, #tpu.memory_space<vmem>>, %arg10: memref<64x32xbf16, #tpu.memory_space<vmem>>) attributes {dimension_semantics = [#tpu.dimension_semantics<parallel>, #tpu.dimension_semantics<arbitrary>], iteration_bounds = array<i64: 2, 1>, scalar_prefetch = 0 : i64, scratch_operands = 1 : i64, tpu.core_type = #tpu.core_type<tc>, window_params = [{transform_indices = @transform_0, window_bounds = array<i64: 1, 64, 32>}, {pipeline_mode = #tpu.pipeline_mode<synchronous>, transform_indices = @transform_1, window_bounds = array<i64: 32, 8>}, {pipeline_mode = #tpu.pipeline_mode<synchronous>, transform_indices = @transform_2, window_bounds = array<i64: 8, 32>}, {pipeline_mode = #tpu.pipeline_mode<synchronous>, transform_indices = @transform_3, window_bounds = array<i64: 1, 32>}, {pipeline_mode = #tpu.pipeline_mode<synchronous>, transform_indices = @transform_4, window_bounds = array<i64: 1, 32>}, {transform_indices = @transform_5, window_bounds = array<i64: 32, 32>}, {transform_indices = @transform_6, window_bounds = array<i64: 1, 32>}, {transform_indices = @transform_7, window_bounds = array<i64: 1, 64, 32>}]} {
    %c0_i32 = arith.constant 0 : i32
    %0 = arith.cmpi eq, %arg1, %c0_i32 : i32
    %1 = arith.extui %0 : i1 to i32
    %c0_i32_0 = arith.constant 0 : i32
    %2 = arith.cmpi ne, %1, %c0_i32_0 : i32
    scf.if %2 {
      %c0_9 = arith.constant 0 : index
      %c0_10 = arith.constant 0 : index
      %c0_11 = arith.constant 0 : index
      %13 = vector.load %arg2[%c0_9, %c0_10, %c0_11] : memref<1x64x32xbf16, #tpu.memory_space<vmem>>, vector<1x64x32xbf16>
      %14 = vector.shape_cast %13 : vector<1x64x32xbf16> to vector<64x32xbf16>
      %15 = arith.extf %14 : vector<64x32xbf16> to vector<64x32xf32>
      %c0_12 = arith.constant 0 : index
      %c0_13 = arith.constant 0 : index
      %16 = vector.load %arg3[%c0_12, %c0_13] : memref<32x8xf32, #tpu.memory_space<vmem>>, vector<32x8xf32>
      %cst_14 = arith.constant dense<0.000000e+00> : vector<64x8xf32>
      %17 = tpu.matmul %15, %16, %cst_14 {dimension_numbers = #tpu.dot_dimension_numbers<[1], [0], [0], [1], [0, 0, 1, 1], [], []>} : vector<64x32xf32>, vector<32x8xf32>, vector<64x8xf32> -> vector<64x8xf32>
      %cst_15 = arith.constant dense<0.000000e+00> : vector<8xf32>
      %18 = vector.multi_reduction <add>, %17, %cst_15 [0] : vector<64x8xf32> to vector<8xf32>
      %19 = vector.shape_cast %18 : vector<8xf32> to vector<1x8xf32>
      %cst_16 = arith.constant 3.906250e-03 : f32
      %20 = vector.broadcast %cst_16 : f32 to vector<1x8xf32>
      %21 = arith.mulf %19, %20 : vector<1x8xf32>
      %c0_17 = arith.constant 0 : index
      %c0_18 = arith.constant 0 : index
      %22 = vector.load %arg4[%c0_17, %c0_18] : memref<8x32xf32, #tpu.memory_space<vmem>>, vector<8x32xf32>
      %cst_19 = arith.constant dense<0.000000e+00> : vector<1x32xf32>
      %23 = tpu.matmul %21, %22, %cst_19 {dimension_numbers = #tpu.dot_dimension_numbers<[1], [0], [0], [1], [0, 0, 1, 1], [], []>} : vector<1x8xf32>, vector<8x32xf32>, vector<1x32xf32> -> vector<1x32xf32>
      %24 = vector.broadcast %23 : vector<1x32xf32> to vector<64x32xf32>
      %25 = arith.subf %15, %24 : vector<64x32xf32>
      %26 = arith.mulf %25, %25 : vector<64x32xf32>
      %cst_20 = arith.constant dense<0.000000e+00> : vector<64x8xf32>
      %27 = tpu.matmul %26, %16, %cst_20 {dimension_numbers = #tpu.dot_dimension_numbers<[1], [0], [0], [1], [0, 0, 1, 1], [], []>} : vector<64x32xf32>, vector<32x8xf32>, vector<64x8xf32> -> vector<64x8xf32>
      %cst_21 = arith.constant dense<0.000000e+00> : vector<8xf32>
      %28 = vector.multi_reduction <add>, %27, %cst_21 [0] : vector<64x8xf32> to vector<8xf32>
      %29 = vector.shape_cast %28 : vector<8xf32> to vector<1x8xf32>
      %cst_22 = arith.constant 3.906250e-03 : f32
      %30 = vector.broadcast %cst_22 : f32 to vector<1x8xf32>
      %31 = arith.mulf %29, %30 : vector<1x8xf32>
      %c0_23 = arith.constant 0 : index
      %c0_24 = arith.constant 0 : index
      %32 = vector.load %arg4[%c0_23, %c0_24] : memref<8x32xf32, #tpu.memory_space<vmem>>, vector<8x32xf32>
      %cst_25 = arith.constant dense<0.000000e+00> : vector<1x32xf32>
      %33 = tpu.matmul %31, %32, %cst_25 {dimension_numbers = #tpu.dot_dimension_numbers<[1], [0], [0], [1], [0, 0, 1, 1], [], []>} : vector<1x8xf32>, vector<8x32xf32>, vector<1x32xf32> -> vector<1x32xf32>
      %cst_26 = arith.constant 9.99999997E-7 : f32
      %34 = vector.broadcast %cst_26 : f32 to vector<1x32xf32>
      %35 = arith.addf %33, %34 : vector<1x32xf32>
      %36 = math.rsqrt %35 : vector<1x32xf32>
      %37 = vector.broadcast %36 : vector<1x32xf32> to vector<64x32xf32>
      %38 = arith.mulf %25, %37 : vector<64x32xf32>
      %c0_27 = arith.constant 0 : index
      %c0_28 = arith.constant 0 : index
      %39 = vector.load %arg5[%c0_27, %c0_28] : memref<1x32xf32, #tpu.memory_space<vmem>>, vector<1x32xf32>
      %40 = vector.broadcast %39 : vector<1x32xf32> to vector<64x32xf32>
      %41 = arith.mulf %38, %40 : vector<64x32xf32>
      %c0_29 = arith.constant 0 : index
      %c0_30 = arith.constant 0 : index
      %42 = vector.load %arg6[%c0_29, %c0_30] : memref<1x32xf32, #tpu.memory_space<vmem>>, vector<1x32xf32>
      %43 = vector.broadcast %42 : vector<1x32xf32> to vector<64x32xf32>
      %44 = arith.addf %41, %43 : vector<64x32xf32>
      %45 = arith.truncf %44 : vector<64x32xf32> to vector<64x32xbf16>
      %c0_31 = arith.constant 0 : index
      %c0_32 = arith.constant 0 : index
      %46 = vector.load %arg10[%c0_31, %c0_32] : memref<64x32xbf16, #tpu.memory_space<vmem>>, vector<64x32xbf16>
      tpu.vector_store %arg10[%c0_31, %c0_32], %45 {strides = array<i32>} : memref<64x32xbf16, #tpu.memory_space<vmem>>, vector<64x32xbf16>,
    } else {
    }
    %c0 = arith.constant 0 : index
    %c0_1 = arith.constant 0 : index
    %3 = vector.load %arg10[%c0, %c0_1] : memref<64x32xbf16, #tpu.memory_space<vmem>>, vector<64x32xbf16>
    %c0_2 = arith.constant 0 : index
    %c0_3 = arith.constant 0 : index
    %4 = vector.load %arg7[%c0_2, %c0_3] : memref<32x32xbf16, #tpu.memory_space<vmem>>, vector<32x32xbf16>
    %cst = arith.constant dense<0.000000e+00> : vector<64x32xf32>
    %5 = tpu.matmul %3, %4, %cst {dimension_numbers = #tpu.dot_dimension_numbers<[1], [0], [0], [1], [0, 0, 1, 1], [], []>} : vector<64x32xbf16>, vector<32x32xbf16>, vector<64x32xf32> -> vector<64x32xf32>
    %c0_4 = arith.constant 0 : index
    %c0_5 = arith.constant 0 : index
    %6 = vector.load %arg8[%c0_4, %c0_5] : memref<1x32xf32, #tpu.memory_space<vmem>>, vector<1x32xf32>
    %7 = vector.broadcast %6 : vector<1x32xf32> to vector<64x32xf32>
    %8 = arith.addf %5, %7 : vector<64x32xf32>
    %9 = arith.truncf %8 : vector<64x32xf32> to vector<64x32xbf16>
    %c0_6 = arith.constant 0 : index
    %c0_7 = arith.constant 0 : index
    %c0_8 = arith.constant 0 : index
    %10 = vector.load %arg9[%c0_6, %c0_7, %c0_8] : memref<1x64x32xbf16, #tpu.memory_space<vmem>>, vector<1x64x32xbf16>
    %11 = vector.shape_cast %10 : vector<1x64x32xbf16> to vector<64x32xbf16>
    %12 = vector.shape_cast %9 : vector<64x32xbf16> to vector<1x64x32xbf16>
    tpu.vector_store %arg9[%c0_6, %c0_7, %c0_8], %12 {strides = array<i32>} : memref<1x64x32xbf16, #tpu.memory_space<vmem>>, vector<1x64x32xbf16>,
    return
  }
  func.func @transform_0(%arg0: i32, %arg1: i32) -> (i32, i32, i32) {
    %c0_i32 = arith.constant 0 : i32
    %c0_i32_0 = arith.constant 0 : i32
    %c0_i32_1 = arith.constant 0 : i32
    return %arg0, %c0_i32, %c0_i32_0 : i32, i32, i32
  }
  func.func @transform_1(%arg0: i32, %arg1: i32) -> (i32, i32) {
    %c0_i32 = arith.constant 0 : i32
    %c0_i32_0 = arith.constant 0 : i32
    %c0_i32_1 = arith.constant 0 : i32
    return %c0_i32, %c0_i32_0 : i32, i32
  }
  func.func @transform_2(%arg0: i32, %arg1: i32) -> (i32, i32) {
    %c0_i32 = arith.constant 0 : i32
    %c0_i32_0 = arith.constant 0 : i32
    %c0_i32_1 = arith.constant 0 : i32
    return %c0_i32, %c0_i32_0 : i32, i32
  }
  func.func @transform_3(%arg0: i32, %arg1: i32) -> (i32, i32) {
    %c0_i32 = arith.constant 0 : i32
    %c0_i32_0 = arith.constant 0 : i32
    %c0_i32_1 = arith.constant 0 : i32
    return %c0_i32, %c0_i32_0 : i32, i32
  }
  func.func @transform_4(%arg0: i32, %arg1: i32) -> (i32, i32) {
    %c0_i32 = arith.constant 0 : i32
    %c0_i32_0 = arith.constant 0 : i32
    %c0_i32_1 = arith.constant 0 : i32
    return %c0_i32, %c0_i32_0 : i32, i32
  }
  func.func @transform_5(%arg0: i32, %arg1: i32) -> (i32, i32) {
    %c0_i32 = arith.constant 0 : i32
    %c0_i32_0 = arith.constant 0 : i32
    return %c0_i32, %arg1 : i32, i32
  }
  func.func @transform_6(%arg0: i32, %arg1: i32) -> (i32, i32) {
    %c0_i32 = arith.constant 0 : i32
    %c0_i32_0 = arith.constant 0 : i32
    return %c0_i32, %arg1 : i32, i32
  }
  func.func @transform_7(%arg0: i32, %arg1: i32) -> (i32, i32, i32) {
    %c0_i32 = arith.constant 0 : i32
    %c0_i32_0 = arith.constant 0 : i32
    return %arg0, %c0_i32, %arg1 : i32, i32, i32
  }
}

module attributes {stable_mosaic.version = 11 : i64} {
  func.func @kernel(%arg0: i32, %arg1: i32, %arg2: memref<128x32xbf16, #tpu.memory_space<vmem>>, %arg3: memref<1x32xf32, #tpu.memory_space<vmem>>, %arg4: memref<1x32xf32, #tpu.memory_space<vmem>>, %arg5: memref<32x96xbf16, #tpu.memory_space<vmem>>, %arg6: memref<128x96xbf16, #tpu.memory_space<vmem>>, %arg7: memref<128x32xbf16, #tpu.memory_space<vmem>>) attributes {dimension_semantics = [#tpu.dimension_semantics<parallel>, #tpu.dimension_semantics<arbitrary>], iteration_bounds = array<i64: 1, 1>, scalar_prefetch = 0 : i64, scratch_operands = 1 : i64, tpu.core_type = #tpu.core_type<tc>, window_params = [{transform_indices = @transform_0, window_bounds = array<i64: 128, 32>}, {pipeline_mode = #tpu.pipeline_mode<synchronous>, transform_indices = @transform_1, window_bounds = array<i64: 1, 32>}, {pipeline_mode = #tpu.pipeline_mode<synchronous>, transform_indices = @transform_2, window_bounds = array<i64: 1, 32>}, {transform_indices = @transform_3, window_bounds = array<i64: 32, 96>}, {transform_indices = @transform_4, window_bounds = array<i64: 128, 96>}]} {
    %c0_i32 = arith.constant 0 : i32
    %0 = arith.cmpi eq, %arg1, %c0_i32 : i32
    %1 = arith.extui %0 : i1 to i32
    %c0_i32_0 = arith.constant 0 : i32
    %2 = arith.cmpi ne, %1, %c0_i32_0 : i32
    scf.if %2 {
      %c0_6 = arith.constant 0 : index
      %c0_7 = arith.constant 0 : index
      %8 = vector.load %arg2[%c0_6, %c0_7] : memref<128x32xbf16, #tpu.memory_space<vmem>>, vector<128x32xbf16>
      %9 = arith.extf %8 : vector<128x32xbf16> to vector<128x32xf32>
      %cst_8 = arith.constant dense<0.000000e+00> : vector<128xf32>
      %10 = vector.multi_reduction <add>, %9, %cst_8 [1] : vector<128x32xf32> to vector<128xf32>
      %11 = vector.shape_cast %10 : vector<128xf32> to vector<128x1xf32>
      %cst_9 = arith.constant 3.200000e+01 : f32
      %12 = vector.broadcast %cst_9 : f32 to vector<128x1xf32>
      %13 = arith.divf %11, %12 : vector<128x1xf32>
      %14 = vector.broadcast %13 : vector<128x1xf32> to vector<128x32xf32>
      %15 = arith.subf %9, %14 : vector<128x32xf32>
      %16 = arith.mulf %15, %15 : vector<128x32xf32>
      %cst_10 = arith.constant dense<0.000000e+00> : vector<128xf32>
      %17 = vector.multi_reduction <add>, %16, %cst_10 [1] : vector<128x32xf32> to vector<128xf32>
      %18 = vector.shape_cast %17 : vector<128xf32> to vector<128x1xf32>
      %cst_11 = arith.constant 3.200000e+01 : f32
      %19 = vector.broadcast %cst_11 : f32 to vector<128x1xf32>
      %20 = arith.divf %18, %19 : vector<128x1xf32>
      %cst_12 = arith.constant 9.99999974E-6 : f32
      %21 = vector.broadcast %cst_12 : f32 to vector<128x1xf32>
      %22 = arith.addf %20, %21 : vector<128x1xf32>
      %23 = math.rsqrt %22 : vector<128x1xf32>
      %24 = vector.broadcast %23 : vector<128x1xf32> to vector<128x32xf32>
      %25 = arith.mulf %15, %24 : vector<128x32xf32>
      %c0_13 = arith.constant 0 : index
      %c0_14 = arith.constant 0 : index
      %26 = vector.load %arg3[%c0_13, %c0_14] : memref<1x32xf32, #tpu.memory_space<vmem>>, vector<1x32xf32>
      %27 = vector.broadcast %26 : vector<1x32xf32> to vector<128x32xf32>
      %28 = arith.mulf %25, %27 : vector<128x32xf32>
      %c0_15 = arith.constant 0 : index
      %c0_16 = arith.constant 0 : index
      %29 = vector.load %arg4[%c0_15, %c0_16] : memref<1x32xf32, #tpu.memory_space<vmem>>, vector<1x32xf32>
      %30 = vector.broadcast %29 : vector<1x32xf32> to vector<128x32xf32>
      %31 = arith.addf %28, %30 : vector<128x32xf32>
      %32 = arith.truncf %31 : vector<128x32xf32> to vector<128x32xbf16>
      %c0_17 = arith.constant 0 : index
      %c0_18 = arith.constant 0 : index
      %33 = vector.load %arg7[%c0_17, %c0_18] : memref<128x32xbf16, #tpu.memory_space<vmem>>, vector<128x32xbf16>
      tpu.vector_store %arg7[%c0_17, %c0_18], %32 {strides = array<i32>} : memref<128x32xbf16, #tpu.memory_space<vmem>>, vector<128x32xbf16>,
    } else {
    }
    %c0 = arith.constant 0 : index
    %c0_1 = arith.constant 0 : index
    %3 = vector.load %arg7[%c0, %c0_1] : memref<128x32xbf16, #tpu.memory_space<vmem>>, vector<128x32xbf16>
    %c0_2 = arith.constant 0 : index
    %c0_3 = arith.constant 0 : index
    %4 = vector.load %arg5[%c0_2, %c0_3] : memref<32x96xbf16, #tpu.memory_space<vmem>>, vector<32x96xbf16>
    %cst = arith.constant dense<0.000000e+00> : vector<128x96xf32>
    %5 = tpu.matmul %3, %4, %cst {dimension_numbers = #tpu.dot_dimension_numbers<[1], [0], [0], [1], [0, 0, 1, 1], [], []>} : vector<128x32xbf16>, vector<32x96xbf16>, vector<128x96xf32> -> vector<128x96xf32>
    %6 = arith.truncf %5 : vector<128x96xf32> to vector<128x96xbf16>
    %c0_4 = arith.constant 0 : index
    %c0_5 = arith.constant 0 : index
    %7 = vector.load %arg6[%c0_4, %c0_5] : memref<128x96xbf16, #tpu.memory_space<vmem>>, vector<128x96xbf16>
    tpu.vector_store %arg6[%c0_4, %c0_5], %6 {strides = array<i32>} : memref<128x96xbf16, #tpu.memory_space<vmem>>, vector<128x96xbf16>,
    return
  }
  func.func @transform_0(%arg0: i32, %arg1: i32) -> (i32, i32) {
    %c0_i32 = arith.constant 0 : i32
    %c0_i32_0 = arith.constant 0 : i32
    return %arg0, %c0_i32 : i32, i32
  }
  func.func @transform_1(%arg0: i32, %arg1: i32) -> (i32, i32) {
    %c0_i32 = arith.constant 0 : i32
    %c0_i32_0 = arith.constant 0 : i32
    %c0_i32_1 = arith.constant 0 : i32
    return %c0_i32, %c0_i32_0 : i32, i32
  }
  func.func @transform_2(%arg0: i32, %arg1: i32) -> (i32, i32) {
    %c0_i32 = arith.constant 0 : i32
    %c0_i32_0 = arith.constant 0 : i32
    %c0_i32_1 = arith.constant 0 : i32
    return %c0_i32, %c0_i32_0 : i32, i32
  }
  func.func @transform_3(%arg0: i32, %arg1: i32) -> (i32, i32) {
    %c0_i32 = arith.constant 0 : i32
    %c0_i32_0 = arith.constant 0 : i32
    return %c0_i32, %arg1 : i32, i32
  }
  func.func @transform_4(%arg0: i32, %arg1: i32) -> (i32, i32) {
    %c0_i32 = arith.constant 0 : i32
    return %arg0, %arg1 : i32, i32
  }
}

module attributes {stable_mosaic.version = 11 : i64} {
  func.func @kernel(%arg0: i32, %arg1: memref<1x64x8xbf16, #tpu.memory_space<vmem>>, %arg2: memref<1x64x8xbf16, #tpu.memory_space<vmem>>, %arg3: memref<1x64x8xbf16, #tpu.memory_space<vmem>>, %arg4: memref<1x64x8xbf16, #tpu.memory_space<vmem>>) attributes {dimension_semantics = [#tpu.dimension_semantics<parallel>], iteration_bounds = array<i64: 8>, scalar_prefetch = 0 : i64, scratch_operands = 0 : i64, tpu.core_type = #tpu.core_type<tc>, window_params = [{transform_indices = @transform_0, window_bounds = array<i64: 1, 64, 8>}, {transform_indices = @transform_1, window_bounds = array<i64: 1, 64, 8>}, {transform_indices = @transform_2, window_bounds = array<i64: 1, 64, 8>}, {transform_indices = @transform_3, window_bounds = array<i64: 1, 64, 8>}]} {
    %c0 = arith.constant 0 : index
    %c0_0 = arith.constant 0 : index
    %c0_1 = arith.constant 0 : index
    %0 = vector.load %arg1[%c0, %c0_0, %c0_1] : memref<1x64x8xbf16, #tpu.memory_space<vmem>>, vector<1x64x8xbf16>
    %1 = vector.shape_cast %0 : vector<1x64x8xbf16> to vector<64x8xbf16>
    %c0_2 = arith.constant 0 : index
    %c0_3 = arith.constant 0 : index
    %c0_4 = arith.constant 0 : index
    %2 = vector.load %arg2[%c0_2, %c0_3, %c0_4] : memref<1x64x8xbf16, #tpu.memory_space<vmem>>, vector<1x64x8xbf16>
    %3 = vector.shape_cast %2 : vector<1x64x8xbf16> to vector<64x8xbf16>
    %c0_5 = arith.constant 0 : index
    %c0_6 = arith.constant 0 : index
    %c0_7 = arith.constant 0 : index
    %4 = vector.load %arg3[%c0_5, %c0_6, %c0_7] : memref<1x64x8xbf16, #tpu.memory_space<vmem>>, vector<1x64x8xbf16>
    %5 = vector.shape_cast %4 : vector<1x64x8xbf16> to vector<64x8xbf16>
    %cst = arith.constant dense<0.000000e+00> : vector<64x64xf32>
    %6 = tpu.matmul %1, %3, %cst {dimension_numbers = #tpu.dot_dimension_numbers<[1], [1], [0], [0], [0, 0, 1, 0], [], []>} : vector<64x8xbf16>, vector<64x8xbf16>, vector<64x64xf32> -> vector<64x64xf32>
    %cst_8 = arith.constant 0.353553385 : f32
    %7 = vector.broadcast %cst_8 : f32 to vector<64x64xf32>
    %8 = arith.mulf %6, %7 : vector<64x64xf32>
    %cst_9 = arith.constant dense<0xFF800000> : vector<64xf32>
    %9 = vector.multi_reduction <maximumf>, %8, %cst_9 [1] : vector<64x64xf32> to vector<64xf32>
    %10 = vector.shape_cast %9 : vector<64xf32> to vector<64x1xf32>
    %11 = vector.broadcast %10 : vector<64x1xf32> to vector<64x64xf32>
    %12 = arith.subf %8, %11 : vector<64x64xf32>
    %13 = math.exp %12 : vector<64x64xf32>
    %cst_10 = arith.constant dense<0.000000e+00> : vector<64xf32>
    %14 = vector.multi_reduction <add>, %13, %cst_10 [1] : vector<64x64xf32> to vector<64xf32>
    %15 = vector.shape_cast %14 : vector<64xf32> to vector<64x1xf32>
    %16 = tpu.reciprocal %15 {approx = true} : vector<64x1xf32> -> vector<64x1xf32>
    %17 = vector.broadcast %16 : vector<64x1xf32> to vector<64x64xf32>
    %18 = arith.mulf %13, %17 : vector<64x64xf32>
    %19 = arith.truncf %18 : vector<64x64xf32> to vector<64x64xbf16>
    %cst_11 = arith.constant dense<0.000000e+00> : vector<64x8xf32>
    %20 = tpu.matmul %19, %5, %cst_11 {dimension_numbers = #tpu.dot_dimension_numbers<[1], [0], [0], [1], [0, 0, 1, 1], [], []>} : vector<64x64xbf16>, vector<64x8xbf16>, vector<64x8xf32> -> vector<64x8xf32>
    %21 = arith.truncf %20 : vector<64x8xf32> to vector<64x8xbf16>
    %c0_12 = arith.constant 0 : index
    %c0_13 = arith.constant 0 : index
    %c0_14 = arith.constant 0 : index
    %22 = vector.load %arg4[%c0_12, %c0_13, %c0_14] : memref<1x64x8xbf16, #tpu.memory_space<vmem>>, vector<1x64x8xbf16>
    %23 = vector.shape_cast %22 : vector<1x64x8xbf16> to vector<64x8xbf16>
    %24 = vector.shape_cast %21 : vector<64x8xbf16> to vector<1x64x8xbf16>
    tpu.vector_store %arg4[%c0_12, %c0_13, %c0_14], %24 {strides = array<i32>} : memref<1x64x8xbf16, #tpu.memory_space<vmem>>, vector<1x64x8xbf16>,
    return
  }
  func.func @transform_0(%arg0: i32) -> (i32, i32, i32) {
    %c0_i32 = arith.constant 0 : i32
    %c0_i32_0 = arith.constant 0 : i32
    %c0_i32_1 = arith.constant 0 : i32
    return %arg0, %c0_i32, %c0_i32_0 : i32, i32, i32
  }
  func.func @transform_1(%arg0: i32) -> (i32, i32, i32) {
    %c0_i32 = arith.constant 0 : i32
    %c0_i32_0 = arith.constant 0 : i32
    %c0_i32_1 = arith.constant 0 : i32
    return %arg0, %c0_i32, %c0_i32_0 : i32, i32, i32
  }
  func.func @transform_2(%arg0: i32) -> (i32, i32, i32) {
    %c0_i32 = arith.constant 0 : i32
    %c0_i32_0 = arith.constant 0 : i32
    %c0_i32_1 = arith.constant 0 : i32
    return %arg0, %c0_i32, %c0_i32_0 : i32, i32, i32
  }
  func.func @transform_3(%arg0: i32) -> (i32, i32, i32) {
    %c0_i32 = arith.constant 0 : i32
    %c0_i32_0 = arith.constant 0 : i32
    %c0_i32_1 = arith.constant 0 : i32
    return %arg0, %c0_i32, %c0_i32_0 : i32, i32, i32
  }
}

module attributes {stable_mosaic.version = 11 : i64} {
  func.func @kernel(%arg0: i32, %arg1: i32, %arg2: memref<16x32xbf16, #tpu.memory_space<vmem>>, %arg3: memref<32x64xbf16, #tpu.memory_space<vmem>>, %arg4: memref<16x64xbf16, #tpu.memory_space<vmem>>) attributes {dimension_semantics = [#tpu.dimension_semantics<parallel>, #tpu.dimension_semantics<parallel>], iteration_bounds = array<i64: 1, 1>, scalar_prefetch = 0 : i64, scratch_operands = 0 : i64, tpu.core_type = #tpu.core_type<tc>, window_params = [{transform_indices = @transform_0, window_bounds = array<i64: 16, 32>}, {transform_indices = @transform_1, window_bounds = array<i64: 32, 64>}, {transform_indices = @transform_2, window_bounds = array<i64: 16, 64>}]} {
    %c0 = arith.constant 0 : index
    %c0_0 = arith.constant 0 : index
    %0 = vector.load %arg2[%c0, %c0_0] : memref<16x32xbf16, #tpu.memory_space<vmem>>, vector<16x32xbf16>
    %c0_1 = arith.constant 0 : index
    %c0_2 = arith.constant 0 : index
    %1 = vector.load %arg3[%c0_1, %c0_2] : memref<32x64xbf16, #tpu.memory_space<vmem>>, vector<32x64xbf16>
    %cst = arith.constant dense<0.000000e+00> : vector<16x64xf32>
    %2 = tpu.matmul %0, %1, %cst {dimension_numbers = #tpu.dot_dimension_numbers<[1], [0], [0], [1], [0, 0, 1, 1], [], []>} : vector<16x32xbf16>, vector<32x64xbf16>, vector<16x64xf32> -> vector<16x64xf32>
    %3 = arith.truncf %2 : vector<16x64xf32> to vector<16x64xbf16>
    %c0_3 = arith.constant 0 : index
    %c0_4 = arith.constant 0 : index
    %4 = vector.load %arg4[%c0_3, %c0_4] : memref<16x64xbf16, #tpu.memory_space<vmem>>, vector<16x64xbf16>
    tpu.vector_store %arg4[%c0_3, %c0_4], %3 {strides = array<i32>} : memref<16x64xbf16, #tpu.memory_space<vmem>>, vector<16x64xbf16>,
    return
  }
  func.func @transform_0(%arg0: i32, %arg1: i32) -> (i32, i32) {
    %c0_i32 = arith.constant 0 : i32
    %c0_i32_0 = arith.constant 0 : i32
    return %arg0, %c0_i32 : i32, i32
  }
  func.func @transform_1(%arg0: i32, %arg1: i32) -> (i32, i32) {
    %c0_i32 = arith.constant 0 : i32
    %c0_i32_0 = arith.constant 0 : i32
    return %c0_i32, %arg1 : i32, i32
  }
  func.func @transform_2(%arg0: i32, %arg1: i32) -> (i32, i32) {
    %c0_i32 = arith.constant 0 : i32
    return %arg0, %arg1 : i32, i32
  }
}

module attributes {stable_mosaic.version = 11 : i64} {
  func.func @kernel(%arg0: i32, %arg1: i32, %arg2: memref<128x32xbf16, #tpu.memory_space<vmem>>, %arg3: memref<32x32xbf16, #tpu.memory_space<vmem>>, %arg4: memref<1x32xf32, #tpu.memory_space<vmem>>, %arg5: memref<128x32xbf16, #tpu.memory_space<vmem>>, %arg6: memref<128x32xbf16, #tpu.memory_space<vmem>>) attributes {dimension_semantics = [#tpu.dimension_semantics<parallel>, #tpu.dimension_semantics<parallel>], iteration_bounds = array<i64: 1, 1>, scalar_prefetch = 0 : i64, scratch_operands = 0 : i64, tpu.core_type = #tpu.core_type<tc>, window_params = [{transform_indices = @transform_0, window_bounds = array<i64: 128, 32>}, {transform_indices = @transform_1, window_bounds = array<i64: 32, 32>}, {transform_indices = @transform_2, window_bounds = array<i64: 1, 32>}, {transform_indices = @transform_3, window_bounds = array<i64: 128, 32>}, {transform_indices = @transform_4, window_bounds = array<i64: 128, 32>}]} {
    %c0 = arith.constant 0 : index
    %c0_0 = arith.constant 0 : index
    %0 = vector.load %arg2[%c0, %c0_0] : memref<128x32xbf16, #tpu.memory_space<vmem>>, vector<128x32xbf16>
    %c0_1 = arith.constant 0 : index
    %c0_2 = arith.constant 0 : index
    %1 = vector.load %arg3[%c0_1, %c0_2] : memref<32x32xbf16, #tpu.memory_space<vmem>>, vector<32x32xbf16>
    %cst = arith.constant dense<0.000000e+00> : vector<128x32xf32>
    %2 = tpu.matmul %0, %1, %cst {dimension_numbers = #tpu.dot_dimension_numbers<[1], [0], [0], [1], [0, 0, 1, 1], [], []>} : vector<128x32xbf16>, vector<32x32xbf16>, vector<128x32xf32> -> vector<128x32xf32>
    %c0_3 = arith.constant 0 : index
    %c0_4 = arith.constant 0 : index
    %3 = vector.load %arg4[%c0_3, %c0_4] : memref<1x32xf32, #tpu.memory_space<vmem>>, vector<1x32xf32>
    %4 = vector.broadcast %3 : vector<1x32xf32> to vector<128x32xf32>
    %5 = arith.addf %2, %4 : vector<128x32xf32>
    %c0_5 = arith.constant 0 : index
    %c0_6 = arith.constant 0 : index
    %6 = vector.load %arg5[%c0_5, %c0_6] : memref<128x32xbf16, #tpu.memory_space<vmem>>, vector<128x32xbf16>
    %7 = arith.extf %6 : vector<128x32xbf16> to vector<128x32xf32>
    %8 = arith.addf %5, %7 : vector<128x32xf32>
    %9 = arith.truncf %8 : vector<128x32xf32> to vector<128x32xbf16>
    %c0_7 = arith.constant 0 : index
    %c0_8 = arith.constant 0 : index
    %10 = vector.load %arg6[%c0_7, %c0_8] : memref<128x32xbf16, #tpu.memory_space<vmem>>, vector<128x32xbf16>
    tpu.vector_store %arg6[%c0_7, %c0_8], %9 {strides = array<i32>} : memref<128x32xbf16, #tpu.memory_space<vmem>>, vector<128x32xbf16>,
    return
  }
  func.func @transform_0(%arg0: i32, %arg1: i32) -> (i32, i32) {
    %c0_i32 = arith.constant 0 : i32
    %c0_i32_0 = arith.constant 0 : i32
    return %arg0, %c0_i32 : i32, i32
  }
  func.func @transform_1(%arg0: i32, %arg1: i32) -> (i32, i32) {
    %c0_i32 = arith.constant 0 : i32
    %c0_i32_0 = arith.constant 0 : i32
    return %c0_i32, %arg1 : i32, i32
  }
  func.func @transform_2(%arg0: i32, %arg1: i32) -> (i32, i32) {
    %c0_i32 = arith.constant 0 : i32
    %c0_i32_0 = arith.constant 0 : i32
    return %c0_i32, %arg1 : i32, i32
  }
  func.func @transform_3(%arg0: i32, %arg1: i32) -> (i32, i32) {
    %c0_i32 = arith.constant 0 : i32
    return %arg0, %arg1 : i32, i32
  }
  func.func @transform_4(%arg0: i32, %arg1: i32) -> (i32, i32) {
    %c0_i32 = arith.constant 0 : i32
    return %arg0, %arg1 : i32, i32
  }
}

module attributes {stable_mosaic.version = 11 : i64} {
  func.func @kernel(%arg0: i32, %arg1: i32, %arg2: memref<128x32xbf16, #tpu.memory_space<vmem>>, %arg3: memref<1x32xf32, #tpu.memory_space<vmem>>, %arg4: memref<1x32xf32, #tpu.memory_space<vmem>>, %arg5: memref<32x32xbf16, #tpu.memory_space<vmem>>, %arg6: memref<128x32xbf16, #tpu.memory_space<vmem>>, %arg7: memref<128x32xbf16, #tpu.memory_space<vmem>>) attributes {dimension_semantics = [#tpu.dimension_semantics<parallel>, #tpu.dimension_semantics<arbitrary>], iteration_bounds = array<i64: 1, 1>, scalar_prefetch = 0 : i64, scratch_operands = 1 : i64, tpu.core_type = #tpu.core_type<tc>, window_params = [{transform_indices = @transform_0, window_bounds = array<i64: 128, 32>}, {pipeline_mode = #tpu.pipeline_mode<synchronous>, transform_indices = @transform_1, window_bounds = array<i64: 1, 32>}, {pipeline_mode = #tpu.pipeline_mode<synchronous>, transform_indices = @transform_2, window_bounds = array<i64: 1, 32>}, {transform_indices = @transform_3, window_bounds = array<i64: 32, 32>}, {transform_indices = @transform_4, window_bounds = array<i64: 128, 32>}]} {
    %c0_i32 = arith.constant 0 : i32
    %0 = arith.cmpi eq, %arg1, %c0_i32 : i32
    %1 = arith.extui %0 : i1 to i32
    %c0_i32_0 = arith.constant 0 : i32
    %2 = arith.cmpi ne, %1, %c0_i32_0 : i32
    scf.if %2 {
      %c0_6 = arith.constant 0 : index
      %c0_7 = arith.constant 0 : index
      %8 = vector.load %arg2[%c0_6, %c0_7] : memref<128x32xbf16, #tpu.memory_space<vmem>>, vector<128x32xbf16>
      %9 = arith.extf %8 : vector<128x32xbf16> to vector<128x32xf32>
      %cst_8 = arith.constant dense<0.000000e+00> : vector<128xf32>
      %10 = vector.multi_reduction <add>, %9, %cst_8 [1] : vector<128x32xf32> to vector<128xf32>
      %11 = vector.shape_cast %10 : vector<128xf32> to vector<128x1xf32>
      %cst_9 = arith.constant 3.200000e+01 : f32
      %12 = vector.broadcast %cst_9 : f32 to vector<128x1xf32>
      %13 = arith.divf %11, %12 : vector<128x1xf32>
      %14 = vector.broadcast %13 : vector<128x1xf32> to vector<128x32xf32>
      %15 = arith.subf %9, %14 : vector<128x32xf32>
      %16 = arith.mulf %15, %15 : vector<128x32xf32>
      %cst_10 = arith.constant dense<0.000000e+00> : vector<128xf32>
      %17 = vector.multi_reduction <add>, %16, %cst_10 [1] : vector<128x32xf32> to vector<128xf32>
      %18 = vector.shape_cast %17 : vector<128xf32> to vector<128x1xf32>
      %cst_11 = arith.constant 3.200000e+01 : f32
      %19 = vector.broadcast %cst_11 : f32 to vector<128x1xf32>
      %20 = arith.divf %18, %19 : vector<128x1xf32>
      %cst_12 = arith.constant 9.99999974E-6 : f32
      %21 = vector.broadcast %cst_12 : f32 to vector<128x1xf32>
      %22 = arith.addf %20, %21 : vector<128x1xf32>
      %23 = math.rsqrt %22 : vector<128x1xf32>
      %24 = vector.broadcast %23 : vector<128x1xf32> to vector<128x32xf32>
      %25 = arith.mulf %15, %24 : vector<128x32xf32>
      %c0_13 = arith.constant 0 : index
      %c0_14 = arith.constant 0 : index
      %26 = vector.load %arg3[%c0_13, %c0_14] : memref<1x32xf32, #tpu.memory_space<vmem>>, vector<1x32xf32>
      %27 = vector.broadcast %26 : vector<1x32xf32> to vector<128x32xf32>
      %28 = arith.mulf %25, %27 : vector<128x32xf32>
      %c0_15 = arith.constant 0 : index
      %c0_16 = arith.constant 0 : index
      %29 = vector.load %arg4[%c0_15, %c0_16] : memref<1x32xf32, #tpu.memory_space<vmem>>, vector<1x32xf32>
      %30 = vector.broadcast %29 : vector<1x32xf32> to vector<128x32xf32>
      %31 = arith.addf %28, %30 : vector<128x32xf32>
      %32 = arith.truncf %31 : vector<128x32xf32> to vector<128x32xbf16>
      %c0_17 = arith.constant 0 : index
      %c0_18 = arith.constant 0 : index
      %33 = vector.load %arg7[%c0_17, %c0_18] : memref<128x32xbf16, #tpu.memory_space<vmem>>, vector<128x32xbf16>
      tpu.vector_store %arg7[%c0_17, %c0_18], %32 {strides = array<i32>} : memref<128x32xbf16, #tpu.memory_space<vmem>>, vector<128x32xbf16>,
    } else {
    }
    %c0 = arith.constant 0 : index
    %c0_1 = arith.constant 0 : index
    %3 = vector.load %arg7[%c0, %c0_1] : memref<128x32xbf16, #tpu.memory_space<vmem>>, vector<128x32xbf16>
    %c0_2 = arith.constant 0 : index
    %c0_3 = arith.constant 0 : index
    %4 = vector.load %arg5[%c0_2, %c0_3] : memref<32x32xbf16, #tpu.memory_space<vmem>>, vector<32x32xbf16>
    %cst = arith.constant dense<0.000000e+00> : vector<128x32xf32>
    %5 = tpu.matmul %3, %4, %cst {dimension_numbers = #tpu.dot_dimension_numbers<[1], [0], [0], [1], [0, 0, 1, 1], [], []>} : vector<128x32xbf16>, vector<32x32xbf16>, vector<128x32xf32> -> vector<128x32xf32>
    %6 = arith.truncf %5 : vector<128x32xf32> to vector<128x32xbf16>
    %c0_4 = arith.constant 0 : index
    %c0_5 = arith.constant 0 : index
    %7 = vector.load %arg6[%c0_4, %c0_5] : memref<128x32xbf16, #tpu.memory_space<vmem>>, vector<128x32xbf16>
    tpu.vector_store %arg6[%c0_4, %c0_5], %6 {strides = array<i32>} : memref<128x32xbf16, #tpu.memory_space<vmem>>, vector<128x32xbf16>,
    return
  }
  func.func @transform_0(%arg0: i32, %arg1: i32) -> (i32, i32) {
    %c0_i32 = arith.constant 0 : i32
    %c0_i32_0 = arith.constant 0 : i32
    return %arg0, %c0_i32 : i32, i32
  }
  func.func @transform_1(%arg0: i32, %arg1: i32) -> (i32, i32) {
    %c0_i32 = arith.constant 0 : i32
    %c0_i32_0 = arith.constant 0 : i32
    %c0_i32_1 = arith.constant 0 : i32
    return %c0_i32, %c0_i32_0 : i32, i32
  }
  func.func @transform_2(%arg0: i32, %arg1: i32) -> (i32, i32) {
    %c0_i32 = arith.constant 0 : i32
    %c0_i32_0 = arith.constant 0 : i32
    %c0_i32_1 = arith.constant 0 : i32
    return %c0_i32, %c0_i32_0 : i32, i32
  }
  func.func @transform_3(%arg0: i32, %arg1: i32) -> (i32, i32) {
    %c0_i32 = arith.constant 0 : i32
    %c0_i32_0 = arith.constant 0 : i32
    return %c0_i32, %arg1 : i32, i32
  }
  func.func @transform_4(%arg0: i32, %arg1: i32) -> (i32, i32) {
    %c0_i32 = arith.constant 0 : i32
    return %arg0, %arg1 : i32, i32
  }
}

module attributes {stable_mosaic.version = 11 : i64} {
  func.func @kernel(%arg0: i32, %arg1: memref<1x64x8xbf16, #tpu.memory_space<vmem>>, %arg2: memref<1x8x8xbf16, #tpu.memory_space<vmem>>, %arg3: memref<1x8x8xbf16, #tpu.memory_space<vmem>>, %arg4: memref<1x64x8xbf16, #tpu.memory_space<vmem>>) attributes {dimension_semantics = [#tpu.dimension_semantics<parallel>], iteration_bounds = array<i64: 8>, scalar_prefetch = 0 : i64, scratch_operands = 0 : i64, tpu.core_type = #tpu.core_type<tc>, window_params = [{transform_indices = @transform_0, window_bounds = array<i64: 1, 64, 8>}, {transform_indices = @transform_1, window_bounds = array<i64: 1, 8, 8>}, {transform_indices = @transform_2, window_bounds = array<i64: 1, 8, 8>}, {transform_indices = @transform_3, window_bounds = array<i64: 1, 64, 8>}]} {
    %c0 = arith.constant 0 : index
    %c0_0 = arith.constant 0 : index
    %c0_1 = arith.constant 0 : index
    %0 = vector.load %arg1[%c0, %c0_0, %c0_1] : memref<1x64x8xbf16, #tpu.memory_space<vmem>>, vector<1x64x8xbf16>
    %1 = vector.shape_cast %0 : vector<1x64x8xbf16> to vector<64x8xbf16>
    %c0_2 = arith.constant 0 : index
    %c0_3 = arith.constant 0 : index
    %c0_4 = arith.constant 0 : index
    %2 = vector.load %arg2[%c0_2, %c0_3, %c0_4] : memref<1x8x8xbf16, #tpu.memory_space<vmem>>, vector<1x8x8xbf16>
    %3 = vector.shape_cast %2 : vector<1x8x8xbf16> to vector<8x8xbf16>
    %c0_5 = arith.constant 0 : index
    %c0_6 = arith.constant 0 : index
    %c0_7 = arith.constant 0 : index
    %4 = vector.load %arg3[%c0_5, %c0_6, %c0_7] : memref<1x8x8xbf16, #tpu.memory_space<vmem>>, vector<1x8x8xbf16>
    %5 = vector.shape_cast %4 : vector<1x8x8xbf16> to vector<8x8xbf16>
    %cst = arith.constant dense<0.000000e+00> : vector<64x8xf32>
    %6 = tpu.matmul %1, %3, %cst {dimension_numbers = #tpu.dot_dimension_numbers<[1], [1], [0], [0], [0, 0, 1, 0], [], []>} : vector<64x8xbf16>, vector<8x8xbf16>, vector<64x8xf32> -> vector<64x8xf32>
    %cst_8 = arith.constant 0.353553385 : f32
    %7 = vector.broadcast %cst_8 : f32 to vector<64x8xf32>
    %8 = arith.mulf %6, %7 : vector<64x8xf32>
    %cst_9 = arith.constant dense<0xFF800000> : vector<64xf32>
    %9 = vector.multi_reduction <maximumf>, %8, %cst_9 [1] : vector<64x8xf32> to vector<64xf32>
    %10 = vector.shape_cast %9 : vector<64xf32> to vector<64x1xf32>
    %11 = vector.broadcast %10 : vector<64x1xf32> to vector<64x8xf32>
    %12 = arith.subf %8, %11 : vector<64x8xf32>
    %13 = math.exp %12 : vector<64x8xf32>
    %cst_10 = arith.constant dense<0.000000e+00> : vector<64xf32>
    %14 = vector.multi_reduction <add>, %13, %cst_10 [1] : vector<64x8xf32> to vector<64xf32>
    %15 = vector.shape_cast %14 : vector<64xf32> to vector<64x1xf32>
    %16 = tpu.reciprocal %15 {approx = true} : vector<64x1xf32> -> vector<64x1xf32>
    %17 = vector.broadcast %16 : vector<64x1xf32> to vector<64x8xf32>
    %18 = arith.mulf %13, %17 : vector<64x8xf32>
    %19 = arith.truncf %18 : vector<64x8xf32> to vector<64x8xbf16>
    %cst_11 = arith.constant dense<0.000000e+00> : vector<64x8xf32>
    %20 = tpu.matmul %19, %5, %cst_11 {dimension_numbers = #tpu.dot_dimension_numbers<[1], [0], [0], [1], [0, 0, 1, 1], [], []>} : vector<64x8xbf16>, vector<8x8xbf16>, vector<64x8xf32> -> vector<64x8xf32>
    %21 = arith.truncf %20 : vector<64x8xf32> to vector<64x8xbf16>
    %c0_12 = arith.constant 0 : index
    %c0_13 = arith.constant 0 : index
    %c0_14 = arith.constant 0 : index
    %22 = vector.load %arg4[%c0_12, %c0_13, %c0_14] : memref<1x64x8xbf16, #tpu.memory_space<vmem>>, vector<1x64x8xbf16>
    %23 = vector.shape_cast %22 : vector<1x64x8xbf16> to vector<64x8xbf16>
    %24 = vector.shape_cast %21 : vector<64x8xbf16> to vector<1x64x8xbf16>
    tpu.vector_store %arg4[%c0_12, %c0_13, %c0_14], %24 {strides = array<i32>} : memref<1x64x8xbf16, #tpu.memory_space<vmem>>, vector<1x64x8xbf16>,
    return
  }
  func.func @transform_0(%arg0: i32) -> (i32, i32, i32) {
    %c0_i32 = arith.constant 0 : i32
    %c0_i32_0 = arith.constant 0 : i32
    %c0_i32_1 = arith.constant 0 : i32
    return %arg0, %c0_i32, %c0_i32_0 : i32, i32, i32
  }
  func.func @transform_1(%arg0: i32) -> (i32, i32, i32) {
    %c0_i32 = arith.constant 0 : i32
    %c0_i32_0 = arith.constant 0 : i32
    %c0_i32_1 = arith.constant 0 : i32
    return %arg0, %c0_i32, %c0_i32_0 : i32, i32, i32
  }
  func.func @transform_2(%arg0: i32) -> (i32, i32, i32) {
    %c0_i32 = arith.constant 0 : i32
    %c0_i32_0 = arith.constant 0 : i32
    %c0_i32_1 = arith.constant 0 : i32
    return %arg0, %c0_i32, %c0_i32_0 : i32, i32, i32
  }
  func.func @transform_3(%arg0: i32) -> (i32, i32, i32) {
    %c0_i32 = arith.constant 0 : i32
    %c0_i32_0 = arith.constant 0 : i32
    %c0_i32_1 = arith.constant 0 : i32
    return %arg0, %c0_i32, %c0_i32_0 : i32, i32, i32
  }
}

module attributes {stable_mosaic.version = 11 : i64} {
  func.func @kernel(%arg0: i32, %arg1: i32, %arg2: memref<128x32xbf16, #tpu.memory_space<vmem>>, %arg3: memref<1x32xf32, #tpu.memory_space<vmem>>, %arg4: memref<1x32xf32, #tpu.memory_space<vmem>>, %arg5: memref<32x128xbf16, #tpu.memory_space<vmem>>, %arg6: memref<32x128xbf16, #tpu.memory_space<vmem>>, %arg7: memref<1x128xf32, #tpu.memory_space<vmem>>, %arg8: memref<1x128xf32, #tpu.memory_space<vmem>>, %arg9: memref<128x128xbf16, #tpu.memory_space<vmem>>, %arg10: memref<128x32xbf16, #tpu.memory_space<vmem>>) attributes {dimension_semantics = [#tpu.dimension_semantics<parallel>, #tpu.dimension_semantics<arbitrary>], iteration_bounds = array<i64: 1, 1>, scalar_prefetch = 0 : i64, scratch_operands = 1 : i64, tpu.core_type = #tpu.core_type<tc>, window_params = [{transform_indices = @transform_0, window_bounds = array<i64: 128, 32>}, {pipeline_mode = #tpu.pipeline_mode<synchronous>, transform_indices = @transform_1, window_bounds = array<i64: 1, 32>}, {pipeline_mode = #tpu.pipeline_mode<synchronous>, transform_indices = @transform_2, window_bounds = array<i64: 1, 32>}, {transform_indices = @transform_3, window_bounds = array<i64: 32, 128>}, {transform_indices = @transform_4, window_bounds = array<i64: 32, 128>}, {transform_indices = @transform_5, window_bounds = array<i64: 1, 128>}, {transform_indices = @transform_6, window_bounds = array<i64: 1, 128>}, {transform_indices = @transform_7, window_bounds = array<i64: 128, 128>}]} {
    %c0_i32 = arith.constant 0 : i32
    %0 = arith.cmpi eq, %arg1, %c0_i32 : i32
    %1 = arith.extui %0 : i1 to i32
    %c0_i32_0 = arith.constant 0 : i32
    %2 = arith.cmpi ne, %1, %c0_i32_0 : i32
    scf.if %2 {
      %c0_28 = arith.constant 0 : index
      %c0_29 = arith.constant 0 : index
      %57 = vector.load %arg2[%c0_28, %c0_29] : memref<128x32xbf16, #tpu.memory_space<vmem>>, vector<128x32xbf16>
      %58 = arith.extf %57 : vector<128x32xbf16> to vector<128x32xf32>
      %cst_30 = arith.constant dense<0.000000e+00> : vector<128xf32>
      %59 = vector.multi_reduction <add>, %58, %cst_30 [1] : vector<128x32xf32> to vector<128xf32>
      %60 = vector.shape_cast %59 : vector<128xf32> to vector<128x1xf32>
      %cst_31 = arith.constant 3.200000e+01 : f32
      %61 = vector.broadcast %cst_31 : f32 to vector<128x1xf32>
      %62 = arith.divf %60, %61 : vector<128x1xf32>
      %63 = vector.broadcast %62 : vector<128x1xf32> to vector<128x32xf32>
      %64 = arith.subf %58, %63 : vector<128x32xf32>
      %65 = arith.mulf %64, %64 : vector<128x32xf32>
      %cst_32 = arith.constant dense<0.000000e+00> : vector<128xf32>
      %66 = vector.multi_reduction <add>, %65, %cst_32 [1] : vector<128x32xf32> to vector<128xf32>
      %67 = vector.shape_cast %66 : vector<128xf32> to vector<128x1xf32>
      %cst_33 = arith.constant 3.200000e+01 : f32
      %68 = vector.broadcast %cst_33 : f32 to vector<128x1xf32>
      %69 = arith.divf %67, %68 : vector<128x1xf32>
      %cst_34 = arith.constant 9.99999974E-6 : f32
      %70 = vector.broadcast %cst_34 : f32 to vector<128x1xf32>
      %71 = arith.addf %69, %70 : vector<128x1xf32>
      %72 = math.rsqrt %71 : vector<128x1xf32>
      %73 = vector.broadcast %72 : vector<128x1xf32> to vector<128x32xf32>
      %74 = arith.mulf %64, %73 : vector<128x32xf32>
      %c0_35 = arith.constant 0 : index
      %c0_36 = arith.constant 0 : index
      %75 = vector.load %arg3[%c0_35, %c0_36] : memref<1x32xf32, #tpu.memory_space<vmem>>, vector<1x32xf32>
      %76 = vector.broadcast %75 : vector<1x32xf32> to vector<128x32xf32>
      %77 = arith.mulf %74, %76 : vector<128x32xf32>
      %c0_37 = arith.constant 0 : index
      %c0_38 = arith.constant 0 : index
      %78 = vector.load %arg4[%c0_37, %c0_38] : memref<1x32xf32, #tpu.memory_space<vmem>>, vector<1x32xf32>
      %79 = vector.broadcast %78 : vector<1x32xf32> to vector<128x32xf32>
      %80 = arith.addf %77, %79 : vector<128x32xf32>
      %81 = arith.truncf %80 : vector<128x32xf32> to vector<128x32xbf16>
      %c0_39 = arith.constant 0 : index
      %c0_40 = arith.constant 0 : index
      %82 = vector.load %arg10[%c0_39, %c0_40] : memref<128x32xbf16, #tpu.memory_space<vmem>>, vector<128x32xbf16>
      tpu.vector_store %arg10[%c0_39, %c0_40], %81 {strides = array<i32>} : memref<128x32xbf16, #tpu.memory_space<vmem>>, vector<128x32xbf16>,
    } else {
    }
    %c0 = arith.constant 0 : index
    %c0_1 = arith.constant 0 : index
    %3 = vector.load %arg10[%c0, %c0_1] : memref<128x32xbf16, #tpu.memory_space<vmem>>, vector<128x32xbf16>
    %c0_2 = arith.constant 0 : index
    %c0_3 = arith.constant 0 : index
    %4 = vector.load %arg5[%c0_2, %c0_3] : memref<32x128xbf16, #tpu.memory_space<vmem>>, vector<32x128xbf16>
    %cst = arith.constant dense<0.000000e+00> : vector<128x128xf32>
    %5 = tpu.matmul %3, %4, %cst {dimension_numbers = #tpu.dot_dimension_numbers<[1], [0], [0], [1], [0, 0, 1, 1], [], []>} : vector<128x32xbf16>, vector<32x128xbf16>, vector<128x128xf32> -> vector<128x128xf32>
    %c0_4 = arith.constant 0 : index
    %c0_5 = arith.constant 0 : index
    %6 = vector.load %arg7[%c0_4, %c0_5] : memref<1x128xf32, #tpu.memory_space<vmem>>, vector<1x128xf32>
    %7 = vector.broadcast %6 : vector<1x128xf32> to vector<128x128xf32>
    %8 = arith.addf %5, %7 : vector<128x128xf32>
    %c0_6 = arith.constant 0 : index
    %c0_7 = arith.constant 0 : index
    %9 = vector.load %arg6[%c0_6, %c0_7] : memref<32x128xbf16, #tpu.memory_space<vmem>>, vector<32x128xbf16>
    %cst_8 = arith.constant dense<0.000000e+00> : vector<128x128xf32>
    %10 = tpu.matmul %3, %9, %cst_8 {dimension_numbers = #tpu.dot_dimension_numbers<[1], [0], [0], [1], [0, 0, 1, 1], [], []>} : vector<128x32xbf16>, vector<32x128xbf16>, vector<128x128xf32> -> vector<128x128xf32>
    %c0_9 = arith.constant 0 : index
    %c0_10 = arith.constant 0 : index
    %11 = vector.load %arg8[%c0_9, %c0_10] : memref<1x128xf32, #tpu.memory_space<vmem>>, vector<1x128xf32>
    %12 = vector.broadcast %11 : vector<1x128xf32> to vector<128x128xf32>
    %13 = arith.addf %10, %12 : vector<128x128xf32>
    %cst_11 = arith.constant 5.000000e-01 : f32
    %14 = vector.broadcast %cst_11 : f32 to vector<128x128xf32>
    %15 = arith.mulf %13, %14 : vector<128x128xf32>
    %cst_12 = arith.constant 0.707106769 : f32
    %16 = vector.broadcast %cst_12 : f32 to vector<128x128xf32>
    %17 = arith.mulf %13, %16 : vector<128x128xf32>
    %18 = math.absf %17 : vector<128x128xf32>
    %cst_13 = arith.constant 0.327591091 : f32
    %19 = vector.broadcast %cst_13 : f32 to vector<128x128xf32>
    %20 = arith.mulf %19, %18 : vector<128x128xf32>
    %cst_14 = arith.constant 1.000000e+00 : f32
    %21 = vector.broadcast %cst_14 : f32 to vector<128x128xf32>
    %22 = arith.addf %21, %20 : vector<128x128xf32>
    %cst_15 = arith.constant 1.000000e+00 : f32
    %23 = vector.broadcast %cst_15 : f32 to vector<128x128xf32>
    %24 = arith.divf %23, %22 : vector<128x128xf32>
    %cst_16 = arith.constant 1.06140542 : f32
    %25 = vector.broadcast %cst_16 : f32 to vector<128x128xf32>
    %26 = arith.mulf %24, %25 : vector<128x128xf32>
    %cst_17 = arith.constant -1.45315206 : f32
    %27 = vector.broadcast %cst_17 : f32 to vector<128x128xf32>
    %28 = arith.addf %27, %26 : vector<128x128xf32>
    %29 = arith.mulf %24, %28 : vector<128x128xf32>
    %cst_18 = arith.constant 1.42141378 : f32
    %30 = vector.broadcast %cst_18 : f32 to vector<128x128xf32>
    %31 = arith.addf %30, %29 : vector<128x128xf32>
    %32 = arith.mulf %24, %31 : vector<128x128xf32>
    %cst_19 = arith.constant -0.284496725 : f32
    %33 = vector.broadcast %cst_19 : f32 to vector<128x128xf32>
    %34 = arith.addf %33, %32 : vector<128x128xf32>
    %35 = arith.mulf %24, %34 : vector<128x128xf32>
    %cst_20 = arith.constant 0.254829586 : f32
    %36 = vector.broadcast %cst_20 : f32 to vector<128x128xf32>
    %37 = arith.addf %36, %35 : vector<128x128xf32>
    %38 = arith.mulf %24, %37 : vector<128x128xf32>
    %cst_21 = arith.constant 0.000000e+00 : f32
    %39 = vector.broadcast %cst_21 : f32 to vector<128x128xf32>
    %40 = arith.subf %39, %18 : vector<128x128xf32>
    %41 = arith.mulf %40, %18 : vector<128x128xf32>
    %42 = math.exp %41 : vector<128x128xf32>
    %43 = arith.mulf %38, %42 : vector<128x128xf32>
    %cst_22 = arith.constant 1.000000e+00 : f32
    %44 = vector.broadcast %cst_22 : f32 to vector<128x128xf32>
    %45 = arith.subf %44, %43 : vector<128x128xf32>
    %cst_23 = arith.constant 0.000000e+00 : f32
    %46 = vector.broadcast %cst_23 : f32 to vector<128x128xf32>
    %47 = arith.cmpf oge, %17, %46 : vector<128x128xf32>
    %cst_24 = arith.constant 0.000000e+00 : f32
    %48 = vector.broadcast %cst_24 : f32 to vector<128x128xf32>
    %49 = arith.subf %48, %45 : vector<128x128xf32>
    %50 = arith.select %47, %45, %49 : vector<128x128xi1>, vector<128x128xf32>
    %cst_25 = arith.constant 1.000000e+00 : f32
    %51 = vector.broadcast %cst_25 : f32 to vector<128x128xf32>
    %52 = arith.addf %51, %50 : vector<128x128xf32>
    %53 = arith.mulf %15, %52 : vector<128x128xf32>
    %54 = arith.mulf %8, %53 : vector<128x128xf32>
    %55 = arith.truncf %54 : vector<128x128xf32> to vector<128x128xbf16>
    %c0_26 = arith.constant 0 : index
    %c0_27 = arith.constant 0 : index
    %56 = vector.load %arg9[%c0_26, %c0_27] : memref<128x128xbf16, #tpu.memory_space<vmem>>, vector<128x128xbf16>
    tpu.vector_store %arg9[%c0_26, %c0_27], %55 {strides = array<i32>} : memref<128x128xbf16, #tpu.memory_space<vmem>>, vector<128x128xbf16>,
    return
  }
  func.func @transform_0(%arg0: i32, %arg1: i32) -> (i32, i32) {
    %c0_i32 = arith.constant 0 : i32
    %c0_i32_0 = arith.constant 0 : i32
    return %arg0, %c0_i32 : i32, i32
  }
  func.func @transform_1(%arg0: i32, %arg1: i32) -> (i32, i32) {
    %c0_i32 = arith.constant 0 : i32
    %c0_i32_0 = arith.constant 0 : i32
    %c0_i32_1 = arith.constant 0 : i32
    return %c0_i32, %c0_i32_0 : i32, i32
  }
  func.func @transform_2(%arg0: i32, %arg1: i32) -> (i32, i32) {
    %c0_i32 = arith.constant 0 : i32
    %c0_i32_0 = arith.constant 0 : i32
    %c0_i32_1 = arith.constant 0 : i32
    return %c0_i32, %c0_i32_0 : i32, i32
  }
  func.func @transform_3(%arg0: i32, %arg1: i32) -> (i32, i32) {
    %c0_i32 = arith.constant 0 : i32
    %c0_i32_0 = arith.constant 0 : i32
    return %c0_i32, %arg1 : i32, i32
  }
  func.func @transform_4(%arg0: i32, %arg1: i32) -> (i32, i32) {
    %c0_i32 = arith.constant 0 : i32
    %c0_i32_0 = arith.constant 0 : i32
    return %c0_i32, %arg1 : i32, i32
  }
  func.func @transform_5(%arg0: i32, %arg1: i32) -> (i32, i32) {
    %c0_i32 = arith.constant 0 : i32
    %c0_i32_0 = arith.constant 0 : i32
    return %c0_i32, %arg1 : i32, i32
  }
  func.func @transform_6(%arg0: i32, %arg1: i32) -> (i32, i32) {
    %c0_i32 = arith.constant 0 : i32
    %c0_i32_0 = arith.constant 0 : i32
    return %c0_i32, %arg1 : i32, i32
  }
  func.func @transform_7(%arg0: i32, %arg1: i32) -> (i32, i32) {
    %c0_i32 = arith.constant 0 : i32
    return %arg0, %arg1 : i32, i32
  }
}

module attributes {stable_mosaic.version = 11 : i64} {
  func.func @kernel(%arg0: i32, %arg1: i32, %arg2: memref<128x128xbf16, #tpu.memory_space<vmem>>, %arg3: memref<128x32xbf16, #tpu.memory_space<vmem>>, %arg4: memref<1x32xf32, #tpu.memory_space<vmem>>, %arg5: memref<128x32xbf16, #tpu.memory_space<vmem>>, %arg6: memref<128x32xbf16, #tpu.memory_space<vmem>>) attributes {dimension_semantics = [#tpu.dimension_semantics<parallel>, #tpu.dimension_semantics<parallel>], iteration_bounds = array<i64: 1, 1>, scalar_prefetch = 0 : i64, scratch_operands = 0 : i64, tpu.core_type = #tpu.core_type<tc>, window_params = [{transform_indices = @transform_0, window_bounds = array<i64: 128, 128>}, {transform_indices = @transform_1, window_bounds = array<i64: 128, 32>}, {transform_indices = @transform_2, window_bounds = array<i64: 1, 32>}, {transform_indices = @transform_3, window_bounds = array<i64: 128, 32>}, {transform_indices = @transform_4, window_bounds = array<i64: 128, 32>}]} {
    %c0 = arith.constant 0 : index
    %c0_0 = arith.constant 0 : index
    %0 = vector.load %arg2[%c0, %c0_0] : memref<128x128xbf16, #tpu.memory_space<vmem>>, vector<128x128xbf16>
    %c0_1 = arith.constant 0 : index
    %c0_2 = arith.constant 0 : index
    %1 = vector.load %arg3[%c0_1, %c0_2] : memref<128x32xbf16, #tpu.memory_space<vmem>>, vector<128x32xbf16>
    %cst = arith.constant dense<0.000000e+00> : vector<128x32xf32>
    %2 = tpu.matmul %0, %1, %cst {dimension_numbers = #tpu.dot_dimension_numbers<[1], [0], [0], [1], [0, 0, 1, 1], [], []>} : vector<128x128xbf16>, vector<128x32xbf16>, vector<128x32xf32> -> vector<128x32xf32>
    %c0_3 = arith.constant 0 : index
    %c0_4 = arith.constant 0 : index
    %3 = vector.load %arg4[%c0_3, %c0_4] : memref<1x32xf32, #tpu.memory_space<vmem>>, vector<1x32xf32>
    %4 = vector.broadcast %3 : vector<1x32xf32> to vector<128x32xf32>
    %5 = arith.addf %2, %4 : vector<128x32xf32>
    %c0_5 = arith.constant 0 : index
    %c0_6 = arith.constant 0 : index
    %6 = vector.load %arg5[%c0_5, %c0_6] : memref<128x32xbf16, #tpu.memory_space<vmem>>, vector<128x32xbf16>
    %7 = arith.extf %6 : vector<128x32xbf16> to vector<128x32xf32>
    %8 = arith.addf %5, %7 : vector<128x32xf32>
    %9 = arith.truncf %8 : vector<128x32xf32> to vector<128x32xbf16>
    %c0_7 = arith.constant 0 : index
    %c0_8 = arith.constant 0 : index
    %10 = vector.load %arg6[%c0_7, %c0_8] : memref<128x32xbf16, #tpu.memory_space<vmem>>, vector<128x32xbf16>
    tpu.vector_store %arg6[%c0_7, %c0_8], %9 {strides = array<i32>} : memref<128x32xbf16, #tpu.memory_space<vmem>>, vector<128x32xbf16>,
    return
  }
  func.func @transform_0(%arg0: i32, %arg1: i32) -> (i32, i32) {
    %c0_i32 = arith.constant 0 : i32
    %c0_i32_0 = arith.constant 0 : i32
    return %arg0, %c0_i32 : i32, i32
  }
  func.func @transform_1(%arg0: i32, %arg1: i32) -> (i32, i32) {
    %c0_i32 = arith.constant 0 : i32
    %c0_i32_0 = arith.constant 0 : i32
    return %c0_i32, %arg1 : i32, i32
  }
  func.func @transform_2(%arg0: i32, %arg1: i32) -> (i32, i32) {
    %c0_i32 = arith.constant 0 : i32
    %c0_i32_0 = arith.constant 0 : i32
    return %c0_i32, %arg1 : i32, i32
  }
  func.func @transform_3(%arg0: i32, %arg1: i32) -> (i32, i32) {
    %c0_i32 = arith.constant 0 : i32
    return %arg0, %arg1 : i32, i32
  }
  func.func @transform_4(%arg0: i32, %arg1: i32) -> (i32, i32) {
    %c0_i32 = arith.constant 0 : i32
    return %arg0, %arg1 : i32, i32
  }
}

</mosaic_0001>

<bundles_post_ra>
// kernel: unet_mid_block_cross_attn.21
= control target key start
LH: loop header
LB: loop body
LE: loop exit
PB: predicated region body
PF: predicated region fallthrough
CT: control target
= control target key end

     0   :  { %v122_v0 = vmov 0.0   ;;  %vm123_vm0 = vmmov 0   ;;  %vm48_vm1 = vcmask 261120   ;;  %vm92_vm2 = vcmask 254976   ;;  %s159_s1 = inlined_call_operand.vmem [shape: bf16[32,32], index: 1, kind: input, shape index: {}]   ;;  %s160_s0 = inlined_call_operand.vmem [shape: bf16[2,32], index: 0, kind: input, shape index: {}]   ;;  %s161_s2 = inlined_call_operand.vmem [shape: f32[1,32], index: 2, kind: input, shape index: {}]   ;;  %s162_s3 = inlined_call_operand.vmem [shape: f32[2,32], index: 3, kind: output, shape index: {}]  }
   0x1   :  { %106 = vmatprep.subr.bf16.mxu0 %v122_v0  ;;  %v116_v1 = vld [vmem:[%s159_s1] sm:$0xff]   ;;  %110 = vmatprep.mubr.msk.bf16.mxu0 %vm123_vm0, %v122_v0  ;;  %v117_v2 = vld [vmem:[%s159_s1 + $0x8] sm:$0xff]  }
   0x2   :  { %107 = vmatpush3.bf16.msra.mxu0 %v116_v1  ;;  %v15_v3 = vld [vmem:[%s160_s0] sm:$0x1] }
   0x3   :  { %108 = vmatprep.subr.bf16.mxu0 %v122_v0  ;;  %v16_v4 = vunpack.c.l.bf16 %v15_v3  ;;  %v99_v11 = vld [vmem:[%s161_s2] ss:$0 sm:$0xff] }
   0x5   :  { %v98_v5 = vmul.f32 -1.442695, %v16_v4 }
   0x6   :  { %109 = vmatpush3.bf16.msra.mxu0 %v117_v2 }
   0x7   :  { %118 = vpow2.f32 %v98_v5 }
  0x11   :  { %v119_v6 = vpop.eup %118 }
  0x12   :  { %v20_v7 = vadd.f32 1.0, %v119_v6 }
  0x14   :  { %120 = vrcp.f32 %v20_v7 }
  0x1e   :  { %v121_v8 = vpop.eup %120 }
  0x1f   :  { %v23_v9 = vmul.f32 %v121_v8, %v16_v4 }
  0x21   :  { %v24_v10 = vpack.c.bf16 %v23_v9, %v23_v9 }
  0x23   :  { %111 = vmatmul.mubr.msk.bf16.vlgmr.msra.gmra.mrb[0].mxu0 %vm48_vm1, %v24_v10 }
  0xf6   :  { %v86_v12 = vpop.f32.mrb[0].mxu0 }
  0xf7   :  { %v87_v13 = vadd.f32 %v99_v11, %v86_v12  ;;  %v112_v14 = vpop.f32.mrb[1].mxu0 }
  0xf8   :  { %v89_v15 = vpop.f32.mrb[2].mxu0 }
  0xf9   :  { %93 = vst.msk [vmem:[%s162_s3] sm:$0x3] %vm92_vm2, %v87_v13  ;;  %v113_v16 = vpop.f32.mrb[3].mxu0 }

// kernel: unet_mid_block_cross_attn.22
= control target key start
LH: loop header
LB: loop body
LE: loop exit
PB: predicated region body
PF: predicated region fallthrough
CT: control target
= control target key end

     0   :  { %s1239_s18 = smov 0   ;;  %s1241_s19 = smov 0   ;;  %s1417_s0 = inlined_call_operand.vmem [shape: bf16[2,64,32], index: 0, kind: input, shape index: {}]   ;;  %s1418_s1 = inlined_call_operand.vmem [shape: f32[32,8], index: 1, kind: input, shape index: {}]   ;;  %s1419_s2 = inlined_call_operand.vmem [shape: f32[8,32], index: 2, kind: input, shape index: {}]   ;;  %s1420_s3 = inlined_call_operand.vmem [shape: f32[1,32], index: 3, kind: input, shape index: {}]   ;;  %s1421_s4 = inlined_call_operand.vmem [shape: f32[1,32], index: 4, kind: input, shape index: {}]   ;;  %s1422_s5 = inlined_call_operand.vmem [shape: bf16[2,64,32], index: 5, kind: output, shape index: {}]  }
   0x1   :  { %s1243_s20 = smov 0  }
   0x2 LB: > { %s27_s21 = sadd.s32 1, %s1201_s19  ;;  %p957_p0 = scmp.ge.s32.totalorder %s1205_s20, 1  ;;  %s1205_s20 = sphi %s1243_s20, %s15_s20   ;;  %s1201_s19 = sphi %s1241_s19, %s1424_s19   ;;  %s1197_s18 = sphi %s1239_s18, %s1423_s18  }
   0x3   : > { %p29_p1 = scmp.ge.s32.totalorder %s27_s21, 2  ;;  %p201_p2 = scmp.lt.s32.totalorder %s1205_s20, 3 }
   0x5   : > { %s1426_s21 = smov (%p29_p1, %s27_s21), 0  ;;  %p202_p3 = pnand %p957_p0, %p201_p2 }
   0x6   : > { %v261_v0 = vld [vmem:[%s1418_s1] sm:$0xff] (!%p202_p3)  ;;  %v262_v1 = vld [vmem:[%s1418_s1 + $0x8] sm:$0xff] (!%p202_p3)  ;;  %v263_v2 = vld [vmem:[%s1418_s1 + $0x10] sm:$0xff] (!%p202_p3)  ;;  %p232_p4 = scmp.lt.s32.totalorder (!%p202_p3), %s1197_s18, 1  ;;  %vm265_vm0 = vcmask (!%p202_p3), 261120   ;;  %v1207_v19 = vmov (!%p202_p3), 0.0   ;;  %v492_v50 = vlaneseq (!%p202_p3) }
   0x7   : > { %205 = sbr.rel (%p202_p3) target bundleno = 999 (0x3e7), region = 40  ;;  %v1266_v3 = vpack.c.bf16 (!%p202_p3), %v262_v1, %v261_v0  ;;  %v264_v4 = vld [vmem:[%s1418_s1 + $0x18] sm:$0xff] (!%p202_p3)  ;;  %v418_v18 = vld [vmem:[%s1419_s2] sm:$0xff] (!%p202_p3)  ;;  %1077 = vmatprep.subr.mxu1 (!%p202_p3), %v1207_v19  ;;  %vm1208_vm1 = vmmov (!%p202_p3), 0   ;;  %vm395_vm2 = vcmask (!%p202_p3), 64512   ;;  %vm867_vm3 = vcmask (!%p202_p3), 257024  }
   0x8   : > { %v1271_v5 = vpack.c.bf16 (!%p202_p3), %v264_v4, %v263_v2  ;;  %1079 = vmatprep.mubr.msk.f32.mxu1 (!%p202_p3), %vm1208_vm1, %v1207_v19  ;;  %1078 = vmatpush3.msra.mxu1 (!%p202_p3), %v418_v18  ;;  %v1341_v51 = vshrl.u32 (!%p202_p3), %v492_v50, 7 }
   0x9   : > { %1108 = vmatprep.subr.bf16.mxu0 (!%p202_p3), %v1266_v3  ;;  %1116 = vmatprep.subr.bf16.mxu1 (!%p202_p3), %v1266_v3 }
   0xa   : > { %1110 = vmatpush3.bf16.msra.mxu0 (!%p202_p3), %v1266_v3  ;;  %v494_v52 = vsub.s32 (!%p202_p3), 0, %v1341_v51 }
   0xb   : > { %1112 = vmatprep.subr.bf16.mxu0 (!%p202_p3), %v1271_v5 }
   0xe   : > { %s1428_s18 = smov (!%p232_p4, %s1197_s18), 1  ;;  %1114 = vmatpush3.bf16.msra.mxu0 %v1271_v5 }
   0xf   : > { %s1000_s30 = sshll.u32 %s1428_s18, 5  ;;  %1102 = vmatprep.subr.mxu0 %v1207_v19 }
  0x10   : > { %s236_s8 = scalar_lea.vmem %s1417_s0, %s1000_s30  ;;  %s244_s17 = scalar_lea.vmem %s1422_s5, %s1000_s30 }
  0x11   : > { %v1284_v6 = vld [vmem:[%s236_s8] sm:$0xff]   ;;  %v1286_v7 = vld [vmem:[%s236_s8 + $0x8] sm:$0xff]   ;;  %v1295_v11 = vld [vmem:[%s236_s8 + $0x10] sm:$0xff]  }
  0x12   : > { %v1012_v8 = vunpack.c.l.bf16 %v1284_v6  ;;  %v1013_v9 = vunpack.c.h.bf16 %v1284_v6  ;;  %v1016_v10 = vunpack.c.l.bf16 %v1286_v7  ;;  %v1017_v12 = vunpack.c.h.bf16 %v1286_v7  ;;  %v1305_v14 = vld [vmem:[%s236_s8 + $0x18] sm:$0xff]  }
  0x13   : > { %v1020_v13 = vunpack.c.l.bf16 %v1295_v11  ;;  %v1021_v15 = vunpack.c.h.bf16 %v1295_v11  ;;  %v1024_v16 = vunpack.c.l.bf16 %v1305_v14  ;;  %v1025_v17 = vunpack.c.h.bf16 %v1305_v14 }
  0x14   : > { %1065 = vmatprep.mubr.msk.f32.mxu0 %vm265_vm0, %v1012_v8 }
  0x15   : > { %1066 = vmatmul.mubr.msk.f32.vlgmr.msra.gmra.mrb[0].mxu0 %vm265_vm0, %v1013_v9 }
  0x16   : > { %1068 = vmatprep.mubr.msk.f32.mxu0 %vm265_vm0, %v1016_v10  ;;  %1103 = vmatpush3.msra.mxu0 %v418_v18 }
  0x19   : > { %1069 = vmatmul.mubr.msk.f32.gmra.mrb[2].mxu0 %vm265_vm0, %v1017_v12 }
  0x1a   : > { %1071 = vmatprep.mubr.msk.f32.mxu0 %vm265_vm0, %v1020_v13 }
  0x1d   : > { %1072 = vmatmul.mubr.msk.f32.gmra.mrb[4].mxu0 %vm265_vm0, %v1021_v15 }
  0x1e   : > { %1074 = vmatprep.mubr.msk.f32.mxu0 %vm265_vm0, %v1024_v16 }
  0x21   : > { %1075 = vmatmul.mubr.msk.f32.gmra.mrb[6].mxu0 %vm265_vm0, %v1025_v17 }
  0x22   : > { %1104 = vmatprep.mubr.msk.f32.mxu0 %vm1208_vm1, %v1207_v19 }
  0xe8   : > { %v1067_v20 = vpop.f32.mrb[0].mxu0 }
  0xe9   : > { %v397_v21 = vsel %vm395_vm2, %v1067_v20, 0.0  ;;  %v356_v22 = vpop.f32.mrb[1].mxu0 }
  0xea   : > { %v396_v23 = vsel %vm395_vm2, %v356_v22, 0.0 }
  0xeb   : > { %v398_v24 = vadd.f32 %v397_v21, %v396_v23 }
  0xec   : > { %v1070_v25 = vpop.f32.mrb[2].mxu0 }
  0xed   : > { %v366_v26 = vpop.f32.mrb[3].mxu0  ;;  %v401_v29 = vsel %vm395_vm2, %v1070_v25, 0.0 }
  0xee   : > { %v399_v27 = vsel %vm395_vm2, %v366_v26, 0.0 }
  0xef   : > { %v400_v28 = vadd.f32 %v399_v27, %v398_v24 }
  0xf0   : > { %v1073_v30 = vpop.f32.mrb[4].mxu0 }
  0xf1   : > { %v376_v31 = vpop.f32.mrb[5].mxu0  ;;  %v402_v32 = vadd.f32 %v401_v29, %v400_v28  ;;  %v405_v35 = vsel %vm395_vm2, %v1073_v30, 0.0 }
  0xf2   : > { %v403_v33 = vsel %vm395_vm2, %v376_v31, 0.0 }
  0xf3   : > { %v404_v34 = vadd.f32 %v403_v33, %v402_v32 }
  0xf4   : > { %v1076_v36 = vpop.f32.mrb[6].mxu0 }
  0xf5   : > { %v386_v37 = vpop.f32.mrb[7].mxu0  ;;  %v406_v38 = vadd.f32 %v405_v35, %v404_v34  ;;  %v409_v41 = vsel %vm395_vm2, %v1076_v36, 0.0 }
  0xf6   : > { %v407_v39 = vsel %vm395_vm2, %v386_v37, 0.0 }
  0xf7   : > { %v408_v40 = vadd.f32 %v407_v39, %v406_v38 }
  0xf9   : > { %v410_v42 = vadd.f32 %v409_v41, %v408_v40 }
  0xfb   : > { %v411_v43 = vrot.slane %v410_v42, 4 }
  0xfd   : > { %v412_v44 = vadd.f32 %v411_v43, %v410_v42  ;;  %v980_v43 = vld [vmem:[%s1420_s3] ss:$0 sm:$0xff] }
  0xff   : > { %v413_v45 = vrot.slane %v412_v44, 2 }
 0x101   : > { %v414_v46 = vadd.f32 %v413_v45, %v412_v44 }
 0x103   : > { %v415_v47 = vrot.slane %v414_v46, 1 }
 0x105   : > { %v416_v48 = vadd.f32 %v415_v47, %v414_v46 }
 0x107   : > { %v417_v49 = vmul.f32 0.00390625, %v416_v48 }
 0x109   : > { %1080 = vmatmul.mubr.msk.f32.vlgmr.msra.gmra.mrb[0].mxu1 %vm395_vm2, %v417_v49 }
 0x10a   : > { %1118 = vmatpush3.bf16.msra.mxu1 %v1266_v3 }
 0x10b   : > { %1120 = vmatprep.subr.bf16.mxu1 %v1271_v5 }
 0x10e   : > { %1122 = vmatpush3.bf16.msra.mxu1 %v1271_v5 }
 0x1dc   : > { %v488_v53 = vpop.f32.mrb[0].mxu1 }
 0x1dd   : > { %v495_v54 = vrot.slane %v488_v53, %v494_v52  ;;  %v1081_v55 = vpop.f32.mrb[1].mxu1 }
 0x1df   : > { %v496_v56 = vsub.f32 %v1012_v8, %v495_v54  ;;  %v497_v57 = vsub.f32 %v1013_v9, %v495_v54  ;;  %v498_v58 = vsub.f32 %v1016_v10, %v495_v54  ;;  %v499_v61 = vsub.f32 %v1017_v12, %v495_v54 }
 0x1e0   : > { %v500_v63 = vsub.f32 %v1020_v13, %v495_v54  ;;  %v501_v1 = vsub.f32 %v1021_v15, %v495_v54  ;;  %v502_v3 = vsub.f32 %v1024_v16, %v495_v54  ;;  %v503_v5 = vsub.f32 %v1025_v17, %v495_v54  ;;  %v981_v54 = vld [vmem:[%s1421_s4] ss:$0 sm:$0xff] }
 0x1e1   : > { %v504_v59 = vmul.f32 %v496_v56, %v496_v56  ;;  %v505_v60 = vmul.f32 %v497_v57, %v497_v57  ;;  %v506_v62 = vmul.f32 %v498_v58, %v498_v58  ;;  %v507_v0 = vmul.f32 %v499_v61, %v499_v61 }
 0x1e2   : > { %v508_v2 = vmul.f32 %v500_v63, %v500_v63  ;;  %v509_v4 = vmul.f32 %v501_v1, %v501_v1  ;;  %v510_v6 = vmul.f32 %v502_v3, %v502_v3  ;;  %v511_v7 = vmul.f32 %v503_v5, %v503_v5 }
 0x1e3   : > { %1090 = vmatprep.mubr.msk.f32.mxu1 %vm265_vm0, %v504_v59 }
 0x1e4   : > { %1091 = vmatmul.mubr.msk.f32.vlgmr.msra.gmra.mrb[2].mxu1 %vm265_vm0, %v505_v60 }
 0x1e5   : > { %1093 = vmatprep.mubr.msk.f32.mxu1 %vm265_vm0, %v506_v62 }
 0x1e8   : > { %1094 = vmatmul.mubr.msk.f32.gmra.mrb[4].mxu1 %vm265_vm0, %v507_v0 }
 0x1e9   : > { %1096 = vmatprep.mubr.msk.f32.mxu1 %vm265_vm0, %v508_v2 }
 0x1ec   : > { %1097 = vmatmul.mubr.msk.f32.gmra.mrb[6].mxu1 %vm265_vm0, %v509_v4 }
 0x1ed   : > { %1099 = vmatprep.mubr.msk.f32.mxu1 %vm265_vm0, %v510_v6 }
 0x1f0   : > { %1100 = vmatmul.mubr.msk.f32.gmra.mrb[8].mxu1 %vm265_vm0, %v511_v7 }
 0x2b7   : > { %v1092_v8 = vpop.f32.mrb[2].mxu1 }
 0x2b8   : > { %v642_v9 = vsel %vm395_vm2, %v1092_v8, 0.0  ;;  %v602_v10 = vpop.f32.mrb[3].mxu1 }
 0x2b9   : > { %v641_v11 = vsel %vm395_vm2, %v602_v10, 0.0 }
 0x2ba   : > { %v643_v12 = vadd.f32 %v642_v9, %v641_v11 }
 0x2bb   : > { %v1095_v13 = vpop.f32.mrb[4].mxu1 }
 0x2bc   : > { %v612_v15 = vpop.f32.mrb[5].mxu1  ;;  %v646_v17 = vsel %vm395_vm2, %v1095_v13, 0.0 }
 0x2bd   : > { %v644_v14 = vsel %vm395_vm2, %v612_v15, 0.0 }
 0x2be   : > { %v645_v16 = vadd.f32 %v644_v14, %v643_v12 }
 0x2bf   : > { %v1098_v18 = vpop.f32.mrb[6].mxu1 }
 0x2c0   : > { %v622_v19 = vpop.f32.mrb[7].mxu1  ;;  %v647_v20 = vadd.f32 %v646_v17, %v645_v16  ;;  %v650_v23 = vsel %vm395_vm2, %v1098_v18, 0.0 }
 0x2c1   : > { %v648_v21 = vsel %vm395_vm2, %v622_v19, 0.0 }
 0x2c2   : > { %v649_v22 = vadd.f32 %v648_v21, %v647_v20 }
 0x2c3   : > { %v1101_v24 = vpop.f32.mrb[8].mxu1 }
 0x2c4   : > { %v632_v25 = vpop.f32.mrb[9].mxu1  ;;  %v651_v26 = vadd.f32 %v650_v23, %v649_v22  ;;  %v654_v29 = vsel %vm395_vm2, %v1101_v24, 0.0 }
 0x2c5   : > { %v652_v27 = vsel %vm395_vm2, %v632_v25, 0.0 }
 0x2c6   : > { %v653_v28 = vadd.f32 %v652_v27, %v651_v26 }
 0x2c8   : > { %v655_v30 = vadd.f32 %v654_v29, %v653_v28 }
 0x2ca   : > { %v656_v31 = vrot.slane %v655_v30, 4 }
 0x2cc   : > { %v657_v32 = vadd.f32 %v656_v31, %v655_v30 }
 0x2ce   : > { %v658_v33 = vrot.slane %v657_v32, 2 }
 0x2d0   : > { %v659_v34 = vadd.f32 %v658_v33, %v657_v32 }
 0x2d2   : > { %v660_v35 = vrot.slane %v659_v34, 1 }
 0x2d4   : > { %v661_v36 = vadd.f32 %v660_v35, %v659_v34 }
 0x2d6   : > { %v662_v37 = vmul.f32 0.00390625, %v661_v36 }
 0x2d8   : > { %1105 = vmatmul.mubr.msk.f32.vlgmr.msra.gmra.mrb[8].mxu0 %vm395_vm2, %v662_v37 }
 0x3ab   : > { %v732_v38 = vpop.f32.mrb[8].mxu0 }
 0x3ac   : > { %v733_v39 = vadd.f32 1e-06, %v732_v38  ;;  %v1106_v40 = vpop.f32.mrb[9].mxu0 }
 0x3ae   : > { %1149 = vrsqrt.f32 %v733_v39 }
 0x3b8   : > { %v1150_v41 = vpop.eup %1149 }
 0x3b9   : > { %v740_v42 = vrot.slane %v1150_v41, %v494_v52 }
 0x3bb   : > { %v741_v44 = vmul.f32 %v740_v42, %v496_v56  ;;  %v742_v45 = vmul.f32 %v740_v42, %v497_v57  ;;  %v743_v46 = vmul.f32 %v740_v42, %v498_v58  ;;  %v744_v47 = vmul.f32 %v740_v42, %v499_v61 }
 0x3bc   : > { %v745_v48 = vmul.f32 %v740_v42, %v500_v63  ;;  %v746_v49 = vmul.f32 %v740_v42, %v501_v1  ;;  %v747_v50 = vmul.f32 %v740_v42, %v502_v3  ;;  %v748_v53 = vmul.f32 %v740_v42, %v503_v5 }
 0x3bd   : > { %v756_v55 = vmul.f32 %v980_v43, %v741_v44  ;;  %v757_v59 = vmul.f32 %v980_v43, %v742_v45  ;;  %v758_v51 = vmul.f32 %v980_v43, %v743_v46  ;;  %v759_v52 = vmul.f32 %v980_v43, %v744_v47 }
 0x3be   : > { %v760_v60 = vmul.f32 %v980_v43, %v745_v48  ;;  %v761_v62 = vmul.f32 %v980_v43, %v746_v49  ;;  %v762_v0 = vmul.f32 %v980_v43, %v747_v50  ;;  %v763_v2 = vmul.f32 %v980_v43, %v748_v53 }
 0x3bf   : > { %v771_v56 = vadd.f32 %v981_v54, %v756_v55  ;;  %v772_v57 = vadd.f32 %v981_v54, %v757_v59  ;;  %v773_v58 = vadd.f32 %v981_v54, %v758_v51  ;;  %v774_v61 = vadd.f32 %v981_v54, %v759_v52 }
 0x3c0   : > { %v775_v63 = vadd.f32 %v981_v54, %v760_v60  ;;  %v776_v1 = vadd.f32 %v981_v54, %v761_v62  ;;  %v1387_v3 = vadd.f32 %v981_v54, %v762_v0  ;;  %v1389_v7 = vadd.f32 %v981_v54, %v763_v2 }
 0x3c1   : > { %v982_v4 = vmul.f32 -1.442695, %v771_v56  ;;  %v983_v5 = vmul.f32 -1.442695, %v772_v57  ;;  %v984_v6 = vmul.f32 -1.442695, %v773_v58 }
 0x3c2   : > { %v985_v8 = vmul.f32 -1.442695, %v774_v61  ;;  %v986_v9 = vmul.f32 -1.442695, %v775_v63  ;;  %v987_v10 = vmul.f32 -1.442695, %v776_v1 }
 0x3c3   : > { %1151 = vpow2.f32 %v982_v4  ;;  %v988_v11 = vmul.f32 -1.442695, %v1387_v3  ;;  %v989_v12 = vmul.f32 -1.442695, %v1389_v7 }
 0x3c4   : > { %1153 = vpow2.f32 %v983_v5 }
 0x3c5   : > { %1155 = vpow2.f32 %v984_v6 }
 0x3c6   : > { %1157 = vpow2.f32 %v985_v8 }
 0x3c7   : > { %1159 = vpow2.f32 %v986_v9 }
 0x3c8   : > { %1161 = vpow2.f32 %v987_v10 }
 0x3c9   : > { %1163 = vpow2.f32 %v988_v11 }
 0x3ca   : > { %1165 = vpow2.f32 %v989_v12 }
 0x3cd   : > { %v1152_v13 = vpop.eup %1151 }
 0x3ce   : > { %v1154_v15 = vpop.eup %1153  ;;  %v803_v14 = vadd.f32 1.0, %v1152_v13 }
 0x3cf   : > { %v1156_v16 = vpop.eup %1155  ;;  %v804_v17 = vadd.f32 1.0, %v1154_v15 }
 0x3d0   : > { %v1158_v18 = vpop.eup %1157  ;;  %v805_v19 = vadd.f32 1.0, %v1156_v16  ;;  %1167 = vrcp.f32 %v803_v14 }
 0x3d1   : > { %v1160_v20 = vpop.eup %1159  ;;  %v806_v21 = vadd.f32 1.0, %v1158_v18  ;;  %1169 = vrcp.f32 %v804_v17 }
 0x3d2   : > { %v1162_v22 = vpop.eup %1161  ;;  %v807_v23 = vadd.f32 1.0, %v1160_v20  ;;  %1171 = vrcp.f32 %v805_v19 }
 0x3d3   : > { %v1164_v24 = vpop.eup %1163  ;;  %v808_v25 = vadd.f32 1.0, %v1162_v22  ;;  %1173 = vrcp.f32 %v806_v21 }
 0x3d4   : > { %v1166_v26 = vpop.eup %1165  ;;  %v809_v27 = vadd.f32 1.0, %v1164_v24  ;;  %1175 = vrcp.f32 %v807_v23 }
 0x3d5   : > { %v810_v28 = vadd.f32 1.0, %v1166_v26  ;;  %1177 = vrcp.f32 %v808_v25 }
 0x3d6   : > { %1179 = vrcp.f32 %v809_v27 }
 0x3d7   : > { %1181 = vrcp.f32 %v810_v28 }
 0x3da   : > { %v1168_v29 = vpop.eup %1167 }
 0x3db   : > { %v1170_v30 = vpop.eup %1169  ;;  %v827_v31 = vmul.f32 %v1168_v29, %v771_v56 }
 0x3dc   : > { %v1172_v32 = vpop.eup %1171  ;;  %v828_v33 = vmul.f32 %v1170_v30, %v772_v57 }
 0x3dd   : > { %v1174_v34 = vpop.eup %1173  ;;  %v829_v35 = vmul.f32 %v1172_v32, %v773_v58  ;;  %v1002_v36 = vpack.c.bf16 %v827_v31, %v827_v31 }
 0x3de   : > { %v1176_v37 = vpop.eup %1175  ;;  %v830_v38 = vmul.f32 %v1174_v34, %v774_v61  ;;  %v1003_v39 = vpack.c.bf16 %v828_v33, %v828_v33 }
 0x3df   : > { %v1178_v40 = vpop.eup %1177  ;;  %v831_v41 = vmul.f32 %v1176_v37, %v775_v63  ;;  %v1004_v42 = vpack.c.bf16 %v829_v35, %v829_v35  ;;  %868 = vst.msk [vmem:[%s244_s17] sm:$0xf] %vm867_vm3, %v1002_v36 }
 0x3e0   : > { %v1180_v43 = vpop.eup %1179  ;;  %v832_v44 = vmul.f32 %v1178_v40, %v776_v1  ;;  %v1005_v45 = vpack.c.bf16 %v830_v38, %v830_v38  ;;  %869 = vst.msk [vmem:[%s244_s17 + $0x4] sm:$0xf] %vm867_vm3, %v1003_v39 }
 0x3e1   : > { %v1182_v46 = vpop.eup %1181  ;;  %v833_v47 = vmul.f32 %v1180_v43, %v1387_v3  ;;  %v1006_v48 = vpack.c.bf16 %v831_v41, %v831_v41  ;;  %870 = vst.msk [vmem:[%s244_s17 + $0x8] sm:$0xf] %vm867_vm3, %v1004_v42 }
 0x3e2   : > { %v834_v49 = vmul.f32 %v1182_v46, %v1389_v7  ;;  %v1007_v50 = vpack.c.bf16 %v832_v44, %v832_v44  ;;  %871 = vst.msk [vmem:[%s244_s17 + $0xc] sm:$0xf] %vm867_vm3, %v1005_v45 }
 0x3e3   : > { %v1008_v53 = vpack.c.bf16 %v833_v47, %v833_v47  ;;  %872 = vst.msk [vmem:[%s244_s17 + $0x10] sm:$0xf] %vm867_vm3, %v1006_v48 }
 0x3e4   : > { %v1009_v54 = vpack.c.bf16 %v834_v49, %v834_v49  ;;  %873 = vst.msk [vmem:[%s244_s17 + $0x14] sm:$0xf] %vm867_vm3, %v1007_v50 }
 0x3e5   : > { %874 = vst.msk [vmem:[%s244_s17 + $0x18] sm:$0xf] %vm867_vm3, %v1008_v53 }
 0x3e6   : > { %875 = vst.msk [vmem:[%s244_s17 + $0x1c] sm:$0xf] %vm867_vm3, %v1009_v54 }
 0x3e7 PF: > { %s15_s20 = sadd.s32 1, %s1205_s20   ;;  %s1423_s18 = smov %s1201_s19 }
 0x3e8   : > { %p12_p5 = scmp.ge.s32.totalorder %s15_s20, 4   ;;  %s1424_s19 = smov %s1426_s21 }
 0x3ea   :  { %14 = sbr.rel (!%p12_p5) target bundleno = 2 (0x2), region = 70 }

// kernel: unet_mid_block_cross_attn.24
= control target key start
LH: loop header
LB: loop body
LE: loop exit
PB: predicated region body
PF: predicated region fallthrough
CT: control target
= control target key end

     0   :  { %s1310_s21 = smov 0   ;;  %s1312_s22 = smov 0   ;;  %s1476_s0 = inlined_call_operand.vmem [shape: bf16[2,64,32], index: 0, kind: input, shape index: {}]   ;;  %s1477_s1 = inlined_call_operand.vmem [shape: f32[2,1,32], index: 1, kind: input, shape index: {}]   ;;  %s1478_s2 = inlined_call_operand.vmem [shape: f32[32,8], index: 2, kind: input, shape index: {}]   ;;  %s1479_s3 = inlined_call_operand.vmem [shape: f32[8,32], index: 3, kind: input, shape index: {}]   ;;  %s1480_s4 = inlined_call_operand.vmem [shape: f32[1,32], index: 4, kind: input, shape index: {}]   ;;  %s1481_s5 = inlined_call_operand.vmem [shape: f32[1,32], index: 5, kind: input, shape index: {}]   ;;  %s1482_s6 = inlined_call_operand.vmem [shape: bf16[2,64,32], index: 6, kind: output, shape index: {}]  }
   0x1   :  { %s1314_s23 = smov 0  }
   0x2 LB: > { %s28_s24 = sadd.s32 1, %s1267_s22  ;;  %p1022_p0 = scmp.ge.s32.totalorder %s1271_s23, 1  ;;  %s1271_s23 = sphi %s1314_s23, %s16_s23   ;;  %s1267_s22 = sphi %s1312_s22, %s1484_s22   ;;  %s1263_s21 = sphi %s1310_s21, %s1483_s21  }
   0x3   : > { %p30_p1 = scmp.ge.s32.totalorder %s28_s24, 2  ;;  %p234_p2 = scmp.lt.s32.totalorder %s1271_s23, 3 }
   0x5   : > { %s1486_s24 = smov (%p30_p1, %s28_s24), 0  ;;  %p235_p3 = pnand %p1022_p0, %p234_p2 }
   0x6   : > { %v317_v0 = vld [vmem:[%s1478_s2] sm:$0xff] (!%p235_p3)  ;;  %v318_v1 = vld [vmem:[%s1478_s2 + $0x8] sm:$0xff] (!%p235_p3)  ;;  %v319_v2 = vld [vmem:[%s1478_s2 + $0x10] sm:$0xff] (!%p235_p3)  ;;  %p270_p4 = scmp.lt.s32.totalorder (!%p235_p3), %s1263_s21, 1  ;;  %vm321_vm0 = vcmask (!%p235_p3), 261120   ;;  %v1273_v28 = vmov (!%p235_p3), 0.0   ;;  %v548_v59 = vlaneseq (!%p235_p3) }
   0x7   : > { %238 = sbr.rel (%p235_p3) target bundleno = 1001 (0x3e9), region = 44  ;;  %v1337_v3 = vpack.c.bf16 (!%p235_p3), %v318_v1, %v317_v0  ;;  %v320_v4 = vld [vmem:[%s1478_s2 + $0x18] sm:$0xff] (!%p235_p3)  ;;  %v474_v27 = vld [vmem:[%s1479_s3] sm:$0xff] (!%p235_p3)  ;;  %1143 = vmatprep.subr.mxu1 (!%p235_p3), %v1273_v28  ;;  %vm1274_vm1 = vmmov (!%p235_p3), 0   ;;  %vm451_vm2 = vcmask (!%p235_p3), 64512   ;;  %vm923_vm3 = vcmask (!%p235_p3), 257024  }
   0x8   : > { %v1342_v5 = vpack.c.bf16 (!%p235_p3), %v320_v4, %v319_v2  ;;  %1145 = vmatprep.mubr.msk.f32.mxu1 (!%p235_p3), %vm1274_vm1, %v1273_v28  ;;  %1144 = vmatpush3.msra.mxu1 (!%p235_p3), %v474_v27  ;;  %v1408_v60 = vshrl.u32 (!%p235_p3), %v548_v59, 7 }
   0x9   : > { %1174 = vmatprep.subr.bf16.mxu0 (!%p235_p3), %v1337_v3  ;;  %1182 = vmatprep.subr.bf16.mxu1 (!%p235_p3), %v1337_v3 }
   0xa   : > { %1176 = vmatpush3.bf16.msra.mxu0 (!%p235_p3), %v1337_v3  ;;  %v550_v61 = vsub.s32 (!%p235_p3), 0, %v1408_v60 }
   0xb   : > { %1178 = vmatprep.subr.bf16.mxu0 (!%p235_p3), %v1342_v5 }
   0xe   : > { %s1488_s21 = smov (!%p270_p4, %s1263_s21), 1  ;;  %1180 = vmatpush3.bf16.msra.mxu0 %v1342_v5 }
   0xf   : > { %s1066_s9 = sshll.u32 %s1488_s21, 5  ;;  %s277_s12 = scalar_lea.vmem %s1477_s1, %s1488_s21  ;;  %1168 = vmatprep.subr.mxu0 %v1273_v28 }
  0x10   : > { %s274_s15 = scalar_lea.vmem %s1476_s0, %s1066_s9  ;;  %v1027_v6 = vld [vmem:[%s277_s12] ss:$0 sm:$0xff]  ;;  %s285_s28 = scalar_lea.vmem %s1482_s6, %s1066_s9 }
  0x11   : > { %v1077_v7 = vld [vmem:[%s274_s15] sm:$0xff]   ;;  %v1092_v8 = vld [vmem:[%s274_s15 + $0x8] sm:$0xff]   ;;  %v1093_v9 = vld [vmem:[%s274_s15 + $0x10] sm:$0xff]  }
  0x12   : > { %v1078_v10 = vunpack.c.l.bf16 %v1077_v7  ;;  %v1079_v11 = vunpack.c.h.bf16 %v1077_v7  ;;  %v1082_v12 = vunpack.c.l.bf16 %v1092_v8  ;;  %v1083_v13 = vunpack.c.h.bf16 %v1092_v8  ;;  %v1094_v18 = vld [vmem:[%s274_s15 + $0x18] sm:$0xff]  }
  0x13   : > { %v1086_v17 = vunpack.c.l.bf16 %v1093_v9  ;;  %v1087_v20 = vunpack.c.h.bf16 %v1093_v9  ;;  %v1090_v22 = vunpack.c.l.bf16 %v1094_v18  ;;  %v1091_v24 = vunpack.c.h.bf16 %v1094_v18 }
  0x14   : > { %v1360_v14 = vadd.f32 %v1078_v10, %v1027_v6  ;;  %v1362_v15 = vadd.f32 %v1079_v11, %v1027_v6  ;;  %v1364_v16 = vadd.f32 %v1082_v12, %v1027_v6  ;;  %v1370_v19 = vadd.f32 %v1083_v13, %v1027_v6 }
  0x15   : > { %v1374_v21 = vadd.f32 %v1086_v17, %v1027_v6  ;;  %v1378_v23 = vadd.f32 %v1087_v20, %v1027_v6  ;;  %v1382_v25 = vadd.f32 %v1090_v22, %v1027_v6  ;;  %v1386_v26 = vadd.f32 %v1091_v24, %v1027_v6 }
  0x16   : > { %1131 = vmatprep.mubr.msk.f32.mxu0 %vm321_vm0, %v1360_v14 }
  0x17   : > { %1132 = vmatmul.mubr.msk.f32.vlgmr.msra.gmra.mrb[0].mxu0 %vm321_vm0, %v1362_v15 }
  0x18   : > { %1134 = vmatprep.mubr.msk.f32.mxu0 %vm321_vm0, %v1364_v16  ;;  %1169 = vmatpush3.msra.mxu0 %v474_v27 }
  0x1b   : > { %1135 = vmatmul.mubr.msk.f32.gmra.mrb[2].mxu0 %vm321_vm0, %v1370_v19 }
  0x1c   : > { %1137 = vmatprep.mubr.msk.f32.mxu0 %vm321_vm0, %v1374_v21 }
  0x1f   : > { %1138 = vmatmul.mubr.msk.f32.gmra.mrb[4].mxu0 %vm321_vm0, %v1378_v23 }
  0x20   : > { %1140 = vmatprep.mubr.msk.f32.mxu0 %vm321_vm0, %v1382_v25 }
  0x23   : > { %1141 = vmatmul.mubr.msk.f32.gmra.mrb[6].mxu0 %vm321_vm0, %v1386_v26 }
  0x24   : > { %1170 = vmatprep.mubr.msk.f32.mxu0 %vm1274_vm1, %v1273_v28 }
  0xea   : > { %v1133_v29 = vpop.f32.mrb[0].mxu0 }
  0xeb   : > { %v453_v30 = vsel %vm451_vm2, %v1133_v29, 0.0  ;;  %v412_v31 = vpop.f32.mrb[1].mxu0 }
  0xec   : > { %v452_v32 = vsel %vm451_vm2, %v412_v31, 0.0 }
  0xed   : > { %v454_v33 = vadd.f32 %v453_v30, %v452_v32 }
  0xee   : > { %v1136_v34 = vpop.f32.mrb[2].mxu0 }
  0xef   : > { %v422_v35 = vpop.f32.mrb[3].mxu0  ;;  %v457_v38 = vsel %vm451_vm2, %v1136_v34, 0.0 }
  0xf0   : > { %v455_v36 = vsel %vm451_vm2, %v422_v35, 0.0 }
  0xf1   : > { %v456_v37 = vadd.f32 %v455_v36, %v454_v33 }
  0xf2   : > { %v1139_v39 = vpop.f32.mrb[4].mxu0 }
  0xf3   : > { %v432_v40 = vpop.f32.mrb[5].mxu0  ;;  %v458_v41 = vadd.f32 %v457_v38, %v456_v37  ;;  %v461_v44 = vsel %vm451_vm2, %v1139_v39, 0.0 }
  0xf4   : > { %v459_v42 = vsel %vm451_vm2, %v432_v40, 0.0 }
  0xf5   : > { %v460_v43 = vadd.f32 %v459_v42, %v458_v41 }
  0xf6   : > { %v1142_v45 = vpop.f32.mrb[6].mxu0 }
  0xf7   : > { %v442_v46 = vpop.f32.mrb[7].mxu0  ;;  %v462_v47 = vadd.f32 %v461_v44, %v460_v43  ;;  %v465_v50 = vsel %vm451_vm2, %v1142_v45, 0.0 }
  0xf8   : > { %v463_v48 = vsel %vm451_vm2, %v442_v46, 0.0 }
  0xf9   : > { %v464_v49 = vadd.f32 %v463_v48, %v462_v47 }
  0xfb   : > { %v466_v51 = vadd.f32 %v465_v50, %v464_v49 }
  0xfd   : > { %v467_v52 = vrot.slane %v466_v51, 4 }
  0xff   : > { %v468_v53 = vadd.f32 %v467_v52, %v466_v51  ;;  %v1046_v52 = vld [vmem:[%s1480_s4] ss:$0 sm:$0xff] }
 0x101   : > { %v469_v54 = vrot.slane %v468_v53, 2 }
 0x103   : > { %v470_v55 = vadd.f32 %v469_v54, %v468_v53 }
 0x105   : > { %v471_v56 = vrot.slane %v470_v55, 1 }
 0x107   : > { %v472_v57 = vadd.f32 %v471_v56, %v470_v55 }
 0x109   : > { %v473_v58 = vmul.f32 0.00390625, %v472_v57 }
 0x10b   : > { %1146 = vmatmul.mubr.msk.f32.vlgmr.msra.gmra.mrb[0].mxu1 %vm451_vm2, %v473_v58 }
 0x10c   : > { %1184 = vmatpush3.bf16.msra.mxu1 %v1337_v3 }
 0x10d   : > { %1186 = vmatprep.subr.bf16.mxu1 %v1342_v5 }
 0x110   : > { %1188 = vmatpush3.bf16.msra.mxu1 %v1342_v5 }
 0x1de   : > { %v544_v62 = vpop.f32.mrb[0].mxu1 }
 0x1df   : > { %v551_v63 = vrot.slane %v544_v62, %v550_v61  ;;  %v1147_v0 = vpop.f32.mrb[1].mxu1 }
 0x1e1   : > { %v552_v1 = vsub.f32 %v1360_v14, %v551_v63  ;;  %v553_v2 = vsub.f32 %v1362_v15, %v551_v63  ;;  %v554_v3 = vsub.f32 %v1364_v16, %v551_v63  ;;  %v555_v5 = vsub.f32 %v1370_v19, %v551_v63 }
 0x1e2   : > { %v556_v8 = vsub.f32 %v1374_v21, %v551_v63  ;;  %v557_v10 = vsub.f32 %v1378_v23, %v551_v63  ;;  %v558_v12 = vsub.f32 %v1382_v25, %v551_v63  ;;  %v559_v14 = vsub.f32 %v1386_v26, %v551_v63  ;;  %v1047_v63 = vld [vmem:[%s1481_s5] ss:$0 sm:$0xff] }
 0x1e3   : > { %v560_v4 = vmul.f32 %v552_v1, %v552_v1  ;;  %v561_v6 = vmul.f32 %v553_v2, %v553_v2  ;;  %v562_v7 = vmul.f32 %v554_v3, %v554_v3  ;;  %v563_v9 = vmul.f32 %v555_v5, %v555_v5 }
 0x1e4   : > { %v564_v11 = vmul.f32 %v556_v8, %v556_v8  ;;  %v565_v13 = vmul.f32 %v557_v10, %v557_v10  ;;  %v566_v15 = vmul.f32 %v558_v12, %v558_v12  ;;  %v567_v16 = vmul.f32 %v559_v14, %v559_v14 }
 0x1e5   : > { %1156 = vmatprep.mubr.msk.f32.mxu1 %vm321_vm0, %v560_v4 }
 0x1e6   : > { %1157 = vmatmul.mubr.msk.f32.vlgmr.msra.gmra.mrb[2].mxu1 %vm321_vm0, %v561_v6 }
 0x1e7   : > { %1159 = vmatprep.mubr.msk.f32.mxu1 %vm321_vm0, %v562_v7 }
 0x1ea   : > { %1160 = vmatmul.mubr.msk.f32.gmra.mrb[4].mxu1 %vm321_vm0, %v563_v9 }
 0x1eb   : > { %1162 = vmatprep.mubr.msk.f32.mxu1 %vm321_vm0, %v564_v11 }
 0x1ee   : > { %1163 = vmatmul.mubr.msk.f32.gmra.mrb[6].mxu1 %vm321_vm0, %v565_v13 }
 0x1ef   : > { %1165 = vmatprep.mubr.msk.f32.mxu1 %vm321_vm0, %v566_v15 }
 0x1f2   : > { %1166 = vmatmul.mubr.msk.f32.gmra.mrb[8].mxu1 %vm321_vm0, %v567_v16 }
 0x2b9   : > { %v1158_v17 = vpop.f32.mrb[2].mxu1 }
 0x2ba   : > { %v698_v18 = vsel %vm451_vm2, %v1158_v17, 0.0  ;;  %v658_v19 = vpop.f32.mrb[3].mxu1 }
 0x2bb   : > { %v697_v20 = vsel %vm451_vm2, %v658_v19, 0.0 }
 0x2bc   : > { %v699_v21 = vadd.f32 %v698_v18, %v697_v20 }
 0x2bd   : > { %v1161_v22 = vpop.f32.mrb[4].mxu1 }
 0x2be   : > { %v668_v23 = vpop.f32.mrb[5].mxu1  ;;  %v702_v26 = vsel %vm451_vm2, %v1161_v22, 0.0 }
 0x2bf   : > { %v700_v24 = vsel %vm451_vm2, %v668_v23, 0.0 }
 0x2c0   : > { %v701_v25 = vadd.f32 %v700_v24, %v699_v21 }
 0x2c1   : > { %v1164_v27 = vpop.f32.mrb[6].mxu1 }
 0x2c2   : > { %v678_v28 = vpop.f32.mrb[7].mxu1  ;;  %v703_v29 = vadd.f32 %v702_v26, %v701_v25  ;;  %v706_v32 = vsel %vm451_vm2, %v1164_v27, 0.0 }
 0x2c3   : > { %v704_v30 = vsel %vm451_vm2, %v678_v28, 0.0 }
 0x2c4   : > { %v705_v31 = vadd.f32 %v704_v30, %v703_v29 }
 0x2c5   : > { %v1167_v33 = vpop.f32.mrb[8].mxu1 }
 0x2c6   : > { %v688_v34 = vpop.f32.mrb[9].mxu1  ;;  %v707_v35 = vadd.f32 %v706_v32, %v705_v31  ;;  %v710_v38 = vsel %vm451_vm2, %v1167_v33, 0.0 }
 0x2c7   : > { %v708_v36 = vsel %vm451_vm2, %v688_v34, 0.0 }
 0x2c8   : > { %v709_v37 = vadd.f32 %v708_v36, %v707_v35 }
 0x2ca   : > { %v711_v39 = vadd.f32 %v710_v38, %v709_v37 }
 0x2cc   : > { %v712_v40 = vrot.slane %v711_v39, 4 }
 0x2ce   : > { %v713_v41 = vadd.f32 %v712_v40, %v711_v39 }
 0x2d0   : > { %v714_v42 = vrot.slane %v713_v41, 2 }
 0x2d2   : > { %v715_v43 = vadd.f32 %v714_v42, %v713_v41 }
 0x2d4   : > { %v716_v44 = vrot.slane %v715_v43, 1 }
 0x2d6   : > { %v717_v45 = vadd.f32 %v716_v44, %v715_v43 }
 0x2d8   : > { %v718_v46 = vmul.f32 0.00390625, %v717_v45 }
 0x2da   : > { %1171 = vmatmul.mubr.msk.f32.vlgmr.msra.gmra.mrb[8].mxu0 %vm451_vm2, %v718_v46 }
 0x3ad   : > { %v788_v47 = vpop.f32.mrb[8].mxu0 }
 0x3ae   : > { %v789_v48 = vadd.f32 1e-06, %v788_v47  ;;  %v1172_v49 = vpop.f32.mrb[9].mxu0 }
 0x3b0   : > { %1215 = vrsqrt.f32 %v789_v48 }
 0x3ba   : > { %v1216_v50 = vpop.eup %1215 }
 0x3bb   : > { %v796_v51 = vrot.slane %v1216_v50, %v550_v61 }
 0x3bd   : > { %v797_v53 = vmul.f32 %v796_v51, %v552_v1  ;;  %v798_v54 = vmul.f32 %v796_v51, %v553_v2  ;;  %v799_v55 = vmul.f32 %v796_v51, %v554_v3  ;;  %v800_v56 = vmul.f32 %v796_v51, %v555_v5 }
 0x3be   : > { %v801_v57 = vmul.f32 %v796_v51, %v556_v8  ;;  %v802_v58 = vmul.f32 %v796_v51, %v557_v10  ;;  %v803_v59 = vmul.f32 %v796_v51, %v558_v12  ;;  %v804_v62 = vmul.f32 %v796_v51, %v559_v14 }
 0x3bf   : > { %v812_v0 = vmul.f32 %v1046_v52, %v797_v53  ;;  %v813_v4 = vmul.f32 %v1046_v52, %v798_v54  ;;  %v814_v60 = vmul.f32 %v1046_v52, %v799_v55  ;;  %v815_v61 = vmul.f32 %v1046_v52, %v800_v56 }
 0x3c0   : > { %v816_v6 = vmul.f32 %v1046_v52, %v801_v57  ;;  %v817_v7 = vmul.f32 %v1046_v52, %v802_v58  ;;  %v818_v9 = vmul.f32 %v1046_v52, %v803_v59  ;;  %v819_v11 = vmul.f32 %v1046_v52, %v804_v62 }
 0x3c1   : > { %v827_v1 = vadd.f32 %v1047_v63, %v812_v0  ;;  %v828_v2 = vadd.f32 %v1047_v63, %v813_v4  ;;  %v829_v3 = vadd.f32 %v1047_v63, %v814_v60  ;;  %v830_v5 = vadd.f32 %v1047_v63, %v815_v61 }
 0x3c2   : > { %v831_v8 = vadd.f32 %v1047_v63, %v816_v6  ;;  %v832_v10 = vadd.f32 %v1047_v63, %v817_v7  ;;  %v1446_v12 = vadd.f32 %v1047_v63, %v818_v9  ;;  %v1448_v16 = vadd.f32 %v1047_v63, %v819_v11 }
 0x3c3   : > { %v1048_v13 = vmul.f32 -1.442695, %v827_v1  ;;  %v1049_v14 = vmul.f32 -1.442695, %v828_v2  ;;  %v1050_v15 = vmul.f32 -1.442695, %v829_v3 }
 0x3c4   : > { %v1051_v17 = vmul.f32 -1.442695, %v830_v5  ;;  %v1052_v18 = vmul.f32 -1.442695, %v831_v8  ;;  %v1053_v19 = vmul.f32 -1.442695, %v832_v10 }
 0x3c5   : > { %1217 = vpow2.f32 %v1048_v13  ;;  %v1054_v20 = vmul.f32 -1.442695, %v1446_v12  ;;  %v1055_v21 = vmul.f32 -1.442695, %v1448_v16 }
 0x3c6   : > { %1219 = vpow2.f32 %v1049_v14 }
 0x3c7   : > { %1221 = vpow2.f32 %v1050_v15 }
 0x3c8   : > { %1223 = vpow2.f32 %v1051_v17 }
 0x3c9   : > { %1225 = vpow2.f32 %v1052_v18 }
 0x3ca   : > { %1227 = vpow2.f32 %v1053_v19 }
 0x3cb   : > { %1229 = vpow2.f32 %v1054_v20 }
 0x3cc   : > { %1231 = vpow2.f32 %v1055_v21 }
 0x3cf   : > { %v1218_v22 = vpop.eup %1217 }
 0x3d0   : > { %v1220_v23 = vpop.eup %1219  ;;  %v859_v24 = vadd.f32 1.0, %v1218_v22 }
 0x3d1   : > { %v1222_v25 = vpop.eup %1221  ;;  %v860_v26 = vadd.f32 1.0, %v1220_v23 }
 0x3d2   : > { %v1224_v27 = vpop.eup %1223  ;;  %v861_v28 = vadd.f32 1.0, %v1222_v25  ;;  %1233 = vrcp.f32 %v859_v24 }
 0x3d3   : > { %v1226_v29 = vpop.eup %1225  ;;  %v862_v30 = vadd.f32 1.0, %v1224_v27  ;;  %1235 = vrcp.f32 %v860_v26 }
 0x3d4   : > { %v1228_v31 = vpop.eup %1227  ;;  %v863_v32 = vadd.f32 1.0, %v1226_v29  ;;  %1237 = vrcp.f32 %v861_v28 }
 0x3d5   : > { %v1230_v33 = vpop.eup %1229  ;;  %v864_v34 = vadd.f32 1.0, %v1228_v31  ;;  %1239 = vrcp.f32 %v862_v30 }
 0x3d6   : > { %v1232_v35 = vpop.eup %1231  ;;  %v865_v36 = vadd.f32 1.0, %v1230_v33  ;;  %1241 = vrcp.f32 %v863_v32 }
 0x3d7   : > { %v866_v37 = vadd.f32 1.0, %v1232_v35  ;;  %1243 = vrcp.f32 %v864_v34 }
 0x3d8   : > { %1245 = vrcp.f32 %v865_v36 }
 0x3d9   : > { %1247 = vrcp.f32 %v866_v37 }
 0x3dc   : > { %v1234_v38 = vpop.eup %1233 }
 0x3dd   : > { %v1236_v39 = vpop.eup %1235  ;;  %v883_v40 = vmul.f32 %v1234_v38, %v827_v1 }
 0x3de   : > { %v1238_v41 = vpop.eup %1237  ;;  %v884_v42 = vmul.f32 %v1236_v39, %v828_v2 }
 0x3df   : > { %v1240_v43 = vpop.eup %1239  ;;  %v885_v44 = vmul.f32 %v1238_v41, %v829_v3  ;;  %v1068_v45 = vpack.c.bf16 %v883_v40, %v883_v40 }
 0x3e0   : > { %v1242_v46 = vpop.eup %1241  ;;  %v886_v47 = vmul.f32 %v1240_v43, %v830_v5  ;;  %v1069_v48 = vpack.c.bf16 %v884_v42, %v884_v42 }
 0x3e1   : > { %v1244_v49 = vpop.eup %1243  ;;  %v887_v50 = vmul.f32 %v1242_v46, %v831_v8  ;;  %v1070_v51 = vpack.c.bf16 %v885_v44, %v885_v44  ;;  %924 = vst.msk [vmem:[%s285_s28] sm:$0xf] %vm923_vm3, %v1068_v45 }
 0x3e2   : > { %v1246_v52 = vpop.eup %1245  ;;  %v888_v53 = vmul.f32 %v1244_v49, %v832_v10  ;;  %v1071_v54 = vpack.c.bf16 %v886_v47, %v886_v47  ;;  %925 = vst.msk [vmem:[%s285_s28 + $0x4] sm:$0xf] %vm923_vm3, %v1069_v48 }
 0x3e3   : > { %v1248_v55 = vpop.eup %1247  ;;  %v889_v56 = vmul.f32 %v1246_v52, %v1446_v12  ;;  %v1072_v57 = vpack.c.bf16 %v887_v50, %v887_v50  ;;  %926 = vst.msk [vmem:[%s285_s28 + $0x8] sm:$0xf] %vm923_vm3, %v1070_v51 }
 0x3e4   : > { %v890_v58 = vmul.f32 %v1248_v55, %v1448_v16  ;;  %v1073_v59 = vpack.c.bf16 %v888_v53, %v888_v53  ;;  %927 = vst.msk [vmem:[%s285_s28 + $0xc] sm:$0xf] %vm923_vm3, %v1071_v54 }
 0x3e5   : > { %v1074_v62 = vpack.c.bf16 %v889_v56, %v889_v56  ;;  %928 = vst.msk [vmem:[%s285_s28 + $0x10] sm:$0xf] %vm923_vm3, %v1072_v57 }
 0x3e6   : > { %v1075_v63 = vpack.c.bf16 %v890_v58, %v890_v58  ;;  %929 = vst.msk [vmem:[%s285_s28 + $0x14] sm:$0xf] %vm923_vm3, %v1073_v59 }
 0x3e7   : > { %930 = vst.msk [vmem:[%s285_s28 + $0x18] sm:$0xf] %vm923_vm3, %v1074_v62 }
 0x3e8   : > { %931 = vst.msk [vmem:[%s285_s28 + $0x1c] sm:$0xf] %vm923_vm3, %v1075_v63 }
 0x3e9 PF: > { %s16_s23 = sadd.s32 1, %s1271_s23   ;;  %s1483_s21 = smov %s1267_s22 }
 0x3ea   : > { %p13_p5 = scmp.ge.s32.totalorder %s16_s23, 4   ;;  %s1484_s22 = smov %s1486_s24 }
 0x3ec   :  { %15 = sbr.rel (!%p13_p5) target bundleno = 2 (0x2), region = 77 }

// kernel: unet_mid_block_cross_attn.23
= control target key start
LH: loop header
LB: loop body
LE: loop exit
PB: predicated region body
PF: predicated region fallthrough
CT: control target
= control target key end

     0   :  { %s2146_s12 = smov 0   ;;  %s2148_s13 = smov 0   ;;  %s2496_s0 = inlined_call_operand.vmem [shape: bf16[2,82,32], index: 0, kind: input, shape index: {}]   ;;  %s2497_s1 = inlined_call_operand.vmem [shape: bf16[3,3,32,32], index: 1, kind: input, shape index: {}]   ;;  %s2498_s2 = inlined_call_operand.vmem [shape: f32[1,32], index: 2, kind: input, shape index: {}]   ;;  %s2499_s3 = inlined_call_operand.vmem [shape: bf16[2,64,32], index: 3, kind: output, shape index: {}]  }
   0x1   :  { %s2150_s14 = smov 0  }
   0x2 LB: > { %s22_s15 = sadd.s32 1, %s2120_s13  ;;  %p1681_p0 = scmp.ge.s32.totalorder %s2124_s14, 1  ;;  %s2124_s14 = sphi %s2150_s14, %s13_s14   ;;  %s2120_s13 = sphi %s2148_s13, %s2531_s13   ;;  %s2116_s12 = sphi %s2146_s12, %s2530_s12  }
   0x3   : > { %p23_p1 = scmp.ge.s32.totalorder %s22_s15, 2  ;;  %p168_p2 = scmp.lt.s32.totalorder %s2124_s14, 3 }
   0x5   : > { %s2533_s15 = smov (%p23_p1, %s22_s15), 0  ;;  %p169_p3 = pnand %p1681_p0, %p168_p2 }
   0x6   : > { %v2057_v0 = vld [vmem:[%s2497_s1 + $0x30] sm:$0xff] (!%p169_p3)   ;;  %p202_p4 = scmp.lt.s32.totalorder (!%p169_p3), %s2116_s12, 1  ;;  %v2058_v1 = vld [vmem:[%s2497_s1] sm:$0xff] (!%p169_p3)   ;;  %v2059_v2 = vld [vmem:[%s2497_s1 + $0x38] sm:$0xff] (!%p169_p3)   ;;  %vm378_vm0 = vcmask (!%p169_p3), 261120   ;;  %vm1175_vm2 = vcmask (!%p169_p3), 1046528  }
   0x7   : > { %172 = sbr.rel (%p169_p3) target bundleno = 314 (0x13a), region = 32  ;;  %1872 = vmatprep.subr.bf16.mxu1 (!%p169_p3), %v2057_v0  ;;  %1884 = vmatprep.subr.bf16.mxu0 (!%p169_p3), %v2058_v1  ;;  %v2060_v3 = vld [vmem:[%s2497_s1 + $0x8] sm:$0xff] (!%p169_p3)   ;;  %v2066_v4 = vld [vmem:[%s2497_s1 + $0x60] sm:$0xff] (!%p169_p3)   ;;  %v2074_v24 = vld [vmem:[%s2497_s1 + $0x50] sm:$0xff] (!%p169_p3)   ;;  %vm728_vm1 = vsmask.f32 (!%p169_p3), 7424 }
   0x8   : > { %1873 = vmatpush3.bf16.msra.mxu1 (!%p169_p3), %v2057_v0  ;;  %1885 = vmatpush3.bf16.msra.mxu0 (!%p169_p3), %v2058_v1  ;;  %v2068_v17 = vld [vmem:[%s2497_s1 + $0x68] sm:$0xff] (!%p169_p3)   ;;  %v2080_v23 = vld [vmem:[%s2497_s1 + $0x40] sm:$0xff] (!%p169_p3)   ;;  %v2081_v38 = vld [vmem:[%s2497_s1 + $0x58] sm:$0xff] (!%p169_p3)   ;;  %vm1561_vm14 = vcmask (!%p169_p3), 257024  }
   0x9   : > { %1874 = vmatprep.subr.bf16.mxu1 (!%p169_p3), %v2059_v2  ;;  %1886 = vmatprep.subr.bf16.mxu0 (!%p169_p3), %v2060_v3  ;;  %v2086_v50 = vld [vmem:[%s2497_s1 + $0x20] sm:$0xff] (!%p169_p3)   ;;  %v2082_v58 = vld [vmem:[%s2497_s1 + $0x48] sm:$0xff] (!%p169_p3)  }
   0xc   : > { %1875 = vmatpush3.bf16.msra.mxu1 (!%p169_p3), %v2059_v2  ;;  %1887 = vmatpush3.bf16.msra.mxu0 (!%p169_p3), %v2060_v3  ;;  %v2085_v2 = vld [vmem:[%s2497_s1 + $0x10] sm:$0xff] (!%p169_p3)  }
   0xd   : > { %1980 = vmatprep.subr.bf16.mxu1 (!%p169_p3), %v2058_v1  ;;  %1896 = vmatprep.subr.bf16.mxu0 (!%p169_p3), %v2066_v4 }
   0xe   : > { %s2535_s12 = smov (!%p202_p4, %s2116_s12), 1 }
   0xf   : > { %s2032_s24 = smul.u32 44, %s2535_s12  ;;  %s1809_s8 = sshll.u32 %s2535_s12, 5 }
  0x10   : > { %s2422_s10 = scalar_lea.vmem %s2499_s3, %s1809_s8 }
  0x11   : > { %s2185_s29 = scalar_lea.vmem %s2496_s0, %s2032_s24 }
  0x12   : > { %v2188_v5 = vld [vmem:[%s2185_s29 + $0x4] sm:$0xf]  ;;  %v330_v6 = vld [vmem:[%s2185_s29 + $0x8] sm:$0xf]  ;;  %v331_v7 = vld [vmem:[%s2185_s29 + $0xc] sm:$0xf] }
  0x13   : > { %v332_v8 = vld [vmem:[%s2185_s29 + $0x10] sm:$0xf]  ;;  %v1689_v9 = vcombine.low %v2188_v5, %v330_v6  ;;  %v2194_v10 = vcombine.low %v330_v6, %v331_v7  ;;  %v328_v11 = vld [vmem:[%s2185_s29] sm:$0xf]  ;;  %v333_v14 = vld [vmem:[%s2185_s29 + $0x14] sm:$0xf] }
  0x14   : > { %v1690_v12 = vcombine.low %v331_v7, %v332_v8  ;;  %v1699_v13 = vcombine.low %v328_v11, %v2188_v5  ;;  %v334_v15 = vld [vmem:[%s2185_s29 + $0x18] sm:$0xf]  ;;  %v551_v18 = vld [vmem:[%s2185_s29 + $0x8] sm:$0xf]  ;;  %v552_v19 = vld [vmem:[%s2185_s29 + $0xc] sm:$0xf]  ;;  %v2221_v27 = vcombine.low %v332_v8, %v333_v14 }
  0x15   : > { %1876 = vmatprep.mubr.msk.bf16.mxu1 %vm378_vm0, %v1689_v9  ;;  %v1691_v16 = vcombine.low %v333_v14, %v334_v15  ;;  %v335_v20 = vld [vmem:[%s2185_s29 + $0x1c] sm:$0xf]  ;;  %v340_v21 = vld [vmem:[%s2185_s29 + $0x20] sm:$0xf]  ;;  %v1713_v22 = vcombine.low %v551_v18, %v552_v19  ;;  %v553_v26 = vld [vmem:[%s2185_s29 + $0x10] sm:$0xf] }
  0x16   : > { %1888 = vmatprep.mubr.msk.bf16.mxu0 %vm378_vm0, %v1699_v13  ;;  %1877 = vmatmul.mubr.msk.bf16.vlgmr.msra.gmra.mrb[0].mxu1 %vm378_vm0, %v1690_v12  ;;  %v1692_v25 = vcombine.low %v335_v20, %v340_v21  ;;  %v712_v28 = vld [vmem:[%s2185_s29 + $0x4] sm:$0xf]  ;;  %v554_v29 = vld [vmem:[%s2185_s29 + $0x14] sm:$0xf]  ;;  %v2225_v30 = vcombine.low %v552_v19, %v553_v26  ;;  %v555_v31 = vld [vmem:[%s2185_s29 + $0x18] sm:$0xf]  ;;  %v2247_v51 = vcombine.low %v334_v15, %v335_v20 }
  0x17   : > { %1889 = vmatmul.mubr.msk.bf16.vlgmr.msra.gmra.mrb[0].mxu0 %vm378_vm0, %v2194_v10  ;;  %1982 = vmatpush3.bf16.msra.mxu1 %v2058_v1  ;;  %v1731_v32 = vcombine.low %v712_v28, %v551_v18  ;;  %v556_v33 = vld [vmem:[%s2185_s29 + $0x1c] sm:$0xf]  ;;  %v1714_v35 = vcombine.low %v553_v26, %v554_v29  ;;  %v1166_v36 = vld [vmem:[%s2185_s29 + $0x4] sm:$0xe]  ;;  %v1733_v43 = vcombine.low %v554_v29, %v555_v31  ;;  %v557_v44 = vld [vmem:[%s2185_s29 + $0x20] sm:$0xf] }
  0x18   : > { %1897 = vmatpush3.bf16.msra.mxu0 %v2066_v4  ;;  %1880 = vmatprep.mubr.msk.bf16.mxu1 %vm378_vm0, %v1691_v16  ;;  %v1715_v37 = vcombine.low %v555_v31, %v556_v33  ;;  %v737_v39 = vshll.u32 %v2225_v30, 16  ;;  %v1773_v42 = vcombine.low %v1166_v36, %v551_v18  ;;  %v558_v45 = vld [vmem:[%s2185_s29 + $0x24] sm:$0xf]  ;;  %v705_v46 = vld [vmem:[%s2185_s29] sm:$0xf]  ;;  %v2242_v47 = vcombine.low %v556_v33, %v557_v44  ;;  %v2088_v19 = vld [vmem:[%s2497_s1 + $0x18] sm:$0xff]  }
  0x19   : > { %1898 = vmatprep.subr.bf16.mxu0 %v2068_v17  ;;  %1981 = vmatprep.subr.bf16.mxu1 %v2060_v3  ;;  %v732_v34 = vshll.u32 %v1731_v32, 16  ;;  %v730_v40 = vshrl.u32 %v1731_v32, 16  ;;  %v1177_v53 = vrot.slane %v2225_v30, 1  ;;  %v1716_v54 = vcombine.low %v557_v44, %v558_v45  ;;  %v2087_v63 = vld [vmem:[%s2185_s29 + $0x24] ss:$0 sps:$4 sm:$0x11]  }
  0x1a   : > { %1900 = vmatprep.mubr.msk.bf16.mxu0 %vm378_vm0, %v1713_v22  ;;  %v739_v49 = vrot.slane %v737_v39, 1  ;;  %v1176_v52 = vrot.slane %v1773_v42, 1  ;;  %v741_v55 = vshrl.u32 %v2225_v30, 16  ;;  %v745_v56 = vshll.u32 %v1733_v43, 16  ;;  %v1160_v9 = vld [vmem:[%s2185_s29] sm:$0xe] }
  0x1b   : > { %1983 = vmatpush3.bf16.msra.mxu1 %v2060_v3  ;;  %v734_v41 = vrot.slane %v732_v34, 1  ;;  %v1742_v57 = vcombine.low %v705_v46, %v2188_v5  ;;  %v749_v60 = vshrl.u32 %v1733_v43, 16  ;;  %v753_v61 = vshll.u32 %v2242_v47, 16  ;;  %v2089_v22 = vld [vmem:[%s2497_s1 + $0x28] sm:$0xff]   ;;  %v2091_v29 = vld [vmem:[%s2497_s1 + $0x70] sm:$0xff]   ;;  %v2092_v31 = vld [vmem:[%s2497_s1 + $0x80] sm:$0xff]  }
  0x1c   : > { %1899 = vmatpush3.bf16.msra.mxu0 %v2068_v17  ;;  %1908 = vmatprep.subr.bf16.mxu1 %v2080_v23  ;;  %v1178_v62 = vsel %vm1175_vm2, %v1176_v52, %v1177_v53  ;;  %v743_v0 = vor.u32 %v741_v55, %v739_v49  ;;  %v747_v1 = vrot.slane %v745_v56, 1  ;;  %v1179_v3 = vrot.slane %v1733_v43, 1  ;;  %v982_v32 = vld [vmem:[%s2185_s29 + $0x8] sm:$0xf]  ;;  %v983_v33 = vld [vmem:[%s2185_s29 + $0xc] sm:$0xf] }
  0x1d   : > { %1944 = vmatprep.subr.bf16.mxu0 %v2074_v24  ;;  %v735_v48 = vor.u32 %v734_v41, %v730_v40  ;;  %v863_v4 = vshll.u32 %v1742_v57, 16  ;;  %v755_v7 = vrot.slane %v753_v61, 1  ;;  %v1181_v8 = vrot.slane %v2242_v47, 1  ;;  %v2093_v44 = vld [vmem:[%s2185_s29 + $0x20] ss:$0 sps:$4 sm:$0x11]  }
  0x1e   : > { %1881 = vmatmul.mubr.msk.bf16.gmra.mrb[4].mxu1 %vm378_vm0, %v1692_v25  ;;  %v751_v6 = vor.u32 %v749_v60, %v747_v1  ;;  %v748_v11 = vsel %vm728_vm1, %v743_v0, %v747_v1  ;;  %v757_v12 = vshrl.u32 %v2242_v47, 16  ;;  %v761_v13 = vshll.u32 %v2087_v63, 16  ;;  %v2097_v46 = vld [vmem:[%s2185_s29 + $0x10] sm:$0xff]   ;;  %v1375_v52 = vld [vmem:[%s2185_s29 + $0x8] sm:$0xe]  ;;  %v2094_v60 = vld [vmem:[%s2497_s1 + $0x78] sm:$0xff]  }
  0x1f   : > { %1892 = vmatprep.mubr.msk.bf16.mxu1 %vm378_vm0, %v2221_v27  ;;  %v740_v59 = vsel %vm728_vm1, %v735_v48, %v739_v49  ;;  %v1180_v14 = vsel %vm1175_vm2, %v1177_v53, %v1179_v3  ;;  %v861_v15 = vshrl.u32 %v1742_v57, 16  ;;  %v865_v16 = vrot.slane %v863_v4, 1 }
  0x20   : > { %v867_v17 = vshll.u32 %v2194_v10, 16  ;;  %v756_v18 = vsel %vm728_vm1, %v751_v6, %v755_v7  ;;  %v1780_v20 = vcombine.low %v1160_v9, %v2188_v5  ;;  %v1182_v21 = vsel %vm1175_vm2, %v1179_v3, %v1181_v8  ;;  %v2100_v6 = vld [vmem:[%s2185_s29 + $0x20] sm:$0xff]  }
  0x21   : > { %v1183_v25 = vrot.slane %v2087_v63, 1  ;;  %v866_v5 = vor.u32 %v865_v16, %v861_v15  ;;  %v1278_v28 = vrot.slane %v2194_v10, 1  ;;  %v871_v34 = vshrl.u32 %v2194_v10, 16  ;;  %v2099_v63 = vld [vmem:[%s2185_s29 + $0x18] sm:$0xff]  }
  0x22   : > { %v869_v26 = vrot.slane %v867_v17, 1  ;;  %v1277_v30 = vrot.slane %v1780_v20, 1  ;;  %v874_v36 = vshll.u32 %v2221_v27, 16  ;;  %v1754_v39 = vcombine.low %v982_v32, %v983_v33  ;;  %v2101_v20 = vld [vmem:[%s2185_s29 + $0x28] ss:$0 sps:$4 sm:$0x11]  }
  0x23   : > { %1901 = vmatmul.mubr.msk.bf16.vlgmr.msra.gmra.mrb[0].mxu0 %vm378_vm0, %v1714_v35  ;;  %v878_v10 = vshrl.u32 %v2221_v27, 16  ;;  %v881_v41 = vshll.u32 %v2247_v51, 16  ;;  %v1280_v45 = vrot.slane %v2221_v27, 1  ;;  %v889_v55 = vshll.u32 %v2093_v44, 16 }
  0x24   : > { %1945 = vmatpush3.bf16.msra.mxu0 %v2074_v24  ;;  %1904 = vmatprep.mubr.msk.bf16.mxu0 %vm378_vm0, %v1715_v37  ;;  %v763_v24 = vrot.slane %v761_v13, 1  ;;  %v1184_v37 = vsel %vm1175_vm2, %v1181_v8, %v1183_v25  ;;  %v1279_v40 = vsel %vm1175_vm2, %v1277_v30, %v1278_v28  ;;  %v873_v42 = vor.u32 %v871_v34, %v869_v26 }
  0x25   : > { %1946 = vmatprep.subr.bf16.mxu0 %v2081_v38  ;;  %v876_v43 = vrot.slane %v874_v36, 1  ;;  %v1022_v47 = vshll.u32 %v1754_v39, 16  ;;  %v883_v49 = vrot.slane %v881_v41, 1  ;;  %v1281_v56 = vsel %vm1175_vm2, %v1278_v28, %v1280_v45 }
  0x26   : > { %v1020_v57 = vshrl.u32 %v1754_v39, 16  ;;  %v1791_v61 = vcombine.low %v1375_v52, %v983_v33  ;;  %v891_v1 = vrot.slane %v889_v55, 1  ;;  %v1385_v8 = vrot.slane %v2097_v46, 1 }
  0x27   : > { %v880_v48 = vor.u32 %v878_v10, %v876_v43  ;;  %v877_v53 = vsel %vm728_vm1, %v873_v42, %v876_v43  ;;  %v1035_v9 = vshll.u32 %v2099_v63, 16  ;;  %v1039_v15 = vshrl.u32 %v2099_v63, 16 }
  0x28   : > { %1947 = vmatpush3.bf16.msra.mxu0 %v2081_v38  ;;  %v870_v38 = vsel %vm728_vm1, %v866_v5, %v869_v26  ;;  %v1043_v16 = vshll.u32 %v2100_v6, 16  ;;  %v1047_v5 = vshrl.u32 %v2100_v6, 16  ;;  %v1051_v26 = vshll.u32 %v2101_v20, 16 }
  0x29   : > { %1956 = vmatprep.subr.bf16.mxu0 %v2086_v50  ;;  %v884_v27 = vsel %vm728_vm1, %v880_v48, %v883_v49  ;;  %v1391_v33 = vrot.slane %v2101_v20, 1 }
  0x2a   : > { %1893 = vmatmul.mubr.msk.bf16.vlgmr.msra.gmra.mrb[4].mxu1 %vm378_vm0, %v2247_v51  ;;  %v1053_v32 = vrot.slane %v1051_v26, 1 }
  0x2b   : > { %1905 = vmatmul.mubr.msk.bf16.gmra.mrb[4].mxu0 %vm378_vm0, %v1716_v54  ;;  %1909 = vmatpush3.bf16.msra.mxu1 %v2080_v23  ;;  %v759_v23 = vor.u32 %v757_v12, %v755_v7  ;;  %v885_v54 = vshrl.u32 %v2247_v51, 16  ;;  %v1384_v7 = vrot.slane %v1791_v61, 1  ;;  %v1031_v12 = vshrl.u32 %v2097_v46, 16 }
  0x2c   : > { %1910 = vmatprep.subr.bf16.mxu1 %v2082_v58  ;;  %1912 = vmatprep.mubr.msk.bf16.mxu1 %vm378_vm0, %v740_v59  ;;  %v1027_v59 = vshll.u32 %v2097_v46, 16 }
  0x2d   : > { %1948 = vmatprep.mubr.msk.bf16.mxu0 %vm378_vm0, %v1178_v62  ;;  %v764_v35 = vsel %vm728_vm1, %v759_v23, %v763_v24  ;;  %v887_v0 = vor.u32 %v885_v54, %v883_v49  ;;  %v1386_v17 = vsel %vm1175_vm2, %v1384_v7, %v1385_v8  ;;  %v1045_v23 = vrot.slane %v1043_v16, 1 }
  0x2e   : > { %v1029_v4 = vrot.slane %v1027_v59, 1  ;;  %v1389_v24 = vrot.slane %v2100_v6, 1 }
  0x2f   : > { %1911 = vmatpush3.bf16.msra.mxu1 %v2082_v58  ;;  %v1024_v58 = vrot.slane %v1022_v47, 1 }
  0x30   : > { %1920 = vmatprep.subr.bf16.mxu1 %v2085_v2 }
  0x31   : > { %v1025_v3 = vor.u32 %v1024_v58, %v1020_v57 }
  0x32   : > { %1913 = vmatmul.mubr.msk.bf16.vlgmr.msra.gmra.mrb[8].mxu1 %vm378_vm0, %v748_v11  ;;  %v892_v11 = vsel %vm728_vm1, %v887_v0, %v891_v1 }
  0x33   : > { %1949 = vmatmul.mubr.msk.bf16.vlgmr.msra.gmra.mrb[8].mxu0 %vm378_vm0, %v1180_v14  ;;  %1921 = vmatpush3.bf16.msra.mxu1 %v2085_v2  ;;  %v1284_v2 = vrot.slane %v2093_v44, 1  ;;  %v1030_v14 = vsel %vm728_vm1, %v1025_v3, %v1029_v4 }
  0x34   : > { %1957 = vmatpush3.bf16.msra.mxu0 %v2086_v50  ;;  %1916 = vmatprep.mubr.msk.bf16.mxu1 %vm378_vm0, %v756_v18  ;;  %v1282_v50 = vrot.slane %v2247_v51, 1  ;;  %v2095_v51 = vld [vmem:[%s2497_s1 + $0x88] sm:$0xff]   ;;  %v1037_v18 = vrot.slane %v1035_v9, 1 }
  0x35   : > { %1952 = vmatprep.mubr.msk.bf16.mxu0 %vm378_vm0, %v1182_v21  ;;  %1922 = vmatprep.subr.bf16.mxu1 %v2088_v19  ;;  %v1387_v21 = vrot.slane %v2099_v63, 1 }
  0x36   : > { %1958 = vmatprep.subr.bf16.mxu0 %v2089_v22  ;;  %v1283_v62 = vsel %vm1175_vm2, %v1280_v45, %v1282_v50  ;;  %v1285_v13 = vsel %vm1175_vm2, %v1282_v50, %v1284_v2 }
  0x37   : > { %1923 = vmatpush3.bf16.msra.mxu1 %v2088_v19  ;;  %v1033_v19 = vor.u32 %v1031_v12, %v1029_v4  ;;  %v1388_v28 = vsel %vm1175_vm2, %v1385_v8, %v1387_v21  ;;  %v1390_v30 = vsel %vm1175_vm2, %v1387_v21, %v1389_v24 }
  0x38   : > { %1959 = vmatpush3.bf16.msra.mxu0 %v2089_v22  ;;  %1932 = vmatprep.subr.bf16.mxu1 %v2091_v29  ;;  %v1041_v22 = vor.u32 %v1039_v15, %v1037_v18 }
  0x39   : > { %1968 = vmatprep.subr.bf16.mxu0 %v2092_v31  ;;  %v1038_v25 = vsel %vm728_vm1, %v1033_v19, %v1037_v18 }
  0x3a   : > { %1917 = vmatmul.mubr.msk.bf16.gmra.mrb[12].mxu1 %vm378_vm0, %v764_v35  ;;  %v1392_v35 = vsel %vm1175_vm2, %v1389_v24, %v1391_v33 }
  0x3b   : > { %1953 = vmatmul.mubr.msk.bf16.gmra.mrb[12].mxu0 %vm378_vm0, %v1184_v37  ;;  %1924 = vmatprep.mubr.msk.bf16.mxu1 %vm378_vm0, %v870_v38 }
  0x3c   : > { %1960 = vmatprep.mubr.msk.bf16.mxu0 %vm378_vm0, %v1279_v40 }
  0x42   : > { %1925 = vmatmul.mubr.msk.bf16.vlgmr.msra.gmra.mrb[8].mxu1 %vm378_vm0, %v877_v53 }
  0x43   : > { %1961 = vmatmul.mubr.msk.bf16.vlgmr.msra.gmra.mrb[8].mxu0 %vm378_vm0, %v1281_v56  ;;  %1933 = vmatpush3.bf16.msra.mxu1 %v2091_v29  ;;  %v1046_v29 = vsel %vm728_vm1, %v1041_v22, %v1045_v23 }
  0x44   : > { %1969 = vmatpush3.bf16.msra.mxu0 %v2092_v31  ;;  %1928 = vmatprep.mubr.msk.bf16.mxu1 %vm378_vm0, %v884_v27  ;;  %v1049_v31 = vor.u32 %v1047_v5, %v1045_v23  ;;  %v223_v27 = vlaneseq  ;;  %v2385_v23 = vld [vmem:[%s2498_s2] ss:$0 sm:$0xff] }
  0x45   : > { %1964 = vmatprep.mubr.msk.bf16.mxu0 %vm378_vm0, %v1283_v62  ;;  %1934 = vmatprep.subr.bf16.mxu1 %v2094_v60 }
  0x46   : > { %1970 = vmatprep.subr.bf16.mxu0 %v2095_v51  ;;  %v1054_v34 = vsel %vm728_vm1, %v1049_v31, %v1053_v32 }
  0x47   : > { %1935 = vmatpush3.bf16.msra.mxu1 %v2094_v60  ;;  %v224_v60 = vshrl.u32 %v223_v27, 7 }
  0x48   : > { %1971 = vmatpush3.bf16.msra.mxu0 %v2095_v51 }
  0x49   : > { %v226_v61 = vadd.s32 16, %v224_v60  ;;  %v227_v62 = vadd.s32 24, %v224_v60  ;;  %v225_v51 = vadd.s32 8, %v224_v60  ;;  %v230_v63 = vadd.s32 48, %v224_v60 }
  0x4a   : > { %1929 = vmatmul.mubr.msk.bf16.gmra.mrb[12].mxu1 %vm378_vm0, %v892_v11  ;;  %v236_v1 = vand.u32 7, %v224_v60  ;;  %v228_v6 = vadd.s32 32, %v224_v60  ;;  %v231_v7 = vadd.s32 56, %v224_v60  ;;  %v229_v8 = vadd.s32 40, %v224_v60 }
  0x4b   : > { %1965 = vmatmul.mubr.msk.bf16.gmra.mrb[12].mxu0 %vm378_vm0, %v1285_v13  ;;  %1936 = vmatprep.mubr.msk.bf16.mxu1 %vm378_vm0, %v1030_v14  ;;  %v250_v0 = vand.u32 7, %v226_v61  ;;  %v257_v2 = vand.u32 7, %v227_v62  ;;  %v243_v3 = vand.u32 7, %v225_v51  ;;  %v278_v4 = vand.u32 7, %v230_v63 }
  0x4c   : > { %1972 = vmatprep.mubr.msk.bf16.mxu0 %vm378_vm0, %v1386_v17  ;;  %vm2358_vm4 = vcmp.eq.s32.totalorder %v236_v1, 0  ;;  %v264_v15 = vand.u32 7, %v228_v6  ;;  %vm2378_vm9 = vcmp.eq.s32.totalorder %v236_v1, 7  ;;  %v285_v19 = vand.u32 7, %v231_v7 }
  0x4d   : > { %vm683_vm3 = vcmp.eq.s32.totalorder %v250_v0, 0  ;;  %vm2362_vm5 = vcmp.eq.s32.totalorder %v257_v2, 0  ;;  %vm2366_vm6 = vcmp.eq.s32.totalorder %v250_v0, 7  ;;  %vm2370_vm7 = vcmp.eq.s32.totalorder %v243_v3, 0 }
  0x4e   : > { %vm2374_vm8 = vcmp.eq.s32.totalorder %v278_v4, 0  ;;  %v271_v20 = vand.u32 7, %v229_v8  ;;  %vm2389_vm10 = vcmp.eq.s32.totalorder %v257_v2, 7  ;;  %vm2397_vm11 = vcmp.eq.s32.totalorder %v243_v3, 7 }
  0x4f   : > { %vm2408_vm12 = vcmp.eq.s32.totalorder %v264_v15, 0  ;;  %vm2415_vm13 = vcmp.eq.s32.totalorder %v285_v19, 0  ;;  %vm2434_vm1 = vcmp.eq.s32.totalorder %v264_v15, 7  ;;  %vm2442_vm2 = vcmp.eq.s32.totalorder %v285_v19, 7 }
  0x50   : > { %vm2425_vm15 = vcmp.eq.s32.totalorder %v271_v20, 0 }
  0x52   : > { %1937 = vmatmul.mubr.msk.bf16.vlgmr.msra.gmra.mrb[8].mxu1 %vm378_vm0, %v1038_v25 }
  0x53   : > { %1973 = vmatmul.mubr.msk.bf16.vlgmr.msra.gmra.mrb[8].mxu0 %vm378_vm0, %v1388_v28  ;;  %1940 = vmatprep.mubr.msk.bf16.mxu1 %vm378_vm0, %v1046_v29 }
  0x54   : > { %1976 = vmatprep.mubr.msk.bf16.mxu0 %vm378_vm0, %v1390_v30 }
  0x5a   : > { %1941 = vmatmul.mubr.msk.bf16.gmra.mrb[12].mxu1 %vm378_vm0, %v1054_v34 }
  0x5b   : > { %1977 = vmatmul.mubr.msk.bf16.gmra.mrb[12].mxu0 %vm378_vm0, %v1392_v35  ;;  %vm2430_vm0 = vcmp.eq.s32.totalorder %v278_v4, 7 }
  0xe9   : > { %v1878_v36 = vpop.f32.mrb[0].mxu1 }
  0xea   : > { %v425_v37 = vpop.f32.mrb[1].mxu1 }
  0xeb   : > { %v1879_v38 = vpop.f32.mrb[2].mxu1 }
  0xec   : > { %v428_v39 = vpop.f32.mrb[3].mxu1 }
  0xf6   : > { %v1902_v40 = vpop.f32.mrb[0].mxu0 }
  0xf7   : > { %v1984_v10 = vadd.f32 %v1902_v40, %v1878_v36  ;;  %v642_v41 = vpop.f32.mrb[1].mxu0 }
  0xf8   : > { %v1985_v42 = vadd.f32 %v642_v41, %v425_v37  ;;  %v1903_v43 = vpop.f32.mrb[2].mxu0 }
  0xf9   : > { %v1986_v44 = vadd.f32 %v1903_v43, %v1879_v38  ;;  %v645_v45 = vpop.f32.mrb[3].mxu0  ;;  %v691_v16 = vsel %vm683_vm3, 0.0, %v1984_v10  ;;  %vm2451_vm3 = vcmp.eq.s32.totalorder %v271_v20, 7 }
  0xfa   : > { %v1987_v46 = vadd.f32 %v645_v45, %v428_v39  ;;  %v689_v24 = vsel %vm2358_vm4, 0.0, %v1985_v42 }
  0xfb   : > { %v692_v30 = vsel %vm2362_vm5, 0.0, %v1986_v44 }
  0xfc   : > { %v690_v37 = vsel %vm2370_vm7, 0.0, %v1987_v46 }
  0xfd   : > { %v1894_v47 = vpop.f32.mrb[4].mxu1 }
  0xfe   : > { %v1906_v48 = vpop.f32.mrb[4].mxu0  ;;  %v536_v49 = vpop.f32.mrb[5].mxu1 }
  0xff   : > { %v2350_v50 = vadd.f32 %v1906_v48, %v1894_v47  ;;  %v658_v52 = vpop.f32.mrb[5].mxu0  ;;  %v1895_v53 = vpop.f32.mrb[6].mxu1 }
 0x100   : > { %v2352_v54 = vadd.f32 %v658_v52, %v536_v49  ;;  %v1907_v55 = vpop.f32.mrb[6].mxu0  ;;  %v539_v56 = vpop.f32.mrb[7].mxu1 }
 0x101   : > { %v2354_v57 = vadd.f32 %v1907_v55, %v1895_v53  ;;  %v661_v58 = vpop.f32.mrb[7].mxu0  ;;  %v695_v60 = vsel %vm2374_vm8, 0.0, %v2350_v50 }
 0x102   : > { %v2356_v59 = vadd.f32 %v661_v58, %v539_v56  ;;  %v693_v1 = vsel %vm2408_vm12, 0.0, %v2352_v54 }
 0x103   : > { %v696_v8 = vsel %vm2415_vm13, 0.0, %v2354_v57 }
 0x104   : > { %v694_v14 = vsel %vm2425_vm15, 0.0, %v2356_v59 }
 0x125   : > { %v1938_v17 = vpop.f32.mrb[8].mxu1 }
 0x126   : > { %v1154_v21 = vadd.f32 %v1938_v17, %v691_v16  ;;  %v1974_v22 = vpop.f32.mrb[8].mxu0  ;;  %v1113_v25 = vpop.f32.mrb[9].mxu1 }
 0x127   : > { %v1500_v26 = vsel %vm2366_vm6, 0.0, %v1974_v22  ;;  %v1152_v28 = vadd.f32 %v1113_v25, %v689_v24  ;;  %v1451_v29 = vpop.f32.mrb[9].mxu0  ;;  %v1939_v31 = vpop.f32.mrb[10].mxu1 }
 0x128   : > { %v1508_v33 = vadd.f32 %v1500_v26, %v1154_v21  ;;  %v1498_v34 = vsel %vm2378_vm9, 0.0, %v1451_v29  ;;  %v1155_v35 = vadd.f32 %v1939_v31, %v692_v30  ;;  %v1975_v36 = vpop.f32.mrb[10].mxu0  ;;  %v1116_v38 = vpop.f32.mrb[11].mxu1 }
 0x129   : > { %v1506_v39 = vadd.f32 %v1498_v34, %v1152_v28  ;;  %v1501_v40 = vsel %vm2389_vm10, 0.0, %v1975_v36  ;;  %v1153_v10 = vadd.f32 %v1116_v38, %v690_v37  ;;  %v1454_v41 = vpop.f32.mrb[11].mxu0 }
 0x12a   : > { %v1523_v43 = vadd.f32 %v2385_v23, %v1508_v33  ;;  %v1509_v44 = vadd.f32 %v1501_v40, %v1155_v35  ;;  %v1499_v45 = vsel %vm2397_vm11, 0.0, %v1454_v41 }
 0x12b   : > { %v1521_v46 = vadd.f32 %v2385_v23, %v1506_v39  ;;  %v1507_v48 = vadd.f32 %v1499_v45, %v1153_v10 }
 0x12c   : > { %v1812_v52 = vpack.c.bf16 %v1523_v43, %v1523_v43  ;;  %v1524_v53 = vadd.f32 %v2385_v23, %v1509_v44 }
 0x12d   : > { %v1810_v58 = vpack.c.bf16 %v1521_v46, %v1521_v46  ;;  %v1522_v27 = vadd.f32 %v2385_v23, %v1507_v48  ;;  %v1942_v61 = vpop.f32.mrb[12].mxu1 }
 0x12e   : > { %1564 = vst.msk [vmem:[%s2422_s10 + $0x8] sm:$0xf] %vm1561_vm14, %v1812_v52  ;;  %v1813_v51 = vpack.c.bf16 %v1524_v53, %v1524_v53  ;;  %v1158_v63 = vadd.f32 %v1942_v61, %v695_v60  ;;  %v1978_v0 = vpop.f32.mrb[12].mxu0  ;;  %v1129_v2 = vpop.f32.mrb[13].mxu1 }
 0x12f   : > { %1562 = vst.msk [vmem:[%s2422_s10] sm:$0xf] %vm1561_vm14, %v1810_v58  ;;  %v1811_v50 = vpack.c.bf16 %v1522_v27, %v1522_v27  ;;  %v1504_v4 = vsel %vm2430_vm0, 0.0, %v1978_v0  ;;  %v1156_v6 = vadd.f32 %v1129_v2, %v693_v1  ;;  %v1467_v7 = vpop.f32.mrb[13].mxu0  ;;  %v1943_v9 = vpop.f32.mrb[14].mxu1 }
 0x130   : > { %1565 = vst.msk [vmem:[%s2422_s10 + $0xc] sm:$0xf] %vm1561_vm14, %v1813_v51  ;;  %v1512_v54 = vadd.f32 %v1504_v4, %v1158_v63  ;;  %v1502_v11 = vsel %vm2434_vm1, 0.0, %v1467_v7  ;;  %v1159_v12 = vadd.f32 %v1943_v9, %v696_v8  ;;  %v1979_v13 = vpop.f32.mrb[14].mxu0  ;;  %v1132_v15 = vpop.f32.mrb[15].mxu1 }
 0x131   : > { %1563 = vst.msk [vmem:[%s2422_s10 + $0x4] sm:$0xf] %vm1561_vm14, %v1811_v50  ;;  %v1510_v16 = vadd.f32 %v1502_v11, %v1156_v6  ;;  %v1505_v57 = vsel %vm2442_vm2, 0.0, %v1979_v13  ;;  %v1157_v17 = vadd.f32 %v1132_v15, %v694_v14  ;;  %v1470_v18 = vpop.f32.mrb[15].mxu0 }
 0x132   : > { %v1527_v19 = vadd.f32 %v2385_v23, %v1512_v54  ;;  %v1513_v20 = vadd.f32 %v1505_v57, %v1159_v12  ;;  %v1503_v21 = vsel %vm2451_vm3, 0.0, %v1470_v18 }
 0x133   : > { %v1525_v59 = vadd.f32 %v2385_v23, %v1510_v16  ;;  %v1511_v22 = vadd.f32 %v1503_v21, %v1157_v17 }
 0x134   : > { %v1816_v24 = vpack.c.bf16 %v1527_v19, %v1527_v19  ;;  %v1528_v25 = vadd.f32 %v2385_v23, %v1513_v20 }
 0x135   : > { %v1814_v5 = vpack.c.bf16 %v1525_v59, %v1525_v59  ;;  %v1526_v26 = vadd.f32 %v2385_v23, %v1511_v22 }
 0x136   : > { %1568 = vst.msk [vmem:[%s2422_s10 + $0x18] sm:$0xf] %vm1561_vm14, %v1816_v24  ;;  %v1817_v28 = vpack.c.bf16 %v1528_v25, %v1528_v25 }
 0x137   : > { %1566 = vst.msk [vmem:[%s2422_s10 + $0x10] sm:$0xf] %vm1561_vm14, %v1814_v5  ;;  %v1815_v29 = vpack.c.bf16 %v1526_v26, %v1526_v26 }
 0x138   : > { %1569 = vst.msk [vmem:[%s2422_s10 + $0x1c] sm:$0xf] %vm1561_vm14, %v1817_v28 }
 0x139   : > { %1567 = vst.msk [vmem:[%s2422_s10 + $0x14] sm:$0xf] %vm1561_vm14, %v1815_v29 }
 0x13a PF: > { %s13_s14 = sadd.s32 1, %s2124_s14   ;;  %s2530_s12 = smov %s2120_s13 }
 0x13b   : > { %p10_p5 = scmp.ge.s32.totalorder %s13_s14, 4   ;;  %s2531_s13 = smov %s2533_s15 }
 0x13d   :  { %12 = sbr.rel (!%p10_p5) target bundleno = 2 (0x2), region = 76 }

// kernel: unet_mid_block_cross_attn.26
= control target key start
LH: loop header
LB: loop body
LE: loop exit
PB: predicated region body
PF: predicated region fallthrough
CT: control target
= control target key end

     0   :  { %s1417_s24 = smov 0   ;;  %s1419_s25 = smov 0   ;;  %s1645_s0 = inlined_call_operand.vmem [shape: bf16[2,64,32], index: 0, kind: input, shape index: {}]   ;;  %s1646_s1 = inlined_call_operand.vmem [shape: f32[32,8], index: 1, kind: input, shape index: {}]   ;;  %s1647_s2 = inlined_call_operand.vmem [shape: f32[8,32], index: 2, kind: input, shape index: {}]   ;;  %s1648_s3 = inlined_call_operand.vmem [shape: f32[1,32], index: 3, kind: input, shape index: {}]   ;;  %s1649_s4 = inlined_call_operand.vmem [shape: f32[1,32], index: 4, kind: input, shape index: {}]   ;;  %s1650_s5 = inlined_call_operand.vmem [shape: bf16[32,32], index: 5, kind: input, shape index: {}]   ;;  %s1651_s6 = inlined_call_operand.vmem [shape: f32[1,32], index: 6, kind: input, shape index: {}]   ;;  %s1652_s7 = inlined_call_operand.vmem [shape: bf16[2,64,32], index: 7, kind: output, shape index: {}]  }
   0x1   :  { %s1421_s26 = smov 0  }
   0x2 LB: > { %s29_s27 = sadd.s32 1, %s1369_s25  ;;  %p1134_p0 = scmp.ge.s32.totalorder %s1373_s26, 1  ;;  %s1373_s26 = sphi %s1421_s26, %s17_s26   ;;  %s1369_s25 = sphi %s1419_s25, %s1654_s25   ;;  %s1365_s24 = sphi %s1417_s24, %s1653_s24  }
   0x3   : > { %p31_p1 = scmp.ge.s32.totalorder %s29_s27, 2  ;;  %p268_p2 = scmp.lt.s32.totalorder %s1373_s26, 3 }
   0x5   : > { %s1656_s27 = smov (%p31_p1, %s29_s27), 0  ;;  %p269_p3 = pnand %p1134_p0, %p268_p2 }
   0x6   : > { %v351_v0 = vld [vmem:[%s1646_s1] sm:$0xff] (!%p269_p3)  ;;  %v352_v1 = vld [vmem:[%s1646_s1 + $0x8] sm:$0xff] (!%p269_p3)  ;;  %v353_v2 = vld [vmem:[%s1646_s1 + $0x10] sm:$0xff] (!%p269_p3)  ;;  %p310_p4 = scmp.lt.s32.totalorder (!%p269_p3), %s1365_s24, 1  ;;  %vm355_vm0 = vcmask (!%p269_p3), 261120   ;;  %v1375_v19 = vmov (!%p269_p3), 0.0   ;;  %v582_v50 = vlaneseq (!%p269_p3) }
   0x7   : > { %272 = sbr.rel (%p269_p3) target bundleno = 1200 (0x4b0), region = 48  ;;  %v1444_v3 = vpack.c.bf16 (!%p269_p3), %v352_v1, %v351_v0  ;;  %v354_v4 = vld [vmem:[%s1646_s1 + $0x18] sm:$0xff] (!%p269_p3)  ;;  %v1506_v18 = vld [vmem:[%s1647_s2] sm:$0xff] (!%p269_p3)  ;;  %1259 = vmatprep.subr.mxu1 (!%p269_p3), %v1375_v19  ;;  %vm1376_vm1 = vmmov (!%p269_p3), 0   ;;  %vm485_vm2 = vcmask (!%p269_p3), 64512   ;;  %vm1014_vm3 = vcmask (!%p269_p3), 257024  }
   0x8   : > { %v1449_v5 = vpack.c.bf16 (!%p269_p3), %v354_v4, %v353_v2  ;;  %1261 = vmatprep.mubr.msk.f32.mxu1 (!%p269_p3), %vm1376_vm1, %v1375_v19  ;;  %1260 = vmatpush3.msra.mxu1 (!%p269_p3), %v1506_v18  ;;  %v1526_v51 = vshrl.u32 (!%p269_p3), %v582_v50, 7  ;;  %v1158_v50 = vld [vmem:[%s1649_s4] ss:$0 sm:$0xff] (!%p269_p3) }
   0x9   : > { %1302 = vmatprep.subr.bf16.mxu0 (!%p269_p3), %v1444_v3  ;;  %1317 = vmatprep.subr.bf16.mxu1 (!%p269_p3), %v1444_v3 }
   0xa   : > { %1304 = vmatpush3.bf16.msra.mxu0 (!%p269_p3), %v1444_v3  ;;  %v584_v52 = vsub.s32 (!%p269_p3), 0, %v1526_v51 }
   0xb   : > { %1306 = vmatprep.subr.bf16.mxu0 (!%p269_p3), %v1449_v5 }
   0xe   : > { %s1658_s24 = smov (!%p310_p4, %s1365_s24), 1  ;;  %1308 = vmatpush3.bf16.msra.mxu0 %v1449_v5 }
   0xf   : > { %s1176_s13 = sshll.u32 %s1658_s24, 5  ;;  %1310 = vmatprep.subr.bf16.mxu0 %v1444_v3 }
  0x10   : > { %s314_s16 = scalar_lea.vmem %s1645_s0, %s1176_s13  ;;  %s329_s12 = scalar_lea.vmem %s1652_s7, %s1176_s13 }
  0x11   : > { %v1462_v6 = vld [vmem:[%s314_s16] sm:$0xff]   ;;  %v1464_v7 = vld [vmem:[%s314_s16 + $0x8] sm:$0xff]   ;;  %v1473_v11 = vld [vmem:[%s314_s16 + $0x10] sm:$0xff]  }
  0x12   : > { %v1188_v8 = vunpack.c.l.bf16 %v1462_v6  ;;  %v1189_v9 = vunpack.c.h.bf16 %v1462_v6  ;;  %v1192_v10 = vunpack.c.l.bf16 %v1464_v7  ;;  %v1193_v12 = vunpack.c.h.bf16 %v1464_v7  ;;  %v1485_v14 = vld [vmem:[%s314_s16 + $0x18] sm:$0xff]  }
  0x13   : > { %v1196_v13 = vunpack.c.l.bf16 %v1473_v11  ;;  %v1197_v15 = vunpack.c.h.bf16 %v1473_v11  ;;  %v1200_v16 = vunpack.c.l.bf16 %v1485_v14  ;;  %v1201_v17 = vunpack.c.h.bf16 %v1485_v14 }
  0x14   : > { %1247 = vmatprep.mubr.msk.f32.mxu0 %vm355_vm0, %v1188_v8 }
  0x15   : > { %1248 = vmatmul.mubr.msk.f32.vlgmr.msra.gmra.mrb[0].mxu0 %vm355_vm0, %v1189_v9 }
  0x16   : > { %1250 = vmatprep.mubr.msk.f32.mxu0 %vm355_vm0, %v1192_v10  ;;  %1312 = vmatpush3.bf16.msra.mxu0 %v1444_v3 }
  0x17   : > { %1314 = vmatprep.subr.bf16.mxu0 %v1449_v5 }
  0x19   : > { %1251 = vmatmul.mubr.msk.f32.gmra.mrb[2].mxu0 %vm355_vm0, %v1193_v12 }
  0x1a   : > { %1253 = vmatprep.mubr.msk.f32.mxu0 %vm355_vm0, %v1196_v13  ;;  %1316 = vmatpush3.bf16.msra.mxu0 %v1449_v5 }
  0x1b   : > { %1284 = vmatprep.subr.mxu0 %v1375_v19 }
  0x1d   : > { %1254 = vmatmul.mubr.msk.f32.gmra.mrb[4].mxu0 %vm355_vm0, %v1197_v15 }
  0x1e   : > { %1256 = vmatprep.mubr.msk.f32.mxu0 %vm355_vm0, %v1200_v16 }
  0x21   : > { %1257 = vmatmul.mubr.msk.f32.gmra.mrb[6].mxu0 %vm355_vm0, %v1201_v17 }
  0xe8   : > { %v1249_v20 = vpop.f32.mrb[0].mxu0 }
  0xe9   : > { %v487_v21 = vsel %vm485_vm2, %v1249_v20, 0.0  ;;  %v446_v22 = vpop.f32.mrb[1].mxu0 }
  0xea   : > { %v486_v23 = vsel %vm485_vm2, %v446_v22, 0.0 }
  0xeb   : > { %v488_v24 = vadd.f32 %v487_v21, %v486_v23 }
  0xec   : > { %v1252_v25 = vpop.f32.mrb[2].mxu0 }
  0xed   : > { %v456_v26 = vpop.f32.mrb[3].mxu0  ;;  %v491_v29 = vsel %vm485_vm2, %v1252_v25, 0.0 }
  0xee   : > { %v489_v27 = vsel %vm485_vm2, %v456_v26, 0.0 }
  0xef   : > { %v490_v28 = vadd.f32 %v489_v27, %v488_v24 }
  0xf0   : > { %v1255_v30 = vpop.f32.mrb[4].mxu0 }
  0xf1   : > { %v466_v31 = vpop.f32.mrb[5].mxu0  ;;  %v492_v32 = vadd.f32 %v491_v29, %v490_v28  ;;  %v495_v35 = vsel %vm485_vm2, %v1255_v30, 0.0 }
  0xf2   : > { %v493_v33 = vsel %vm485_vm2, %v466_v31, 0.0 }
  0xf3   : > { %v494_v34 = vadd.f32 %v493_v33, %v492_v32 }
  0xf4   : > { %v1258_v36 = vpop.f32.mrb[6].mxu0 }
  0xf5   : > { %v476_v37 = vpop.f32.mrb[7].mxu0  ;;  %v496_v38 = vadd.f32 %v495_v35, %v494_v34  ;;  %v499_v41 = vsel %vm485_vm2, %v1258_v36, 0.0 }
  0xf6   : > { %v497_v39 = vsel %vm485_vm2, %v476_v37, 0.0 }
  0xf7   : > { %v498_v40 = vadd.f32 %v497_v39, %v496_v38  ;;  %v1347_v38 = vld [vmem:[%s1650_s5] sm:$0xff]   ;;  %v1348_v39 = vld [vmem:[%s1650_s5 + $0x8] sm:$0xff]  }
  0xf9   : > { %v500_v42 = vadd.f32 %v499_v41, %v498_v40 }
  0xfb   : > { %v501_v43 = vrot.slane %v500_v42, 4 }
  0xfd   : > { %v502_v44 = vadd.f32 %v501_v43, %v500_v42 }
  0xff   : > { %v503_v45 = vrot.slane %v502_v44, 2 }
 0x101   : > { %v504_v46 = vadd.f32 %v503_v45, %v502_v44  ;;  %v1157_v45 = vld [vmem:[%s1648_s3] ss:$0 sm:$0xff] }
 0x103   : > { %v505_v47 = vrot.slane %v504_v46, 1 }
 0x105   : > { %v506_v48 = vadd.f32 %v505_v47, %v504_v46 }
 0x107   : > { %v507_v49 = vmul.f32 0.00390625, %v506_v48 }
 0x109   : > { %1262 = vmatmul.mubr.msk.f32.vlgmr.msra.gmra.mrb[0].mxu1 %vm485_vm2, %v507_v49 }
 0x10a   : > { %1319 = vmatpush3.bf16.msra.mxu1 %v1444_v3 }
 0x10b   : > { %1318 = vmatprep.subr.bf16.mxu1 %v1449_v5 }
 0x10e   : > { %1320 = vmatpush3.bf16.msra.mxu1 %v1449_v5 }
 0x10f   : > { %1289 = vmatprep.subr.bf16.mxu1 %v1347_v38 }
 0x1dc   : > { %v578_v53 = vpop.f32.mrb[0].mxu1 }
 0x1dd   : > { %v585_v54 = vrot.slane %v578_v53, %v584_v52  ;;  %v1263_v55 = vpop.f32.mrb[1].mxu1 }
 0x1df   : > { %v1533_v56 = vsub.f32 %v1188_v8, %v585_v54  ;;  %v1537_v57 = vsub.f32 %v1196_v13, %v585_v54  ;;  %v1541_v58 = vsub.f32 %v1189_v9, %v585_v54  ;;  %v1543_v59 = vsub.f32 %v1197_v15, %v585_v54 }
 0x1e0   : > { %v1547_v60 = vsub.f32 %v1192_v10, %v585_v54  ;;  %v1549_v61 = vsub.f32 %v1200_v16, %v585_v54  ;;  %v589_v2 = vsub.f32 %v1193_v12, %v585_v54  ;;  %v1563_v3 = vsub.f32 %v1201_v17, %v585_v54 }
 0x1e1   : > { %v594_v62 = vmul.f32 %v1533_v56, %v1533_v56  ;;  %v598_v63 = vmul.f32 %v1537_v57, %v1537_v57  ;;  %v595_v0 = vmul.f32 %v1541_v58, %v1541_v58  ;;  %v599_v1 = vmul.f32 %v1543_v59, %v1543_v59 }
 0x1e2   : > { %v596_v4 = vmul.f32 %v1547_v60, %v1547_v60  ;;  %v600_v5 = vmul.f32 %v1549_v61, %v1549_v61  ;;  %v597_v6 = vmul.f32 %v589_v2, %v589_v2  ;;  %v601_v7 = vmul.f32 %v1563_v3, %v1563_v3 }
 0x1e3   : > { %1272 = vmatprep.mubr.msk.f32.mxu0 %vm355_vm0, %v594_v62  ;;  %1278 = vmatprep.mubr.msk.f32.mxu1 %vm355_vm0, %v598_v63 }
 0x1e4   : > { %1273 = vmatmul.mubr.msk.f32.vlgmr.msra.gmra.mrb[8].mxu0 %vm355_vm0, %v595_v0  ;;  %1279 = vmatmul.mubr.msk.f32.vlgmr.msra.gmra.mrb[2].mxu1 %vm355_vm0, %v599_v1 }
 0x1e5   : > { %1275 = vmatprep.mubr.msk.f32.mxu0 %vm355_vm0, %v596_v4  ;;  %1281 = vmatprep.mubr.msk.f32.mxu1 %vm355_vm0, %v600_v5 }
 0x1e6   : > { %1285 = vmatpush3.msra.mxu0 %v1506_v18  ;;  %1290 = vmatpush3.bf16.msra.mxu1 %v1347_v38 }
 0x1e7   : > { %1291 = vmatprep.subr.bf16.mxu1 %v1348_v39 }
 0x1e8   : > { %1276 = vmatmul.mubr.msk.f32.gmra.mrb[10].mxu0 %vm355_vm0, %v597_v6  ;;  %1282 = vmatmul.mubr.msk.f32.gmra.mrb[4].mxu1 %vm355_vm0, %v601_v7 }
 0x1e9   : > { %1286 = vmatprep.mubr.msk.f32.mxu0 %vm1376_vm1, %v1375_v19 }
 0x1ea   : > { %1292 = vmatpush3.bf16.msra.mxu1 %v1348_v39 }
 0x2b7   : > { %v1274_v8 = vpop.f32.mrb[8].mxu0  ;;  %v1280_v9 = vpop.f32.mrb[2].mxu1 }
 0x2b8   : > { %v732_v10 = vsel %vm485_vm2, %v1274_v8, 0.0  ;;  %v692_v11 = vpop.f32.mrb[9].mxu0  ;;  %v712_v12 = vpop.f32.mrb[3].mxu1  ;;  %v740_v25 = vsel %vm485_vm2, %v1280_v9, 0.0 }
 0x2b9   : > { %v731_v13 = vsel %vm485_vm2, %v692_v11, 0.0  ;;  %v738_v19 = vsel %vm485_vm2, %v712_v12, 0.0 }
 0x2ba   : > { %v733_v14 = vadd.f32 %v732_v10, %v731_v13 }
 0x2bb   : > { %v1277_v15 = vpop.f32.mrb[10].mxu0  ;;  %v1283_v16 = vpop.f32.mrb[4].mxu1 }
 0x2bc   : > { %v702_v17 = vpop.f32.mrb[11].mxu0  ;;  %v722_v18 = vpop.f32.mrb[5].mxu1  ;;  %v736_v22 = vsel %vm485_vm2, %v1277_v15, 0.0  ;;  %v744_v29 = vsel %vm485_vm2, %v1283_v16, 0.0  ;;  %v1159_v15 = vld [vmem:[%s1651_s6] ss:$0 sm:$0xff] }
 0x2bd   : > { %v734_v20 = vsel %vm485_vm2, %v702_v17, 0.0  ;;  %v742_v27 = vsel %vm485_vm2, %v722_v18, 0.0 }
 0x2be   : > { %v735_v21 = vadd.f32 %v734_v20, %v733_v14 }
 0x2c0   : > { %v737_v23 = vadd.f32 %v736_v22, %v735_v21 }
 0x2c2   : > { %v739_v24 = vadd.f32 %v738_v19, %v737_v23 }
 0x2c4   : > { %v741_v26 = vadd.f32 %v740_v25, %v739_v24 }
 0x2c6   : > { %v743_v28 = vadd.f32 %v742_v27, %v741_v26 }
 0x2c8   : > { %v745_v30 = vadd.f32 %v744_v29, %v743_v28 }
 0x2ca   : > { %v746_v31 = vrot.slane %v745_v30, 4 }
 0x2cc   : > { %v747_v32 = vadd.f32 %v746_v31, %v745_v30 }
 0x2ce   : > { %v748_v33 = vrot.slane %v747_v32, 2 }
 0x2d0   : > { %v749_v34 = vadd.f32 %v748_v33, %v747_v32 }
 0x2d2   : > { %v750_v35 = vrot.slane %v749_v34, 1 }
 0x2d4   : > { %v751_v36 = vadd.f32 %v750_v35, %v749_v34 }
 0x2d6   : > { %v752_v37 = vmul.f32 0.00390625, %v751_v36 }
 0x2d8   : > { %1287 = vmatmul.mubr.msk.f32.vlgmr.msra.gmra.mrb[12].mxu0 %vm485_vm2, %v752_v37 }
 0x3ab   : > { %v822_v40 = vpop.f32.mrb[12].mxu0 }
 0x3ac   : > { %v823_v41 = vadd.f32 1e-06, %v822_v40  ;;  %v1288_v42 = vpop.f32.mrb[13].mxu0 }
 0x3ae   : > { %1349 = vrsqrt.f32 %v823_v41 }
 0x3b8   : > { %v1350_v43 = vpop.eup %1349 }
 0x3b9   : > { %v830_v44 = vrot.slane %v1350_v43, %v584_v52 }
 0x3bb   : > { %v833_v46 = vmul.f32 %v830_v44, %v1547_v60  ;;  %v834_v47 = vmul.f32 %v830_v44, %v589_v2  ;;  %v831_v48 = vmul.f32 %v830_v44, %v1533_v56  ;;  %v832_v49 = vmul.f32 %v830_v44, %v1541_v58 }
 0x3bc   : > { %v835_v53 = vmul.f32 %v830_v44, %v1537_v57  ;;  %v836_v51 = vmul.f32 %v830_v44, %v1543_v59  ;;  %v837_v52 = vmul.f32 %v830_v44, %v1549_v61  ;;  %v838_v54 = vmul.f32 %v830_v44, %v1563_v3 }
 0x3bd   : > { %v848_v55 = vmul.f32 %v1157_v45, %v833_v46  ;;  %v849_v62 = vmul.f32 %v1157_v45, %v834_v47  ;;  %v846_v60 = vmul.f32 %v1157_v45, %v831_v48  ;;  %v847_v63 = vmul.f32 %v1157_v45, %v832_v49 }
 0x3be   : > { %v850_v0 = vmul.f32 %v1157_v45, %v835_v53  ;;  %v851_v56 = vmul.f32 %v1157_v45, %v836_v51  ;;  %v852_v1 = vmul.f32 %v1157_v45, %v837_v52  ;;  %v853_v58 = vmul.f32 %v1157_v45, %v838_v54 }
 0x3bf   : > { %v861_v2 = vadd.f32 %v1158_v50, %v846_v60  ;;  %v862_v4 = vadd.f32 %v1158_v50, %v847_v63  ;;  %v863_v5 = vadd.f32 %v1158_v50, %v848_v55  ;;  %v864_v6 = vadd.f32 %v1158_v50, %v849_v62 }
 0x3c0   : > { %v865_v7 = vadd.f32 %v1158_v50, %v850_v0  ;;  %v866_v57 = vadd.f32 %v1158_v50, %v851_v56  ;;  %v867_v8 = vadd.f32 %v1158_v50, %v852_v1  ;;  %v868_v59 = vadd.f32 %v1158_v50, %v853_v58 }
 0x3c1   : > { %v869_v9 = vpack.c.bf16 %v862_v4, %v861_v2  ;;  %v870_v61 = vpack.c.bf16 %v864_v6, %v863_v5 }
 0x3c2   : > { %v871_v10 = vpack.c.bf16 %v866_v57, %v865_v7  ;;  %v872_v3 = vpack.c.bf16 %v868_v59, %v867_v8 }
 0x3c3   : > { %873 = vst.msk [vmem:[#allocation2] sm:$0xff] %vm355_vm0, %v869_v9  ;;  %874 = vst.msk [vmem:[#allocation2 + $0x8] sm:$0xff] %vm355_vm0, %v870_v61 }
 0x3c4   : > { %875 = vst.msk [vmem:[#allocation2 + $0x10] sm:$0xff] %vm355_vm0, %v871_v10  ;;  %876 = vst.msk [vmem:[#allocation2 + $0x18] sm:$0xff] %vm355_vm0, %v872_v3 }
 0x3ca   : > { %v877_v11 = vld [vmem:[#allocation2] sm:$0xff]  ;;  %v878_v12 = vld [vmem:[#allocation2 + $0x8] sm:$0xff] }
 0x3cb   : > { %1293 = vmatprep.mubr.msk.bf16.mxu1 %vm355_vm0, %v877_v11  ;;  %v879_v13 = vld [vmem:[#allocation2 + $0x10] sm:$0xff]  ;;  %v880_v14 = vld [vmem:[#allocation2 + $0x18] sm:$0xff] }
 0x3cc   : > { %1294 = vmatmul.mubr.msk.bf16.vlgmr.msra.gmra.mrb[8].mxu1 %vm355_vm0, %v878_v12 }
 0x3cd   : > { %1297 = vmatprep.mubr.msk.bf16.mxu1 %vm355_vm0, %v879_v13 }
 0x3d4   : > { %1298 = vmatmul.mubr.msk.bf16.gmra.mrb[12].mxu1 %vm355_vm0, %v880_v14 }
 0x49f   : > { %v1295_v16 = vpop.f32.mrb[8].mxu1 }
 0x4a0   : > { %v960_v17 = vadd.f32 %v1295_v16, %v1159_v15  ;;  %v951_v18 = vpop.f32.mrb[9].mxu1 }
 0x4a1   : > { %v952_v20 = vadd.f32 %v1159_v15, %v951_v18  ;;  %v1296_v21 = vpop.f32.mrb[10].mxu1 }
 0x4a2   : > { %v1180_v22 = vpack.c.bf16 %v960_v17, %v960_v17  ;;  %v963_v23 = vadd.f32 %v1296_v21, %v1159_v15  ;;  %v954_v19 = vpop.f32.mrb[11].mxu1 }
 0x4a3   : > { %v1178_v24 = vpack.c.bf16 %v952_v20, %v952_v20  ;;  %v955_v25 = vadd.f32 %v1159_v15, %v954_v19 }
 0x4a4   : > { %1017 = vst.msk [vmem:[%s329_s12 + $0x8] sm:$0xf] %vm1014_vm3, %v1180_v22  ;;  %v1181_v26 = vpack.c.bf16 %v963_v23, %v963_v23 }
 0x4a5   : > { %1015 = vst.msk [vmem:[%s329_s12] sm:$0xf] %vm1014_vm3, %v1178_v24  ;;  %v1179_v27 = vpack.c.bf16 %v955_v25, %v955_v25 }
 0x4a6   : > { %1018 = vst.msk [vmem:[%s329_s12 + $0xc] sm:$0xf] %vm1014_vm3, %v1181_v26 }
 0x4a7   : > { %1016 = vst.msk [vmem:[%s329_s12 + $0x4] sm:$0xf] %vm1014_vm3, %v1179_v27  ;;  %v1299_v28 = vpop.f32.mrb[12].mxu1 }
 0x4a8   : > { %v976_v29 = vadd.f32 %v1299_v28, %v1159_v15  ;;  %v967_v30 = vpop.f32.mrb[13].mxu1 }
 0x4a9   : > { %v968_v31 = vadd.f32 %v1159_v15, %v967_v30  ;;  %v1300_v32 = vpop.f32.mrb[14].mxu1 }
 0x4aa   : > { %v1184_v33 = vpack.c.bf16 %v976_v29, %v976_v29  ;;  %v979_v34 = vadd.f32 %v1300_v32, %v1159_v15  ;;  %v970_v35 = vpop.f32.mrb[15].mxu1 }
 0x4ab   : > { %v1182_v36 = vpack.c.bf16 %v968_v31, %v968_v31  ;;  %v971_v37 = vadd.f32 %v1159_v15, %v970_v35 }
 0x4ac   : > { %1021 = vst.msk [vmem:[%s329_s12 + $0x18] sm:$0xf] %vm1014_vm3, %v1184_v33  ;;  %v1185_v38 = vpack.c.bf16 %v979_v34, %v979_v34 }
 0x4ad   : > { %1019 = vst.msk [vmem:[%s329_s12 + $0x10] sm:$0xf] %vm1014_vm3, %v1182_v36  ;;  %v1183_v39 = vpack.c.bf16 %v971_v37, %v971_v37 }
 0x4ae   : > { %1022 = vst.msk [vmem:[%s329_s12 + $0x1c] sm:$0xf] %vm1014_vm3, %v1185_v38 }
 0x4af   : > { %1020 = vst.msk [vmem:[%s329_s12 + $0x14] sm:$0xf] %vm1014_vm3, %v1183_v39 }
 0x4b0 PF: > { %s17_s26 = sadd.s32 1, %s1373_s26   ;;  %s1653_s24 = smov %s1369_s25 }
 0x4b1   : > { %p14_p5 = scmp.ge.s32.totalorder %s17_s26, 4   ;;  %s1654_s25 = smov %s1656_s27 }
 0x4b3   :  { %16 = sbr.rel (!%p14_p5) target bundleno = 2 (0x2), region = 88 }

// kernel: unet_mid_block_cross_attn.25
= control target key start
LH: loop header
LB: loop body
LE: loop exit
PB: predicated region body
PF: predicated region fallthrough
CT: control target
= control target key end

     0   :  { %s2273_s15 = smov 0   ;;  %s2275_s16 = smov 0   ;;  %s2662_s0 = inlined_call_operand.vmem [shape: bf16[2,82,32], index: 0, kind: input, shape index: {}]   ;;  %s2663_s1 = inlined_call_operand.vmem [shape: bf16[3,3,32,32], index: 1, kind: input, shape index: {}]   ;;  %s2664_s2 = inlined_call_operand.vmem [shape: f32[1,32], index: 2, kind: input, shape index: {}]   ;;  %s2665_s3 = inlined_call_operand.vmem [shape: bf16[2,64,32], index: 3, kind: input, shape index: {}, may-alias: {3,4}]   ;;  %s2666_s4 = inlined_call_operand.vmem [shape: bf16[2,64,32], index: 4, kind: output, shape index: {}, may-alias: {3,4}]  }
   0x1   :  { %s2277_s17 = smov 0  }
   0x2 LB: > { %s23_s18 = sadd.s32 1, %s2242_s16  ;;  %p1781_p0 = scmp.ge.s32.totalorder %s2246_s17, 1  ;;  %s2246_s17 = sphi %s2277_s17, %s14_s17   ;;  %s2242_s16 = sphi %s2275_s16, %s2700_s16   ;;  %s2238_s15 = sphi %s2273_s15, %s2699_s15  }
   0x3   : > { %p24_p1 = scmp.ge.s32.totalorder %s23_s18, 2  ;;  %p208_p2 = scmp.lt.s32.totalorder %s2246_s17, 3 }
   0x5   : > { %s2702_s18 = smov (%p24_p1, %s23_s18), 0  ;;  %p209_p3 = pnand %p1781_p0, %p208_p2 }
   0x6   : > { %v2179_v0 = vld [vmem:[%s2663_s1 + $0x30] sm:$0xff] (!%p209_p3)   ;;  %p252_p4 = scmp.lt.s32.totalorder (!%p209_p3), %s2238_s15, 1  ;;  %v2180_v1 = vld [vmem:[%s2663_s1] sm:$0xff] (!%p209_p3)   ;;  %v2181_v2 = vld [vmem:[%s2663_s1 + $0x38] sm:$0xff] (!%p209_p3)   ;;  %vm436_vm0 = vcmask (!%p209_p3), 261120   ;;  %vm1233_vm2 = vcmask (!%p209_p3), 1046528  }
   0x7   : > { %212 = sbr.rel (%p209_p3) target bundleno = 316 (0x13c), region = 36  ;;  %1994 = vmatprep.subr.bf16.mxu1 (!%p209_p3), %v2179_v0  ;;  %2006 = vmatprep.subr.bf16.mxu0 (!%p209_p3), %v2180_v1  ;;  %v2182_v3 = vld [vmem:[%s2663_s1 + $0x8] sm:$0xff] (!%p209_p3)   ;;  %v2188_v4 = vld [vmem:[%s2663_s1 + $0x60] sm:$0xff] (!%p209_p3)   ;;  %v2196_v24 = vld [vmem:[%s2663_s1 + $0x50] sm:$0xff] (!%p209_p3)   ;;  %vm786_vm1 = vsmask.f32 (!%p209_p3), 7424 }
   0x8   : > { %1995 = vmatpush3.bf16.msra.mxu1 (!%p209_p3), %v2179_v0  ;;  %2007 = vmatpush3.bf16.msra.mxu0 (!%p209_p3), %v2180_v1  ;;  %v2190_v17 = vld [vmem:[%s2663_s1 + $0x68] sm:$0xff] (!%p209_p3)   ;;  %v2202_v23 = vld [vmem:[%s2663_s1 + $0x40] sm:$0xff] (!%p209_p3)   ;;  %v2203_v38 = vld [vmem:[%s2663_s1 + $0x58] sm:$0xff] (!%p209_p3)   ;;  %vm1643_vm15 = vcmask (!%p209_p3), 257024  }
   0x9   : > { %1996 = vmatprep.subr.bf16.mxu1 (!%p209_p3), %v2181_v2  ;;  %2008 = vmatprep.subr.bf16.mxu0 (!%p209_p3), %v2182_v3  ;;  %v2208_v50 = vld [vmem:[%s2663_s1 + $0x20] sm:$0xff] (!%p209_p3)   ;;  %v2204_v58 = vld [vmem:[%s2663_s1 + $0x48] sm:$0xff] (!%p209_p3)  }
   0xc   : > { %1997 = vmatpush3.bf16.msra.mxu1 (!%p209_p3), %v2181_v2  ;;  %2009 = vmatpush3.bf16.msra.mxu0 (!%p209_p3), %v2182_v3  ;;  %v2207_v2 = vld [vmem:[%s2663_s1 + $0x10] sm:$0xff] (!%p209_p3)  }
   0xd   : > { %2102 = vmatprep.subr.bf16.mxu1 (!%p209_p3), %v2180_v1  ;;  %2018 = vmatprep.subr.bf16.mxu0 (!%p209_p3), %v2188_v4 }
   0xe   : > { %s2704_s15 = smov (!%p252_p4, %s2238_s15), 1 }
   0xf   : > { %s2154_s27 = smul.u32 44, %s2704_s15 }
  0x11   : > { %s2312_s6 = scalar_lea.vmem %s2662_s0, %s2154_s27 }
  0x12   : > { %v2315_v5 = vld [vmem:[%s2312_s6 + $0x4] sm:$0xf]  ;;  %v388_v6 = vld [vmem:[%s2312_s6 + $0x8] sm:$0xf]  ;;  %v389_v7 = vld [vmem:[%s2312_s6 + $0xc] sm:$0xf] }
  0x13   : > { %v390_v8 = vld [vmem:[%s2312_s6 + $0x10] sm:$0xf]  ;;  %v1791_v9 = vcombine.low %v2315_v5, %v388_v6  ;;  %v2321_v10 = vcombine.low %v388_v6, %v389_v7  ;;  %v386_v11 = vld [vmem:[%s2312_s6] sm:$0xf]  ;;  %v391_v14 = vld [vmem:[%s2312_s6 + $0x14] sm:$0xf] }
  0x14   : > { %v1792_v12 = vcombine.low %v389_v7, %v390_v8  ;;  %v1801_v13 = vcombine.low %v386_v11, %v2315_v5  ;;  %v392_v15 = vld [vmem:[%s2312_s6 + $0x18] sm:$0xf]  ;;  %v609_v18 = vld [vmem:[%s2312_s6 + $0x8] sm:$0xf]  ;;  %v610_v19 = vld [vmem:[%s2312_s6 + $0xc] sm:$0xf]  ;;  %v2348_v27 = vcombine.low %v390_v8, %v391_v14 }
  0x15   : > { %1998 = vmatprep.mubr.msk.bf16.mxu1 %vm436_vm0, %v1791_v9  ;;  %v1793_v16 = vcombine.low %v391_v14, %v392_v15  ;;  %v393_v20 = vld [vmem:[%s2312_s6 + $0x1c] sm:$0xf]  ;;  %v398_v21 = vld [vmem:[%s2312_s6 + $0x20] sm:$0xf]  ;;  %v1815_v22 = vcombine.low %v609_v18, %v610_v19  ;;  %v611_v26 = vld [vmem:[%s2312_s6 + $0x10] sm:$0xf] }
  0x16   : > { %2010 = vmatprep.mubr.msk.bf16.mxu0 %vm436_vm0, %v1801_v13  ;;  %1999 = vmatmul.mubr.msk.bf16.vlgmr.msra.gmra.mrb[0].mxu1 %vm436_vm0, %v1792_v12  ;;  %v1794_v25 = vcombine.low %v393_v20, %v398_v21  ;;  %v770_v28 = vld [vmem:[%s2312_s6 + $0x4] sm:$0xf]  ;;  %v612_v29 = vld [vmem:[%s2312_s6 + $0x14] sm:$0xf]  ;;  %v2352_v30 = vcombine.low %v610_v19, %v611_v26  ;;  %v613_v31 = vld [vmem:[%s2312_s6 + $0x18] sm:$0xf]  ;;  %v2374_v51 = vcombine.low %v392_v15, %v393_v20 }
  0x17   : > { %2011 = vmatmul.mubr.msk.bf16.vlgmr.msra.gmra.mrb[0].mxu0 %vm436_vm0, %v2321_v10  ;;  %2104 = vmatpush3.bf16.msra.mxu1 %v2180_v1  ;;  %v1833_v32 = vcombine.low %v770_v28, %v609_v18  ;;  %v614_v33 = vld [vmem:[%s2312_s6 + $0x1c] sm:$0xf]  ;;  %v1816_v35 = vcombine.low %v611_v26, %v612_v29  ;;  %v1224_v36 = vld [vmem:[%s2312_s6 + $0x4] sm:$0xe]  ;;  %v1835_v43 = vcombine.low %v612_v29, %v613_v31  ;;  %v615_v44 = vld [vmem:[%s2312_s6 + $0x20] sm:$0xf] }
  0x18   : > { %2019 = vmatpush3.bf16.msra.mxu0 %v2188_v4  ;;  %2002 = vmatprep.mubr.msk.bf16.mxu1 %vm436_vm0, %v1793_v16  ;;  %v1817_v37 = vcombine.low %v613_v31, %v614_v33  ;;  %v795_v39 = vshll.u32 %v2352_v30, 16  ;;  %v1875_v42 = vcombine.low %v1224_v36, %v609_v18  ;;  %v616_v45 = vld [vmem:[%s2312_s6 + $0x24] sm:$0xf]  ;;  %v763_v46 = vld [vmem:[%s2312_s6] sm:$0xf]  ;;  %v2369_v47 = vcombine.low %v614_v33, %v615_v44  ;;  %v2210_v19 = vld [vmem:[%s2663_s1 + $0x18] sm:$0xff]  }
  0x19   : > { %2020 = vmatprep.subr.bf16.mxu0 %v2190_v17  ;;  %2103 = vmatprep.subr.bf16.mxu1 %v2182_v3  ;;  %v790_v34 = vshll.u32 %v1833_v32, 16  ;;  %v788_v40 = vshrl.u32 %v1833_v32, 16  ;;  %v1235_v53 = vrot.slane %v2352_v30, 1  ;;  %v1818_v54 = vcombine.low %v615_v44, %v616_v45  ;;  %v2209_v63 = vld [vmem:[%s2312_s6 + $0x24] ss:$0 sps:$4 sm:$0x11]  }
  0x1a   : > { %2022 = vmatprep.mubr.msk.bf16.mxu0 %vm436_vm0, %v1815_v22  ;;  %v797_v49 = vrot.slane %v795_v39, 1  ;;  %v1234_v52 = vrot.slane %v1875_v42, 1  ;;  %v799_v55 = vshrl.u32 %v2352_v30, 16  ;;  %v803_v56 = vshll.u32 %v1835_v43, 16  ;;  %v1218_v9 = vld [vmem:[%s2312_s6] sm:$0xe] }
  0x1b   : > { %2105 = vmatpush3.bf16.msra.mxu1 %v2182_v3  ;;  %v792_v41 = vrot.slane %v790_v34, 1  ;;  %v1844_v57 = vcombine.low %v763_v46, %v2315_v5  ;;  %v807_v60 = vshrl.u32 %v1835_v43, 16  ;;  %v811_v61 = vshll.u32 %v2369_v47, 16  ;;  %v2211_v22 = vld [vmem:[%s2663_s1 + $0x28] sm:$0xff]   ;;  %v2213_v29 = vld [vmem:[%s2663_s1 + $0x70] sm:$0xff]   ;;  %v2214_v31 = vld [vmem:[%s2663_s1 + $0x80] sm:$0xff]  }
  0x1c   : > { %2021 = vmatpush3.bf16.msra.mxu0 %v2190_v17  ;;  %2030 = vmatprep.subr.bf16.mxu1 %v2202_v23  ;;  %v1236_v62 = vsel %vm1233_vm2, %v1234_v52, %v1235_v53  ;;  %v801_v0 = vor.u32 %v799_v55, %v797_v49  ;;  %v805_v1 = vrot.slane %v803_v56, 1  ;;  %v1237_v3 = vrot.slane %v1835_v43, 1  ;;  %v1040_v32 = vld [vmem:[%s2312_s6 + $0x8] sm:$0xf]  ;;  %v1041_v33 = vld [vmem:[%s2312_s6 + $0xc] sm:$0xf] }
  0x1d   : > { %2066 = vmatprep.subr.bf16.mxu0 %v2196_v24  ;;  %v793_v48 = vor.u32 %v792_v41, %v788_v40  ;;  %v921_v4 = vshll.u32 %v1844_v57, 16  ;;  %v813_v7 = vrot.slane %v811_v61, 1  ;;  %v1239_v8 = vrot.slane %v2369_v47, 1  ;;  %v2215_v44 = vld [vmem:[%s2312_s6 + $0x20] ss:$0 sps:$4 sm:$0x11]  }
  0x1e   : > { %2003 = vmatmul.mubr.msk.bf16.gmra.mrb[4].mxu1 %vm436_vm0, %v1794_v25  ;;  %v809_v6 = vor.u32 %v807_v60, %v805_v1  ;;  %v806_v11 = vsel %vm786_vm1, %v801_v0, %v805_v1  ;;  %v815_v12 = vshrl.u32 %v2369_v47, 16  ;;  %v819_v13 = vshll.u32 %v2209_v63, 16  ;;  %v2219_v46 = vld [vmem:[%s2312_s6 + $0x10] sm:$0xff]   ;;  %v1433_v52 = vld [vmem:[%s2312_s6 + $0x8] sm:$0xe]  ;;  %v2216_v60 = vld [vmem:[%s2663_s1 + $0x78] sm:$0xff]  }
  0x1f   : > { %2014 = vmatprep.mubr.msk.bf16.mxu1 %vm436_vm0, %v2348_v27  ;;  %v798_v59 = vsel %vm786_vm1, %v793_v48, %v797_v49  ;;  %v1238_v14 = vsel %vm1233_vm2, %v1235_v53, %v1237_v3  ;;  %v919_v15 = vshrl.u32 %v1844_v57, 16  ;;  %v923_v16 = vrot.slane %v921_v4, 1 }
  0x20   : > { %v925_v17 = vshll.u32 %v2321_v10, 16  ;;  %v814_v18 = vsel %vm786_vm1, %v809_v6, %v813_v7  ;;  %v1882_v20 = vcombine.low %v1218_v9, %v2315_v5  ;;  %v1240_v21 = vsel %vm1233_vm2, %v1237_v3, %v1239_v8  ;;  %v2222_v6 = vld [vmem:[%s2312_s6 + $0x20] sm:$0xff]  }
  0x21   : > { %v1241_v25 = vrot.slane %v2209_v63, 1  ;;  %v924_v5 = vor.u32 %v923_v16, %v919_v15  ;;  %v1336_v28 = vrot.slane %v2321_v10, 1  ;;  %v929_v34 = vshrl.u32 %v2321_v10, 16  ;;  %v2221_v63 = vld [vmem:[%s2312_s6 + $0x18] sm:$0xff]  }
  0x22   : > { %v927_v26 = vrot.slane %v925_v17, 1  ;;  %v1335_v30 = vrot.slane %v1882_v20, 1  ;;  %v932_v36 = vshll.u32 %v2348_v27, 16  ;;  %v1856_v39 = vcombine.low %v1040_v32, %v1041_v33  ;;  %v2223_v20 = vld [vmem:[%s2312_s6 + $0x28] ss:$0 sps:$4 sm:$0x11]  }
  0x23   : > { %2023 = vmatmul.mubr.msk.bf16.vlgmr.msra.gmra.mrb[0].mxu0 %vm436_vm0, %v1816_v35  ;;  %v936_v10 = vshrl.u32 %v2348_v27, 16  ;;  %v939_v41 = vshll.u32 %v2374_v51, 16  ;;  %v1338_v45 = vrot.slane %v2348_v27, 1  ;;  %v947_v55 = vshll.u32 %v2215_v44, 16  ;;  %s1911_s6 = sshll.u32 %s2704_s15, 5 }
  0x24   : > { %2067 = vmatpush3.bf16.msra.mxu0 %v2196_v24  ;;  %2026 = vmatprep.mubr.msk.bf16.mxu0 %vm436_vm0, %v1817_v37  ;;  %v821_v24 = vrot.slane %v819_v13, 1  ;;  %v1242_v37 = vsel %vm1233_vm2, %v1239_v8, %v1241_v25  ;;  %v1337_v40 = vsel %vm1233_vm2, %v1335_v30, %v1336_v28  ;;  %v931_v42 = vor.u32 %v929_v34, %v927_v26  ;;  %s2499_s14 = scalar_lea.vmem %s2665_s3, %s1911_s6  ;;  %s2613_s23 = scalar_lea.vmem %s2666_s4, %s1911_s6 }
  0x25   : > { %2068 = vmatprep.subr.bf16.mxu0 %v2203_v38  ;;  %v934_v43 = vrot.slane %v932_v36, 1  ;;  %v1080_v47 = vshll.u32 %v1856_v39, 16  ;;  %v941_v49 = vrot.slane %v939_v41, 1  ;;  %v1339_v56 = vsel %vm1233_vm2, %v1336_v28, %v1338_v45 }
  0x26   : > { %v1078_v57 = vshrl.u32 %v1856_v39, 16  ;;  %v1893_v61 = vcombine.low %v1433_v52, %v1041_v33  ;;  %v949_v1 = vrot.slane %v947_v55, 1  ;;  %v1443_v8 = vrot.slane %v2219_v46, 1 }
  0x27   : > { %v938_v48 = vor.u32 %v936_v10, %v934_v43  ;;  %v935_v53 = vsel %vm786_vm1, %v931_v42, %v934_v43  ;;  %v1093_v9 = vshll.u32 %v2221_v63, 16  ;;  %v1097_v15 = vshrl.u32 %v2221_v63, 16 }
  0x28   : > { %2069 = vmatpush3.bf16.msra.mxu0 %v2203_v38  ;;  %v928_v38 = vsel %vm786_vm1, %v924_v5, %v927_v26  ;;  %v1101_v16 = vshll.u32 %v2222_v6, 16  ;;  %v1105_v5 = vshrl.u32 %v2222_v6, 16  ;;  %v1109_v26 = vshll.u32 %v2223_v20, 16 }
  0x29   : > { %2078 = vmatprep.subr.bf16.mxu0 %v2208_v50  ;;  %v942_v27 = vsel %vm786_vm1, %v938_v48, %v941_v49  ;;  %v1449_v33 = vrot.slane %v2223_v20, 1 }
  0x2a   : > { %2015 = vmatmul.mubr.msk.bf16.vlgmr.msra.gmra.mrb[4].mxu1 %vm436_vm0, %v2374_v51  ;;  %v1111_v32 = vrot.slane %v1109_v26, 1 }
  0x2b   : > { %2027 = vmatmul.mubr.msk.bf16.gmra.mrb[4].mxu0 %vm436_vm0, %v1818_v54  ;;  %2031 = vmatpush3.bf16.msra.mxu1 %v2202_v23  ;;  %v817_v23 = vor.u32 %v815_v12, %v813_v7  ;;  %v943_v54 = vshrl.u32 %v2374_v51, 16  ;;  %v1442_v7 = vrot.slane %v1893_v61, 1  ;;  %v1089_v12 = vshrl.u32 %v2219_v46, 16 }
  0x2c   : > { %2032 = vmatprep.subr.bf16.mxu1 %v2204_v58  ;;  %2034 = vmatprep.mubr.msk.bf16.mxu1 %vm436_vm0, %v798_v59  ;;  %v1085_v59 = vshll.u32 %v2219_v46, 16 }
  0x2d   : > { %2070 = vmatprep.mubr.msk.bf16.mxu0 %vm436_vm0, %v1236_v62  ;;  %v822_v35 = vsel %vm786_vm1, %v817_v23, %v821_v24  ;;  %v945_v0 = vor.u32 %v943_v54, %v941_v49  ;;  %v1444_v17 = vsel %vm1233_vm2, %v1442_v7, %v1443_v8  ;;  %v1103_v23 = vrot.slane %v1101_v16, 1 }
  0x2e   : > { %v1087_v4 = vrot.slane %v1085_v59, 1  ;;  %v1447_v24 = vrot.slane %v2222_v6, 1 }
  0x2f   : > { %2033 = vmatpush3.bf16.msra.mxu1 %v2204_v58  ;;  %v1082_v58 = vrot.slane %v1080_v47, 1 }
  0x30   : > { %2042 = vmatprep.subr.bf16.mxu1 %v2207_v2 }
  0x31   : > { %v1083_v3 = vor.u32 %v1082_v58, %v1078_v57 }
  0x32   : > { %2035 = vmatmul.mubr.msk.bf16.vlgmr.msra.gmra.mrb[8].mxu1 %vm436_vm0, %v806_v11  ;;  %v950_v11 = vsel %vm786_vm1, %v945_v0, %v949_v1 }
  0x33   : > { %2071 = vmatmul.mubr.msk.bf16.vlgmr.msra.gmra.mrb[8].mxu0 %vm436_vm0, %v1238_v14  ;;  %2043 = vmatpush3.bf16.msra.mxu1 %v2207_v2  ;;  %v1342_v2 = vrot.slane %v2215_v44, 1  ;;  %v1088_v14 = vsel %vm786_vm1, %v1083_v3, %v1087_v4 }
  0x34   : > { %2079 = vmatpush3.bf16.msra.mxu0 %v2208_v50  ;;  %2038 = vmatprep.mubr.msk.bf16.mxu1 %vm436_vm0, %v814_v18  ;;  %v1340_v50 = vrot.slane %v2374_v51, 1  ;;  %v2217_v51 = vld [vmem:[%s2663_s1 + $0x88] sm:$0xff]   ;;  %v1095_v18 = vrot.slane %v1093_v9, 1 }
  0x35   : > { %2074 = vmatprep.mubr.msk.bf16.mxu0 %vm436_vm0, %v1240_v21  ;;  %2044 = vmatprep.subr.bf16.mxu1 %v2210_v19  ;;  %v1445_v21 = vrot.slane %v2221_v63, 1 }
  0x36   : > { %2080 = vmatprep.subr.bf16.mxu0 %v2211_v22  ;;  %v1341_v62 = vsel %vm1233_vm2, %v1338_v45, %v1340_v50  ;;  %v1343_v13 = vsel %vm1233_vm2, %v1340_v50, %v1342_v2 }
  0x37   : > { %2045 = vmatpush3.bf16.msra.mxu1 %v2210_v19  ;;  %v1091_v19 = vor.u32 %v1089_v12, %v1087_v4  ;;  %v1446_v28 = vsel %vm1233_vm2, %v1443_v8, %v1445_v21  ;;  %v1448_v30 = vsel %vm1233_vm2, %v1445_v21, %v1447_v24 }
  0x38   : > { %2081 = vmatpush3.bf16.msra.mxu0 %v2211_v22  ;;  %2054 = vmatprep.subr.bf16.mxu1 %v2213_v29  ;;  %v1099_v22 = vor.u32 %v1097_v15, %v1095_v18  ;;  %v2510_v15 = vld [vmem:[%s2499_s14 + $0x8] sm:$0xff]  }
  0x39   : > { %2090 = vmatprep.subr.bf16.mxu0 %v2214_v31  ;;  %v1096_v25 = vsel %vm786_vm1, %v1091_v19, %v1095_v18 }
  0x3a   : > { %2039 = vmatmul.mubr.msk.bf16.gmra.mrb[12].mxu1 %vm436_vm0, %v822_v35  ;;  %v1450_v35 = vsel %vm1233_vm2, %v1447_v24, %v1449_v33 }
  0x3b   : > { %2075 = vmatmul.mubr.msk.bf16.gmra.mrb[12].mxu0 %vm436_vm0, %v1242_v37  ;;  %2046 = vmatprep.mubr.msk.bf16.mxu1 %vm436_vm0, %v928_v38 }
  0x3c   : > { %2082 = vmatprep.mubr.msk.bf16.mxu0 %vm436_vm0, %v1337_v40 }
  0x42   : > { %2047 = vmatmul.mubr.msk.bf16.vlgmr.msra.gmra.mrb[8].mxu1 %vm436_vm0, %v935_v53 }
  0x43   : > { %2083 = vmatmul.mubr.msk.bf16.vlgmr.msra.gmra.mrb[8].mxu0 %vm436_vm0, %v1339_v56  ;;  %2055 = vmatpush3.bf16.msra.mxu1 %v2213_v29  ;;  %v1104_v29 = vsel %vm786_vm1, %v1099_v22, %v1103_v23 }
  0x44   : > { %2091 = vmatpush3.bf16.msra.mxu0 %v2214_v31  ;;  %2050 = vmatprep.mubr.msk.bf16.mxu1 %vm436_vm0, %v942_v27  ;;  %v1107_v31 = vor.u32 %v1105_v5, %v1103_v23  ;;  %v281_v27 = vlaneseq }
  0x45   : > { %2086 = vmatprep.mubr.msk.bf16.mxu0 %vm436_vm0, %v1341_v62  ;;  %2056 = vmatprep.subr.bf16.mxu1 %v2216_v60 }
  0x46   : > { %2092 = vmatprep.subr.bf16.mxu0 %v2217_v51  ;;  %v1112_v34 = vsel %vm786_vm1, %v1107_v31, %v1111_v32  ;;  %v1928_v31 = vunpack.c.h.bf16 %v2510_v15 }
  0x47   : > { %2057 = vmatpush3.bf16.msra.mxu1 %v2216_v60  ;;  %v282_v60 = vshrl.u32 %v281_v27, 7 }
  0x48   : > { %2093 = vmatpush3.bf16.msra.mxu0 %v2217_v51 }
  0x49   : > { %v284_v61 = vadd.s32 16, %v282_v60  ;;  %v285_v62 = vadd.s32 24, %v282_v60  ;;  %v283_v51 = vadd.s32 8, %v282_v60  ;;  %v288_v63 = vadd.s32 48, %v282_v60 }
  0x4a   : > { %2051 = vmatmul.mubr.msk.bf16.gmra.mrb[12].mxu1 %vm436_vm0, %v950_v11  ;;  %v286_v0 = vadd.s32 32, %v282_v60  ;;  %v289_v1 = vadd.s32 56, %v282_v60  ;;  %v2491_v2 = vadd.s32 40, %v282_v60  ;;  %v294_v4 = vand.u32 7, %v282_v60  ;;  %v1939_v60 = vld [vmem:[%s2499_s14 + $0x18] sm:$0xff]  }
  0x4b   : > { %2087 = vmatmul.mubr.msk.bf16.gmra.mrb[12].mxu0 %vm436_vm0, %v1343_v13  ;;  %2058 = vmatprep.mubr.msk.bf16.mxu1 %vm436_vm0, %v1088_v14  ;;  %v308_v3 = vand.u32 7, %v284_v61  ;;  %v315_v6 = vand.u32 7, %v285_v62  ;;  %v301_v7 = vand.u32 7, %v283_v51  ;;  %v336_v8 = vand.u32 7, %v288_v63  ;;  %v2507_v14 = vld [vmem:[%s2499_s14] sm:$0xff]   ;;  %v1938_v51 = vld [vmem:[%s2499_s14 + $0x10] sm:$0xff]  }
  0x4c   : > { %2094 = vmatprep.mubr.msk.bf16.mxu0 %vm436_vm0, %v1444_v17  ;;  %v322_v9 = vand.u32 7, %v286_v0  ;;  %v343_v11 = vand.u32 7, %v289_v1  ;;  %v329_v12 = vand.u32 7, %v2491_v2  ;;  %vm2512_vm4 = vcmp.eq.s32.totalorder %v294_v4, 0 }
  0x4d   : > { %vm2502_vm3 = vcmp.eq.s32.totalorder %v308_v3, 0  ;;  %vm2516_vm5 = vcmp.eq.s32.totalorder %v315_v6, 0  ;;  %vm2520_vm6 = vcmp.eq.s32.totalorder %v301_v7, 0  ;;  %vm2524_vm7 = vcmp.eq.s32.totalorder %v336_v8, 0 }
  0x4e   : > { %vm2528_vm8 = vcmp.eq.s32.totalorder %v322_v9, 0  ;;  %vm2532_vm9 = vcmp.eq.s32.totalorder %v343_v11, 0  ;;  %vm2536_vm10 = vcmp.eq.s32.totalorder %v329_v12, 0  ;;  %vm2540_vm11 = vcmp.eq.s32.totalorder %v308_v3, 7 }
  0x4f   : > { %vm2544_vm12 = vcmp.eq.s32.totalorder %v294_v4, 7  ;;  %vm2548_vm13 = vcmp.eq.s32.totalorder %v315_v6, 7  ;;  %vm2552_vm14 = vcmp.eq.s32.totalorder %v301_v7, 7  ;;  %vm2586_vm1 = vcmp.eq.s32.totalorder %v322_v9, 7 }
  0x50   : > { %vm2594_vm2 = vcmp.eq.s32.totalorder %v343_v11, 7  ;;  %v1935_v1 = vunpack.c.l.bf16 %v1939_v60  ;;  %v1931_v7 = vunpack.c.l.bf16 %v1938_v51 }
  0x52   : > { %2059 = vmatmul.mubr.msk.bf16.vlgmr.msra.gmra.mrb[8].mxu1 %vm436_vm0, %v1096_v25 }
  0x53   : > { %2095 = vmatmul.mubr.msk.bf16.vlgmr.msra.gmra.mrb[8].mxu0 %vm436_vm0, %v1446_v28  ;;  %2062 = vmatprep.mubr.msk.bf16.mxu1 %vm436_vm0, %v1104_v29  ;;  %v1927_v29 = vunpack.c.l.bf16 %v2510_v15 }
  0x54   : > { %2098 = vmatprep.mubr.msk.bf16.mxu0 %vm436_vm0, %v1448_v30  ;;  %v1923_v30 = vunpack.c.l.bf16 %v2507_v14 }
  0x5a   : > { %2063 = vmatmul.mubr.msk.bf16.gmra.mrb[12].mxu1 %vm436_vm0, %v1112_v34  ;;  %v2564_v34 = vld [vmem:[%s2664_s2] ss:$0 sm:$0xff] }
  0x5b   : > { %2099 = vmatmul.mubr.msk.bf16.gmra.mrb[12].mxu0 %vm436_vm0, %v1450_v35  ;;  %vm2575_vm0 = vcmp.eq.s32.totalorder %v336_v8, 7 }
  0xe9   : > { %v2000_v36 = vpop.f32.mrb[0].mxu1 }
  0xea   : > { %v483_v37 = vpop.f32.mrb[1].mxu1 }
  0xeb   : > { %v2001_v38 = vpop.f32.mrb[2].mxu1 }
  0xec   : > { %v486_v39 = vpop.f32.mrb[3].mxu1 }
  0xf6   : > { %v2024_v40 = vpop.f32.mrb[0].mxu0 }
  0xf7   : > { %v2106_v10 = vadd.f32 %v2024_v40, %v2000_v36  ;;  %v700_v41 = vpop.f32.mrb[1].mxu0 }
  0xf8   : > { %v2477_v42 = vadd.f32 %v700_v41, %v483_v37  ;;  %v2025_v43 = vpop.f32.mrb[2].mxu0  ;;  %v1924_v37 = vunpack.c.h.bf16 %v2507_v14 }
  0xf9   : > { %v2479_v44 = vadd.f32 %v2025_v43, %v2001_v38  ;;  %v703_v45 = vpop.f32.mrb[3].mxu0  ;;  %v749_v26 = vsel %vm2502_vm3, 0.0, %v2106_v10  ;;  %vm2600_vm3 = vcmp.eq.s32.totalorder %v329_v12, 7 }
  0xfa   : > { %v2481_v46 = vadd.f32 %v703_v45, %v486_v39  ;;  %v747_v35 = vsel %vm2512_vm4, 0.0, %v2477_v42 }
  0xfb   : > { %v750_v10 = vsel %vm2516_vm5, 0.0, %v2479_v44 }
  0xfd   : > { %v2016_v47 = vpop.f32.mrb[4].mxu1 }
  0xfe   : > { %v2028_v48 = vpop.f32.mrb[4].mxu0  ;;  %v594_v49 = vpop.f32.mrb[5].mxu1 }
  0xff   : > { %v2483_v50 = vadd.f32 %v2028_v48, %v2016_v47  ;;  %v716_v52 = vpop.f32.mrb[5].mxu0  ;;  %v2017_v53 = vpop.f32.mrb[6].mxu1 }
 0x100   : > { %v2485_v54 = vadd.f32 %v716_v52, %v594_v49  ;;  %v2029_v55 = vpop.f32.mrb[6].mxu0  ;;  %v597_v56 = vpop.f32.mrb[7].mxu1  ;;  %v748_v49 = vsel %vm2520_vm6, 0.0, %v2481_v46 }
 0x101   : > { %v2487_v57 = vadd.f32 %v2029_v55, %v2017_v53  ;;  %v719_v58 = vpop.f32.mrb[7].mxu0  ;;  %v753_v6 = vsel %vm2524_vm7, 0.0, %v2483_v50 }
 0x102   : > { %v2489_v59 = vadd.f32 %v719_v58, %v597_v56  ;;  %v751_v12 = vsel %vm2528_vm8, 0.0, %v2485_v54 }
 0x103   : > { %v754_v50 = vsel %vm2532_vm9, 0.0, %v2487_v57 }
 0x104   : > { %v752_v18 = vsel %vm2536_vm10, 0.0, %v2489_v59 }
 0x125   : > { %v2060_v28 = vpop.f32.mrb[8].mxu1 }
 0x126   : > { %v1212_v32 = vadd.f32 %v2060_v28, %v749_v26  ;;  %v2096_v33 = vpop.f32.mrb[8].mxu0  ;;  %v1171_v36 = vpop.f32.mrb[9].mxu1 }
 0x127   : > { %v1558_v38 = vsel %vm2540_vm11, 0.0, %v2096_v33  ;;  %v1210_v39 = vadd.f32 %v1171_v36, %v747_v35  ;;  %v1509_v40 = vpop.f32.mrb[9].mxu0  ;;  %v2061_v41 = vpop.f32.mrb[10].mxu1  ;;  %v1936_v36 = vunpack.c.h.bf16 %v1939_v60 }
 0x128   : > { %v1566_v45 = vadd.f32 %v1558_v38, %v1212_v32  ;;  %v1556_v42 = vsel %vm2544_vm12, 0.0, %v1509_v40  ;;  %v1213_v47 = vadd.f32 %v2061_v41, %v750_v10  ;;  %v2097_v48 = vpop.f32.mrb[10].mxu0  ;;  %v1174_v52 = vpop.f32.mrb[11].mxu1  ;;  %v1932_v40 = vunpack.c.h.bf16 %v1938_v51 }
 0x129   : > { %v1564_v53 = vadd.f32 %v1556_v42, %v1210_v39  ;;  %v1559_v44 = vsel %vm2548_vm13, 0.0, %v2097_v48  ;;  %v1211_v55 = vadd.f32 %v1174_v52, %v748_v49  ;;  %v1512_v56 = vpop.f32.mrb[11].mxu0 }
 0x12a   : > { %v1581_v27 = vadd.f32 %v2564_v34, %v1566_v45  ;;  %v1567_v61 = vadd.f32 %v1559_v44, %v1213_v47  ;;  %v1557_v62 = vsel %vm2552_vm14, 0.0, %v1512_v56 }
 0x12b   : > { %v1579_v63 = vadd.f32 %v2564_v34, %v1564_v53  ;;  %v1565_v0 = vadd.f32 %v1557_v62, %v1211_v55 }
 0x12c   : > { %v1605_v3 = vadd.f32 %v1927_v29, %v1581_v27  ;;  %v1582_v4 = vadd.f32 %v2564_v34, %v1567_v61 }
 0x12d   : > { %v1603_v8 = vadd.f32 %v1923_v30, %v1579_v63  ;;  %v1580_v9 = vadd.f32 %v2564_v34, %v1565_v0  ;;  %v2064_v11 = vpop.f32.mrb[12].mxu1 }
 0x12e   : > { %v1915_v13 = vpack.c.bf16 %v1605_v3, %v1605_v3  ;;  %v1606_v14 = vadd.f32 %v1928_v31, %v1582_v4  ;;  %v1216_v15 = vadd.f32 %v2064_v11, %v753_v6  ;;  %v2100_v16 = vpop.f32.mrb[12].mxu0  ;;  %v1187_v17 = vpop.f32.mrb[13].mxu1 }
 0x12f   : > { %v1913_v19 = vpack.c.bf16 %v1603_v8, %v1603_v8  ;;  %v1604_v23 = vadd.f32 %v1924_v37, %v1580_v9  ;;  %v1562_v20 = vsel %vm2575_vm0, 0.0, %v2100_v16  ;;  %v1214_v54 = vadd.f32 %v1187_v17, %v751_v12  ;;  %v1525_v24 = vpop.f32.mrb[13].mxu0  ;;  %v2065_v21 = vpop.f32.mrb[14].mxu1 }
 0x130   : > { %1646 = vst.msk [vmem:[%s2613_s23 + $0x8] sm:$0xf] %vm1643_vm15, %v1915_v13  ;;  %v1916_v57 = vpack.c.bf16 %v1606_v14, %v1606_v14  ;;  %v1570_v25 = vadd.f32 %v1562_v20, %v1216_v15  ;;  %v1560_v5 = vsel %vm2586_vm1, 0.0, %v1525_v24  ;;  %v1217_v26 = vadd.f32 %v2065_v21, %v754_v50  ;;  %v2101_v22 = vpop.f32.mrb[14].mxu0  ;;  %v1190_v59 = vpop.f32.mrb[15].mxu1 }
 0x131   : > { %1644 = vst.msk [vmem:[%s2613_s23] sm:$0xf] %vm1643_vm15, %v1913_v19  ;;  %v1914_v28 = vpack.c.bf16 %v1604_v23, %v1604_v23  ;;  %v1568_v29 = vadd.f32 %v1560_v5, %v1214_v54  ;;  %v1563_v30 = vsel %vm2594_vm2, 0.0, %v2101_v22  ;;  %v1215_v31 = vadd.f32 %v1190_v59, %v752_v18  ;;  %v1528_v32 = vpop.f32.mrb[15].mxu0 }
 0x132   : > { %1647 = vst.msk [vmem:[%s2613_s23 + $0xc] sm:$0xf] %vm1643_vm15, %v1916_v57  ;;  %v1585_v33 = vadd.f32 %v2564_v34, %v1570_v25  ;;  %v1571_v35 = vadd.f32 %v1563_v30, %v1217_v26  ;;  %v1561_v37 = vsel %vm2600_vm3, 0.0, %v1528_v32 }
 0x133   : > { %1645 = vst.msk [vmem:[%s2613_s23 + $0x4] sm:$0xf] %vm1643_vm15, %v1914_v28  ;;  %v1583_v38 = vadd.f32 %v2564_v34, %v1568_v29  ;;  %v1569_v39 = vadd.f32 %v1561_v37, %v1215_v31 }
 0x134   : > { %v1609_v10 = vadd.f32 %v1935_v1, %v1585_v33  ;;  %v1586_v41 = vadd.f32 %v2564_v34, %v1571_v35 }
 0x135   : > { %v1607_v43 = vadd.f32 %v1931_v7, %v1583_v38  ;;  %v1584_v45 = vadd.f32 %v2564_v34, %v1569_v39 }
 0x136   : > { %v1919_v42 = vpack.c.bf16 %v1609_v10, %v1609_v10  ;;  %v1610_v47 = vadd.f32 %v1936_v36, %v1586_v41 }
 0x137   : > { %v1917_v48 = vpack.c.bf16 %v1607_v43, %v1607_v43  ;;  %v1608_v49 = vadd.f32 %v1932_v40, %v1584_v45 }
 0x138   : > { %1650 = vst.msk [vmem:[%s2613_s23 + $0x18] sm:$0xf] %vm1643_vm15, %v1919_v42  ;;  %v1920_v52 = vpack.c.bf16 %v1610_v47, %v1610_v47 }
 0x139   : > { %1648 = vst.msk [vmem:[%s2613_s23 + $0x10] sm:$0xf] %vm1643_vm15, %v1917_v48  ;;  %v1918_v53 = vpack.c.bf16 %v1608_v49, %v1608_v49 }
 0x13a   : > { %1651 = vst.msk [vmem:[%s2613_s23 + $0x1c] sm:$0xf] %vm1643_vm15, %v1920_v52 }
 0x13b   : > { %1649 = vst.msk [vmem:[%s2613_s23 + $0x14] sm:$0xf] %vm1643_vm15, %v1918_v53 }
 0x13c PF: > { %s14_s17 = sadd.s32 1, %s2246_s17   ;;  %s2699_s15 = smov %s2242_s16 }
 0x13d   : > { %p11_p5 = scmp.ge.s32.totalorder %s14_s17, 4   ;;  %s2700_s16 = smov %s2702_s18 }
 0x13f   :  { %13 = sbr.rel (!%p11_p5) target bundleno = 2 (0x2), region = 83 }

// kernel: unet_mid_block_cross_attn.27
= control target key start
LH: loop header
LB: loop body
LE: loop exit
PB: predicated region body
PF: predicated region fallthrough
CT: control target
= control target key end

     0   :  { %vm54_vm0 = vcmask 261120   ;;  %vm536_vm1 = vcmask 781312   ;;  %s1085_s0 = inlined_call_operand.vmem [shape: bf16[128,32], index: 0, kind: input, shape index: {}]   ;;  %s1086_s3 = inlined_call_operand.vmem [shape: bf16[32,96], index: 3, kind: input, shape index: {}]   ;;  %s1087_s1 = inlined_call_operand.vmem [shape: f32[1,32], index: 1, kind: input, shape index: {}]   ;;  %s1088_s2 = inlined_call_operand.vmem [shape: f32[1,32], index: 2, kind: input, shape index: {}]   ;;  %s1089_s4 = inlined_call_operand.vmem [shape: bf16[128,96], index: 4, kind: output, shape index: {}]  }
   0x1   :  { %v736_v0 = vld [vmem:[%s1085_s0] sm:$0xff]   ;;  %v750_v6 = vld [vmem:[%s1085_s0 + $0x8] sm:$0xff]   ;;  %v778_v18 = vld [vmem:[%s1085_s0 + $0x10] sm:$0xff]  }
   0x2   :  { %v741_v1 = vld [vmem:[%s1085_s0 + $0x20] sm:$0xff]   ;;  %v603_v2 = vunpack.c.l.bf16 %v736_v0  ;;  %v604_v4 = vunpack.c.h.bf16 %v736_v0  ;;  %v607_v11 = vunpack.c.l.bf16 %v750_v6  ;;  %v608_v12 = vunpack.c.h.bf16 %v750_v6  ;;  %v765_v13 = vld [vmem:[%s1085_s0 + $0x28] sm:$0xff]   ;;  %v791_v23 = vld [vmem:[%s1085_s0 + $0x30] sm:$0xff]  }
   0x3   :  { %v619_v3 = vunpack.c.l.bf16 %v741_v1  ;;  %v620_v5 = vunpack.c.h.bf16 %v741_v1  ;;  %v623_v16 = vunpack.c.l.bf16 %v765_v13  ;;  %v624_v17 = vunpack.c.h.bf16 %v765_v13  ;;  %v804_v28 = vld [vmem:[%s1085_s0 + $0x18] sm:$0xff]  }
   0x4   :  { %v55_v7 = vsel %vm54_vm0, %v603_v2, 0.0  ;;  %v58_v9 = vsel %vm54_vm0, %v604_v4, 0.0  ;;  %v61_v14 = vsel %vm54_vm0, %v607_v11, 0.0  ;;  %v64_v15 = vsel %vm54_vm0, %v608_v12, 0.0  ;;  %v817_v33 = vld [vmem:[%s1085_s0 + $0x38] sm:$0xff]  }
   0x5   :  { %v79_v8 = vsel %vm54_vm0, %v619_v3, 0.0  ;;  %56 = vadd.xlane.f32.xlu0 %v55_v7  ;;  %v82_v10 = vsel %vm54_vm0, %v620_v5, 0.0  ;;  %v85_v19 = vsel %vm54_vm0, %v623_v16, 0.0  ;;  %v88_v20 = vsel %vm54_vm0, %v624_v17, 0.0 }
   0x6   :  { %80 = vadd.xlane.f32.xlu1 %v79_v8  ;;  %v611_v21 = vunpack.c.l.bf16 %v778_v18  ;;  %v612_v22 = vunpack.c.h.bf16 %v778_v18  ;;  %v627_v26 = vunpack.c.l.bf16 %v791_v23  ;;  %v628_v27 = vunpack.c.h.bf16 %v791_v23 }
   0x7   :  { %v615_v31 = vunpack.c.l.bf16 %v804_v28  ;;  %v616_v32 = vunpack.c.h.bf16 %v804_v28  ;;  %v631_v36 = vunpack.c.l.bf16 %v817_v33  ;;  %v632_v37 = vunpack.c.h.bf16 %v817_v33 }
   0x8   :  { %v67_v24 = vsel %vm54_vm0, %v611_v21, 0.0  ;;  %v70_v25 = vsel %vm54_vm0, %v612_v22, 0.0  ;;  %v91_v29 = vsel %vm54_vm0, %v627_v26, 0.0  ;;  %v94_v30 = vsel %vm54_vm0, %v628_v27, 0.0 }
   0x9   :  { %59 = vadd.xlane.f32.xlu0 %v58_v9  ;;  %v73_v34 = vsel %vm54_vm0, %v615_v31, 0.0  ;;  %v76_v35 = vsel %vm54_vm0, %v616_v32, 0.0  ;;  %v97_v38 = vsel %vm54_vm0, %v631_v36, 0.0  ;;  %v100_v39 = vsel %vm54_vm0, %v632_v37, 0.0 }
   0xa   :  { %83 = vadd.xlane.f32.xlu1 %v82_v10 }
   0xd   :  { %62 = vadd.xlane.f32.xlu0 %v61_v14 }
   0xe   :  { %65 = vadd.xlane.f32.xlu1 %v64_v15 }
  0x11   :  { %86 = vadd.xlane.f32.xlu0 %v85_v19 }
  0x12   :  { %89 = vadd.xlane.f32.xlu1 %v88_v20 }
  0x15   :  { %68 = vadd.xlane.f32.xlu0 %v67_v24 }
  0x16   :  { %71 = vadd.xlane.f32.xlu1 %v70_v25 }
  0x19   :  { %92 = vadd.xlane.f32.xlu0 %v91_v29 }
  0x1a   :  { %95 = vadd.xlane.f32.xlu1 %v94_v30 }
  0x1d   :  { %74 = vadd.xlane.f32.xlu0 %v73_v34 }
  0x1e   :  { %77 = vadd.xlane.f32.xlu1 %v76_v35 }
  0x21   :  { %98 = vadd.xlane.f32.xlu0 %v97_v38 }
  0x22   :  { %101 = vadd.xlane.f32.xlu1 %v100_v39 }
  0x92   :  { %v57_v40 = vpop.xlane.xlu0 %56 }
  0x93   :  { %v81_v41 = vpop.xlane.xlu1 %80  ;;  %v104_v42 = vmul.f32 0.03125, %v57_v40 }
  0x94   :  { %v112_v43 = vmul.f32 0.03125, %v81_v41 }
  0x95   :  { %v833_v44 = vsub.f32 %v603_v2, %v104_v42 }
  0x96   :  { %v835_v45 = vsub.f32 %v619_v3, %v112_v43  ;;  %v60_v46 = vpop.xlane.xlu0 %59 }
  0x97   :  { %v84_v47 = vpop.xlane.xlu1 %83  ;;  %v105_v48 = vmul.f32 0.03125, %v60_v46  ;;  %v136_v50 = vmul.f32 %v833_v44, %v833_v44 }
  0x98   :  { %v113_v49 = vmul.f32 0.03125, %v84_v47  ;;  %v144_v51 = vmul.f32 %v835_v45, %v835_v45 }
  0x99   :  { %v843_v52 = vsub.f32 %v604_v4, %v105_v48  ;;  %v152_v54 = vsel %vm54_vm0, %v136_v50, 0.0 }
  0x9a   :  { %v847_v53 = vsub.f32 %v620_v5, %v113_v49  ;;  %153 = vadd.xlane.f32.xlu0 %v152_v54  ;;  %v63_v55 = vpop.xlane.xlu0 %62  ;;  %v176_v57 = vsel %vm54_vm0, %v144_v51, 0.0 }
  0x9b   :  { %v66_v56 = vpop.xlane.xlu1 %65  ;;  %v106_v58 = vmul.f32 0.03125, %v63_v55  ;;  %v137_v60 = vmul.f32 %v843_v52, %v843_v52 }
  0x9c   :  { %v107_v59 = vmul.f32 0.03125, %v66_v56  ;;  %v145_v61 = vmul.f32 %v847_v53, %v847_v53 }
  0x9d   :  { %v857_v62 = vsub.f32 %v607_v11, %v106_v58  ;;  %v155_v0 = vsel %vm54_vm0, %v137_v60, 0.0 }
  0x9e   :  { %v861_v63 = vsub.f32 %v608_v12, %v107_v59  ;;  %177 = vadd.xlane.f32.xlu0 %v176_v57  ;;  %156 = vadd.xlane.f32.xlu1 %v155_v0  ;;  %v87_v1 = vpop.xlane.xlu0 %86  ;;  %v179_v3 = vsel %vm54_vm0, %v145_v61, 0.0 }
  0x9f   :  { %v90_v2 = vpop.xlane.xlu1 %89  ;;  %v114_v4 = vmul.f32 0.03125, %v87_v1  ;;  %v138_v7 = vmul.f32 %v857_v62, %v857_v62 }
  0xa0   :  { %v115_v5 = vmul.f32 0.03125, %v90_v2  ;;  %v139_v8 = vmul.f32 %v861_v63, %v861_v63 }
  0xa1   :  { %v871_v6 = vsub.f32 %v623_v16, %v114_v4  ;;  %v158_v10 = vsel %vm54_vm0, %v138_v7, 0.0 }
  0xa2   :  { %v875_v9 = vsub.f32 %v624_v17, %v115_v5  ;;  %180 = vadd.xlane.f32.xlu1 %v179_v3  ;;  %159 = vadd.xlane.f32.xlu0 %v158_v10  ;;  %v69_v11 = vpop.xlane.xlu0 %68  ;;  %v161_v14 = vsel %vm54_vm0, %v139_v8, 0.0 }
  0xa3   :  { %v72_v12 = vpop.xlane.xlu1 %71  ;;  %v108_v15 = vmul.f32 0.03125, %v69_v11  ;;  %v146_v20 = vmul.f32 %v871_v6, %v871_v6 }
  0xa4   :  { %v109_v19 = vmul.f32 0.03125, %v72_v12  ;;  %v147_v16 = vmul.f32 %v875_v9, %v875_v9 }
  0xa5   :  { %v885_v13 = vsub.f32 %v611_v21, %v108_v15  ;;  %v182_v24 = vsel %vm54_vm0, %v146_v20, 0.0 }
  0xa6   :  { %v889_v17 = vsub.f32 %v612_v22, %v109_v19  ;;  %162 = vadd.xlane.f32.xlu1 %v161_v14  ;;  %183 = vadd.xlane.f32.xlu0 %v182_v24  ;;  %v93_v25 = vpop.xlane.xlu0 %92  ;;  %v185_v30 = vsel %vm54_vm0, %v147_v16, 0.0 }
  0xa7   :  { %v96_v29 = vpop.xlane.xlu1 %95  ;;  %v116_v34 = vmul.f32 0.03125, %v93_v25  ;;  %v140_v38 = vmul.f32 %v885_v13, %v885_v13 }
  0xa8   :  { %v117_v35 = vmul.f32 0.03125, %v96_v29  ;;  %v141_v21 = vmul.f32 %v889_v17, %v889_v17 }
  0xa9   :  { %v899_v18 = vsub.f32 %v627_v26, %v116_v34  ;;  %v164_v39 = vsel %vm54_vm0, %v140_v38, 0.0 }
  0xaa   :  { %v903_v22 = vsub.f32 %v628_v27, %v117_v35  ;;  %186 = vadd.xlane.f32.xlu1 %v185_v30  ;;  %165 = vadd.xlane.f32.xlu0 %v164_v39  ;;  %v75_v40 = vpop.xlane.xlu0 %74  ;;  %v167_v42 = vsel %vm54_vm0, %v141_v21, 0.0 }
  0xab   :  { %v78_v41 = vpop.xlane.xlu1 %77  ;;  %v110_v43 = vmul.f32 0.03125, %v75_v40  ;;  %v148_v47 = vmul.f32 %v899_v18, %v899_v18  ;;  %v951_v40 = vld [vmem:[%s1087_s1] ss:$0 sm:$0xff] }
  0xac   :  { %v111_v46 = vmul.f32 0.03125, %v78_v41  ;;  %v149_v26 = vmul.f32 %v903_v22, %v903_v22 }
  0xad   :  { %v913_v23 = vsub.f32 %v615_v31, %v110_v43  ;;  %v188_v48 = vsel %vm54_vm0, %v148_v47, 0.0 }
  0xae   :  { %v917_v27 = vsub.f32 %v616_v32, %v111_v46  ;;  %168 = vadd.xlane.f32.xlu1 %v167_v42  ;;  %189 = vadd.xlane.f32.xlu0 %v188_v48  ;;  %v99_v49 = vpop.xlane.xlu0 %98  ;;  %v191_v51 = vsel %vm54_vm0, %v149_v26, 0.0 }
  0xaf   :  { %v102_v50 = vpop.xlane.xlu1 %101  ;;  %v118_v54 = vmul.f32 0.03125, %v99_v49  ;;  %v142_v56 = vmul.f32 %v913_v23, %v913_v23 }
  0xb0   :  { %v119_v55 = vmul.f32 0.03125, %v102_v50  ;;  %v143_v31 = vmul.f32 %v917_v27, %v917_v27 }
  0xb1   :  { %v927_v28 = vsub.f32 %v631_v36, %v118_v54  ;;  %v170_v57 = vsel %vm54_vm0, %v142_v56, 0.0  ;;  %v674_v36 = vld [vmem:[%s1086_s3] sm:$0xff]  }
  0xb2   :  { %v931_v32 = vsub.f32 %v632_v37, %v119_v55  ;;  %192 = vadd.xlane.f32.xlu1 %v191_v51  ;;  %171 = vadd.xlane.f32.xlu0 %v170_v57  ;;  %v173_v58 = vsel %vm54_vm0, %v143_v31, 0.0  ;;  %v675_v37 = vld [vmem:[%s1086_s3 + $0x8] sm:$0xff]   ;;  %v958_v51 = vld [vmem:[%s1088_s2] ss:$0 sm:$0xff] }
  0xb3   :  { %v150_v59 = vmul.f32 %v927_v28, %v927_v28  ;;  %650 = vmatprep.subr.bf16.mxu0 %v674_v36  ;;  %670 = vmatprep.subr.bf16.mxu1 %v674_v36 }
  0xb4   :  { %v151_v60 = vmul.f32 %v931_v32, %v931_v32  ;;  %651 = vmatpush3.bf16.msra.mxu0 %v674_v36  ;;  %672 = vmatpush3.bf16.msra.mxu1 %v674_v36 }
  0xb5   :  { %v194_v61 = vsel %vm54_vm0, %v150_v59, 0.0  ;;  %652 = vmatprep.subr.bf16.mxu0 %v675_v37  ;;  %671 = vmatprep.subr.bf16.mxu1 %v675_v37 }
  0xb6   :  { %174 = vadd.xlane.f32.xlu1 %v173_v58  ;;  %195 = vadd.xlane.f32.xlu0 %v194_v61  ;;  %v197_v33 = vsel %vm54_vm0, %v151_v60, 0.0 }
  0xb8   :  { %653 = vmatpush3.bf16.msra.mxu0 %v675_v37  ;;  %673 = vmatpush3.bf16.msra.mxu1 %v675_v37 }
  0xba   :  { %198 = vadd.xlane.f32.xlu1 %v197_v33 }
 0x127   :  { %v154_v0 = vpop.xlane.xlu0 %153 }
 0x128   :  { %v200_v1 = vmul.f32 0.03125, %v154_v0 }
 0x12a   :  { %v216_v2 = vadd.f32 1e-05, %v200_v1 }
 0x12b   :  { %v157_v3 = vpop.xlane.xlu1 %156  ;;  %v178_v4 = vpop.xlane.xlu0 %177 }
 0x12c   :  { %676 = vrsqrt.f32 %v216_v2  ;;  %v201_v5 = vmul.f32 0.03125, %v157_v3  ;;  %v208_v7 = vmul.f32 0.03125, %v178_v4 }
 0x12e   :  { %v217_v8 = vadd.f32 1e-05, %v201_v5  ;;  %v224_v10 = vadd.f32 1e-05, %v208_v7 }
 0x12f   :  { %v181_v11 = vpop.xlane.xlu1 %180  ;;  %v160_v12 = vpop.xlane.xlu0 %159 }
 0x130   :  { %678 = vrsqrt.f32 %v217_v8  ;;  %v209_v14 = vmul.f32 0.03125, %v181_v11  ;;  %v202_v15 = vmul.f32 0.03125, %v160_v12 }
 0x131   :  { %680 = vrsqrt.f32 %v224_v10 }
 0x132   :  { %v225_v19 = vadd.f32 1e-05, %v209_v14  ;;  %v218_v20 = vadd.f32 1e-05, %v202_v15 }
 0x133   :  { %v163_v16 = vpop.xlane.xlu1 %162  ;;  %v184_v24 = vpop.xlane.xlu0 %183 }
 0x134   :  { %682 = vrsqrt.f32 %v225_v19  ;;  %v203_v25 = vmul.f32 0.03125, %v163_v16  ;;  %v210_v29 = vmul.f32 0.03125, %v184_v24 }
 0x135   :  { %684 = vrsqrt.f32 %v218_v20 }
 0x136   :  { %v677_v30 = vpop.eup %676  ;;  %v219_v34 = vadd.f32 1e-05, %v203_v25  ;;  %v226_v35 = vadd.f32 1e-05, %v210_v29 }
 0x137   :  { %v248_v38 = vmul.f32 %v677_v30, %v833_v44  ;;  %v187_v21 = vpop.xlane.xlu1 %186  ;;  %v166_v39 = vpop.xlane.xlu0 %165 }
 0x138   :  { %686 = vrsqrt.f32 %v219_v34  ;;  %v211_v41 = vmul.f32 0.03125, %v187_v21  ;;  %v204_v42 = vmul.f32 0.03125, %v166_v39 }
 0x139   :  { %688 = vrsqrt.f32 %v226_v35  ;;  %v271_v48 = vmul.f32 %v951_v40, %v248_v38 }
 0x13a   :  { %v679_v43 = vpop.eup %678  ;;  %v227_v46 = vadd.f32 1e-05, %v211_v41  ;;  %v220_v47 = vadd.f32 1e-05, %v204_v42 }
 0x13b   :  { %v681_v26 = vpop.eup %680  ;;  %v249_v49 = vmul.f32 %v679_v43, %v843_v52  ;;  %v169_v44 = vpop.xlane.xlu1 %168  ;;  %v294_v52 = vadd.f32 %v958_v51, %v271_v48 }
 0x13c   :  { %v190_v50 = vpop.xlane.xlu0 %189  ;;  %v256_v54 = vmul.f32 %v681_v26, %v835_v45  ;;  %690 = vrsqrt.f32 %v227_v46  ;;  %v205_v55 = vmul.f32 0.03125, %v169_v44 }
 0x13d   :  { %v212_v56 = vmul.f32 0.03125, %v190_v50  ;;  %v272_v31 = vmul.f32 %v951_v40, %v249_v49  ;;  %692 = vrsqrt.f32 %v220_v47 }
 0x13e   :  { %v683_v57 = vpop.eup %682  ;;  %v221_v58 = vadd.f32 1e-05, %v205_v55  ;;  %v279_v33 = vmul.f32 %v951_v40, %v256_v54 }
 0x13f   :  { %v228_v59 = vadd.f32 1e-05, %v212_v56  ;;  %v685_v60 = vpop.eup %684  ;;  %v295_v61 = vadd.f32 %v958_v51, %v272_v31  ;;  %v257_v36 = vmul.f32 %v683_v57, %v847_v53  ;;  %v193_v37 = vpop.xlane.xlu1 %192 }
 0x140   :  { %v172_v45 = vpop.xlane.xlu0 %171  ;;  %v250_v0 = vmul.f32 %v685_v60, %v857_v62  ;;  %694 = vrsqrt.f32 %v221_v58  ;;  %v213_v1 = vmul.f32 0.03125, %v193_v37  ;;  %v302_v53 = vadd.f32 %v958_v51, %v279_v33 }
 0x141   :  { %v310_v2 = vpack.c.bf16 %v295_v61, %v294_v52  ;;  %v280_v3 = vmul.f32 %v951_v40, %v257_v36  ;;  %696 = vrsqrt.f32 %v228_v59  ;;  %v206_v4 = vmul.f32 0.03125, %v172_v45 }
 0x142   :  { %v687_v5 = vpop.eup %686  ;;  %v273_v7 = vmul.f32 %v951_v40, %v250_v0  ;;  %v229_v8 = vadd.f32 1e-05, %v213_v1 }
 0x143   :  { %v689_v10 = vpop.eup %688  ;;  %318 = vst.msk [vmem:[#allocation2] sm:$0xff] %vm54_vm0, %v310_v2  ;;  %v303_v11 = vadd.f32 %v958_v51, %v280_v3  ;;  %v251_v62 = vmul.f32 %v687_v5, %v861_v63  ;;  %v222_v12 = vadd.f32 1e-05, %v206_v4  ;;  %v175_v14 = vpop.xlane.xlu1 %174 }
 0x144   :  { %v196_v15 = vpop.xlane.xlu0 %195  ;;  %v258_v19 = vmul.f32 %v689_v10, %v871_v6  ;;  %698 = vrsqrt.f32 %v229_v8  ;;  %v207_v20 = vmul.f32 0.03125, %v175_v14  ;;  %v296_v30 = vadd.f32 %v958_v51, %v273_v7 }
 0x145   :  { %v314_v16 = vpack.c.bf16 %v303_v11, %v302_v53  ;;  %v274_v24 = vmul.f32 %v951_v40, %v251_v62  ;;  %700 = vrsqrt.f32 %v222_v12  ;;  %v214_v25 = vmul.f32 0.03125, %v196_v15 }
 0x146   :  { %v691_v29 = vpop.eup %690  ;;  %v223_v34 = vadd.f32 1e-05, %v207_v20  ;;  %v281_v38 = vmul.f32 %v951_v40, %v258_v19 }
 0x147   :  { %v693_v35 = vpop.eup %692  ;;  %322 = vst.msk [vmem:[#allocation2 + $0x20] sm:$0xff] %vm54_vm0, %v314_v16  ;;  %v297_v63 = vadd.f32 %v958_v51, %v274_v24  ;;  %v259_v6 = vmul.f32 %v691_v29, %v875_v9  ;;  %v230_v21 = vadd.f32 1e-05, %v214_v25  ;;  %v199_v39 = vpop.xlane.xlu1 %198 }
 0x148   :  { %v252_v41 = vmul.f32 %v693_v35, %v885_v13  ;;  %702 = vrsqrt.f32 %v223_v34  ;;  %v215_v42 = vmul.f32 0.03125, %v199_v39  ;;  %v304_v44 = vadd.f32 %v958_v51, %v281_v38 }
 0x149   :  { %v311_v43 = vpack.c.bf16 %v297_v63, %v296_v30  ;;  %v282_v46 = vmul.f32 %v951_v40, %v259_v6  ;;  %704 = vrsqrt.f32 %v230_v21 }
 0x14a   :  { %v695_v47 = vpop.eup %694  ;;  %v231_v26 = vadd.f32 1e-05, %v215_v42  ;;  %v326_v48 = vld [vmem:[#allocation2] sm:$0xff]  ;;  %v275_v50 = vmul.f32 %v951_v40, %v252_v41 }
 0x14b   :  { %v697_v49 = vpop.eup %696  ;;  %319 = vst.msk [vmem:[#allocation2 + $0x8] sm:$0xff] %vm54_vm0, %v311_v43  ;;  %v305_v9 = vadd.f32 %v958_v51, %v282_v46  ;;  %v253_v13 = vmul.f32 %v695_v47, %v889_v17  ;;  %654 = vmatprep.mubr.msk.bf16.mxu0 %vm54_vm0, %v326_v48 }
 0x14c   :  { %v260_v54 = vmul.f32 %v697_v49, %v899_v18  ;;  %706 = vrsqrt.f32 %v231_v26  ;;  %v298_v59 = vadd.f32 %v958_v51, %v275_v50 }
 0x14d   :  { %v315_v55 = vpack.c.bf16 %v305_v9, %v304_v44  ;;  %v276_v56 = vmul.f32 %v951_v40, %v253_v13 }
 0x14e   :  { %v699_v31 = vpop.eup %698  ;;  %v330_v57 = vld [vmem:[#allocation2 + $0x20] sm:$0xff]  ;;  %v283_v52 = vmul.f32 %v951_v40, %v260_v54 }
 0x14f   :  { %v701_v58 = vpop.eup %700  ;;  %323 = vst.msk [vmem:[#allocation2 + $0x28] sm:$0xff] %vm54_vm0, %v315_v55  ;;  %v299_v60 = vadd.f32 %v958_v51, %v276_v56  ;;  %v261_v17 = vmul.f32 %v699_v31, %v903_v22  ;;  %662 = vmatprep.mubr.msk.bf16.mxu1 %vm54_vm0, %v330_v57 }
 0x150   :  { %v254_v18 = vmul.f32 %v701_v58, %v913_v23  ;;  %v306_v0 = vadd.f32 %v958_v51, %v283_v52 }
 0x151   :  { %v312_v61 = vpack.c.bf16 %v299_v60, %v298_v59  ;;  %v284_v33 = vmul.f32 %v951_v40, %v261_v17 }
 0x152   :  { %v703_v36 = vpop.eup %702  ;;  %v327_v37 = vld [vmem:[#allocation2 + $0x8] sm:$0xff]  ;;  %v277_v2 = vmul.f32 %v951_v40, %v254_v18 }
 0x153   :  { %v705_v45 = vpop.eup %704  ;;  %320 = vst.msk [vmem:[#allocation2 + $0x10] sm:$0xff] %vm54_vm0, %v312_v61  ;;  %v307_v1 = vadd.f32 %v958_v51, %v284_v33  ;;  %v255_v22 = vmul.f32 %v703_v36, %v917_v27  ;;  %655 = vmatmul.mubr.msk.bf16.vlgmr.msra.gmra.mrb[0].mxu0 %vm54_vm0, %v327_v37 }
 0x154   :  { %v262_v23 = vmul.f32 %v705_v45, %v927_v28  ;;  %v300_v8 = vadd.f32 %v958_v51, %v277_v2 }
 0x155   :  { %v316_v3 = vpack.c.bf16 %v307_v1, %v306_v0  ;;  %v278_v4 = vmul.f32 %v951_v40, %v255_v22 }
 0x156   :  { %v707_v5 = vpop.eup %706  ;;  %v331_v7 = vld [vmem:[#allocation2 + $0x28] sm:$0xff]  ;;  %v285_v53 = vmul.f32 %v951_v40, %v262_v23 }
 0x157   :  { %324 = vst.msk [vmem:[#allocation2 + $0x30] sm:$0xff] %vm54_vm0, %v316_v3  ;;  %v301_v10 = vadd.f32 %v958_v51, %v278_v4  ;;  %v263_v11 = vmul.f32 %v707_v5, %v931_v32  ;;  %663 = vmatmul.mubr.msk.bf16.vlgmr.msra.gmra.mrb[0].mxu1 %vm54_vm0, %v331_v7 }
 0x158   :  { %v308_v12 = vadd.f32 %v958_v51, %v285_v53 }
 0x159   :  { %v313_v27 = vpack.c.bf16 %v301_v10, %v300_v8  ;;  %v286_v28 = vmul.f32 %v951_v40, %v263_v11 }
 0x15a   :  { %v328_v62 = vld [vmem:[#allocation2 + $0x10] sm:$0xff] }
 0x15b   :  { %321 = vst.msk [vmem:[#allocation2 + $0x18] sm:$0xff] %vm54_vm0, %v313_v27  ;;  %v309_v14 = vadd.f32 %v958_v51, %v286_v28  ;;  %658 = vmatprep.mubr.msk.bf16.mxu0 %vm54_vm0, %v328_v62 }
 0x15d   :  { %v317_v15 = vpack.c.bf16 %v309_v14, %v308_v12 }
 0x15e   :  { %v332_v19 = vld [vmem:[#allocation2 + $0x30] sm:$0xff] }
 0x15f   :  { %325 = vst.msk [vmem:[#allocation2 + $0x38] sm:$0xff] %vm54_vm0, %v317_v15  ;;  %666 = vmatprep.mubr.msk.bf16.mxu1 %vm54_vm0, %v332_v19 }
 0x162   :  { %v329_v32 = vld [vmem:[#allocation2 + $0x18] sm:$0xff] }
 0x163   :  { %659 = vmatmul.mubr.msk.bf16.gmra.mrb[4].mxu0 %vm54_vm0, %v329_v32 }
 0x166   :  { %v333_v20 = vld [vmem:[#allocation2 + $0x38] sm:$0xff] }
 0x167   :  { %667 = vmatmul.mubr.msk.bf16.gmra.mrb[4].mxu1 %vm54_vm0, %v333_v20 }
 0x226   :  { %v656_v40 = vpop.f32.mrb[0].mxu0 }
 0x227   :  { %v587_v16 = vpack.c.bf16 %v656_v40, %v656_v40  ;;  %v409_v24 = vpop.f32.mrb[1].mxu0 }
 0x228   :  { %v585_v25 = vpack.c.bf16 %v409_v24, %v409_v24  ;;  %v657_v51 = vpop.f32.mrb[2].mxu0 }
 0x229   :  { %539 = vst.msk [vmem:[%s1089_s4 + $0x8] sm:$0xf] %vm536_vm1, %v587_v16  ;;  %v588_v29 = vpack.c.bf16 %v657_v51, %v657_v51  ;;  %v412_v30 = vpop.f32.mrb[3].mxu0 }
 0x22a   :  { %537 = vst.msk [vmem:[%s1089_s4] sm:$0xf] %vm536_vm1, %v585_v25  ;;  %v586_v34 = vpack.c.bf16 %v412_v30, %v412_v30  ;;  %v664_v35 = vpop.f32.mrb[0].mxu1 }
 0x22b   :  { %540 = vst.msk [vmem:[%s1089_s4 + $0xc] sm:$0xf] %vm536_vm1, %v588_v29  ;;  %v595_v63 = vpack.c.bf16 %v664_v35, %v664_v35  ;;  %v441_v38 = vpop.f32.mrb[1].mxu1 }
 0x22c   :  { %538 = vst.msk [vmem:[%s1089_s4 + $0x4] sm:$0xf] %vm536_vm1, %v586_v34  ;;  %v593_v6 = vpack.c.bf16 %v441_v38, %v441_v38  ;;  %v665_v21 = vpop.f32.mrb[2].mxu1 }
 0x22d   :  { %547 = vst.msk [vmem:[%s1089_s4 + $0x28] sm:$0xf] %vm536_vm1, %v595_v63  ;;  %v596_v39 = vpack.c.bf16 %v665_v21, %v665_v21  ;;  %v444_v41 = vpop.f32.mrb[3].mxu1 }
 0x22e   :  { %545 = vst.msk [vmem:[%s1089_s4 + $0x20] sm:$0xf] %vm536_vm1, %v593_v6  ;;  %v594_v42 = vpack.c.bf16 %v444_v41, %v444_v41 }
 0x22f   :  { %548 = vst.msk [vmem:[%s1089_s4 + $0x2c] sm:$0xf] %vm536_vm1, %v596_v39 }
 0x230   :  { %546 = vst.msk [vmem:[%s1089_s4 + $0x24] sm:$0xf] %vm536_vm1, %v594_v42 }
 0x236   :  { %v660_v43 = vpop.f32.mrb[4].mxu0 }
 0x237   :  { %v591_v46 = vpack.c.bf16 %v660_v43, %v660_v43  ;;  %v425_v47 = vpop.f32.mrb[5].mxu0 }
 0x238   :  { %v589_v26 = vpack.c.bf16 %v425_v47, %v425_v47  ;;  %v661_v48 = vpop.f32.mrb[6].mxu0 }
 0x239   :  { %543 = vst.msk [vmem:[%s1089_s4 + $0x18] sm:$0xf] %vm536_vm1, %v591_v46  ;;  %v592_v49 = vpack.c.bf16 %v661_v48, %v661_v48  ;;  %v428_v44 = vpop.f32.mrb[7].mxu0 }
 0x23a   :  { %541 = vst.msk [vmem:[%s1089_s4 + $0x10] sm:$0xf] %vm536_vm1, %v589_v26  ;;  %v590_v9 = vpack.c.bf16 %v428_v44, %v428_v44  ;;  %v668_v50 = vpop.f32.mrb[4].mxu1 }
 0x23b   :  { %544 = vst.msk [vmem:[%s1089_s4 + $0x1c] sm:$0xf] %vm536_vm1, %v592_v49  ;;  %v599_v13 = vpack.c.bf16 %v668_v50, %v668_v50  ;;  %v457_v54 = vpop.f32.mrb[5].mxu1 }
 0x23c   :  { %542 = vst.msk [vmem:[%s1089_s4 + $0x14] sm:$0xf] %vm536_vm1, %v590_v9  ;;  %v597_v55 = vpack.c.bf16 %v457_v54, %v457_v54  ;;  %v669_v56 = vpop.f32.mrb[6].mxu1 }
 0x23d   :  { %551 = vst.msk [vmem:[%s1089_s4 + $0x38] sm:$0xf] %vm536_vm1, %v599_v13  ;;  %v600_v31 = vpack.c.bf16 %v669_v56, %v669_v56  ;;  %v460_v57 = vpop.f32.mrb[7].mxu1 }
 0x23e   :  { %549 = vst.msk [vmem:[%s1089_s4 + $0x30] sm:$0xf] %vm536_vm1, %v597_v55  ;;  %v598_v58 = vpack.c.bf16 %v460_v57, %v460_v57 }
 0x23f   :  { %552 = vst.msk [vmem:[%s1089_s4 + $0x3c] sm:$0xf] %vm536_vm1, %v600_v31 }
 0x240   :  { %550 = vst.msk [vmem:[%s1089_s4 + $0x34] sm:$0xf] %vm536_vm1, %v598_v58 }

// kernel: unet_mid_block_cross_attn.28
= control target key start
LH: loop header
LB: loop body
LE: loop exit
PB: predicated region body
PF: predicated region fallthrough
CT: control target
= control target key end

     0   :  { %s875_s12 = smov 0   ;;  %s944_s0 = inlined_call_operand.vmem [shape: bf16[8,64,8], index: 0, kind: input, shape index: {}]   ;;  %s945_s1 = inlined_call_operand.vmem [shape: bf16[8,64,8], index: 1, kind: input, shape index: {}]   ;;  %s946_s2 = inlined_call_operand.vmem [shape: bf16[8,64,8], index: 2, kind: input, shape index: {}]   ;;  %s947_s3 = inlined_call_operand.vmem [shape: bf16[8,64,8], index: 3, kind: output, shape index: {}]  }
   0x1 LB: > { %s688_s13 = sadd.s32 4294967295, %s853_s12   ;;  %p692_p0 = scmp.ge.s32.totalorder %s853_s12, 1  ;;  %s853_s12 = sphi %s875_s12, %s13_s12  }
   0x2   : > { %p157_p1 = scmp.lt.s32.totalorder %s853_s12, 9 }
   0x4   : > { %p158_p2 = pnand %p692_p0, %p157_p1 }
   0x5   : > { %p191_p3 = scmp.lt.s32.totalorder (!%p158_p2), %s688_s13, 7  ;;  %vm276_vm0 = vcmask (!%p158_p2), 64512   ;;  %vm374_vm1 = vcmask (!%p158_p2), 523264   ;;  %vm600_vm2 = vcmask (!%p158_p2), 60416  }
   0x6   : > { %161 = sbr.rel (%p158_p2) target bundleno = 814 (0x32e), region = 32 }
   0xd   : > { %s949_s13 = smov (!%p191_p3, %s688_s13), 7 }
   0xe   : > { %s883_s14 = sshll.u32 %s949_s13, 5 }
   0xf   : > { %s200_s17 = scalar_lea.vmem %s945_s1, %s883_s14  ;;  %s195_s20 = scalar_lea.vmem %s944_s0, %s883_s14 }
  0x10   : > { %v803_v0 = vld [vmem:[%s200_s17] sm:$0xff]   ;;  %v804_v1 = vld [vmem:[%s200_s17 + $0x8] sm:$0xff]   ;;  %v805_v5 = vld [vmem:[%s200_s17 + $0x10] sm:$0xff]   ;;  %s205_s23 = scalar_lea.vmem %s946_s2, %s883_s14  ;;  %s210_s26 = scalar_lea.vmem %s947_s3, %s883_s14 }
  0x11   : > { %791 = vmatprep.subr.msk.bf16.mxu0 %vm276_vm0, %v803_v0  ;;  %v290_v2 = vsel %vm276_vm0, %v803_v0, 0  ;;  %v807_v3 = vld [vmem:[%s195_s20] sm:$0xff]   ;;  %v293_v4 = vsel %vm276_vm0, %v804_v1, 0  ;;  %v296_v6 = vsel %vm276_vm0, %v805_v5, 0  ;;  %v806_v7 = vld [vmem:[%s200_s17 + $0x18] sm:$0xff]   ;;  %v808_v9 = vld [vmem:[%s195_s20 + $0x8] sm:$0xff]  }
  0x12   : > { %760 = vmatpush3.bf16.xpose.msra.mxu0 %v290_v2  ;;  %767 = vmatprep.mubr.msk.bf16.mxu0 %vm276_vm0, %v807_v3  ;;  %v299_v8 = vsel %vm276_vm0, %v806_v7, 0  ;;  %v809_v10 = vld [vmem:[%s195_s20 + $0x10] sm:$0xff]   ;;  %v810_v11 = vld [vmem:[%s195_s20 + $0x18] sm:$0xff]  }
  0x13   : > { %792 = vmatprep.subr.msk.bf16.mxu0 %vm276_vm0, %v804_v1 }
  0x1a   : > { %762 = vmatpush3.bf16.xpose.msra.mxu0 %v293_v4 }
  0x1b   : > { %793 = vmatprep.subr.msk.bf16.mxu0 %vm276_vm0, %v805_v5 }
  0x22   : > { %764 = vmatpush3.bf16.xpose.msra.mxu0 %v296_v6 }
  0x23   : > { %794 = vmatprep.subr.msk.bf16.mxu0 %vm276_vm0, %v806_v7 }
  0x2a   : > { %766 = vmatpush3.bf16.xpose.msra.mxu0 %v299_v8 }
  0x31   : > { %768 = vmatmul.mubr.msk.bf16.vlgmr.msra.gmra.mrb[0].mxu0 %vm276_vm0, %v808_v9 }
  0x32   : > { %771 = vmatprep.mubr.msk.bf16.mxu0 %vm276_vm0, %v809_v10 }
  0x39   : > { %772 = vmatmul.mubr.msk.bf16.gmra.mrb[4].mxu0 %vm276_vm0, %v810_v11 }
 0x104   : > { %v769_v12 = vpop.f32.mrb[0].mxu0 }
 0x105   : > { %v368_v13 = vmul.f32 0.35355338, %v769_v12  ;;  %v335_v14 = vpop.f32.mrb[1].mxu0  ;;  %v811_v12 = vld [vmem:[%s205_s23] sm:$0xff]  }
 0x106   : > { %v366_v15 = vmul.f32 0.35355338, %v335_v14  ;;  %v770_v16 = vpop.f32.mrb[2].mxu0  ;;  %775 = vmatprep.subr.bf16.mxu1 %v811_v12  ;;  %v813_v14 = vld [vmem:[%s205_s23 + $0x10] sm:$0xff]  }
 0x107   : > { %v369_v17 = vmul.f32 0.35355338, %v770_v16  ;;  %v338_v18 = vpop.f32.mrb[3].mxu0  ;;  %v381_v19 = vsel %vm374_vm1, %v368_v13, -inf  ;;  %776 = vmatpush3.bf16.msra.mxu1 %v811_v12 }
 0x108   : > { %v367_v20 = vmul.f32 0.35355338, %v338_v18  ;;  %382 = vmax.xlane.f32.xlu1 %v381_v19  ;;  %v375_v21 = vsel %vm374_vm1, %v366_v15, -inf }
 0x109   : > { %376 = vmax.xlane.f32.xlu0 %v375_v21  ;;  %v384_v22 = vsel %vm374_vm1, %v369_v17, -inf }
 0x10a   : > { %v378_v24 = vsel %vm374_vm1, %v367_v20, -inf }
 0x10c   : > { %385 = vmax.xlane.f32.xlu1 %v384_v22  ;;  %v773_v23 = vpop.f32.mrb[4].mxu0 }
 0x10d   : > { %379 = vmax.xlane.f32.xlu0 %v378_v24  ;;  %v351_v25 = vpop.f32.mrb[5].mxu0  ;;  %v372_v29 = vmul.f32 0.35355338, %v773_v23 }
 0x10e   : > { %v370_v26 = vmul.f32 0.35355338, %v351_v25  ;;  %v774_v27 = vpop.f32.mrb[6].mxu0 }
 0x10f   : > { %v354_v28 = vpop.f32.mrb[7].mxu0  ;;  %v373_v32 = vmul.f32 0.35355338, %v774_v27  ;;  %v393_v34 = vsel %vm374_vm1, %v372_v29, -inf }
 0x110   : > { %v371_v30 = vmul.f32 0.35355338, %v354_v28  ;;  %v387_v31 = vsel %vm374_vm1, %v370_v26, -inf }
 0x111   : > { %388 = vmax.xlane.f32.xlu0 %v387_v31  ;;  %v396_v35 = vsel %vm374_vm1, %v373_v32, -inf }
 0x112   : > { %v390_v33 = vsel %vm374_vm1, %v371_v30, -inf }
 0x113   : > { %391 = vmax.xlane.f32.xlu1 %v390_v33 }
 0x115   : > { %394 = vmax.xlane.f32.xlu0 %v393_v34 }
 0x117   : > { %397 = vmax.xlane.f32.xlu1 %v396_v35 }
 0x195   : > { %v383_v36 = vpop.xlane.xlu1 %382 }
 0x196   : > { %v401_v37 = vsub.f32 %v368_v13, %v383_v36  ;;  %v377_v38 = vpop.xlane.xlu0 %376  ;;  %v812_v13 = vld [vmem:[%s205_s23 + $0x8] sm:$0xff]  }
 0x197   : > { %v399_v39 = vsub.f32 %v366_v15, %v377_v38  ;;  %777 = vmatprep.subr.bf16.mxu1 %v812_v13  ;;  %v814_v15 = vld [vmem:[%s205_s23 + $0x18] sm:$0xff]  }
 0x198   : > { %v411_v40 = vmul.f32 1.442695, %v401_v37  ;;  %778 = vmatpush3.bf16.msra.mxu1 %v812_v13 }
 0x199   : > { %v407_v41 = vmul.f32 1.442695, %v399_v39  ;;  %v386_v42 = vpop.xlane.xlu1 %385  ;;  %779 = vmatprep.subr.bf16.mxu1 %v813_v14 }
 0x19a   : > { %v402_v43 = vsub.f32 %v369_v17, %v386_v42  ;;  %v380_v44 = vpop.xlane.xlu0 %379 }
 0x19b   : > { %815 = vpow2.f32 %v407_v41  ;;  %v400_v45 = vsub.f32 %v367_v20, %v380_v44 }
 0x19c   : > { %817 = vpow2.f32 %v411_v40  ;;  %v413_v46 = vmul.f32 1.442695, %v402_v43  ;;  %780 = vmatpush3.bf16.msra.mxu1 %v813_v14 }
 0x19d   : > { %v409_v47 = vmul.f32 1.442695, %v400_v45  ;;  %781 = vmatprep.subr.bf16.mxu1 %v814_v15 }
 0x19e   : > { %v389_v48 = vpop.xlane.xlu0 %388 }
 0x19f   : > { %819 = vpow2.f32 %v409_v47  ;;  %v403_v49 = vsub.f32 %v370_v26, %v389_v48 }
 0x1a0   : > { %v392_v50 = vpop.xlane.xlu1 %391  ;;  %821 = vpow2.f32 %v413_v46  ;;  %782 = vmatpush3.bf16.msra.mxu1 %v814_v15 }
 0x1a1   : > { %v415_v51 = vmul.f32 1.442695, %v403_v49  ;;  %v404_v52 = vsub.f32 %v371_v30, %v392_v50 }
 0x1a2   : > { %v395_v53 = vpop.xlane.xlu0 %394 }
 0x1a3   : > { %823 = vpow2.f32 %v415_v51  ;;  %v417_v54 = vmul.f32 1.442695, %v404_v52  ;;  %v405_v55 = vsub.f32 %v372_v29, %v395_v53 }
 0x1a4   : > { %v398_v56 = vpop.xlane.xlu1 %397 }
 0x1a5   : > { %v816_v57 = vpop.eup %815  ;;  %825 = vpow2.f32 %v417_v54  ;;  %v419_v58 = vmul.f32 1.442695, %v405_v55  ;;  %v406_v59 = vsub.f32 %v373_v32, %v398_v56 }
 0x1a6   : > { %v423_v60 = vsel %vm374_vm1, %v816_v57, 0.0  ;;  %v818_v61 = vpop.eup %817 }
 0x1a7   : > { %827 = vpow2.f32 %v419_v58  ;;  %v421_v62 = vmul.f32 1.442695, %v406_v59  ;;  %424 = vadd.xlane.f32.xlu0 %v423_v60  ;;  %v429_v0 = vsel %vm374_vm1, %v818_v61, 0.0 }
 0x1a9   : > { %v820_v63 = vpop.eup %819  ;;  %829 = vpow2.f32 %v421_v62 }
 0x1aa   : > { %v426_v1 = vsel %vm374_vm1, %v820_v63, 0.0  ;;  %v822_v2 = vpop.eup %821 }
 0x1ab   : > { %430 = vadd.xlane.f32.xlu0 %v429_v0  ;;  %427 = vadd.xlane.f32.xlu1 %v426_v1  ;;  %v432_v5 = vsel %vm374_vm1, %v822_v2, 0.0 }
 0x1ad   : > { %v824_v3 = vpop.eup %823 }
 0x1ae   : > { %v435_v4 = vsel %vm374_vm1, %v824_v3, 0.0 }
 0x1af   : > { %v826_v6 = vpop.eup %825  ;;  %436 = vadd.xlane.f32.xlu0 %v435_v4  ;;  %433 = vadd.xlane.f32.xlu1 %v432_v5 }
 0x1b0   : > { %v438_v9 = vsel %vm374_vm1, %v826_v6, 0.0 }
 0x1b1   : > { %v828_v7 = vpop.eup %827 }
 0x1b2   : > { %v441_v8 = vsel %vm374_vm1, %v828_v7, 0.0 }
 0x1b3   : > { %v830_v10 = vpop.eup %829  ;;  %442 = vadd.xlane.f32.xlu0 %v441_v8  ;;  %439 = vadd.xlane.f32.xlu1 %v438_v9 }
 0x1b4   : > { %v444_v11 = vsel %vm374_vm1, %v830_v10, 0.0 }
 0x1b7   : > { %445 = vadd.xlane.f32.xlu1 %v444_v11 }
 0x234   : > { %v425_v16 = vpop.xlane.xlu0 %424 }
 0x235   : > { %831 = vrcp.f32 %v425_v16 }
 0x238   : > { %v431_v17 = vpop.xlane.xlu0 %430  ;;  %v428_v18 = vpop.xlane.xlu1 %427 }
 0x239   : > { %833 = vrcp.f32 %v428_v18 }
 0x23a   : > { %835 = vrcp.f32 %v431_v17 }
 0x23c   : > { %v437_v19 = vpop.xlane.xlu0 %436  ;;  %v434_v20 = vpop.xlane.xlu1 %433 }
 0x23d   : > { %837 = vrcp.f32 %v434_v20 }
 0x23e   : > { %839 = vrcp.f32 %v437_v19 }
 0x23f   : > { %v832_v23 = vpop.eup %831 }
 0x240   : > { %v443_v21 = vpop.xlane.xlu0 %442  ;;  %v440_v22 = vpop.xlane.xlu1 %439  ;;  %v455_v26 = vmul.f32 %v832_v23, %v816_v57 }
 0x241   : > { %841 = vrcp.f32 %v440_v22 }
 0x242   : > { %843 = vrcp.f32 %v443_v21 }
 0x243   : > { %v834_v24 = vpop.eup %833 }
 0x244   : > { %v446_v25 = vpop.xlane.xlu1 %445  ;;  %v456_v27 = vmul.f32 %v834_v24, %v820_v63  ;;  %v836_v28 = vpop.eup %835 }
 0x245   : > { %845 = vrcp.f32 %v446_v25  ;;  %v457_v31 = vmul.f32 %v836_v28, %v818_v61 }
 0x246   : > { %v463_v29 = vpack.c.bf16 %v456_v27, %v455_v26 }
 0x247   : > { %v838_v30 = vpop.eup %837 }
 0x248   : > { %783 = vmatprep.mubr.msk.bf16.mxu1 %vm374_vm1, %v463_v29  ;;  %v458_v32 = vmul.f32 %v838_v30, %v822_v2  ;;  %v840_v33 = vpop.eup %839 }
 0x249   : > { %v459_v37 = vmul.f32 %v840_v33, %v824_v3 }
 0x24a   : > { %v464_v34 = vpack.c.bf16 %v458_v32, %v457_v31 }
 0x24b   : > { %v842_v35 = vpop.eup %841 }
 0x24c   : > { %v844_v36 = vpop.eup %843  ;;  %784 = vmatmul.mubr.msk.bf16.vlgmr.msra.gmra.mrb[0].mxu1 %vm374_vm1, %v464_v34  ;;  %v460_v38 = vmul.f32 %v842_v35, %v826_v6 }
 0x24d   : > { %v461_v41 = vmul.f32 %v844_v36, %v828_v7 }
 0x24e   : > { %v465_v40 = vpack.c.bf16 %v460_v38, %v459_v37 }
 0x24f   : > { %v846_v39 = vpop.eup %845 }
 0x250   : > { %v462_v42 = vmul.f32 %v846_v39, %v830_v10  ;;  %787 = vmatprep.mubr.msk.bf16.mxu1 %vm374_vm1, %v465_v40 }
 0x252   : > { %v466_v43 = vpack.c.bf16 %v462_v42, %v461_v41 }
 0x254   : > { %788 = vmatmul.mubr.msk.bf16.gmra.mrb[4].mxu1 %vm374_vm1, %v466_v43 }
 0x31f   : > { %v785_v44 = vpop.f32.mrb[0].mxu1 }
 0x320   : > { %v737_v45 = vpack.c.bf16 %v785_v44, %v785_v44  ;;  %v537_v46 = vpop.f32.mrb[1].mxu1 }
 0x321   : > { %v735_v47 = vpack.c.bf16 %v537_v46, %v537_v46  ;;  %v786_v48 = vpop.f32.mrb[2].mxu1 }
 0x322   : > { %603 = vst.msk [vmem:[%s210_s26 + $0x8] sm:$0xf] %vm600_vm2, %v737_v45  ;;  %v738_v49 = vpack.c.bf16 %v786_v48, %v786_v48  ;;  %v540_v50 = vpop.f32.mrb[3].mxu1 }
 0x323   : > { %601 = vst.msk [vmem:[%s210_s26] sm:$0xf] %vm600_vm2, %v735_v47  ;;  %v736_v51 = vpack.c.bf16 %v540_v50, %v540_v50 }
 0x324   : > { %604 = vst.msk [vmem:[%s210_s26 + $0xc] sm:$0xf] %vm600_vm2, %v738_v49 }
 0x325   : > { %602 = vst.msk [vmem:[%s210_s26 + $0x4] sm:$0xf] %vm600_vm2, %v736_v51 }
 0x327   : > { %v789_v52 = vpop.f32.mrb[4].mxu1 }
 0x328   : > { %v741_v53 = vpack.c.bf16 %v789_v52, %v789_v52  ;;  %v553_v54 = vpop.f32.mrb[5].mxu1 }
 0x329   : > { %v739_v55 = vpack.c.bf16 %v553_v54, %v553_v54  ;;  %v790_v56 = vpop.f32.mrb[6].mxu1 }
 0x32a   : > { %607 = vst.msk [vmem:[%s210_s26 + $0x18] sm:$0xf] %vm600_vm2, %v741_v53  ;;  %v742_v57 = vpack.c.bf16 %v790_v56, %v790_v56  ;;  %v556_v58 = vpop.f32.mrb[7].mxu1 }
 0x32b   : > { %605 = vst.msk [vmem:[%s210_s26 + $0x10] sm:$0xf] %vm600_vm2, %v739_v55  ;;  %v740_v59 = vpack.c.bf16 %v556_v58, %v556_v58 }
 0x32c   : > { %608 = vst.msk [vmem:[%s210_s26 + $0x1c] sm:$0xf] %vm600_vm2, %v742_v57 }
 0x32d   : > { %606 = vst.msk [vmem:[%s210_s26 + $0x14] sm:$0xf] %vm600_vm2, %v740_v59 }
 0x32e PF: > { %s13_s12 = sadd.s32 1, %s853_s12  }
 0x32f   : > { %p10_p4 = scmp.ge.s32.totalorder %s13_s12, 10  }
 0x331   :  { %12 = sbr.rel (!%p10_p4) target bundleno = 1 (0x1), region = 68 }

// kernel: unet_mid_block_cross_attn.30
= control target key start
LH: loop header
LB: loop body
LE: loop exit
PB: predicated region body
PF: predicated region fallthrough
CT: control target
= control target key end

     0   :  { %v119_v0 = vmov 0.0   ;;  %vm120_vm0 = vmmov 0   ;;  %vm35_vm1 = vcmask 261120   ;;  %vm88_vm2 = vcmask 519168   ;;  %s151_s1 = inlined_call_operand.vmem [shape: bf16[32,64], index: 1, kind: input, shape index: {}]   ;;  %s152_s0 = inlined_call_operand.vmem [shape: bf16[16,32], index: 0, kind: input, shape index: {}]   ;;  %s153_s2 = inlined_call_operand.vmem [shape: bf16[16,64], index: 2, kind: output, shape index: {}]  }
   0x1   :  { %106 = vmatprep.subr.bf16.mxu0 %v119_v0  ;;  %v116_v1 = vld [vmem:[%s151_s1] sm:$0xff]   ;;  %110 = vmatprep.mubr.msk.bf16.mxu0 %vm120_vm0, %v119_v0  ;;  %v117_v2 = vld [vmem:[%s151_s1 + $0x8] sm:$0xff]  }
   0x2   :  { %107 = vmatpush3.bf16.msra.mxu0 %v116_v1  ;;  %v118_v3 = vld [vmem:[%s152_s0] sm:$0xff]  }
   0x3   :  { %108 = vmatprep.subr.bf16.mxu0 %v119_v0 }
   0x6   :  { %109 = vmatpush3.bf16.msra.mxu0 %v117_v2 }
   0x9   :  { %111 = vmatmul.mubr.msk.bf16.vlgmr.msra.gmra.mrb[0].mxu0 %vm35_vm1, %v118_v3 }
  0xdc   :  { %v73_v4 = vpop.f32.mrb[0].mxu0 }
  0xdd   :  { %v101_v5 = vpack.c.bf16 %v73_v4, %v73_v4  ;;  %v112_v6 = vpop.f32.mrb[1].mxu0 }
  0xde   :  { %v76_v7 = vpop.f32.mrb[2].mxu0 }
  0xdf   :  { %89 = vst.msk [vmem:[%s153_s2] sm:$0xf] %vm88_vm2, %v101_v5  ;;  %v102_v8 = vpack.c.bf16 %v76_v7, %v76_v7  ;;  %v113_v9 = vpop.f32.mrb[3].mxu0 }
  0xe1   :  { %90 = vst.msk [vmem:[%s153_s2 + $0x4] sm:$0xf] %vm88_vm2, %v102_v8 }

// kernel: unet_mid_block_cross_attn.29
= control target key start
LH: loop header
LB: loop body
LE: loop exit
PB: predicated region body
PF: predicated region fallthrough
CT: control target
= control target key end

     0   :  { %vm97_vm0 = vcmask 261120   ;;  %vm331_vm1 = vcmask 257024   ;;  %s658_s1 = inlined_call_operand.vmem [shape: bf16[32,32], index: 1, kind: input, shape index: {}]   ;;  %s659_s0 = inlined_call_operand.vmem [shape: bf16[128,32], index: 0, kind: input, shape index: {}]   ;;  %s660_s3 = inlined_call_operand.vmem [shape: bf16[128,32], index: 3, kind: input, shape index: {}, may-alias: {3,4}]   ;;  %s661_s2 = inlined_call_operand.vmem [shape: f32[1,32], index: 2, kind: input, shape index: {}]   ;;  %s662_s4 = inlined_call_operand.vmem [shape: bf16[128,32], index: 4, kind: output, shape index: {}, may-alias: {3,4}]  }
   0x1   :  { %v476_v0 = vld [vmem:[%s658_s1] sm:$0xff]   ;;  %v477_v1 = vld [vmem:[%s658_s1 + $0x8] sm:$0xff]   ;;  %v482_v6 = vld [vmem:[%s659_s0 + $0x10] sm:$0xff]  }
   0x2   :  { %452 = vmatprep.subr.bf16.mxu0 %v476_v0  ;;  %472 = vmatprep.subr.bf16.mxu1 %v476_v0  ;;  %v478_v2 = vld [vmem:[%s659_s0] sm:$0xff]   ;;  %v480_v4 = vld [vmem:[%s659_s0 + $0x8] sm:$0xff]   ;;  %v483_v7 = vld [vmem:[%s659_s0 + $0x30] sm:$0xff]  }
   0x3   :  { %453 = vmatpush3.bf16.msra.mxu0 %v476_v0  ;;  %474 = vmatpush3.bf16.msra.mxu1 %v476_v0  ;;  %v479_v3 = vld [vmem:[%s659_s0 + $0x20] sm:$0xff]   ;;  %v481_v5 = vld [vmem:[%s659_s0 + $0x28] sm:$0xff]   ;;  %v484_v8 = vld [vmem:[%s659_s0 + $0x18] sm:$0xff]  }
   0x4   :  { %454 = vmatprep.subr.bf16.mxu0 %v477_v1  ;;  %473 = vmatprep.subr.bf16.mxu1 %v477_v1  ;;  %v485_v9 = vld [vmem:[%s659_s0 + $0x38] sm:$0xff]   ;;  %v435_v10 = vld [vmem:[%s660_s3 + $0x8] sm:$0xff]   ;;  %v404_v12 = vld [vmem:[%s660_s3] sm:$0xff]  }
   0x5   :  { %456 = vmatprep.mubr.msk.bf16.mxu0 %vm97_vm0, %v478_v2  ;;  %464 = vmatprep.mubr.msk.bf16.mxu1 %vm97_vm0, %v479_v3  ;;  %v439_v11 = vld [vmem:[%s660_s3 + $0x28] sm:$0xff]   ;;  %v438_v13 = vld [vmem:[%s660_s3 + $0x20] sm:$0xff]   ;;  %v409_v15 = vunpack.c.l.bf16 %v435_v10  ;;  %v405_v19 = vunpack.c.l.bf16 %v404_v12  ;;  %v410_v21 = vunpack.c.h.bf16 %v435_v10  ;;  %v406_v27 = vunpack.c.h.bf16 %v404_v12  ;;  %v437_v43 = vld [vmem:[%s660_s3 + $0x18] sm:$0xff]  }
   0x6   :  { %v564_v14 = vld [vmem:[%s661_s2] ss:$0 sm:$0xff]  ;;  %v425_v16 = vunpack.c.l.bf16 %v439_v11  ;;  %v421_v20 = vunpack.c.l.bf16 %v438_v13  ;;  %v426_v26 = vunpack.c.h.bf16 %v439_v11  ;;  %v422_v32 = vunpack.c.h.bf16 %v438_v13  ;;  %v441_v44 = vld [vmem:[%s660_s3 + $0x38] sm:$0xff]   ;;  %v436_v49 = vld [vmem:[%s660_s3 + $0x10] sm:$0xff]  }
   0x7   :  { %455 = vmatpush3.bf16.msra.mxu0 %v477_v1  ;;  %475 = vmatpush3.bf16.msra.mxu1 %v477_v1  ;;  %v440_v50 = vld [vmem:[%s660_s3 + $0x30] sm:$0xff]   ;;  %v417_v57 = vunpack.c.l.bf16 %v437_v43  ;;  %v433_v58 = vunpack.c.l.bf16 %v441_v44  ;;  %v413_v63 = vunpack.c.l.bf16 %v436_v49  ;;  %v414_v11 = vunpack.c.h.bf16 %v436_v49 }
   0x8   :  { %v429_v0 = vunpack.c.l.bf16 %v440_v50  ;;  %v430_v12 = vunpack.c.h.bf16 %v440_v50 }
   0xa   :  { %457 = vmatmul.mubr.msk.bf16.vlgmr.msra.gmra.mrb[0].mxu0 %vm97_vm0, %v480_v4  ;;  %465 = vmatmul.mubr.msk.bf16.vlgmr.msra.gmra.mrb[0].mxu1 %vm97_vm0, %v481_v5  ;;  %v418_v5 = vunpack.c.h.bf16 %v437_v43 }
   0xb   :  { %460 = vmatprep.mubr.msk.bf16.mxu0 %vm97_vm0, %v482_v6  ;;  %468 = vmatprep.mubr.msk.bf16.mxu1 %vm97_vm0, %v483_v7  ;;  %v434_v6 = vunpack.c.h.bf16 %v441_v44 }
  0x12   :  { %461 = vmatmul.mubr.msk.bf16.gmra.mrb[4].mxu0 %vm97_vm0, %v484_v8  ;;  %469 = vmatmul.mubr.msk.bf16.gmra.mrb[4].mxu1 %vm97_vm0, %v485_v9 }
  0xdd   :  { %v458_v17 = vpop.f32.mrb[0].mxu0  ;;  %v466_v18 = vpop.f32.mrb[0].mxu1 }
  0xde   :  { %v165_v22 = vadd.f32 %v458_v17, %v564_v14  ;;  %v197_v23 = vadd.f32 %v466_v18, %v564_v14  ;;  %v156_v24 = vpop.f32.mrb[1].mxu0  ;;  %v188_v25 = vpop.f32.mrb[1].mxu1 }
  0xdf   :  { %v157_v28 = vadd.f32 %v564_v14, %v156_v24  ;;  %v189_v29 = vadd.f32 %v564_v14, %v188_v25  ;;  %v459_v30 = vpop.f32.mrb[2].mxu0  ;;  %v467_v31 = vpop.f32.mrb[2].mxu1 }
  0xe0   :  { %v253_v33 = vadd.f32 %v409_v15, %v165_v22  ;;  %v261_v34 = vadd.f32 %v425_v16, %v197_v23  ;;  %v168_v35 = vadd.f32 %v459_v30, %v564_v14  ;;  %v200_v36 = vadd.f32 %v467_v31, %v564_v14  ;;  %v159_v37 = vpop.f32.mrb[3].mxu0  ;;  %v191_v38 = vpop.f32.mrb[3].mxu1 }
  0xe1   :  { %v251_v39 = vadd.f32 %v405_v19, %v157_v28  ;;  %v259_v40 = vadd.f32 %v421_v20, %v189_v29  ;;  %v160_v41 = vadd.f32 %v564_v14, %v159_v37  ;;  %v192_v42 = vadd.f32 %v564_v14, %v191_v38 }
  0xe2   :  { %v389_v45 = vpack.c.bf16 %v253_v33, %v253_v33  ;;  %v397_v46 = vpack.c.bf16 %v261_v34, %v261_v34  ;;  %v254_v47 = vadd.f32 %v410_v21, %v168_v35  ;;  %v262_v48 = vadd.f32 %v426_v26, %v200_v36 }
  0xe3   :  { %v387_v51 = vpack.c.bf16 %v251_v39, %v251_v39  ;;  %v395_v52 = vpack.c.bf16 %v259_v40, %v259_v40  ;;  %v252_v53 = vadd.f32 %v406_v27, %v160_v41  ;;  %v260_v54 = vadd.f32 %v422_v32, %v192_v42 }
  0xe4   :  { %334 = vst.msk [vmem:[%s662_s4 + $0x8] sm:$0xf] %vm331_vm1, %v389_v45  ;;  %342 = vst.msk [vmem:[%s662_s4 + $0x28] sm:$0xf] %vm331_vm1, %v397_v46  ;;  %v390_v55 = vpack.c.bf16 %v254_v47, %v254_v47  ;;  %v398_v56 = vpack.c.bf16 %v262_v48, %v262_v48 }
  0xe5   :  { %332 = vst.msk [vmem:[%s662_s4] sm:$0xf] %vm331_vm1, %v387_v51  ;;  %340 = vst.msk [vmem:[%s662_s4 + $0x20] sm:$0xf] %vm331_vm1, %v395_v52  ;;  %v388_v59 = vpack.c.bf16 %v252_v53, %v252_v53  ;;  %v396_v60 = vpack.c.bf16 %v260_v54, %v260_v54  ;;  %v462_v61 = vpop.f32.mrb[4].mxu0  ;;  %v470_v62 = vpop.f32.mrb[4].mxu1 }
  0xe6   :  { %335 = vst.msk [vmem:[%s662_s4 + $0xc] sm:$0xf] %vm331_vm1, %v390_v55  ;;  %343 = vst.msk [vmem:[%s662_s4 + $0x2c] sm:$0xf] %vm331_vm1, %v398_v56  ;;  %v181_v1 = vadd.f32 %v462_v61, %v564_v14  ;;  %v213_v2 = vadd.f32 %v470_v62, %v564_v14  ;;  %v172_v3 = vpop.f32.mrb[5].mxu0  ;;  %v204_v4 = vpop.f32.mrb[5].mxu1 }
  0xe7   :  { %333 = vst.msk [vmem:[%s662_s4 + $0x4] sm:$0xf] %vm331_vm1, %v388_v59  ;;  %341 = vst.msk [vmem:[%s662_s4 + $0x24] sm:$0xf] %vm331_vm1, %v396_v60  ;;  %v173_v7 = vadd.f32 %v564_v14, %v172_v3  ;;  %v205_v8 = vadd.f32 %v564_v14, %v204_v4  ;;  %v463_v9 = vpop.f32.mrb[6].mxu0  ;;  %v471_v10 = vpop.f32.mrb[6].mxu1 }
  0xe8   :  { %v257_v13 = vadd.f32 %v417_v57, %v181_v1  ;;  %v265_v15 = vadd.f32 %v433_v58, %v213_v2  ;;  %v184_v16 = vadd.f32 %v463_v9, %v564_v14  ;;  %v216_v17 = vadd.f32 %v471_v10, %v564_v14  ;;  %v175_v18 = vpop.f32.mrb[7].mxu0  ;;  %v207_v19 = vpop.f32.mrb[7].mxu1 }
  0xe9   :  { %v255_v20 = vadd.f32 %v413_v63, %v173_v7  ;;  %v263_v21 = vadd.f32 %v429_v0, %v205_v8  ;;  %v176_v22 = vadd.f32 %v564_v14, %v175_v18  ;;  %v208_v23 = vadd.f32 %v564_v14, %v207_v19 }
  0xea   :  { %v393_v24 = vpack.c.bf16 %v257_v13, %v257_v13  ;;  %v401_v25 = vpack.c.bf16 %v265_v15, %v265_v15  ;;  %v258_v26 = vadd.f32 %v418_v5, %v184_v16  ;;  %v266_v27 = vadd.f32 %v434_v6, %v216_v17 }
  0xeb   :  { %v391_v28 = vpack.c.bf16 %v255_v20, %v255_v20  ;;  %v399_v29 = vpack.c.bf16 %v263_v21, %v263_v21  ;;  %v256_v30 = vadd.f32 %v414_v11, %v176_v22  ;;  %v264_v31 = vadd.f32 %v430_v12, %v208_v23 }
  0xec   :  { %338 = vst.msk [vmem:[%s662_s4 + $0x18] sm:$0xf] %vm331_vm1, %v393_v24  ;;  %346 = vst.msk [vmem:[%s662_s4 + $0x38] sm:$0xf] %vm331_vm1, %v401_v25  ;;  %v394_v32 = vpack.c.bf16 %v258_v26, %v258_v26  ;;  %v402_v14 = vpack.c.bf16 %v266_v27, %v266_v27 }
  0xed   :  { %336 = vst.msk [vmem:[%s662_s4 + $0x10] sm:$0xf] %vm331_vm1, %v391_v28  ;;  %344 = vst.msk [vmem:[%s662_s4 + $0x30] sm:$0xf] %vm331_vm1, %v399_v29  ;;  %v392_v33 = vpack.c.bf16 %v256_v30, %v256_v30  ;;  %v400_v34 = vpack.c.bf16 %v264_v31, %v264_v31 }
  0xee   :  { %339 = vst.msk [vmem:[%s662_s4 + $0x1c] sm:$0xf] %vm331_vm1, %v394_v32  ;;  %347 = vst.msk [vmem:[%s662_s4 + $0x3c] sm:$0xf] %vm331_vm1, %v402_v14 }
  0xef   :  { %337 = vst.msk [vmem:[%s662_s4 + $0x14] sm:$0xf] %vm331_vm1, %v392_v33  ;;  %345 = vst.msk [vmem:[%s662_s4 + $0x34] sm:$0xf] %vm331_vm1, %v400_v34 }

// kernel: unet_mid_block_cross_attn.31
= control target key start
LH: loop header
LB: loop body
LE: loop exit
PB: predicated region body
PF: predicated region fallthrough
CT: control target
= control target key end

     0   :  { %vm54_vm0 = vcmask 261120   ;;  %vm536_vm1 = vcmask 257024   ;;  %s1085_s0 = inlined_call_operand.vmem [shape: bf16[128,32], index: 0, kind: input, shape index: {}]   ;;  %s1086_s3 = inlined_call_operand.vmem [shape: bf16[32,32], index: 3, kind: input, shape index: {}]   ;;  %s1087_s1 = inlined_call_operand.vmem [shape: f32[1,32], index: 1, kind: input, shape index: {}]   ;;  %s1088_s2 = inlined_call_operand.vmem [shape: f32[1,32], index: 2, kind: input, shape index: {}]   ;;  %s1089_s4 = inlined_call_operand.vmem [shape: bf16[128,32], index: 4, kind: output, shape index: {}]  }
   0x1   :  { %v736_v0 = vld [vmem:[%s1085_s0] sm:$0xff]   ;;  %v750_v6 = vld [vmem:[%s1085_s0 + $0x8] sm:$0xff]   ;;  %v778_v18 = vld [vmem:[%s1085_s0 + $0x10] sm:$0xff]  }
   0x2   :  { %v741_v1 = vld [vmem:[%s1085_s0 + $0x20] sm:$0xff]   ;;  %v603_v2 = vunpack.c.l.bf16 %v736_v0  ;;  %v604_v4 = vunpack.c.h.bf16 %v736_v0  ;;  %v607_v11 = vunpack.c.l.bf16 %v750_v6  ;;  %v608_v12 = vunpack.c.h.bf16 %v750_v6  ;;  %v765_v13 = vld [vmem:[%s1085_s0 + $0x28] sm:$0xff]   ;;  %v791_v23 = vld [vmem:[%s1085_s0 + $0x30] sm:$0xff]  }
   0x3   :  { %v619_v3 = vunpack.c.l.bf16 %v741_v1  ;;  %v620_v5 = vunpack.c.h.bf16 %v741_v1  ;;  %v623_v16 = vunpack.c.l.bf16 %v765_v13  ;;  %v624_v17 = vunpack.c.h.bf16 %v765_v13  ;;  %v804_v28 = vld [vmem:[%s1085_s0 + $0x18] sm:$0xff]  }
   0x4   :  { %v55_v7 = vsel %vm54_vm0, %v603_v2, 0.0  ;;  %v58_v9 = vsel %vm54_vm0, %v604_v4, 0.0  ;;  %v61_v14 = vsel %vm54_vm0, %v607_v11, 0.0  ;;  %v64_v15 = vsel %vm54_vm0, %v608_v12, 0.0  ;;  %v817_v33 = vld [vmem:[%s1085_s0 + $0x38] sm:$0xff]  }
   0x5   :  { %v79_v8 = vsel %vm54_vm0, %v619_v3, 0.0  ;;  %56 = vadd.xlane.f32.xlu0 %v55_v7  ;;  %v82_v10 = vsel %vm54_vm0, %v620_v5, 0.0  ;;  %v85_v19 = vsel %vm54_vm0, %v623_v16, 0.0  ;;  %v88_v20 = vsel %vm54_vm0, %v624_v17, 0.0 }
   0x6   :  { %80 = vadd.xlane.f32.xlu1 %v79_v8  ;;  %v611_v21 = vunpack.c.l.bf16 %v778_v18  ;;  %v612_v22 = vunpack.c.h.bf16 %v778_v18  ;;  %v627_v26 = vunpack.c.l.bf16 %v791_v23  ;;  %v628_v27 = vunpack.c.h.bf16 %v791_v23 }
   0x7   :  { %v615_v31 = vunpack.c.l.bf16 %v804_v28  ;;  %v616_v32 = vunpack.c.h.bf16 %v804_v28  ;;  %v631_v36 = vunpack.c.l.bf16 %v817_v33  ;;  %v632_v37 = vunpack.c.h.bf16 %v817_v33 }
   0x8   :  { %v67_v24 = vsel %vm54_vm0, %v611_v21, 0.0  ;;  %v70_v25 = vsel %vm54_vm0, %v612_v22, 0.0  ;;  %v91_v29 = vsel %vm54_vm0, %v627_v26, 0.0  ;;  %v94_v30 = vsel %vm54_vm0, %v628_v27, 0.0 }
   0x9   :  { %59 = vadd.xlane.f32.xlu0 %v58_v9  ;;  %v73_v34 = vsel %vm54_vm0, %v615_v31, 0.0  ;;  %v76_v35 = vsel %vm54_vm0, %v616_v32, 0.0  ;;  %v97_v38 = vsel %vm54_vm0, %v631_v36, 0.0  ;;  %v100_v39 = vsel %vm54_vm0, %v632_v37, 0.0 }
   0xa   :  { %83 = vadd.xlane.f32.xlu1 %v82_v10 }
   0xd   :  { %62 = vadd.xlane.f32.xlu0 %v61_v14 }
   0xe   :  { %65 = vadd.xlane.f32.xlu1 %v64_v15 }
  0x11   :  { %86 = vadd.xlane.f32.xlu0 %v85_v19 }
  0x12   :  { %89 = vadd.xlane.f32.xlu1 %v88_v20 }
  0x15   :  { %68 = vadd.xlane.f32.xlu0 %v67_v24 }
  0x16   :  { %71 = vadd.xlane.f32.xlu1 %v70_v25 }
  0x19   :  { %92 = vadd.xlane.f32.xlu0 %v91_v29 }
  0x1a   :  { %95 = vadd.xlane.f32.xlu1 %v94_v30 }
  0x1d   :  { %74 = vadd.xlane.f32.xlu0 %v73_v34 }
  0x1e   :  { %77 = vadd.xlane.f32.xlu1 %v76_v35 }
  0x21   :  { %98 = vadd.xlane.f32.xlu0 %v97_v38 }
  0x22   :  { %101 = vadd.xlane.f32.xlu1 %v100_v39 }
  0x92   :  { %v57_v40 = vpop.xlane.xlu0 %56 }
  0x93   :  { %v81_v41 = vpop.xlane.xlu1 %80  ;;  %v104_v42 = vmul.f32 0.03125, %v57_v40 }
  0x94   :  { %v112_v43 = vmul.f32 0.03125, %v81_v41 }
  0x95   :  { %v833_v44 = vsub.f32 %v603_v2, %v104_v42 }
  0x96   :  { %v835_v45 = vsub.f32 %v619_v3, %v112_v43  ;;  %v60_v46 = vpop.xlane.xlu0 %59 }
  0x97   :  { %v84_v47 = vpop.xlane.xlu1 %83  ;;  %v105_v48 = vmul.f32 0.03125, %v60_v46  ;;  %v136_v50 = vmul.f32 %v833_v44, %v833_v44 }
  0x98   :  { %v113_v49 = vmul.f32 0.03125, %v84_v47  ;;  %v144_v51 = vmul.f32 %v835_v45, %v835_v45 }
  0x99   :  { %v843_v52 = vsub.f32 %v604_v4, %v105_v48  ;;  %v152_v54 = vsel %vm54_vm0, %v136_v50, 0.0 }
  0x9a   :  { %v847_v53 = vsub.f32 %v620_v5, %v113_v49  ;;  %153 = vadd.xlane.f32.xlu0 %v152_v54  ;;  %v63_v55 = vpop.xlane.xlu0 %62  ;;  %v176_v57 = vsel %vm54_vm0, %v144_v51, 0.0 }
  0x9b   :  { %v66_v56 = vpop.xlane.xlu1 %65  ;;  %v106_v58 = vmul.f32 0.03125, %v63_v55  ;;  %v137_v60 = vmul.f32 %v843_v52, %v843_v52 }
  0x9c   :  { %v107_v59 = vmul.f32 0.03125, %v66_v56  ;;  %v145_v61 = vmul.f32 %v847_v53, %v847_v53 }
  0x9d   :  { %v857_v62 = vsub.f32 %v607_v11, %v106_v58  ;;  %v155_v0 = vsel %vm54_vm0, %v137_v60, 0.0 }
  0x9e   :  { %v861_v63 = vsub.f32 %v608_v12, %v107_v59  ;;  %177 = vadd.xlane.f32.xlu0 %v176_v57  ;;  %156 = vadd.xlane.f32.xlu1 %v155_v0  ;;  %v87_v1 = vpop.xlane.xlu0 %86  ;;  %v179_v3 = vsel %vm54_vm0, %v145_v61, 0.0 }
  0x9f   :  { %v90_v2 = vpop.xlane.xlu1 %89  ;;  %v114_v4 = vmul.f32 0.03125, %v87_v1  ;;  %v138_v7 = vmul.f32 %v857_v62, %v857_v62 }
  0xa0   :  { %v115_v5 = vmul.f32 0.03125, %v90_v2  ;;  %v139_v8 = vmul.f32 %v861_v63, %v861_v63 }
  0xa1   :  { %v871_v6 = vsub.f32 %v623_v16, %v114_v4  ;;  %v158_v10 = vsel %vm54_vm0, %v138_v7, 0.0 }
  0xa2   :  { %v875_v9 = vsub.f32 %v624_v17, %v115_v5  ;;  %180 = vadd.xlane.f32.xlu1 %v179_v3  ;;  %159 = vadd.xlane.f32.xlu0 %v158_v10  ;;  %v69_v11 = vpop.xlane.xlu0 %68  ;;  %v161_v14 = vsel %vm54_vm0, %v139_v8, 0.0 }
  0xa3   :  { %v72_v12 = vpop.xlane.xlu1 %71  ;;  %v108_v15 = vmul.f32 0.03125, %v69_v11  ;;  %v146_v20 = vmul.f32 %v871_v6, %v871_v6 }
  0xa4   :  { %v109_v19 = vmul.f32 0.03125, %v72_v12  ;;  %v147_v16 = vmul.f32 %v875_v9, %v875_v9 }
  0xa5   :  { %v885_v13 = vsub.f32 %v611_v21, %v108_v15  ;;  %v182_v24 = vsel %vm54_vm0, %v146_v20, 0.0 }
  0xa6   :  { %v889_v17 = vsub.f32 %v612_v22, %v109_v19  ;;  %162 = vadd.xlane.f32.xlu1 %v161_v14  ;;  %183 = vadd.xlane.f32.xlu0 %v182_v24  ;;  %v93_v25 = vpop.xlane.xlu0 %92  ;;  %v185_v30 = vsel %vm54_vm0, %v147_v16, 0.0 }
  0xa7   :  { %v96_v29 = vpop.xlane.xlu1 %95  ;;  %v116_v34 = vmul.f32 0.03125, %v93_v25  ;;  %v140_v38 = vmul.f32 %v885_v13, %v885_v13 }
  0xa8   :  { %v117_v35 = vmul.f32 0.03125, %v96_v29  ;;  %v141_v21 = vmul.f32 %v889_v17, %v889_v17 }
  0xa9   :  { %v899_v18 = vsub.f32 %v627_v26, %v116_v34  ;;  %v164_v39 = vsel %vm54_vm0, %v140_v38, 0.0 }
  0xaa   :  { %v903_v22 = vsub.f32 %v628_v27, %v117_v35  ;;  %186 = vadd.xlane.f32.xlu1 %v185_v30  ;;  %165 = vadd.xlane.f32.xlu0 %v164_v39  ;;  %v75_v40 = vpop.xlane.xlu0 %74  ;;  %v167_v42 = vsel %vm54_vm0, %v141_v21, 0.0 }
  0xab   :  { %v78_v41 = vpop.xlane.xlu1 %77  ;;  %v110_v43 = vmul.f32 0.03125, %v75_v40  ;;  %v148_v47 = vmul.f32 %v899_v18, %v899_v18  ;;  %v951_v40 = vld [vmem:[%s1087_s1] ss:$0 sm:$0xff] }
  0xac   :  { %v111_v46 = vmul.f32 0.03125, %v78_v41  ;;  %v149_v26 = vmul.f32 %v903_v22, %v903_v22 }
  0xad   :  { %v913_v23 = vsub.f32 %v615_v31, %v110_v43  ;;  %v188_v48 = vsel %vm54_vm0, %v148_v47, 0.0 }
  0xae   :  { %v917_v27 = vsub.f32 %v616_v32, %v111_v46  ;;  %168 = vadd.xlane.f32.xlu1 %v167_v42  ;;  %189 = vadd.xlane.f32.xlu0 %v188_v48  ;;  %v99_v49 = vpop.xlane.xlu0 %98  ;;  %v191_v51 = vsel %vm54_vm0, %v149_v26, 0.0 }
  0xaf   :  { %v102_v50 = vpop.xlane.xlu1 %101  ;;  %v118_v54 = vmul.f32 0.03125, %v99_v49  ;;  %v142_v56 = vmul.f32 %v913_v23, %v913_v23 }
  0xb0   :  { %v119_v55 = vmul.f32 0.03125, %v102_v50  ;;  %v143_v31 = vmul.f32 %v917_v27, %v917_v27 }
  0xb1   :  { %v927_v28 = vsub.f32 %v631_v36, %v118_v54  ;;  %v170_v57 = vsel %vm54_vm0, %v142_v56, 0.0  ;;  %v674_v36 = vld [vmem:[%s1086_s3] sm:$0xff]  }
  0xb2   :  { %v931_v32 = vsub.f32 %v632_v37, %v119_v55  ;;  %192 = vadd.xlane.f32.xlu1 %v191_v51  ;;  %171 = vadd.xlane.f32.xlu0 %v170_v57  ;;  %v173_v58 = vsel %vm54_vm0, %v143_v31, 0.0  ;;  %v675_v37 = vld [vmem:[%s1086_s3 + $0x8] sm:$0xff]   ;;  %v958_v51 = vld [vmem:[%s1088_s2] ss:$0 sm:$0xff] }
  0xb3   :  { %v150_v59 = vmul.f32 %v927_v28, %v927_v28  ;;  %650 = vmatprep.subr.bf16.mxu0 %v674_v36  ;;  %670 = vmatprep.subr.bf16.mxu1 %v674_v36 }
  0xb4   :  { %v151_v60 = vmul.f32 %v931_v32, %v931_v32  ;;  %651 = vmatpush3.bf16.msra.mxu0 %v674_v36  ;;  %672 = vmatpush3.bf16.msra.mxu1 %v674_v36 }
  0xb5   :  { %v194_v61 = vsel %vm54_vm0, %v150_v59, 0.0  ;;  %652 = vmatprep.subr.bf16.mxu0 %v675_v37  ;;  %671 = vmatprep.subr.bf16.mxu1 %v675_v37 }
  0xb6   :  { %174 = vadd.xlane.f32.xlu1 %v173_v58  ;;  %195 = vadd.xlane.f32.xlu0 %v194_v61  ;;  %v197_v33 = vsel %vm54_vm0, %v151_v60, 0.0 }
  0xb8   :  { %653 = vmatpush3.bf16.msra.mxu0 %v675_v37  ;;  %673 = vmatpush3.bf16.msra.mxu1 %v675_v37 }
  0xba   :  { %198 = vadd.xlane.f32.xlu1 %v197_v33 }
 0x127   :  { %v154_v0 = vpop.xlane.xlu0 %153 }
 0x128   :  { %v200_v1 = vmul.f32 0.03125, %v154_v0 }
 0x12a   :  { %v216_v2 = vadd.f32 1e-05, %v200_v1 }
 0x12b   :  { %v157_v3 = vpop.xlane.xlu1 %156  ;;  %v178_v4 = vpop.xlane.xlu0 %177 }
 0x12c   :  { %676 = vrsqrt.f32 %v216_v2  ;;  %v201_v5 = vmul.f32 0.03125, %v157_v3  ;;  %v208_v7 = vmul.f32 0.03125, %v178_v4 }
 0x12e   :  { %v217_v8 = vadd.f32 1e-05, %v201_v5  ;;  %v224_v10 = vadd.f32 1e-05, %v208_v7 }
 0x12f   :  { %v181_v11 = vpop.xlane.xlu1 %180  ;;  %v160_v12 = vpop.xlane.xlu0 %159 }
 0x130   :  { %678 = vrsqrt.f32 %v217_v8  ;;  %v209_v14 = vmul.f32 0.03125, %v181_v11  ;;  %v202_v15 = vmul.f32 0.03125, %v160_v12 }
 0x131   :  { %680 = vrsqrt.f32 %v224_v10 }
 0x132   :  { %v225_v19 = vadd.f32 1e-05, %v209_v14  ;;  %v218_v20 = vadd.f32 1e-05, %v202_v15 }
 0x133   :  { %v163_v16 = vpop.xlane.xlu1 %162  ;;  %v184_v24 = vpop.xlane.xlu0 %183 }
 0x134   :  { %682 = vrsqrt.f32 %v225_v19  ;;  %v203_v25 = vmul.f32 0.03125, %v163_v16  ;;  %v210_v29 = vmul.f32 0.03125, %v184_v24 }
 0x135   :  { %684 = vrsqrt.f32 %v218_v20 }
 0x136   :  { %v677_v30 = vpop.eup %676  ;;  %v219_v34 = vadd.f32 1e-05, %v203_v25  ;;  %v226_v35 = vadd.f32 1e-05, %v210_v29 }
 0x137   :  { %v248_v38 = vmul.f32 %v677_v30, %v833_v44  ;;  %v187_v21 = vpop.xlane.xlu1 %186  ;;  %v166_v39 = vpop.xlane.xlu0 %165 }
 0x138   :  { %686 = vrsqrt.f32 %v219_v34  ;;  %v211_v41 = vmul.f32 0.03125, %v187_v21  ;;  %v204_v42 = vmul.f32 0.03125, %v166_v39 }
 0x139   :  { %688 = vrsqrt.f32 %v226_v35  ;;  %v271_v48 = vmul.f32 %v951_v40, %v248_v38 }
 0x13a   :  { %v679_v43 = vpop.eup %678  ;;  %v227_v46 = vadd.f32 1e-05, %v211_v41  ;;  %v220_v47 = vadd.f32 1e-05, %v204_v42 }
 0x13b   :  { %v681_v26 = vpop.eup %680  ;;  %v249_v49 = vmul.f32 %v679_v43, %v843_v52  ;;  %v169_v44 = vpop.xlane.xlu1 %168  ;;  %v294_v52 = vadd.f32 %v958_v51, %v271_v48 }
 0x13c   :  { %v190_v50 = vpop.xlane.xlu0 %189  ;;  %v256_v54 = vmul.f32 %v681_v26, %v835_v45  ;;  %690 = vrsqrt.f32 %v227_v46  ;;  %v205_v55 = vmul.f32 0.03125, %v169_v44 }
 0x13d   :  { %v212_v56 = vmul.f32 0.03125, %v190_v50  ;;  %v272_v31 = vmul.f32 %v951_v40, %v249_v49  ;;  %692 = vrsqrt.f32 %v220_v47 }
 0x13e   :  { %v683_v57 = vpop.eup %682  ;;  %v221_v58 = vadd.f32 1e-05, %v205_v55  ;;  %v279_v33 = vmul.f32 %v951_v40, %v256_v54 }
 0x13f   :  { %v228_v59 = vadd.f32 1e-05, %v212_v56  ;;  %v685_v60 = vpop.eup %684  ;;  %v295_v61 = vadd.f32 %v958_v51, %v272_v31  ;;  %v257_v36 = vmul.f32 %v683_v57, %v847_v53  ;;  %v193_v37 = vpop.xlane.xlu1 %192 }
 0x140   :  { %v172_v45 = vpop.xlane.xlu0 %171  ;;  %v250_v0 = vmul.f32 %v685_v60, %v857_v62  ;;  %694 = vrsqrt.f32 %v221_v58  ;;  %v213_v1 = vmul.f32 0.03125, %v193_v37  ;;  %v302_v53 = vadd.f32 %v958_v51, %v279_v33 }
 0x141   :  { %v310_v2 = vpack.c.bf16 %v295_v61, %v294_v52  ;;  %v280_v3 = vmul.f32 %v951_v40, %v257_v36  ;;  %696 = vrsqrt.f32 %v228_v59  ;;  %v206_v4 = vmul.f32 0.03125, %v172_v45 }
 0x142   :  { %v687_v5 = vpop.eup %686  ;;  %v273_v7 = vmul.f32 %v951_v40, %v250_v0  ;;  %v229_v8 = vadd.f32 1e-05, %v213_v1 }
 0x143   :  { %v689_v10 = vpop.eup %688  ;;  %318 = vst.msk [vmem:[#allocation2] sm:$0xff] %vm54_vm0, %v310_v2  ;;  %v303_v11 = vadd.f32 %v958_v51, %v280_v3  ;;  %v251_v62 = vmul.f32 %v687_v5, %v861_v63  ;;  %v222_v12 = vadd.f32 1e-05, %v206_v4  ;;  %v175_v14 = vpop.xlane.xlu1 %174 }
 0x144   :  { %v196_v15 = vpop.xlane.xlu0 %195  ;;  %v258_v19 = vmul.f32 %v689_v10, %v871_v6  ;;  %698 = vrsqrt.f32 %v229_v8  ;;  %v207_v20 = vmul.f32 0.03125, %v175_v14  ;;  %v296_v30 = vadd.f32 %v958_v51, %v273_v7 }
 0x145   :  { %v314_v16 = vpack.c.bf16 %v303_v11, %v302_v53  ;;  %v274_v24 = vmul.f32 %v951_v40, %v251_v62  ;;  %700 = vrsqrt.f32 %v222_v12  ;;  %v214_v25 = vmul.f32 0.03125, %v196_v15 }
 0x146   :  { %v691_v29 = vpop.eup %690  ;;  %v223_v34 = vadd.f32 1e-05, %v207_v20  ;;  %v281_v38 = vmul.f32 %v951_v40, %v258_v19 }
 0x147   :  { %v693_v35 = vpop.eup %692  ;;  %322 = vst.msk [vmem:[#allocation2 + $0x20] sm:$0xff] %vm54_vm0, %v314_v16  ;;  %v297_v63 = vadd.f32 %v958_v51, %v274_v24  ;;  %v259_v6 = vmul.f32 %v691_v29, %v875_v9  ;;  %v230_v21 = vadd.f32 1e-05, %v214_v25  ;;  %v199_v39 = vpop.xlane.xlu1 %198 }
 0x148   :  { %v252_v41 = vmul.f32 %v693_v35, %v885_v13  ;;  %702 = vrsqrt.f32 %v223_v34  ;;  %v215_v42 = vmul.f32 0.03125, %v199_v39  ;;  %v304_v44 = vadd.f32 %v958_v51, %v281_v38 }
 0x149   :  { %v311_v43 = vpack.c.bf16 %v297_v63, %v296_v30  ;;  %v282_v46 = vmul.f32 %v951_v40, %v259_v6  ;;  %704 = vrsqrt.f32 %v230_v21 }
 0x14a   :  { %v695_v47 = vpop.eup %694  ;;  %v231_v26 = vadd.f32 1e-05, %v215_v42  ;;  %v326_v48 = vld [vmem:[#allocation2] sm:$0xff]  ;;  %v275_v50 = vmul.f32 %v951_v40, %v252_v41 }
 0x14b   :  { %v697_v49 = vpop.eup %696  ;;  %319 = vst.msk [vmem:[#allocation2 + $0x8] sm:$0xff] %vm54_vm0, %v311_v43  ;;  %v305_v9 = vadd.f32 %v958_v51, %v282_v46  ;;  %v253_v13 = vmul.f32 %v695_v47, %v889_v17  ;;  %654 = vmatprep.mubr.msk.bf16.mxu0 %vm54_vm0, %v326_v48 }
 0x14c   :  { %v260_v54 = vmul.f32 %v697_v49, %v899_v18  ;;  %706 = vrsqrt.f32 %v231_v26  ;;  %v298_v59 = vadd.f32 %v958_v51, %v275_v50 }
 0x14d   :  { %v315_v55 = vpack.c.bf16 %v305_v9, %v304_v44  ;;  %v276_v56 = vmul.f32 %v951_v40, %v253_v13 }
 0x14e   :  { %v699_v31 = vpop.eup %698  ;;  %v330_v57 = vld [vmem:[#allocation2 + $0x20] sm:$0xff]  ;;  %v283_v52 = vmul.f32 %v951_v40, %v260_v54 }
 0x14f   :  { %v701_v58 = vpop.eup %700  ;;  %323 = vst.msk [vmem:[#allocation2 + $0x28] sm:$0xff] %vm54_vm0, %v315_v55  ;;  %v299_v60 = vadd.f32 %v958_v51, %v276_v56  ;;  %v261_v17 = vmul.f32 %v699_v31, %v903_v22  ;;  %662 = vmatprep.mubr.msk.bf16.mxu1 %vm54_vm0, %v330_v57 }
 0x150   :  { %v254_v18 = vmul.f32 %v701_v58, %v913_v23  ;;  %v306_v0 = vadd.f32 %v958_v51, %v283_v52 }
 0x151   :  { %v312_v61 = vpack.c.bf16 %v299_v60, %v298_v59  ;;  %v284_v33 = vmul.f32 %v951_v40, %v261_v17 }
 0x152   :  { %v703_v36 = vpop.eup %702  ;;  %v327_v37 = vld [vmem:[#allocation2 + $0x8] sm:$0xff]  ;;  %v277_v2 = vmul.f32 %v951_v40, %v254_v18 }
 0x153   :  { %v705_v45 = vpop.eup %704  ;;  %320 = vst.msk [vmem:[#allocation2 + $0x10] sm:$0xff] %vm54_vm0, %v312_v61  ;;  %v307_v1 = vadd.f32 %v958_v51, %v284_v33  ;;  %v255_v22 = vmul.f32 %v703_v36, %v917_v27  ;;  %655 = vmatmul.mubr.msk.bf16.vlgmr.msra.gmra.mrb[0].mxu0 %vm54_vm0, %v327_v37 }
 0x154   :  { %v262_v23 = vmul.f32 %v705_v45, %v927_v28  ;;  %v300_v8 = vadd.f32 %v958_v51, %v277_v2 }
 0x155   :  { %v316_v3 = vpack.c.bf16 %v307_v1, %v306_v0  ;;  %v278_v4 = vmul.f32 %v951_v40, %v255_v22 }
 0x156   :  { %v707_v5 = vpop.eup %706  ;;  %v331_v7 = vld [vmem:[#allocation2 + $0x28] sm:$0xff]  ;;  %v285_v53 = vmul.f32 %v951_v40, %v262_v23 }
 0x157   :  { %324 = vst.msk [vmem:[#allocation2 + $0x30] sm:$0xff] %vm54_vm0, %v316_v3  ;;  %v301_v10 = vadd.f32 %v958_v51, %v278_v4  ;;  %v263_v11 = vmul.f32 %v707_v5, %v931_v32  ;;  %663 = vmatmul.mubr.msk.bf16.vlgmr.msra.gmra.mrb[0].mxu1 %vm54_vm0, %v331_v7 }
 0x158   :  { %v308_v12 = vadd.f32 %v958_v51, %v285_v53 }
 0x159   :  { %v313_v27 = vpack.c.bf16 %v301_v10, %v300_v8  ;;  %v286_v28 = vmul.f32 %v951_v40, %v263_v11 }
 0x15a   :  { %v328_v62 = vld [vmem:[#allocation2 + $0x10] sm:$0xff] }
 0x15b   :  { %321 = vst.msk [vmem:[#allocation2 + $0x18] sm:$0xff] %vm54_vm0, %v313_v27  ;;  %v309_v14 = vadd.f32 %v958_v51, %v286_v28  ;;  %658 = vmatprep.mubr.msk.bf16.mxu0 %vm54_vm0, %v328_v62 }
 0x15d   :  { %v317_v15 = vpack.c.bf16 %v309_v14, %v308_v12 }
 0x15e   :  { %v332_v19 = vld [vmem:[#allocation2 + $0x30] sm:$0xff] }
 0x15f   :  { %325 = vst.msk [vmem:[#allocation2 + $0x38] sm:$0xff] %vm54_vm0, %v317_v15  ;;  %666 = vmatprep.mubr.msk.bf16.mxu1 %vm54_vm0, %v332_v19 }
 0x162   :  { %v329_v32 = vld [vmem:[#allocation2 + $0x18] sm:$0xff] }
 0x163   :  { %659 = vmatmul.mubr.msk.bf16.gmra.mrb[4].mxu0 %vm54_vm0, %v329_v32 }
 0x166   :  { %v333_v20 = vld [vmem:[#allocation2 + $0x38] sm:$0xff] }
 0x167   :  { %667 = vmatmul.mubr.msk.bf16.gmra.mrb[4].mxu1 %vm54_vm0, %v333_v20 }
 0x226   :  { %v656_v40 = vpop.f32.mrb[0].mxu0 }
 0x227   :  { %v587_v16 = vpack.c.bf16 %v656_v40, %v656_v40  ;;  %v409_v24 = vpop.f32.mrb[1].mxu0 }
 0x228   :  { %v585_v25 = vpack.c.bf16 %v409_v24, %v409_v24  ;;  %v657_v51 = vpop.f32.mrb[2].mxu0 }
 0x229   :  { %539 = vst.msk [vmem:[%s1089_s4 + $0x8] sm:$0xf] %vm536_vm1, %v587_v16  ;;  %v588_v29 = vpack.c.bf16 %v657_v51, %v657_v51  ;;  %v412_v30 = vpop.f32.mrb[3].mxu0 }
 0x22a   :  { %537 = vst.msk [vmem:[%s1089_s4] sm:$0xf] %vm536_vm1, %v585_v25  ;;  %v586_v34 = vpack.c.bf16 %v412_v30, %v412_v30  ;;  %v664_v35 = vpop.f32.mrb[0].mxu1 }
 0x22b   :  { %540 = vst.msk [vmem:[%s1089_s4 + $0xc] sm:$0xf] %vm536_vm1, %v588_v29  ;;  %v595_v63 = vpack.c.bf16 %v664_v35, %v664_v35  ;;  %v441_v38 = vpop.f32.mrb[1].mxu1 }
 0x22c   :  { %538 = vst.msk [vmem:[%s1089_s4 + $0x4] sm:$0xf] %vm536_vm1, %v586_v34  ;;  %v593_v6 = vpack.c.bf16 %v441_v38, %v441_v38  ;;  %v665_v21 = vpop.f32.mrb[2].mxu1 }
 0x22d   :  { %547 = vst.msk [vmem:[%s1089_s4 + $0x28] sm:$0xf] %vm536_vm1, %v595_v63  ;;  %v596_v39 = vpack.c.bf16 %v665_v21, %v665_v21  ;;  %v444_v41 = vpop.f32.mrb[3].mxu1 }
 0x22e   :  { %545 = vst.msk [vmem:[%s1089_s4 + $0x20] sm:$0xf] %vm536_vm1, %v593_v6  ;;  %v594_v42 = vpack.c.bf16 %v444_v41, %v444_v41 }
 0x22f   :  { %548 = vst.msk [vmem:[%s1089_s4 + $0x2c] sm:$0xf] %vm536_vm1, %v596_v39 }
 0x230   :  { %546 = vst.msk [vmem:[%s1089_s4 + $0x24] sm:$0xf] %vm536_vm1, %v594_v42 }
 0x236   :  { %v660_v43 = vpop.f32.mrb[4].mxu0 }
 0x237   :  { %v591_v46 = vpack.c.bf16 %v660_v43, %v660_v43  ;;  %v425_v47 = vpop.f32.mrb[5].mxu0 }
 0x238   :  { %v589_v26 = vpack.c.bf16 %v425_v47, %v425_v47  ;;  %v661_v48 = vpop.f32.mrb[6].mxu0 }
 0x239   :  { %543 = vst.msk [vmem:[%s1089_s4 + $0x18] sm:$0xf] %vm536_vm1, %v591_v46  ;;  %v592_v49 = vpack.c.bf16 %v661_v48, %v661_v48  ;;  %v428_v44 = vpop.f32.mrb[7].mxu0 }
 0x23a   :  { %541 = vst.msk [vmem:[%s1089_s4 + $0x10] sm:$0xf] %vm536_vm1, %v589_v26  ;;  %v590_v9 = vpack.c.bf16 %v428_v44, %v428_v44  ;;  %v668_v50 = vpop.f32.mrb[4].mxu1 }
 0x23b   :  { %544 = vst.msk [vmem:[%s1089_s4 + $0x1c] sm:$0xf] %vm536_vm1, %v592_v49  ;;  %v599_v13 = vpack.c.bf16 %v668_v50, %v668_v50  ;;  %v457_v54 = vpop.f32.mrb[5].mxu1 }
 0x23c   :  { %542 = vst.msk [vmem:[%s1089_s4 + $0x14] sm:$0xf] %vm536_vm1, %v590_v9  ;;  %v597_v55 = vpack.c.bf16 %v457_v54, %v457_v54  ;;  %v669_v56 = vpop.f32.mrb[6].mxu1 }
 0x23d   :  { %551 = vst.msk [vmem:[%s1089_s4 + $0x38] sm:$0xf] %vm536_vm1, %v599_v13  ;;  %v600_v31 = vpack.c.bf16 %v669_v56, %v669_v56  ;;  %v460_v57 = vpop.f32.mrb[7].mxu1 }
 0x23e   :  { %549 = vst.msk [vmem:[%s1089_s4 + $0x30] sm:$0xf] %vm536_vm1, %v597_v55  ;;  %v598_v58 = vpack.c.bf16 %v460_v57, %v460_v57 }
 0x23f   :  { %552 = vst.msk [vmem:[%s1089_s4 + $0x3c] sm:$0xf] %vm536_vm1, %v600_v31 }
 0x240   :  { %550 = vst.msk [vmem:[%s1089_s4 + $0x34] sm:$0xf] %vm536_vm1, %v598_v58 }

// kernel: unet_mid_block_cross_attn.32
= control target key start
LH: loop header
LB: loop body
LE: loop exit
PB: predicated region body
PF: predicated region fallthrough
CT: control target
= control target key end

     0   :  { %s765_s12 = smov 0   ;;  %s834_s0 = inlined_call_operand.vmem [shape: bf16[8,64,8], index: 0, kind: input, shape index: {}]   ;;  %s835_s1 = inlined_call_operand.vmem [shape: bf16[8,8,8], index: 1, kind: input, shape index: {}]   ;;  %s836_s2 = inlined_call_operand.vmem [shape: bf16[8,8,8], index: 2, kind: input, shape index: {}]   ;;  %s837_s3 = inlined_call_operand.vmem [shape: bf16[8,64,8], index: 3, kind: output, shape index: {}]  }
   0x1 LB: > { %s618_s13 = sadd.s32 4294967295, %s743_s12   ;;  %p622_p0 = scmp.ge.s32.totalorder %s743_s12, 1  ;;  %s743_s12 = sphi %s765_s12, %s13_s12  }
   0x2   : > { %p155_p1 = scmp.lt.s32.totalorder %s743_s12, 9 }
   0x4   : > { %p156_p2 = pnand %p622_p0, %p155_p1 }
   0x5   : > { %p187_p3 = scmp.lt.s32.totalorder (!%p156_p2), %s618_s13, 7  ;;  %vm236_vm0 = vcmask (!%p156_p2), 64512   ;;  %vm429_vm1 = vcmask (!%p156_p2), 1043456   ;;  %vm530_vm2 = vcmask (!%p156_p2), 60416  }
   0x6   : > { %159 = sbr.rel (%p156_p2) target bundleno = 790 (0x316), region = 32 }
   0xd   : > { %s839_s13 = smov (!%p187_p3, %s618_s13), 7 }
   0xe   : > { %s651_s14 = sshll.u32 %s839_s13, 5  ;;  %s625_s15 = sshll.u32 %s839_s13, 2 }
   0xf   : > { %s191_s18 = scalar_lea.vmem %s834_s0, %s651_s14  ;;  %s195_s21 = scalar_lea.vmem %s835_s1, %s625_s15 }
  0x10   : > { %v214_v0 = vld [vmem:[%s195_s21] sm:$0xf]  ;;  %v702_v3 = vld [vmem:[%s191_s18 + $0x8] sm:$0xff]   ;;  %v703_v4 = vld [vmem:[%s191_s18 + $0x10] sm:$0xff]   ;;  %s199_s24 = scalar_lea.vmem %s836_s2, %s625_s15  ;;  %s204_s27 = scalar_lea.vmem %s837_s3, %s651_s14 }
  0x11   : > { %691 = vmatprep.subr.msk.bf16.mxu0 %vm236_vm0, %v214_v0  ;;  %v250_v1 = vsel %vm236_vm0, %v214_v0, 0  ;;  %v701_v2 = vld [vmem:[%s191_s18] sm:$0xff]   ;;  %v704_v5 = vld [vmem:[%s191_s18 + $0x18] sm:$0xff]  }
  0x12   : > { %672 = vmatpush3.bf16.xpose.msra.mxu0 %v250_v1  ;;  %673 = vmatprep.mubr.msk.bf16.mxu0 %vm236_vm0, %v701_v2 }
  0x19   : > { %674 = vmatmul.mubr.msk.bf16.vlgmr.msra.gmra.mrb[0].mxu0 %vm236_vm0, %v702_v3 }
  0x1a   : > { %677 = vmatprep.mubr.msk.bf16.mxu0 %vm236_vm0, %v703_v4 }
  0x21   : > { %678 = vmatmul.mubr.msk.bf16.gmra.mrb[4].mxu0 %vm236_vm0, %v704_v5 }
  0xec   : > { %v675_v6 = vpop.f32.mrb[0].mxu0 }
  0xed   : > { %v319_v7 = vmul.f32 0.35355338, %v675_v6  ;;  %v286_v8 = vpop.f32.mrb[1].mxu0  ;;  %v215_v6 = vld [vmem:[%s199_s24] sm:$0xf] }
  0xee   : > { %v317_v9 = vmul.f32 0.35355338, %v286_v8  ;;  %v676_v10 = vpop.f32.mrb[2].mxu0  ;;  %692 = vmatprep.subr.msk.bf16.mxu1 %vm429_vm1, %v215_v6 }
  0xef   : > { %v320_v11 = vmul.f32 0.35355338, %v676_v10  ;;  %v289_v12 = vpop.f32.mrb[3].mxu0  ;;  %v331_v13 = vsel %vm236_vm0, %v319_v7, -inf }
  0xf0   : > { %v318_v14 = vmul.f32 0.35355338, %v289_v12  ;;  %332 = vmax.xlane.f32.xlu1 %v331_v13  ;;  %v325_v15 = vsel %vm236_vm0, %v317_v9, -inf }
  0xf1   : > { %326 = vmax.xlane.f32.xlu0 %v325_v15  ;;  %v334_v16 = vsel %vm236_vm0, %v320_v11, -inf }
  0xf2   : > { %v328_v18 = vsel %vm236_vm0, %v318_v14, -inf }
  0xf4   : > { %335 = vmax.xlane.f32.xlu1 %v334_v16  ;;  %v679_v17 = vpop.f32.mrb[4].mxu0 }
  0xf5   : > { %329 = vmax.xlane.f32.xlu0 %v328_v18  ;;  %v302_v19 = vpop.f32.mrb[5].mxu0  ;;  %v323_v23 = vmul.f32 0.35355338, %v679_v17 }
  0xf6   : > { %v321_v20 = vmul.f32 0.35355338, %v302_v19  ;;  %v680_v21 = vpop.f32.mrb[6].mxu0 }
  0xf7   : > { %v305_v22 = vpop.f32.mrb[7].mxu0  ;;  %v324_v26 = vmul.f32 0.35355338, %v680_v21  ;;  %v343_v28 = vsel %vm236_vm0, %v323_v23, -inf }
  0xf8   : > { %v322_v24 = vmul.f32 0.35355338, %v305_v22  ;;  %v337_v25 = vsel %vm236_vm0, %v321_v20, -inf }
  0xf9   : > { %338 = vmax.xlane.f32.xlu0 %v337_v25  ;;  %v346_v29 = vsel %vm236_vm0, %v324_v26, -inf }
  0xfa   : > { %v340_v27 = vsel %vm236_vm0, %v322_v24, -inf }
  0xfb   : > { %341 = vmax.xlane.f32.xlu1 %v340_v27 }
  0xfd   : > { %344 = vmax.xlane.f32.xlu0 %v343_v28 }
  0xff   : > { %347 = vmax.xlane.f32.xlu1 %v346_v29 }
 0x17d   : > { %v333_v30 = vpop.xlane.xlu1 %332 }
 0x17e   : > { %v351_v31 = vsub.f32 %v319_v7, %v333_v30  ;;  %v327_v32 = vpop.xlane.xlu0 %326  ;;  %v431_v7 = vsel %vm429_vm1, %v215_v6, 0 }
 0x17f   : > { %v349_v33 = vsub.f32 %v317_v9, %v327_v32  ;;  %682 = vmatpush3.bf16.msra.mxu1 %v431_v7 }
 0x180   : > { %v361_v34 = vmul.f32 1.442695, %v351_v31 }
 0x181   : > { %v357_v35 = vmul.f32 1.442695, %v349_v33  ;;  %v336_v36 = vpop.xlane.xlu1 %335 }
 0x182   : > { %v352_v37 = vsub.f32 %v320_v11, %v336_v36  ;;  %v330_v38 = vpop.xlane.xlu0 %329 }
 0x183   : > { %705 = vpow2.f32 %v357_v35  ;;  %v350_v39 = vsub.f32 %v318_v14, %v330_v38 }
 0x184   : > { %707 = vpow2.f32 %v361_v34  ;;  %v363_v40 = vmul.f32 1.442695, %v352_v37 }
 0x185   : > { %v359_v41 = vmul.f32 1.442695, %v350_v39 }
 0x186   : > { %v339_v42 = vpop.xlane.xlu0 %338 }
 0x187   : > { %709 = vpow2.f32 %v359_v41  ;;  %v353_v43 = vsub.f32 %v321_v20, %v339_v42 }
 0x188   : > { %v342_v44 = vpop.xlane.xlu1 %341  ;;  %711 = vpow2.f32 %v363_v40 }
 0x189   : > { %v365_v45 = vmul.f32 1.442695, %v353_v43  ;;  %v354_v46 = vsub.f32 %v322_v24, %v342_v44 }
 0x18a   : > { %v345_v47 = vpop.xlane.xlu0 %344 }
 0x18b   : > { %713 = vpow2.f32 %v365_v45  ;;  %v367_v48 = vmul.f32 1.442695, %v354_v46  ;;  %v355_v49 = vsub.f32 %v323_v23, %v345_v47 }
 0x18c   : > { %v348_v50 = vpop.xlane.xlu1 %347 }
 0x18d   : > { %v706_v51 = vpop.eup %705  ;;  %715 = vpow2.f32 %v367_v48  ;;  %v369_v52 = vmul.f32 1.442695, %v355_v49  ;;  %v356_v53 = vsub.f32 %v324_v26, %v348_v50 }
 0x18e   : > { %v373_v54 = vsel %vm236_vm0, %v706_v51, 0.0  ;;  %v708_v55 = vpop.eup %707 }
 0x18f   : > { %717 = vpow2.f32 %v369_v52  ;;  %v371_v56 = vmul.f32 1.442695, %v356_v53  ;;  %374 = vadd.xlane.f32.xlu0 %v373_v54  ;;  %v379_v58 = vsel %vm236_vm0, %v708_v55, 0.0 }
 0x191   : > { %v710_v57 = vpop.eup %709  ;;  %719 = vpow2.f32 %v371_v56 }
 0x192   : > { %v376_v59 = vsel %vm236_vm0, %v710_v57, 0.0  ;;  %v712_v60 = vpop.eup %711 }
 0x193   : > { %380 = vadd.xlane.f32.xlu0 %v379_v58  ;;  %377 = vadd.xlane.f32.xlu1 %v376_v59  ;;  %v382_v63 = vsel %vm236_vm0, %v712_v60, 0.0 }
 0x195   : > { %v714_v61 = vpop.eup %713 }
 0x196   : > { %v385_v62 = vsel %vm236_vm0, %v714_v61, 0.0 }
 0x197   : > { %v716_v0 = vpop.eup %715  ;;  %386 = vadd.xlane.f32.xlu0 %v385_v62  ;;  %383 = vadd.xlane.f32.xlu1 %v382_v63 }
 0x198   : > { %v388_v3 = vsel %vm236_vm0, %v716_v0, 0.0 }
 0x199   : > { %v718_v1 = vpop.eup %717 }
 0x19a   : > { %v391_v2 = vsel %vm236_vm0, %v718_v1, 0.0 }
 0x19b   : > { %v720_v4 = vpop.eup %719  ;;  %392 = vadd.xlane.f32.xlu0 %v391_v2  ;;  %389 = vadd.xlane.f32.xlu1 %v388_v3 }
 0x19c   : > { %v394_v5 = vsel %vm236_vm0, %v720_v4, 0.0 }
 0x19f   : > { %395 = vadd.xlane.f32.xlu1 %v394_v5 }
 0x21c   : > { %v375_v8 = vpop.xlane.xlu0 %374 }
 0x21d   : > { %721 = vrcp.f32 %v375_v8 }
 0x220   : > { %v381_v9 = vpop.xlane.xlu0 %380  ;;  %v378_v10 = vpop.xlane.xlu1 %377 }
 0x221   : > { %723 = vrcp.f32 %v378_v10 }
 0x222   : > { %725 = vrcp.f32 %v381_v9 }
 0x224   : > { %v387_v11 = vpop.xlane.xlu0 %386  ;;  %v384_v12 = vpop.xlane.xlu1 %383 }
 0x225   : > { %727 = vrcp.f32 %v384_v12 }
 0x226   : > { %729 = vrcp.f32 %v387_v11 }
 0x227   : > { %v722_v15 = vpop.eup %721 }
 0x228   : > { %v393_v13 = vpop.xlane.xlu0 %392  ;;  %v390_v14 = vpop.xlane.xlu1 %389  ;;  %v405_v18 = vmul.f32 %v722_v15, %v706_v51 }
 0x229   : > { %731 = vrcp.f32 %v390_v14 }
 0x22a   : > { %733 = vrcp.f32 %v393_v13 }
 0x22b   : > { %v724_v16 = vpop.eup %723 }
 0x22c   : > { %v396_v17 = vpop.xlane.xlu1 %395  ;;  %v406_v19 = vmul.f32 %v724_v16, %v710_v57  ;;  %v726_v20 = vpop.eup %725 }
 0x22d   : > { %735 = vrcp.f32 %v396_v17  ;;  %v407_v23 = vmul.f32 %v726_v20, %v708_v55 }
 0x22e   : > { %v413_v21 = vpack.c.bf16 %v406_v19, %v405_v18 }
 0x22f   : > { %v728_v22 = vpop.eup %727 }
 0x230   : > { %683 = vmatprep.mubr.msk.bf16.mxu1 %vm236_vm0, %v413_v21  ;;  %v408_v24 = vmul.f32 %v728_v22, %v712_v60  ;;  %v730_v25 = vpop.eup %729 }
 0x231   : > { %v409_v29 = vmul.f32 %v730_v25, %v714_v61 }
 0x232   : > { %v414_v26 = vpack.c.bf16 %v408_v24, %v407_v23 }
 0x233   : > { %v732_v27 = vpop.eup %731 }
 0x234   : > { %v734_v28 = vpop.eup %733  ;;  %684 = vmatmul.mubr.msk.bf16.vlgmr.msra.gmra.mrb[0].mxu1 %vm236_vm0, %v414_v26  ;;  %v410_v30 = vmul.f32 %v732_v27, %v716_v0 }
 0x235   : > { %v411_v33 = vmul.f32 %v734_v28, %v718_v1 }
 0x236   : > { %v415_v32 = vpack.c.bf16 %v410_v30, %v409_v29 }
 0x237   : > { %v736_v31 = vpop.eup %735 }
 0x238   : > { %v412_v34 = vmul.f32 %v736_v31, %v720_v4  ;;  %687 = vmatprep.mubr.msk.bf16.mxu1 %vm236_vm0, %v415_v32 }
 0x23a   : > { %v416_v35 = vpack.c.bf16 %v412_v34, %v411_v33 }
 0x23c   : > { %688 = vmatmul.mubr.msk.bf16.gmra.mrb[4].mxu1 %vm236_vm0, %v416_v35 }
 0x307   : > { %v685_v36 = vpop.f32.mrb[0].mxu1 }
 0x308   : > { %v655_v37 = vpack.c.bf16 %v685_v36, %v685_v36  ;;  %v467_v38 = vpop.f32.mrb[1].mxu1 }
 0x309   : > { %v653_v39 = vpack.c.bf16 %v467_v38, %v467_v38  ;;  %v686_v40 = vpop.f32.mrb[2].mxu1 }
 0x30a   : > { %533 = vst.msk [vmem:[%s204_s27 + $0x8] sm:$0xf] %vm530_vm2, %v655_v37  ;;  %v656_v41 = vpack.c.bf16 %v686_v40, %v686_v40  ;;  %v470_v42 = vpop.f32.mrb[3].mxu1 }
 0x30b   : > { %531 = vst.msk [vmem:[%s204_s27] sm:$0xf] %vm530_vm2, %v653_v39  ;;  %v654_v43 = vpack.c.bf16 %v470_v42, %v470_v42 }
 0x30c   : > { %534 = vst.msk [vmem:[%s204_s27 + $0xc] sm:$0xf] %vm530_vm2, %v656_v41 }
 0x30d   : > { %532 = vst.msk [vmem:[%s204_s27 + $0x4] sm:$0xf] %vm530_vm2, %v654_v43 }
 0x30f   : > { %v689_v44 = vpop.f32.mrb[4].mxu1 }
 0x310   : > { %v659_v45 = vpack.c.bf16 %v689_v44, %v689_v44  ;;  %v483_v46 = vpop.f32.mrb[5].mxu1 }
 0x311   : > { %v657_v47 = vpack.c.bf16 %v483_v46, %v483_v46  ;;  %v690_v48 = vpop.f32.mrb[6].mxu1 }
 0x312   : > { %537 = vst.msk [vmem:[%s204_s27 + $0x18] sm:$0xf] %vm530_vm2, %v659_v45  ;;  %v660_v49 = vpack.c.bf16 %v690_v48, %v690_v48  ;;  %v486_v50 = vpop.f32.mrb[7].mxu1 }
 0x313   : > { %535 = vst.msk [vmem:[%s204_s27 + $0x10] sm:$0xf] %vm530_vm2, %v657_v47  ;;  %v658_v51 = vpack.c.bf16 %v486_v50, %v486_v50 }
 0x314   : > { %538 = vst.msk [vmem:[%s204_s27 + $0x1c] sm:$0xf] %vm530_vm2, %v660_v49 }
 0x315   : > { %536 = vst.msk [vmem:[%s204_s27 + $0x14] sm:$0xf] %vm530_vm2, %v658_v51 }
 0x316 PF: > { %s13_s12 = sadd.s32 1, %s743_s12  }
 0x317   : > { %p10_p4 = scmp.ge.s32.totalorder %s13_s12, 10  }
 0x319   :  { %12 = sbr.rel (!%p10_p4) target bundleno = 1 (0x1), region = 68 }

// kernel: unet_mid_block_cross_attn.35
= control target key start
LH: loop header
LB: loop body
LE: loop exit
PB: predicated region body
PF: predicated region fallthrough
CT: control target
= control target key end

     0   :  { %vm362_vm0 = vcmask 257024   ;;  %s733_s1 = inlined_call_operand.vmem [shape: bf16[128,32], index: 1, kind: input, shape index: {}]   ;;  %s734_s0 = inlined_call_operand.vmem [shape: bf16[128,128], index: 0, kind: input, shape index: {}]   ;;  %s735_s3 = inlined_call_operand.vmem [shape: bf16[128,32], index: 3, kind: input, shape index: {}, may-alias: {3,4}]   ;;  %s736_s2 = inlined_call_operand.vmem [shape: f32[1,32], index: 2, kind: input, shape index: {}]   ;;  %s737_s4 = inlined_call_operand.vmem [shape: bf16[128,32], index: 4, kind: output, shape index: {}, may-alias: {3,4}]  }
   0x1   :  { %v535_v0 = vld [vmem:[%s733_s1] sm:$0xff]   ;;  %v536_v1 = vld [vmem:[%s733_s1 + $0x8] sm:$0xff]   ;;  %v537_v2 = vld [vmem:[%s733_s1 + $0x10] sm:$0xff]  }
   0x2   :  { %487 = vmatprep.subr.bf16.mxu0 %v535_v0  ;;  %519 = vmatprep.subr.bf16.mxu1 %v535_v0  ;;  %v538_v3 = vld [vmem:[%s733_s1 + $0x18] sm:$0xff]   ;;  %v543_v4 = vld [vmem:[%s734_s0] sm:$0xff]   ;;  %v540_v7 = vld [vmem:[%s733_s1 + $0x28] sm:$0xff]  }
   0x3   :  { %488 = vmatpush3.bf16.msra.mxu0 %v535_v0  ;;  %527 = vmatpush3.bf16.msra.mxu1 %v535_v0  ;;  %v544_v5 = vld [vmem:[%s734_s0 + $0x20] sm:$0xff]   ;;  %v541_v8 = vld [vmem:[%s733_s1 + $0x30] sm:$0xff]   ;;  %v542_v9 = vld [vmem:[%s733_s1 + $0x38] sm:$0xff]  }
   0x4   :  { %489 = vmatprep.subr.bf16.mxu0 %v536_v1  ;;  %520 = vmatprep.subr.bf16.mxu1 %v536_v1  ;;  %v539_v6 = vld [vmem:[%s733_s1 + $0x20] sm:$0xff]   ;;  %v545_v10 = vld [vmem:[%s734_s0 + $0x8] sm:$0xff]   ;;  %v547_v12 = vld [vmem:[%s734_s0 + $0x10] sm:$0xff]  }
   0x5   :  { %503 = vmatprep.mubr.bf16.mxu0 %v543_v4  ;;  %511 = vmatprep.mubr.bf16.mxu1 %v544_v5  ;;  %v546_v11 = vld [vmem:[%s734_s0 + $0x28] sm:$0xff]   ;;  %v548_v13 = vld [vmem:[%s734_s0 + $0x30] sm:$0xff]   ;;  %v549_v14 = vld [vmem:[%s734_s0 + $0x18] sm:$0xff]  }
   0x6   :  { %v550_v15 = vld [vmem:[%s734_s0 + $0x38] sm:$0xff]   ;;  %v464_v16 = vld [vmem:[%s735_s3 + $0x8] sm:$0xff]   ;;  %v433_v18 = vld [vmem:[%s735_s3] sm:$0xff]  }
   0x7   :  { %490 = vmatpush3.bf16.msra.mxu0 %v536_v1  ;;  %528 = vmatpush3.bf16.msra.mxu1 %v536_v1  ;;  %v468_v17 = vld [vmem:[%s735_s3 + $0x28] sm:$0xff]   ;;  %v467_v19 = vld [vmem:[%s735_s3 + $0x20] sm:$0xff]   ;;  %v438_v21 = vunpack.c.l.bf16 %v464_v16  ;;  %v434_v25 = vunpack.c.l.bf16 %v433_v18  ;;  %v439_v27 = vunpack.c.h.bf16 %v464_v16  ;;  %v435_v33 = vunpack.c.h.bf16 %v433_v18  ;;  %v466_v49 = vld [vmem:[%s735_s3 + $0x18] sm:$0xff]  }
   0x8   :  { %491 = vmatprep.subr.bf16.mxu0 %v537_v2  ;;  %521 = vmatprep.subr.bf16.mxu1 %v537_v2  ;;  %v639_v20 = vld [vmem:[%s736_s2] ss:$0 sm:$0xff]  ;;  %v454_v22 = vunpack.c.l.bf16 %v468_v17  ;;  %v450_v26 = vunpack.c.l.bf16 %v467_v19  ;;  %v455_v32 = vunpack.c.h.bf16 %v468_v17  ;;  %v451_v38 = vunpack.c.h.bf16 %v467_v19  ;;  %v470_v50 = vld [vmem:[%s735_s3 + $0x38] sm:$0xff]   ;;  %v465_v55 = vld [vmem:[%s735_s3 + $0x10] sm:$0xff]  }
   0x9   :  { %v469_v56 = vld [vmem:[%s735_s3 + $0x30] sm:$0xff]   ;;  %v446_v63 = vunpack.c.l.bf16 %v466_v49  ;;  %v462_v0 = vunpack.c.l.bf16 %v470_v50  ;;  %v442_v5 = vunpack.c.l.bf16 %v465_v55  ;;  %v443_v17 = vunpack.c.h.bf16 %v465_v55 }
   0xa   :  { %v459_v18 = vunpack.c.h.bf16 %v469_v56 }
   0xb   :  { %492 = vmatpush3.bf16.msra.mxu0 %v537_v2  ;;  %529 = vmatpush3.bf16.msra.mxu1 %v537_v2 }
   0xc   :  { %493 = vmatprep.subr.bf16.mxu0 %v538_v3  ;;  %522 = vmatprep.subr.bf16.mxu1 %v538_v3 }
   0xf   :  { %494 = vmatpush3.bf16.msra.mxu0 %v538_v3  ;;  %530 = vmatpush3.bf16.msra.mxu1 %v538_v3 }
  0x10   :  { %495 = vmatprep.subr.bf16.mxu0 %v539_v6  ;;  %523 = vmatprep.subr.bf16.mxu1 %v539_v6 }
  0x13   :  { %496 = vmatpush3.bf16.msra.mxu0 %v539_v6  ;;  %531 = vmatpush3.bf16.msra.mxu1 %v539_v6  ;;  %v458_v6 = vunpack.c.l.bf16 %v469_v56 }
  0x14   :  { %497 = vmatprep.subr.bf16.mxu0 %v540_v7  ;;  %524 = vmatprep.subr.bf16.mxu1 %v540_v7 }
  0x17   :  { %498 = vmatpush3.bf16.msra.mxu0 %v540_v7  ;;  %532 = vmatpush3.bf16.msra.mxu1 %v540_v7 }
  0x18   :  { %499 = vmatprep.subr.bf16.mxu0 %v541_v8  ;;  %525 = vmatprep.subr.bf16.mxu1 %v541_v8 }
  0x1b   :  { %500 = vmatpush3.bf16.msra.mxu0 %v541_v8  ;;  %533 = vmatpush3.bf16.msra.mxu1 %v541_v8 }
  0x1c   :  { %501 = vmatprep.subr.bf16.mxu0 %v542_v9  ;;  %526 = vmatprep.subr.bf16.mxu1 %v542_v9 }
  0x1f   :  { %502 = vmatpush3.bf16.msra.mxu0 %v542_v9  ;;  %534 = vmatpush3.bf16.msra.mxu1 %v542_v9 }
  0x22   :  { %504 = vmatmul.mubr.bf16.vlgmr.msra.gmra.mrb[0].mxu0 %v545_v10  ;;  %512 = vmatmul.mubr.bf16.vlgmr.msra.gmra.mrb[0].mxu1 %v546_v11  ;;  %v447_v11 = vunpack.c.h.bf16 %v466_v49 }
  0x23   :  { %507 = vmatprep.mubr.bf16.mxu0 %v547_v12  ;;  %515 = vmatprep.mubr.bf16.mxu1 %v548_v13  ;;  %v463_v12 = vunpack.c.h.bf16 %v470_v50 }
  0x2a   :  { %508 = vmatmul.mubr.bf16.gmra.mrb[4].mxu0 %v549_v14  ;;  %516 = vmatmul.mubr.bf16.gmra.mrb[4].mxu1 %v550_v15 }
  0xf5   :  { %v505_v23 = vpop.f32.mrb[0].mxu0  ;;  %v513_v24 = vpop.f32.mrb[0].mxu1 }
  0xf6   :  { %v196_v28 = vadd.f32 %v505_v23, %v639_v20  ;;  %v228_v29 = vadd.f32 %v513_v24, %v639_v20  ;;  %v187_v30 = vpop.f32.mrb[1].mxu0  ;;  %v219_v31 = vpop.f32.mrb[1].mxu1 }
  0xf7   :  { %v188_v34 = vadd.f32 %v639_v20, %v187_v30  ;;  %v220_v35 = vadd.f32 %v639_v20, %v219_v31  ;;  %v506_v36 = vpop.f32.mrb[2].mxu0  ;;  %v514_v37 = vpop.f32.mrb[2].mxu1 }
  0xf8   :  { %v284_v39 = vadd.f32 %v438_v21, %v196_v28  ;;  %v292_v40 = vadd.f32 %v454_v22, %v228_v29  ;;  %v199_v41 = vadd.f32 %v506_v36, %v639_v20  ;;  %v231_v42 = vadd.f32 %v514_v37, %v639_v20  ;;  %v190_v43 = vpop.f32.mrb[3].mxu0  ;;  %v222_v44 = vpop.f32.mrb[3].mxu1 }
  0xf9   :  { %v282_v45 = vadd.f32 %v434_v25, %v188_v34  ;;  %v290_v46 = vadd.f32 %v450_v26, %v220_v35  ;;  %v191_v47 = vadd.f32 %v639_v20, %v190_v43  ;;  %v223_v48 = vadd.f32 %v639_v20, %v222_v44 }
  0xfa   :  { %v418_v51 = vpack.c.bf16 %v284_v39, %v284_v39  ;;  %v426_v52 = vpack.c.bf16 %v292_v40, %v292_v40  ;;  %v285_v53 = vadd.f32 %v439_v27, %v199_v41  ;;  %v293_v54 = vadd.f32 %v455_v32, %v231_v42 }
  0xfb   :  { %v416_v57 = vpack.c.bf16 %v282_v45, %v282_v45  ;;  %v424_v58 = vpack.c.bf16 %v290_v46, %v290_v46  ;;  %v283_v59 = vadd.f32 %v435_v33, %v191_v47  ;;  %v291_v60 = vadd.f32 %v451_v38, %v223_v48 }
  0xfc   :  { %365 = vst.msk [vmem:[%s737_s4 + $0x8] sm:$0xf] %vm362_vm0, %v418_v51  ;;  %373 = vst.msk [vmem:[%s737_s4 + $0x28] sm:$0xf] %vm362_vm0, %v426_v52  ;;  %v419_v61 = vpack.c.bf16 %v285_v53, %v285_v53  ;;  %v427_v62 = vpack.c.bf16 %v293_v54, %v293_v54 }
  0xfd   :  { %363 = vst.msk [vmem:[%s737_s4] sm:$0xf] %vm362_vm0, %v416_v57  ;;  %371 = vst.msk [vmem:[%s737_s4 + $0x20] sm:$0xf] %vm362_vm0, %v424_v58  ;;  %v417_v1 = vpack.c.bf16 %v283_v59, %v283_v59  ;;  %v425_v2 = vpack.c.bf16 %v291_v60, %v291_v60  ;;  %v509_v3 = vpop.f32.mrb[4].mxu0  ;;  %v517_v4 = vpop.f32.mrb[4].mxu1 }
  0xfe   :  { %366 = vst.msk [vmem:[%s737_s4 + $0xc] sm:$0xf] %vm362_vm0, %v419_v61  ;;  %374 = vst.msk [vmem:[%s737_s4 + $0x2c] sm:$0xf] %vm362_vm0, %v427_v62  ;;  %v212_v7 = vadd.f32 %v509_v3, %v639_v20  ;;  %v244_v8 = vadd.f32 %v517_v4, %v639_v20  ;;  %v203_v9 = vpop.f32.mrb[5].mxu0  ;;  %v235_v10 = vpop.f32.mrb[5].mxu1 }
  0xff   :  { %364 = vst.msk [vmem:[%s737_s4 + $0x4] sm:$0xf] %vm362_vm0, %v417_v1  ;;  %372 = vst.msk [vmem:[%s737_s4 + $0x24] sm:$0xf] %vm362_vm0, %v425_v2  ;;  %v204_v13 = vadd.f32 %v639_v20, %v203_v9  ;;  %v236_v14 = vadd.f32 %v639_v20, %v235_v10  ;;  %v510_v15 = vpop.f32.mrb[6].mxu0  ;;  %v518_v16 = vpop.f32.mrb[6].mxu1 }
 0x100   :  { %v288_v19 = vadd.f32 %v446_v63, %v212_v7  ;;  %v296_v21 = vadd.f32 %v462_v0, %v244_v8  ;;  %v215_v22 = vadd.f32 %v510_v15, %v639_v20  ;;  %v247_v23 = vadd.f32 %v518_v16, %v639_v20  ;;  %v206_v24 = vpop.f32.mrb[7].mxu0  ;;  %v238_v25 = vpop.f32.mrb[7].mxu1 }
 0x101   :  { %v286_v26 = vadd.f32 %v442_v5, %v204_v13  ;;  %v294_v27 = vadd.f32 %v458_v6, %v236_v14  ;;  %v207_v28 = vadd.f32 %v639_v20, %v206_v24  ;;  %v239_v29 = vadd.f32 %v639_v20, %v238_v25 }
 0x102   :  { %v422_v30 = vpack.c.bf16 %v288_v19, %v288_v19  ;;  %v430_v31 = vpack.c.bf16 %v296_v21, %v296_v21  ;;  %v289_v32 = vadd.f32 %v447_v11, %v215_v22  ;;  %v297_v33 = vadd.f32 %v463_v12, %v247_v23 }
 0x103   :  { %v420_v34 = vpack.c.bf16 %v286_v26, %v286_v26  ;;  %v428_v35 = vpack.c.bf16 %v294_v27, %v294_v27  ;;  %v287_v36 = vadd.f32 %v443_v17, %v207_v28  ;;  %v295_v37 = vadd.f32 %v459_v18, %v239_v29 }
 0x104   :  { %369 = vst.msk [vmem:[%s737_s4 + $0x18] sm:$0xf] %vm362_vm0, %v422_v30  ;;  %377 = vst.msk [vmem:[%s737_s4 + $0x38] sm:$0xf] %vm362_vm0, %v430_v31  ;;  %v423_v38 = vpack.c.bf16 %v289_v32, %v289_v32  ;;  %v431_v20 = vpack.c.bf16 %v297_v33, %v297_v33 }
 0x105   :  { %367 = vst.msk [vmem:[%s737_s4 + $0x10] sm:$0xf] %vm362_vm0, %v420_v34  ;;  %375 = vst.msk [vmem:[%s737_s4 + $0x30] sm:$0xf] %vm362_vm0, %v428_v35  ;;  %v421_v39 = vpack.c.bf16 %v287_v36, %v287_v36  ;;  %v429_v40 = vpack.c.bf16 %v295_v37, %v295_v37 }
 0x106   :  { %370 = vst.msk [vmem:[%s737_s4 + $0x1c] sm:$0xf] %vm362_vm0, %v423_v38  ;;  %378 = vst.msk [vmem:[%s737_s4 + $0x3c] sm:$0xf] %vm362_vm0, %v431_v20 }
 0x107   :  { %368 = vst.msk [vmem:[%s737_s4 + $0x14] sm:$0xf] %vm362_vm0, %v421_v39  ;;  %376 = vst.msk [vmem:[%s737_s4 + $0x34] sm:$0xf] %vm362_vm0, %v429_v40 }

// kernel: unet_mid_block_cross_attn.34
= control target key start
LH: loop header
LB: loop body
LE: loop exit
PB: predicated region body
PF: predicated region fallthrough
CT: control target
= control target key end

     0   :  { %vm63_vm0 = vcmask 261120   ;;  %s2194_s0 = inlined_call_operand.vmem [shape: bf16[128,32], index: 0, kind: input, shape index: {}]   ;;  %s2195_s3 = inlined_call_operand.vmem [shape: bf16[32,128], index: 3, kind: input, shape index: {}]   ;;  %s2196_s4 = inlined_call_operand.vmem [shape: bf16[32,128], index: 4, kind: input, shape index: {}]   ;;  %s2197_s1 = inlined_call_operand.vmem [shape: f32[1,32], index: 1, kind: input, shape index: {}]   ;;  %s2198_s2 = inlined_call_operand.vmem [shape: f32[1,32], index: 2, kind: input, shape index: {}]   ;;  %s2199_s6 = inlined_call_operand.vmem [shape: f32[1,128], index: 6, kind: input, shape index: {}]   ;;  %s2200_s5 = inlined_call_operand.vmem [shape: f32[1,128], index: 5, kind: input, shape index: {}]   ;;  %s2201_s7 = inlined_call_operand.vmem [shape: bf16[128,128], index: 7, kind: output, shape index: {}]  }
   0x1   :  { %v1486_v0 = vld [vmem:[%s2194_s0] sm:$0xff]   ;;  %v1491_v1 = vld [vmem:[%s2194_s0 + $0x8] sm:$0xff]   ;;  %v1500_v6 = vld [vmem:[%s2194_s0 + $0x10] sm:$0xff]  }
   0x2   :  { %v1198_v2 = vunpack.c.l.bf16 %v1486_v0  ;;  %v1202_v3 = vunpack.c.l.bf16 %v1491_v1  ;;  %v1199_v4 = vunpack.c.h.bf16 %v1486_v0  ;;  %v1203_v5 = vunpack.c.h.bf16 %v1491_v1  ;;  %v1515_v13 = vld [vmem:[%s2194_s0 + $0x18] sm:$0xff]   ;;  %v1528_v18 = vld [vmem:[%s2194_s0 + $0x20] sm:$0xff]   ;;  %v1541_v23 = vld [vmem:[%s2194_s0 + $0x28] sm:$0xff]  }
   0x3   :  { %v1206_v11 = vunpack.c.l.bf16 %v1500_v6  ;;  %v1207_v12 = vunpack.c.h.bf16 %v1500_v6  ;;  %v1210_v16 = vunpack.c.l.bf16 %v1515_v13  ;;  %v1211_v17 = vunpack.c.h.bf16 %v1515_v13  ;;  %v1554_v28 = vld [vmem:[%s2194_s0 + $0x30] sm:$0xff]   ;;  %v1567_v33 = vld [vmem:[%s2194_s0 + $0x38] sm:$0xff]  }
   0x4   :  { %v64_v7 = vsel %vm63_vm0, %v1198_v2, 0.0  ;;  %v70_v8 = vsel %vm63_vm0, %v1202_v3, 0.0  ;;  %v67_v9 = vsel %vm63_vm0, %v1199_v4, 0.0  ;;  %v73_v10 = vsel %vm63_vm0, %v1203_v5, 0.0 }
   0x5   :  { %65 = vadd.xlane.f32.xlu0 %v64_v7  ;;  %71 = vadd.xlane.f32.xlu1 %v70_v8  ;;  %v76_v14 = vsel %vm63_vm0, %v1206_v11, 0.0  ;;  %v79_v15 = vsel %vm63_vm0, %v1207_v12, 0.0  ;;  %v82_v19 = vsel %vm63_vm0, %v1210_v16, 0.0  ;;  %v85_v20 = vsel %vm63_vm0, %v1211_v17, 0.0 }
   0x6   :  { %v1214_v21 = vunpack.c.l.bf16 %v1528_v18  ;;  %v1215_v22 = vunpack.c.h.bf16 %v1528_v18  ;;  %v1218_v26 = vunpack.c.l.bf16 %v1541_v23  ;;  %v1219_v27 = vunpack.c.h.bf16 %v1541_v23 }
   0x7   :  { %v1222_v31 = vunpack.c.l.bf16 %v1554_v28  ;;  %v1223_v32 = vunpack.c.h.bf16 %v1554_v28  ;;  %v1226_v36 = vunpack.c.l.bf16 %v1567_v33  ;;  %v1227_v37 = vunpack.c.h.bf16 %v1567_v33 }
   0x8   :  { %v88_v24 = vsel %vm63_vm0, %v1214_v21, 0.0  ;;  %v91_v25 = vsel %vm63_vm0, %v1215_v22, 0.0  ;;  %v94_v29 = vsel %vm63_vm0, %v1218_v26, 0.0  ;;  %v97_v30 = vsel %vm63_vm0, %v1219_v27, 0.0 }
   0x9   :  { %68 = vadd.xlane.f32.xlu0 %v67_v9  ;;  %74 = vadd.xlane.f32.xlu1 %v73_v10  ;;  %v100_v34 = vsel %vm63_vm0, %v1222_v31, 0.0  ;;  %v103_v35 = vsel %vm63_vm0, %v1223_v32, 0.0  ;;  %v106_v38 = vsel %vm63_vm0, %v1226_v36, 0.0  ;;  %v109_v39 = vsel %vm63_vm0, %v1227_v37, 0.0 }
   0xd   :  { %77 = vadd.xlane.f32.xlu0 %v76_v14  ;;  %80 = vadd.xlane.f32.xlu1 %v79_v15 }
  0x11   :  { %83 = vadd.xlane.f32.xlu0 %v82_v19  ;;  %86 = vadd.xlane.f32.xlu1 %v85_v20 }
  0x15   :  { %89 = vadd.xlane.f32.xlu0 %v88_v24  ;;  %92 = vadd.xlane.f32.xlu1 %v91_v25 }
  0x19   :  { %95 = vadd.xlane.f32.xlu0 %v94_v29  ;;  %98 = vadd.xlane.f32.xlu1 %v97_v30 }
  0x1d   :  { %101 = vadd.xlane.f32.xlu0 %v100_v34  ;;  %104 = vadd.xlane.f32.xlu1 %v103_v35 }
  0x21   :  { %107 = vadd.xlane.f32.xlu0 %v106_v38  ;;  %110 = vadd.xlane.f32.xlu1 %v109_v39 }
  0x92   :  { %v66_v40 = vpop.xlane.xlu0 %65  ;;  %v72_v41 = vpop.xlane.xlu1 %71 }
  0x93   :  { %v113_v42 = vmul.f32 0.03125, %v66_v40  ;;  %v115_v43 = vmul.f32 0.03125, %v72_v41 }
  0x95   :  { %v1583_v44 = vsub.f32 %v1198_v2, %v113_v42  ;;  %v1585_v45 = vsub.f32 %v1202_v3, %v115_v43 }
  0x96   :  { %v69_v46 = vpop.xlane.xlu0 %68  ;;  %v75_v47 = vpop.xlane.xlu1 %74 }
  0x97   :  { %v114_v48 = vmul.f32 0.03125, %v69_v46  ;;  %v116_v49 = vmul.f32 0.03125, %v75_v47  ;;  %v145_v50 = vmul.f32 %v1583_v44, %v1583_v44  ;;  %v147_v51 = vmul.f32 %v1585_v45, %v1585_v45 }
  0x99   :  { %v1593_v52 = vsub.f32 %v1199_v4, %v114_v48  ;;  %v1597_v53 = vsub.f32 %v1203_v5, %v116_v49  ;;  %v161_v54 = vsel %vm63_vm0, %v145_v50, 0.0  ;;  %v167_v57 = vsel %vm63_vm0, %v147_v51, 0.0 }
  0x9a   :  { %162 = vadd.xlane.f32.xlu0 %v161_v54  ;;  %v78_v55 = vpop.xlane.xlu0 %77  ;;  %v81_v56 = vpop.xlane.xlu1 %80 }
  0x9b   :  { %v117_v58 = vmul.f32 0.03125, %v78_v55  ;;  %v118_v59 = vmul.f32 0.03125, %v81_v56  ;;  %v146_v60 = vmul.f32 %v1593_v52, %v1593_v52  ;;  %v148_v61 = vmul.f32 %v1597_v53, %v1597_v53 }
  0x9d   :  { %v1607_v62 = vsub.f32 %v1206_v11, %v117_v58  ;;  %v1611_v63 = vsub.f32 %v1207_v12, %v118_v59  ;;  %v164_v0 = vsel %vm63_vm0, %v146_v60, 0.0  ;;  %v170_v3 = vsel %vm63_vm0, %v148_v61, 0.0 }
  0x9e   :  { %168 = vadd.xlane.f32.xlu0 %v167_v57  ;;  %165 = vadd.xlane.f32.xlu1 %v164_v0  ;;  %v84_v1 = vpop.xlane.xlu0 %83  ;;  %v87_v2 = vpop.xlane.xlu1 %86  ;;  %v1344_v0 = vld [vmem:[%s2195_s3 + $0x8] sm:$0xff]  }
  0x9f   :  { %v119_v4 = vmul.f32 0.03125, %v84_v1  ;;  %v120_v5 = vmul.f32 0.03125, %v87_v2  ;;  %v149_v7 = vmul.f32 %v1607_v62, %v1607_v62  ;;  %v150_v8 = vmul.f32 %v1611_v63, %v1611_v63  ;;  %v1345_v1 = vld [vmem:[%s2196_s4 + $0x8] sm:$0xff]  }
  0xa1   :  { %v1621_v6 = vsub.f32 %v1210_v16, %v119_v4  ;;  %v1625_v9 = vsub.f32 %v1211_v17, %v120_v5  ;;  %v173_v10 = vsel %vm63_vm0, %v149_v7, 0.0  ;;  %v176_v14 = vsel %vm63_vm0, %v150_v8, 0.0 }
  0xa2   :  { %171 = vadd.xlane.f32.xlu1 %v170_v3  ;;  %174 = vadd.xlane.f32.xlu0 %v173_v10  ;;  %v90_v11 = vpop.xlane.xlu0 %89  ;;  %v93_v12 = vpop.xlane.xlu1 %92 }
  0xa3   :  { %v121_v15 = vmul.f32 0.03125, %v90_v11  ;;  %v122_v19 = vmul.f32 0.03125, %v93_v12  ;;  %v151_v20 = vmul.f32 %v1621_v6, %v1621_v6  ;;  %v152_v16 = vmul.f32 %v1625_v9, %v1625_v9 }
  0xa5   :  { %v1635_v13 = vsub.f32 %v1214_v21, %v121_v15  ;;  %v1639_v17 = vsub.f32 %v1215_v22, %v122_v19  ;;  %v179_v24 = vsel %vm63_vm0, %v151_v20, 0.0  ;;  %v182_v30 = vsel %vm63_vm0, %v152_v16, 0.0 }
  0xa6   :  { %177 = vadd.xlane.f32.xlu1 %v176_v14  ;;  %180 = vadd.xlane.f32.xlu0 %v179_v24  ;;  %v96_v25 = vpop.xlane.xlu0 %95  ;;  %v99_v29 = vpop.xlane.xlu1 %98 }
  0xa7   :  { %v123_v34 = vmul.f32 0.03125, %v96_v25  ;;  %v124_v35 = vmul.f32 0.03125, %v99_v29  ;;  %v153_v38 = vmul.f32 %v1635_v13, %v1635_v13  ;;  %v154_v21 = vmul.f32 %v1639_v17, %v1639_v17 }
  0xa9   :  { %v1649_v18 = vsub.f32 %v1218_v26, %v123_v34  ;;  %v1653_v22 = vsub.f32 %v1219_v27, %v124_v35  ;;  %v185_v39 = vsel %vm63_vm0, %v153_v38, 0.0  ;;  %v188_v42 = vsel %vm63_vm0, %v154_v21, 0.0 }
  0xaa   :  { %183 = vadd.xlane.f32.xlu1 %v182_v30  ;;  %186 = vadd.xlane.f32.xlu0 %v185_v39  ;;  %v102_v40 = vpop.xlane.xlu0 %101  ;;  %v105_v41 = vpop.xlane.xlu1 %104 }
  0xab   :  { %v125_v43 = vmul.f32 0.03125, %v102_v40  ;;  %v126_v46 = vmul.f32 0.03125, %v105_v41  ;;  %v155_v47 = vmul.f32 %v1649_v18, %v1649_v18  ;;  %v156_v26 = vmul.f32 %v1653_v22, %v1653_v22 }
  0xad   :  { %v1663_v23 = vsub.f32 %v1222_v31, %v125_v43  ;;  %v1667_v27 = vsub.f32 %v1223_v32, %v126_v46  ;;  %v191_v48 = vsel %vm63_vm0, %v155_v47, 0.0  ;;  %v194_v51 = vsel %vm63_vm0, %v156_v26, 0.0 }
  0xae   :  { %189 = vadd.xlane.f32.xlu1 %v188_v42  ;;  %192 = vadd.xlane.f32.xlu0 %v191_v48  ;;  %v108_v49 = vpop.xlane.xlu0 %107  ;;  %v111_v50 = vpop.xlane.xlu1 %110  ;;  %v1707_v42 = vld [vmem:[%s2197_s1] ss:$0 sm:$0xff] }
  0xaf   :  { %v127_v54 = vmul.f32 0.03125, %v108_v49  ;;  %v128_v55 = vmul.f32 0.03125, %v111_v50  ;;  %v157_v56 = vmul.f32 %v1663_v23, %v1663_v23  ;;  %v158_v31 = vmul.f32 %v1667_v27, %v1667_v27 }
  0xb1   :  { %v1677_v28 = vsub.f32 %v1226_v36, %v127_v54  ;;  %v1681_v32 = vsub.f32 %v1227_v37, %v128_v55  ;;  %v197_v57 = vsel %vm63_vm0, %v157_v56, 0.0  ;;  %v200_v58 = vsel %vm63_vm0, %v158_v31, 0.0  ;;  %v1342_v36 = vld [vmem:[%s2195_s3] sm:$0xff]  }
  0xb2   :  { %195 = vadd.xlane.f32.xlu1 %v194_v51  ;;  %198 = vadd.xlane.f32.xlu0 %v197_v57  ;;  %v1343_v37 = vld [vmem:[%s2196_s4] sm:$0xff]  }
  0xb3   :  { %v159_v59 = vmul.f32 %v1677_v28, %v1677_v28  ;;  %v160_v60 = vmul.f32 %v1681_v32, %v1681_v32  ;;  %1302 = vmatprep.subr.bf16.mxu0 %v1342_v36  ;;  %1322 = vmatprep.subr.bf16.mxu1 %v1343_v37  ;;  %v1714_v55 = vld [vmem:[%s2198_s2] ss:$0 sm:$0xff] }
  0xb4   :  { %1303 = vmatpush3.bf16.msra.mxu0 %v1342_v36  ;;  %1323 = vmatpush3.bf16.msra.mxu1 %v1343_v37 }
  0xb5   :  { %v203_v61 = vsel %vm63_vm0, %v159_v59, 0.0  ;;  %v206_v33 = vsel %vm63_vm0, %v160_v60, 0.0  ;;  %1304 = vmatprep.subr.bf16.mxu0 %v1344_v0  ;;  %1324 = vmatprep.subr.bf16.mxu1 %v1345_v1 }
  0xb6   :  { %201 = vadd.xlane.f32.xlu1 %v200_v58  ;;  %204 = vadd.xlane.f32.xlu0 %v203_v61 }
  0xb8   :  { %1305 = vmatpush3.bf16.msra.mxu0 %v1344_v0  ;;  %1325 = vmatpush3.bf16.msra.mxu1 %v1345_v1 }
  0xba   :  { %207 = vadd.xlane.f32.xlu1 %v206_v33 }
 0x127   :  { %v163_v2 = vpop.xlane.xlu0 %162 }
 0x128   :  { %v209_v3 = vmul.f32 0.03125, %v163_v2 }
 0x12a   :  { %v225_v4 = vadd.f32 1e-05, %v209_v3 }
 0x12b   :  { %v166_v5 = vpop.xlane.xlu1 %165  ;;  %v169_v7 = vpop.xlane.xlu0 %168 }
 0x12c   :  { %1346 = vrsqrt.f32 %v225_v4  ;;  %v210_v8 = vmul.f32 0.03125, %v166_v5  ;;  %v211_v10 = vmul.f32 0.03125, %v169_v7 }
 0x12e   :  { %v226_v11 = vadd.f32 1e-05, %v210_v8  ;;  %v227_v12 = vadd.f32 1e-05, %v211_v10 }
 0x12f   :  { %v172_v14 = vpop.xlane.xlu1 %171  ;;  %v175_v15 = vpop.xlane.xlu0 %174 }
 0x130   :  { %1348 = vrsqrt.f32 %v226_v11  ;;  %v212_v19 = vmul.f32 0.03125, %v172_v14  ;;  %v213_v20 = vmul.f32 0.03125, %v175_v15 }
 0x131   :  { %1350 = vrsqrt.f32 %v227_v12 }
 0x132   :  { %v228_v16 = vadd.f32 1e-05, %v212_v19  ;;  %v229_v24 = vadd.f32 1e-05, %v213_v20 }
 0x133   :  { %v178_v25 = vpop.xlane.xlu1 %177  ;;  %v181_v29 = vpop.xlane.xlu0 %180 }
 0x134   :  { %1352 = vrsqrt.f32 %v228_v16  ;;  %v214_v30 = vmul.f32 0.03125, %v178_v25  ;;  %v215_v34 = vmul.f32 0.03125, %v181_v29 }
 0x135   :  { %1354 = vrsqrt.f32 %v229_v24 }
 0x136   :  { %v1347_v35 = vpop.eup %1346  ;;  %v230_v38 = vadd.f32 1e-05, %v214_v30  ;;  %v231_v21 = vadd.f32 1e-05, %v215_v34 }
 0x137   :  { %v257_v39 = vmul.f32 %v1347_v35, %v1583_v44  ;;  %v184_v40 = vpop.xlane.xlu1 %183  ;;  %v187_v41 = vpop.xlane.xlu0 %186 }
 0x138   :  { %1356 = vrsqrt.f32 %v230_v38  ;;  %v216_v43 = vmul.f32 0.03125, %v184_v40  ;;  %v217_v46 = vmul.f32 0.03125, %v187_v41 }
 0x139   :  { %1358 = vrsqrt.f32 %v231_v21  ;;  %v280_v50 = vmul.f32 %v1707_v42, %v257_v39 }
 0x13a   :  { %v1349_v47 = vpop.eup %1348  ;;  %v232_v26 = vadd.f32 1e-05, %v216_v43  ;;  %v233_v48 = vadd.f32 1e-05, %v217_v46 }
 0x13b   :  { %v1351_v49 = vpop.eup %1350  ;;  %v258_v51 = vmul.f32 %v1349_v47, %v1593_v52  ;;  %v190_v44 = vpop.xlane.xlu1 %189  ;;  %v303_v52 = vadd.f32 %v1714_v55, %v280_v50 }
 0x13c   :  { %v193_v54 = vpop.xlane.xlu0 %192  ;;  %v259_v56 = vmul.f32 %v1351_v49, %v1585_v45  ;;  %1360 = vrsqrt.f32 %v232_v26  ;;  %v218_v31 = vmul.f32 0.03125, %v190_v44 }
 0x13d   :  { %v219_v57 = vmul.f32 0.03125, %v193_v54  ;;  %v281_v58 = vmul.f32 %v1707_v42, %v258_v51  ;;  %1362 = vrsqrt.f32 %v233_v48 }
 0x13e   :  { %v1353_v59 = vpop.eup %1352  ;;  %v234_v60 = vadd.f32 1e-05, %v218_v31  ;;  %v282_v37 = vmul.f32 %v1707_v42, %v259_v56 }
 0x13f   :  { %v235_v61 = vadd.f32 1e-05, %v219_v57  ;;  %v1355_v33 = vpop.eup %1354  ;;  %v304_v36 = vadd.f32 %v1714_v55, %v281_v58  ;;  %v260_v0 = vmul.f32 %v1353_v59, %v1597_v53  ;;  %v196_v1 = vpop.xlane.xlu1 %195 }
 0x140   :  { %v199_v45 = vpop.xlane.xlu0 %198  ;;  %v261_v2 = vmul.f32 %v1355_v33, %v1607_v62  ;;  %1364 = vrsqrt.f32 %v234_v60  ;;  %v220_v3 = vmul.f32 0.03125, %v196_v1  ;;  %v305_v53 = vadd.f32 %v1714_v55, %v282_v37 }
 0x141   :  { %v319_v4 = vpack.c.bf16 %v304_v36, %v303_v52  ;;  %v283_v5 = vmul.f32 %v1707_v42, %v260_v0  ;;  %1366 = vrsqrt.f32 %v235_v61  ;;  %v221_v7 = vmul.f32 0.03125, %v199_v45 }
 0x142   :  { %v1357_v8 = vpop.eup %1356  ;;  %v284_v10 = vmul.f32 %v1707_v42, %v261_v2  ;;  %v236_v11 = vadd.f32 1e-05, %v220_v3 }
 0x143   :  { %v1359_v12 = vpop.eup %1358  ;;  %327 = vst.msk [vmem:[#allocation2] sm:$0xff] %vm63_vm0, %v319_v4  ;;  %v306_v14 = vadd.f32 %v1714_v55, %v283_v5  ;;  %v262_v62 = vmul.f32 %v1357_v8, %v1611_v63  ;;  %v237_v15 = vadd.f32 1e-05, %v221_v7  ;;  %v202_v19 = vpop.xlane.xlu1 %201 }
 0x144   :  { %v205_v20 = vpop.xlane.xlu0 %204  ;;  %v263_v16 = vmul.f32 %v1359_v12, %v1621_v6  ;;  %1368 = vrsqrt.f32 %v236_v11  ;;  %v222_v24 = vmul.f32 0.03125, %v202_v19  ;;  %v307_v35 = vadd.f32 %v1714_v55, %v284_v10 }
 0x145   :  { %v320_v25 = vpack.c.bf16 %v306_v14, %v305_v53  ;;  %v285_v29 = vmul.f32 %v1707_v42, %v262_v62  ;;  %1370 = vrsqrt.f32 %v237_v15  ;;  %v223_v30 = vmul.f32 0.03125, %v205_v20 }
 0x146   :  { %v1361_v34 = vpop.eup %1360  ;;  %v238_v38 = vadd.f32 1e-05, %v222_v24  ;;  %v286_v39 = vmul.f32 %v1707_v42, %v263_v16 }
 0x147   :  { %v1363_v21 = vpop.eup %1362  ;;  %328 = vst.msk [vmem:[#allocation2 + $0x8] sm:$0xff] %vm63_vm0, %v320_v25  ;;  %v308_v63 = vadd.f32 %v1714_v55, %v285_v29  ;;  %v264_v6 = vmul.f32 %v1361_v34, %v1625_v9  ;;  %v239_v40 = vadd.f32 1e-05, %v223_v30  ;;  %v208_v41 = vpop.xlane.xlu1 %207 }
 0x148   :  { %v265_v43 = vmul.f32 %v1363_v21, %v1635_v13  ;;  %1372 = vrsqrt.f32 %v238_v38  ;;  %v224_v46 = vmul.f32 0.03125, %v208_v41  ;;  %v309_v9 = vadd.f32 %v1714_v55, %v286_v39 }
 0x149   :  { %v321_v47 = vpack.c.bf16 %v308_v63, %v307_v35  ;;  %v287_v26 = vmul.f32 %v1707_v42, %v264_v6  ;;  %1374 = vrsqrt.f32 %v239_v40 }
 0x14a   :  { %v1365_v48 = vpop.eup %1364  ;;  %v288_v49 = vmul.f32 %v1707_v42, %v265_v43  ;;  %v240_v50 = vadd.f32 1e-05, %v224_v46  ;;  %v335_v51 = vld [vmem:[#allocation2] sm:$0xff] }
 0x14b   :  { %v1367_v44 = vpop.eup %1366  ;;  %329 = vst.msk [vmem:[#allocation2 + $0x10] sm:$0xff] %vm63_vm0, %v321_v47  ;;  %v310_v54 = vadd.f32 %v1714_v55, %v287_v26  ;;  %v266_v13 = vmul.f32 %v1365_v48, %v1639_v17  ;;  %1306 = vmatprep.mubr.msk.bf16.mxu0 %vm63_vm0, %v335_v51  ;;  %1326 = vmatprep.mubr.msk.bf16.mxu1 %vm63_vm0, %v335_v51 }
 0x14c   :  { %v267_v56 = vmul.f32 %v1367_v44, %v1649_v18  ;;  %1376 = vrsqrt.f32 %v240_v50  ;;  %v311_v59 = vadd.f32 %v1714_v55, %v288_v49  ;;  %v1808_v44 = vld [vmem:[%s2200_s5] ss:$0 sm:$0xff] }
 0x14d   :  { %v322_v31 = vpack.c.bf16 %v310_v54, %v309_v9  ;;  %v289_v57 = vmul.f32 %v1707_v42, %v266_v13 }
 0x14e   :  { %v1369_v58 = vpop.eup %1368  ;;  %v336_v60 = vld [vmem:[#allocation2 + $0x8] sm:$0xff]  ;;  %v290_v17 = vmul.f32 %v1707_v42, %v267_v56 }
 0x14f   :  { %v1371_v61 = vpop.eup %1370  ;;  %330 = vst.msk [vmem:[#allocation2 + $0x18] sm:$0xff] %vm63_vm0, %v322_v31  ;;  %v312_v33 = vadd.f32 %v1714_v55, %v289_v57  ;;  %v268_v52 = vmul.f32 %v1369_v58, %v1653_v22  ;;  %1307 = vmatmul.mubr.msk.bf16.vlgmr.msra.gmra.mrb[0].mxu0 %vm63_vm0, %v336_v60  ;;  %1327 = vmatmul.mubr.msk.bf16.vlgmr.msra.gmra.mrb[0].mxu1 %vm63_vm0, %v336_v60 }
 0x150   :  { %v269_v18 = vmul.f32 %v1371_v61, %v1663_v23  ;;  %v313_v3 = vadd.f32 %v1714_v55, %v290_v17 }
 0x151   :  { %v323_v36 = vpack.c.bf16 %v312_v33, %v311_v59  ;;  %v291_v37 = vmul.f32 %v1707_v42, %v268_v52 }
 0x152   :  { %v1373_v0 = vpop.eup %1372  ;;  %v292_v1 = vmul.f32 %v1707_v42, %v269_v18  ;;  %v337_v45 = vld [vmem:[#allocation2 + $0x10] sm:$0xff] }
 0x153   :  { %v1375_v2 = vpop.eup %1374  ;;  %331 = vst.msk [vmem:[#allocation2 + $0x20] sm:$0xff] %vm63_vm0, %v323_v36  ;;  %v314_v22 = vadd.f32 %v1714_v55, %v291_v37  ;;  %v270_v4 = vmul.f32 %v1373_v0, %v1667_v27  ;;  %1310 = vmatprep.mubr.msk.bf16.mxu0 %vm63_vm0, %v337_v45  ;;  %1330 = vmatprep.mubr.msk.bf16.mxu1 %vm63_vm0, %v337_v45 }
 0x154   :  { %v271_v23 = vmul.f32 %v1375_v2, %v1677_v28  ;;  %v315_v10 = vadd.f32 %v1714_v55, %v292_v1 }
 0x155   :  { %v324_v5 = vpack.c.bf16 %v314_v22, %v313_v3  ;;  %v293_v7 = vmul.f32 %v1707_v42, %v270_v4 }
 0x156   :  { %v1377_v8 = vpop.eup %1376  ;;  %v338_v11 = vld [vmem:[#allocation2 + $0x18] sm:$0xff]  ;;  %v294_v53 = vmul.f32 %v1707_v42, %v271_v23 }
 0x157   :  { %332 = vst.msk [vmem:[#allocation2 + $0x28] sm:$0xff] %vm63_vm0, %v324_v5  ;;  %v316_v12 = vadd.f32 %v1714_v55, %v293_v7  ;;  %v272_v27 = vmul.f32 %v1377_v8, %v1681_v32  ;;  %1311 = vmatmul.mubr.msk.bf16.gmra.mrb[4].mxu0 %vm63_vm0, %v338_v11  ;;  %1331 = vmatmul.mubr.msk.bf16.gmra.mrb[4].mxu1 %vm63_vm0, %v338_v11 }
 0x158   :  { %v317_v15 = vadd.f32 %v1714_v55, %v294_v53 }
 0x159   :  { %v325_v28 = vpack.c.bf16 %v316_v12, %v315_v10  ;;  %v295_v14 = vmul.f32 %v1707_v42, %v272_v27 }
 0x15a   :  { %v339_v62 = vld [vmem:[#allocation2 + $0x20] sm:$0xff] }
 0x15b   :  { %333 = vst.msk [vmem:[#allocation2 + $0x30] sm:$0xff] %vm63_vm0, %v325_v28  ;;  %v318_v19 = vadd.f32 %v1714_v55, %v295_v14  ;;  %1314 = vmatprep.mubr.msk.bf16.mxu0 %vm63_vm0, %v339_v62  ;;  %1334 = vmatprep.mubr.msk.bf16.mxu1 %vm63_vm0, %v339_v62  ;;  %v1788_v55 = vld [vmem:[%s2199_s6] ss:$0 sm:$0xff] }
 0x15d   :  { %v326_v20 = vpack.c.bf16 %v318_v19, %v317_v15 }
 0x15e   :  { %v340_v32 = vld [vmem:[#allocation2 + $0x28] sm:$0xff] }
 0x15f   :  { %334 = vst.msk [vmem:[#allocation2 + $0x38] sm:$0xff] %vm63_vm0, %v326_v20  ;;  %1315 = vmatmul.mubr.msk.bf16.gmra.mrb[8].mxu0 %vm63_vm0, %v340_v32  ;;  %1335 = vmatmul.mubr.msk.bf16.gmra.mrb[8].mxu1 %vm63_vm0, %v340_v32 }
 0x162   :  { %v341_v42 = vld [vmem:[#allocation2 + $0x30] sm:$0xff] }
 0x163   :  { %1318 = vmatprep.mubr.msk.bf16.mxu0 %vm63_vm0, %v341_v42  ;;  %1338 = vmatprep.mubr.msk.bf16.mxu1 %vm63_vm0, %v341_v42 }
 0x166   :  { %v342_v16 = vld [vmem:[#allocation2 + $0x38] sm:$0xff] }
 0x167   :  { %1319 = vmatmul.mubr.msk.bf16.gmra.mrb[12].mxu0 %vm63_vm0, %v342_v16  ;;  %1339 = vmatmul.mubr.msk.bf16.gmra.mrb[12].mxu1 %vm63_vm0, %v342_v16 }
 0x222   :  { %v1308_v24 = vpop.f32.mrb[0].mxu0  ;;  %v1328_v25 = vpop.f32.mrb[0].mxu1 }
 0x223   :  { %v554_v29 = vadd.f32 %v1328_v25, %v1788_v55  ;;  %v425_v30 = vpop.f32.mrb[1].mxu0  ;;  %v545_v34 = vpop.f32.mrb[1].mxu1  ;;  %v1818_v3 = vadd.f32 %v1308_v24, %v1808_v44 }
 0x224   :  { %v546_v35 = vadd.f32 %v1788_v55, %v545_v34  ;;  %v1309_v38 = vpop.f32.mrb[2].mxu0  ;;  %v1329_v21 = vpop.f32.mrb[2].mxu1  ;;  %v1821_v22 = vadd.f32 %v1808_v44, %v425_v30 }
 0x225   :  { %v1792_v63 = vmul.f32 0.70710677, %v554_v29  ;;  %v557_v39 = vadd.f32 %v1329_v21, %v1788_v55  ;;  %v428_v6 = vpop.f32.mrb[3].mxu0  ;;  %v548_v40 = vpop.f32.mrb[3].mxu1  ;;  %v1824_v5 = vmul.f32 0.5, %v554_v29  ;;  %v1830_v12 = vadd.f32 %v1309_v38, %v1808_v44 }
 0x226   :  { %v1795_v41 = vmul.f32 0.70710677, %v546_v35  ;;  %v549_v43 = vadd.f32 %v1788_v55, %v548_v40  ;;  %v1827_v11 = vmul.f32 0.5, %v546_v35  ;;  %v1853_v29 = vadd.f32 %v1808_v44, %v428_v6 }
 0x227   :  { %v642_v46 = vand.u32 2147483647, %v1792_v63  ;;  %v1799_v47 = vmul.f32 0.70710677, %v557_v39  ;;  %v1843_v20 = vmul.f32 0.5, %v557_v39  ;;  %vm962_vm1 = vcmp.ge.f32.partialorder %v1792_v63, 0.0 }
 0x228   :  { %v640_v26 = vand.u32 2147483647, %v1795_v41  ;;  %v1802_v48 = vmul.f32 0.70710677, %v549_v43  ;;  %v1845_v32 = vmul.f32 0.5, %v549_v43  ;;  %vm960_vm2 = vcmp.ge.f32.partialorder %v1795_v41, 0.0 }
 0x229   :  { %v658_v49 = vmul.f32 0.3275911, %v642_v46  ;;  %v866_v50 = vsub.f32 0.0, %v642_v46  ;;  %v643_v51 = vand.u32 2147483647, %v1799_v47  ;;  %vm963_vm3 = vcmp.ge.f32.partialorder %v1799_v47, 0.0 }
 0x22a   :  { %v656_v9 = vmul.f32 0.3275911, %v640_v26  ;;  %v864_v54 = vsub.f32 0.0, %v640_v26  ;;  %v641_v13 = vand.u32 2147483647, %v1802_v48  ;;  %v1312_v57 = vpop.f32.mrb[4].mxu0 }
 0x22b   :  { %v674_v56 = vadd.f32 1.0, %v658_v49  ;;  %v659_v31 = vmul.f32 0.3275911, %v643_v51  ;;  %v1332_v58 = vpop.f32.mrb[4].mxu1  ;;  %v882_v59 = vmul.f32 %v866_v50, %v642_v46  ;;  %v867_v61 = vsub.f32 0.0, %v643_v51  ;;  %v1811_v17 = vpop.f32.mrb[5].mxu0 }
 0x22c   :  { %v672_v60 = vadd.f32 1.0, %v656_v9  ;;  %v657_v33 = vmul.f32 0.3275911, %v641_v13  ;;  %v561_v52 = vpop.f32.mrb[5].mxu1  ;;  %v1813_v36 = vpop.f32.mrb[6].mxu0  ;;  %v880_v0 = vmul.f32 %v864_v54, %v640_v26  ;;  %v865_v1 = vsub.f32 0.0, %v641_v13 }
 0x22d   :  { %1378 = vrcp.f32 %v674_v56  ;;  %v675_v18 = vadd.f32 1.0, %v659_v31  ;;  %v1333_v37 = vpop.f32.mrb[6].mxu1  ;;  %v1815_v45 = vpop.f32.mrb[7].mxu0  ;;  %v570_v23 = vadd.f32 %v1332_v58, %v1788_v55  ;;  %v900_v7 = vmul.f32 1.442695, %v882_v59 }
 0x22e   :  { %1380 = vrcp.f32 %v672_v60  ;;  %v564_v2 = vpop.f32.mrb[7].mxu1  ;;  %v673_v4 = vadd.f32 1.0, %v657_v33  ;;  %v883_v8 = vmul.f32 %v867_v61, %v643_v51  ;;  %v562_v10 = vadd.f32 %v1788_v55, %v561_v52 }
 0x22f   :  { %1382 = vrcp.f32 %v675_v18  ;;  %v1832_v53 = vmul.f32 0.70710677, %v570_v23  ;;  %v896_v27 = vmul.f32 1.442695, %v880_v0  ;;  %v881_v28 = vmul.f32 %v865_v1, %v641_v13 }
 0x230   :  { %v1834_v14 = vmul.f32 0.70710677, %v562_v10  ;;  %v1837_v62 = vadd.f32 %v1333_v37, %v1788_v55  ;;  %1384 = vrcp.f32 %v673_v4  ;;  %v902_v25 = vmul.f32 1.442695, %v883_v8 }
 0x231   :  { %v646_v42 = vand.u32 2147483647, %v1832_v53  ;;  %1386 = vpow2.f32 %v900_v7  ;;  %v1861_v38 = vadd.f32 %v1312_v57, %v1808_v44  ;;  %v898_v46 = vmul.f32 1.442695, %v881_v28 }
 0x232   :  { %v1839_v15 = vpop.f32.mrb[8].mxu0  ;;  %v1841_v19 = vpop.f32.mrb[8].mxu1  ;;  %v644_v30 = vand.u32 2147483647, %v1834_v14  ;;  %v1864_v40 = vmul.f32 0.70710677, %v1837_v62  ;;  %1388 = vpow2.f32 %v896_v27  ;;  %v1874_v13 = vadd.f32 %v1788_v55, %v564_v2 }
 0x233   :  { %2204 = vst [vmem:[#allocation3_spill] sm:$0xff] %v1839_v15  ;;  %v1848_v16 = vpop.f32.mrb[9].mxu0  ;;  %v1850_v24 = vpop.f32.mrb[9].mxu1  ;;  %v662_v21 = vmul.f32 0.3275911, %v646_v42  ;;  %v870_v39 = vsub.f32 0.0, %v646_v42  ;;  %v1890_v4 = vadd.f32 %v1808_v44, %v1811_v17 }
 0x234   :  { %2205 = vst [vmem:[#allocation4_spill] sm:$0xff] %v1848_v16  ;;  %v1856_v34 = vpop.f32.mrb[10].mxu0  ;;  %v1858_v35 = vpop.f32.mrb[10].mxu1  ;;  %v660_v6 = vmul.f32 0.3275911, %v644_v30  ;;  %v868_v26 = vsub.f32 0.0, %v644_v30 }
 0x235   :  { %2206 = vst [vmem:[#allocation5_spill] sm:$0xff] %v1856_v34  ;;  %v1866_v43 = vpop.f32.mrb[11].mxu0  ;;  %v1868_v49 = vpop.f32.mrb[11].mxu1  ;;  %v678_v51 = vadd.f32 1.0, %v662_v21  ;;  %v886_v9 = vmul.f32 %v870_v39, %v646_v42  ;;  %v647_v54 = vand.u32 2147483647, %v1864_v40 }
 0x236   :  { %2207 = vst [vmem:[#allocation6_spill] sm:$0xff] %v1866_v43  ;;  %v1879_v57 = vmul.f32 0.5, %v570_v23  ;;  %v676_v58 = vadd.f32 1.0, %v660_v6  ;;  %v884_v59 = vmul.f32 %v868_v26, %v644_v30  ;;  %v1882_v61 = vmul.f32 0.5, %v562_v10 }
 0x237   :  { %v1870_v50 = vpop.eup %1378  ;;  %1390 = vrcp.f32 %v678_v51  ;;  %v663_v33 = vmul.f32 0.3275911, %v647_v54  ;;  %v908_v18 = vmul.f32 1.442695, %v886_v9  ;;  %v871_v37 = vsub.f32 0.0, %v647_v54 }
 0x238   :  { %v1876_v56 = vpop.eup %1380  ;;  %v722_v31 = vmul.f32 1.0614054, %v1870_v50  ;;  %1392 = vrcp.f32 %v676_v58  ;;  %v1893_v7 = vmul.f32 0.70710677, %v1874_v13  ;;  %v904_v28 = vmul.f32 1.442695, %v884_v59 }
 0x239   :  { %v720_v60 = vmul.f32 1.0614054, %v1876_v56  ;;  %v1886_v1 = vpop.eup %1382  ;;  %v679_v23 = vadd.f32 1.0, %v663_v33  ;;  %1394 = vpow2.f32 %v902_v25  ;;  %v887_v39 = vmul.f32 %v871_v37, %v647_v54 }
 0x23a   :  { %v738_v52 = vadd.f32 -1.4531521, %v722_v31  ;;  %v1884_v0 = vpop.f32.mrb[12].mxu0  ;;  %v1895_v8 = vpop.f32.mrb[12].mxu1  ;;  %v723_v27 = vmul.f32 1.0614054, %v1886_v1  ;;  %v1914_v33 = vadd.f32 %v1841_v19, %v1788_v55 }
 0x23b   :  { %2208 = vst [vmem:[#allocation7_spill] sm:$0xff] %v1884_v0  ;;  %v736_v2 = vadd.f32 -1.4531521, %v720_v60  ;;  %v1899_v42 = vpop.f32.mrb[13].mxu0  ;;  %v1901_v30 = vpop.f32.mrb[13].mxu1  ;;  %1396 = vrcp.f32 %v679_v23  ;;  %vm961_vm4 = vcmp.ge.f32.partialorder %v1802_v48, 0.0 }
 0x23c   :  { %v754_v10 = vmul.f32 %v1870_v50, %v738_v52  ;;  %2209 = vst [vmem:[#allocation8_spill] sm:$0xff] %v1899_v42  ;;  %2210 = vst [vmem:[#allocation9_spill] sm:$0xff] %v1901_v30  ;;  %v1903_v21 = vpop.eup %1384  ;;  %v645_v6 = vand.u32 2147483647, %v1893_v7  ;;  %v1907_v26 = vpop.f32.mrb[14].mxu0  ;;  %1398 = vpow2.f32 %v898_v46  ;;  %vm966_vm5 = vcmp.ge.f32.partialorder %v1832_v53, 0.0 }
 0x23d   :  { %v752_v17 = vmul.f32 %v1876_v56, %v736_v2  ;;  %2211 = vst [vmem:[#allocation10_spill] sm:$0xff] %v1907_v26  ;;  %v1909_v51 = vpop.f32.mrb[14].mxu1  ;;  %v1387_v9 = vpop.eup %1386  ;;  %v739_v25 = vadd.f32 -1.4531521, %v723_v27  ;;  %v721_v58 = vmul.f32 1.0614054, %v1903_v21  ;;  %1400 = vpow2.f32 %v908_v18 }
 0x23e   :  { %2212 = vst [vmem:[#allocation11_spill] sm:$0xff] %v1909_v51  ;;  %v770_v31 = vadd.f32 1.4214138, %v754_v10  ;;  %v661_v60 = vmul.f32 0.3275911, %v645_v6  ;;  %2213 = vst [vmem:[#allocation12_spill] sm:$0xff] %v1914_v33  ;;  %v1389_v54 = vpop.eup %1388  ;;  %1402 = vpow2.f32 %v904_v28 }
 0x23f   :  { %v768_v59 = vadd.f32 1.4214138, %v752_v17  ;;  %v755_v37 = vmul.f32 %v1886_v1, %v739_v25  ;;  %v737_v2 = vadd.f32 -1.4531521, %v721_v58  ;;  %v869_v23 = vsub.f32 0.0, %v645_v6  ;;  %v1918_v26 = vpop.f32.mrb[15].mxu0 }
 0x240   :  { %v786_v52 = vmul.f32 %v1870_v50, %v770_v31  ;;  %2214 = vst [vmem:[#allocation13_spill] sm:$0xff] %v1918_v26  ;;  %v1920_v10 = vpop.f32.mrb[15].mxu1  ;;  %v910_v18 = vmul.f32 1.442695, %v887_v39  ;;  %v677_v27 = vadd.f32 1.0, %v661_v60  ;;  %v1931_v58 = vadd.f32 %v1788_v55, %v1850_v24 }
 0x241   :  { %2215 = vst [vmem:[#allocation14_spill] sm:$0xff] %v1920_v10  ;;  %v784_v46 = vmul.f32 %v1876_v56, %v768_v59  ;;  %v771_v42 = vadd.f32 1.4214138, %v755_v37  ;;  %v753_v19 = vmul.f32 %v1903_v21, %v737_v2  ;;  %v885_v0 = vmul.f32 %v869_v23, %v645_v6  ;;  %v1924_v43 = vpop.eup %1390 }
 0x242   :  { %v802_v17 = vadd.f32 -0.28449672, %v786_v52  ;;  %1404 = vrcp.f32 %v677_v27  ;;  %v1927_v25 = vmul.f32 0.70710677, %v1914_v33  ;;  %v1933_v59 = vpop.eup %1392  ;;  %v726_v6 = vmul.f32 1.0614054, %v1924_v43 }
 0x243   :  { %v800_v31 = vadd.f32 -0.28449672, %v784_v46  ;;  %v787_v39 = vmul.f32 %v1886_v1, %v771_v42  ;;  %v769_v60 = vadd.f32 1.4214138, %v753_v19  ;;  %v724_v37 = vmul.f32 1.0614054, %v1933_v59  ;;  %v1395_v46 = vpop.eup %1394 }
 0x244   :  { %2216 = vst [vmem:[#allocation15_spill] sm:$0xff] %v1927_v25  ;;  %v818_v28 = vmul.f32 %v1870_v50, %v802_v17  ;;  %v1940_v2 = vmul.f32 1.442695, %v885_v0  ;;  %v650_v23 = vand.u32 2147483647, %v1927_v25  ;;  %1406 = vpow2.f32 %v910_v18 }
 0x245   :  { %v816_v52 = vmul.f32 %v1876_v56, %v800_v31  ;;  %v803_v27 = vadd.f32 -0.28449672, %v787_v39  ;;  %v785_v26 = vmul.f32 %v1903_v21, %v769_v60  ;;  %v742_v34 = vadd.f32 -1.4531521, %v726_v6  ;;  %v1944_v17 = vpop.eup %1396 }
 0x246   :  { %v834_v24 = vadd.f32 0.2548296, %v818_v28  ;;  %v740_v19 = vadd.f32 -1.4531521, %v724_v37  ;;  %v666_v31 = vmul.f32 0.3275911, %v650_v23  ;;  %v1399_v16 = vpop.eup %1398 }
 0x247   :  { %v832_v42 = vadd.f32 0.2548296, %v816_v52  ;;  %v819_v10 = vmul.f32 %v1886_v1, %v803_v27  ;;  %v801_v28 = vadd.f32 -0.28449672, %v785_v26  ;;  %v758_v39 = vmul.f32 %v1924_v43, %v742_v34  ;;  %v1951_v60 = vpop.eup %1400 }
 0x248   :  { %v850_v0 = vmul.f32 %v1870_v50, %v834_v24  ;;  %v756_v51 = vmul.f32 %v1933_v59, %v740_v19  ;;  %v727_v52 = vmul.f32 1.0614054, %v1944_v17  ;;  %v682_v18 = vadd.f32 1.0, %v666_v31  ;;  %v1403_v33 = vpop.eup %1402 }
 0x249   :  { %v848_v6 = vmul.f32 %v1876_v56, %v832_v42  ;;  %v835_v15 = vadd.f32 0.2548296, %v819_v10  ;;  %v817_v50 = vmul.f32 %v1903_v21, %v801_v28  ;;  %v774_v24 = vadd.f32 1.4214138, %v758_v39 }
 0x24a   :  { %v930_v37 = vmul.f32 %v1387_v9, %v850_v0  ;;  %v772_v26 = vadd.f32 1.4214138, %v756_v51  ;;  %v743_v34 = vadd.f32 -1.4531521, %v727_v52  ;;  %1408 = vrcp.f32 %v682_v18 }
 0x24b   :  { %v928_v25 = vmul.f32 %v1389_v54, %v848_v6  ;;  %v851_v56 = vmul.f32 %v1886_v1, %v835_v15  ;;  %v833_v42 = vadd.f32 0.2548296, %v817_v50  ;;  %v790_v19 = vmul.f32 %v1924_v43, %v774_v24 }
 0x24c   :  { %v946_v27 = vsub.f32 1.0, %v930_v37  ;;  %v1960_v30 = vpop.eup %1404  ;;  %v788_v10 = vmul.f32 %v1933_v59, %v772_v26  ;;  %v759_v54 = vmul.f32 %v1944_v17, %v743_v34  ;;  %v874_v31 = vsub.f32 0.0, %v650_v23 }
 0x24d   :  { %v944_v9 = vsub.f32 1.0, %v928_v25  ;;  %v931_v51 = vmul.f32 %v1395_v46, %v851_v56  ;;  %v849_v28 = vmul.f32 %v1903_v21, %v833_v42  ;;  %v806_v39 = vadd.f32 -0.28449672, %v790_v19 }
 0x24e   :  { %v978_v0 = vsub.f32 0.0, %v946_v27  ;;  %v804_v15 = vadd.f32 -0.28449672, %v788_v10  ;;  %v775_v1 = vadd.f32 1.4214138, %v759_v54  ;;  %v890_v52 = vmul.f32 %v874_v31, %v650_v23  ;;  %v1407_v24 = vpop.eup %1406 }
 0x24f   :  { %v976_v6 = vsub.f32 0.0, %v944_v9  ;;  %v947_v25 = vsub.f32 1.0, %v931_v51  ;;  %v929_v37 = vmul.f32 %v1399_v16, %v849_v28  ;;  %v822_v50 = vmul.f32 %v1924_v43, %v806_v39 }
 0x250   :  { %v994_v18 = vsel %vm962_vm1, %v946_v27, %v978_v0  ;;  %v820_v46 = vmul.f32 %v1933_v59, %v804_v15  ;;  %v791_v21 = vmul.f32 %v1944_v17, %v775_v1  ;;  %v725_v10 = vmul.f32 1.0614054, %v1960_v30 }
 0x251   :  { %v1010_v26 = vadd.f32 1.0, %v994_v18  ;;  %v992_v34 = vsel %vm960_vm2, %v944_v9, %v976_v6  ;;  %v979_v42 = vsub.f32 0.0, %v947_v25  ;;  %v945_v19 = vsub.f32 1.0, %v929_v37 }
 0x252   :  { %v1008_v56 = vadd.f32 1.0, %v992_v34  ;;  %v838_v23 = vadd.f32 0.2548296, %v822_v50  ;;  %v836_v16 = vadd.f32 0.2548296, %v820_v46  ;;  %1410 = vpow2.f32 %v1940_v2 }
 0x253   :  { %v1026_v63 = vmul.f32 %v1010_v26, %v1824_v5  ;;  %v807_v27 = vadd.f32 -0.28449672, %v791_v21  ;;  %v995_v41 = vsel %vm963_vm3, %v947_v25, %v979_v42  ;;  %v977_v9 = vsub.f32 0.0, %v945_v19 }
 0x254   :  { %v1024_v54 = vmul.f32 %v1008_v56, %v1827_v11  ;;  %v854_v31 = vmul.f32 %v1924_v43, %v838_v23  ;;  %v1980_v0 = vpop.eup %1408  ;;  %v1011_v28 = vadd.f32 1.0, %v995_v41  ;;  %v852_v5 = vmul.f32 %v1933_v59, %v836_v16 }
 0x255   :  { %v1042_v51 = vmul.f32 %v1026_v63, %v1818_v3  ;;  %v823_v39 = vmul.f32 %v1944_v17, %v807_v27  ;;  %v993_v11 = vsel %vm961_vm4, %v945_v19, %v977_v9  ;;  %v741_v15 = vadd.f32 -1.4531521, %v725_v10 }
 0x256   :  { %v1040_v6 = vmul.f32 %v1024_v54, %v1821_v22  ;;  %v934_v47 = vmul.f32 %v1951_v60, %v854_v31  ;;  %v1027_v1 = vmul.f32 %v1011_v28, %v1843_v20  ;;  %v1009_v43 = vadd.f32 1.0, %v993_v11 }
 0x257   :  { %v932_v18 = vmul.f32 %v1403_v33, %v852_v5  ;;  %v839_v25 = vadd.f32 0.2548296, %v823_v39  ;;  %v757_v3 = vmul.f32 %v1960_v30, %v741_v15  ;;  %v730_v59 = vmul.f32 1.0614054, %v1980_v0 }
 0x258   :  { %v950_v37 = vsub.f32 1.0, %v934_v47  ;;  %v916_v50 = vmul.f32 1.442695, %v890_v52  ;;  %v1043_v26 = vmul.f32 %v1027_v1, %v1830_v12  ;;  %v1025_v22 = vmul.f32 %v1009_v43, %v1845_v32 }
 0x259   :  { %v948_v48 = vsub.f32 1.0, %v932_v18  ;;  %v855_v34 = vmul.f32 %v1944_v17, %v839_v25  ;;  %v773_v46 = vadd.f32 1.4214138, %v757_v3  ;;  %v746_v20 = vadd.f32 -1.4531521, %v730_v59 }
 0x25a   :  { %v982_v60 = vsub.f32 0.0, %v950_v37  ;;  %v1236_v33 = vpack.c.bf16 %v1043_v26, %v1042_v51  ;;  %v1041_v21 = vmul.f32 %v1025_v22, %v1853_v29  ;;  %vm964_vm6 = vcmp.ge.f32.partialorder %v1834_v14, 0.0 }
 0x25b   :  { %v980_v56 = vsub.f32 0.0, %v948_v48  ;;  %v935_v42 = vmul.f32 %v1407_v24, %v855_v34  ;;  %v789_v12 = vmul.f32 %v1960_v30, %v773_v46  ;;  %v762_v32 = vmul.f32 %v1980_v0, %v746_v20 }
 0x25c   :  { %v998_v52 = vsel %vm966_vm5, %v950_v37, %v982_v60  ;;  %1275 = vst [vmem:[%s2201_s7 + $0x8] sm:$0xff] %v1236_v33   ;;  %v1231_v2 = vpack.c.bf16 %v1041_v21, %v1040_v6  ;;  %1412 = vpow2.f32 %v916_v50  ;;  %v2010_v16 = vmul.f32 0.70710677, %v1931_v58  ;;  %v1411_v11 = vpop.eup %1410 }
 0x25d   :  { %v1014_v17 = vadd.f32 1.0, %v998_v52  ;;  %v996_v19 = vsel %vm964_vm6, %v948_v48, %v980_v56  ;;  %v951_v23 = vsub.f32 1.0, %v935_v42  ;;  %v805_v63 = vadd.f32 -0.28449672, %v789_v12  ;;  %v2217_v12 = vld [vmem:[#allocation9_spill] sm:$0xff] }
 0x25e   :  { %v1012_v29 = vadd.f32 1.0, %v996_v19  ;;  %v778_v24 = vadd.f32 1.4214138, %v762_v32  ;;  %1232 = vst [vmem:[%s2201_s7] sm:$0xff] %v1231_v2   ;;  %v2014_v27 = vadd.f32 %v1858_v35, %v1788_v55  ;;  %vm967_vm7 = vcmp.ge.f32.partialorder %v1864_v40, 0.0  ;;  %v2218_v2 = vld [vmem:[#allocation15_spill] sm:$0xff]  ;;  %v2219_v19 = vld [vmem:[#allocation12_spill] sm:$0xff] }
 0x25f   :  { %v1030_v53 = vmul.f32 %v1014_v17, %v1879_v57  ;;  %v983_v14 = vsub.f32 0.0, %v951_v23  ;;  %v821_v54 = vmul.f32 %v1960_v30, %v805_v63  ;;  %v615_v57 = vmul.f32 0.5, %v1837_v62 }
 0x260   :  { %v1028_v10 = vmul.f32 %v1012_v29, %v1882_v61  ;;  %v794_v41 = vmul.f32 %v1980_v0, %v778_v24  ;;  %v648_v51 = vand.u32 2147483647, %v2010_v16  ;;  %v453_v40 = vadd.f32 %v1813_v36, %v1808_v44 }
 0x261   :  { %v1046_v9 = vmul.f32 %v1030_v53, %v1861_v38  ;;  %v999_v31 = vsel %vm967_vm7, %v951_v23, %v983_v14  ;;  %v837_v5 = vadd.f32 0.2548296, %v821_v54  ;;  %v2029_v6 = vmul.f32 0.70710677, %v2014_v27 }
 0x262   :  { %v2024_v28 = vmul.f32 %v1028_v10, %v1890_v4  ;;  %v1015_v35 = vadd.f32 1.0, %v999_v31  ;;  %v810_v39 = vadd.f32 -0.28449672, %v794_v41  ;;  %v664_v61 = vmul.f32 0.3275911, %v648_v51  ;;  %v2220_v10 = vld [vmem:[#allocation3_spill] sm:$0xff] }
 0x263   :  { %v853_v62 = vmul.f32 %v1960_v30, %v837_v5  ;;  %v2035_v4 = vadd.f32 %v1788_v55, %v1868_v49  ;;  %v651_v1 = vand.u32 2147483647, %v2029_v6  ;;  %vm965_vm8 = vcmp.ge.f32.partialorder %v1893_v7, 0.0 }
 0x264   :  { %v1031_v38 = vmul.f32 %v1015_v35, %v615_v57  ;;  %v826_v47 = vmul.f32 %v1980_v0, %v810_v39  ;;  %v680_v15 = vadd.f32 1.0, %v664_v61  ;;  %v2049_v34 = vadd.f32 %v1895_v8, %v1788_v55  ;;  %v2221_v57 = vld [vmem:[#allocation11_spill] sm:$0xff] }
 0x265   :  { %v933_v18 = vmul.f32 %v1411_v11, %v853_v62  ;;  %v667_v25 = vmul.f32 0.3275911, %v651_v1  ;;  %v2040_v30 = vmul.f32 0.70710677, %v2035_v4  ;;  %v613_v20 = vmul.f32 0.5, %v1874_v13 }
 0x266   :  { %v1047_v43 = vmul.f32 %v1031_v38, %v453_v40  ;;  %v842_v36 = vadd.f32 0.2548296, %v826_v47  ;;  %1414 = vrcp.f32 %v680_v15  ;;  %v1413_v37 = vpop.eup %1412  ;;  %v872_v21 = vsub.f32 0.0, %v648_v51 }
 0x267   :  { %v949_v59 = vsub.f32 1.0, %v933_v18  ;;  %v683_v26 = vadd.f32 1.0, %v667_v25  ;;  %v649_v48 = vand.u32 2147483647, %v2040_v30  ;;  %v2053_v56 = vmul.f32 0.70710677, %v2049_v34 }
 0x268   :  { %v1246_v3 = vpack.c.bf16 %v1047_v43, %v1046_v9  ;;  %v858_v50 = vmul.f32 %v1980_v0, %v842_v36  ;;  %v445_v42 = vadd.f32 %v1808_v44, %v1815_v45  ;;  %v2059_v32 = vadd.f32 %v1788_v55, %v2217_v12 }
 0x269   :  { %v981_v49 = vsub.f32 0.0, %v949_v59  ;;  %1416 = vrcp.f32 %v683_v26  ;;  %v665_v46 = vmul.f32 0.3275911, %v649_v48  ;;  %vm970_vm9 = vcmp.ge.f32.partialorder %v2218_v2, 0.0 }
 0x26a   :  { %1277 = vst [vmem:[%s2201_s7 + $0x18] sm:$0xff] %v1246_v3   ;;  %v938_v22 = vmul.f32 %v1413_v37, %v858_v50  ;;  %v875_v17 = vsub.f32 0.0, %v651_v1  ;;  %v654_v13 = vand.u32 2147483647, %v2053_v56  ;;  %v618_v23 = vmul.f32 0.5, %v2219_v19  ;;  %v2222_v50 = vld [vmem:[#allocation14_spill] sm:$0xff] }
 0x26b   :  { %v997_v0 = vsel %vm965_vm8, %v949_v59, %v981_v49  ;;  %v681_v7 = vadd.f32 1.0, %v665_v46  ;;  %v888_v53 = vmul.f32 %v872_v21, %v648_v51  ;;  %v466_v54 = vadd.f32 %v2220_v10, %v1808_v44 }
 0x26c   :  { %v954_v60 = vsub.f32 1.0, %v938_v22  ;;  %v1013_v33 = vadd.f32 1.0, %v997_v0  ;;  %v670_v14 = vmul.f32 0.3275911, %v654_v13  ;;  %v2070_v9 = vmul.f32 0.70710677, %v2059_v32 }
 0x26d   :  { %1418 = vrcp.f32 %v681_v7  ;;  %v2074_v31 = vadd.f32 %v2221_v57, %v1788_v55  ;;  %v891_v39 = vmul.f32 %v875_v17, %v651_v1  ;;  %v912_v62 = vmul.f32 1.442695, %v888_v53 }
 0x26e   :  { %v986_v52 = vsub.f32 0.0, %v954_v60  ;;  %v1029_v8 = vmul.f32 %v1013_v33, %v613_v20  ;;  %v686_v40 = vadd.f32 1.0, %v670_v14  ;;  %v652_v51 = vand.u32 2147483647, %v2070_v9 }
 0x26f   :  { %v2086_v47 = vmul.f32 0.70710677, %v2074_v31  ;;  %v873_v1 = vsub.f32 0.0, %v649_v48  ;;  %v918_v18 = vmul.f32 1.442695, %v891_v39  ;;  %v2093_v26 = vadd.f32 %v1788_v55, %v2222_v50 }
 0x270   :  { %v1002_v29 = vsel %vm970_vm9, %v954_v60, %v986_v52  ;;  %v2064_v63 = vpop.eup %1414  ;;  %v1045_v24 = vmul.f32 %v1029_v8, %v445_v42  ;;  %1420 = vrcp.f32 %v686_v40  ;;  %v668_v43 = vmul.f32 0.3275911, %v652_v51 }
 0x271   :  { %v1018_v45 = vadd.f32 1.0, %v1002_v29  ;;  %v728_v41 = vmul.f32 1.0614054, %v2064_v63  ;;  %v655_v36 = vand.u32 2147483647, %v2086_v47  ;;  %1422 = vpow2.f32 %v912_v62  ;;  %v2223_v29 = vld [vmem:[#allocation4_spill] sm:$0xff] }
 0x272   :  { %v1241_v35 = vpack.c.bf16 %v1045_v24, %v2024_v28  ;;  %v684_v3 = vadd.f32 1.0, %v668_v43  ;;  %v889_v60 = vmul.f32 %v873_v1, %v649_v48  ;;  %v878_v20 = vsub.f32 0.0, %v654_v13 }
 0x273   :  { %v1034_v5 = vmul.f32 %v1018_v45, %v618_v23  ;;  %v744_v61 = vadd.f32 -1.4531521, %v728_v41  ;;  %v2078_v11 = vpop.eup %1416  ;;  %v671_v59 = vmul.f32 0.3275911, %v655_v36  ;;  %v2101_v52 = vmul.f32 0.70710677, %v2093_v26 }
 0x274   :  { %1276 = vst [vmem:[%s2201_s7 + $0x10] sm:$0xff] %v1241_v35   ;;  %v731_v15 = vmul.f32 1.0614054, %v2078_v11  ;;  %1424 = vrcp.f32 %v684_v3  ;;  %v914_v8 = vmul.f32 1.442695, %v889_v60  ;;  %v894_v19 = vmul.f32 %v878_v20, %v654_v13 }
 0x275   :  { %v2083_v38 = vmul.f32 %v1034_v5, %v466_v54  ;;  %v760_v28 = vmul.f32 %v2064_v63, %v744_v61  ;;  %v687_v33 = vadd.f32 1.0, %v671_v59  ;;  %1426 = vpow2.f32 %v918_v18 }
 0x276   :  { %v747_v37 = vadd.f32 -1.4531521, %v731_v15  ;;  %v2106_v48 = vand.u32 2147483647, %v2101_v52  ;;  %v876_v23 = vsub.f32 0.0, %v652_v51  ;;  %v2113_v24 = vadd.f32 %v1808_v44, %v2223_v29 }
 0x277   :  { %v776_v25 = vadd.f32 1.4214138, %v760_v28  ;;  %v2095_v49 = vpop.eup %1418  ;;  %1428 = vrcp.f32 %v687_v33  ;;  %v616_v10 = vmul.f32 0.5, %v1931_v58  ;;  %v879_v41 = vsub.f32 0.0, %v655_v36 }
 0x278   :  { %v763_v0 = vmul.f32 %v2078_v11, %v747_v37  ;;  %v729_v46 = vmul.f32 1.0614054, %v2095_v49  ;;  %v669_v57 = vmul.f32 0.3275911, %v2106_v48  ;;  %1430 = vpow2.f32 %v914_v8 }
 0x279   :  { %v792_v22 = vmul.f32 %v2064_v63, %v776_v25  ;;  %v924_v61 = vmul.f32 1.442695, %v894_v19  ;;  %v892_v62 = vmul.f32 %v876_v23, %v652_v51  ;;  %vm968_vm10 = vcmp.ge.f32.partialorder %v2010_v16, 0.0 }
 0x27a   :  { %v779_v42 = vadd.f32 1.4214138, %v763_v0  ;;  %v745_v55 = vadd.f32 -1.4531521, %v729_v46  ;;  %v2108_v2 = vpop.eup %1420  ;;  %v685_v28 = vadd.f32 1.0, %v669_v57  ;;  %v895_v25 = vmul.f32 %v879_v41, %v655_v36 }
 0x27b   :  { %v808_v21 = vadd.f32 -0.28449672, %v792_v22  ;;  %v734_v14 = vmul.f32 1.0614054, %v2108_v2  ;;  %v1423_v39 = vpop.eup %1422  ;;  %v619_v59 = vmul.f32 0.5, %v2014_v27  ;;  %vm971_vm11 = vcmp.ge.f32.partialorder %v2029_v6, 0.0 }
 0x27c   :  { %v795_v12 = vmul.f32 %v2078_v11, %v779_v42  ;;  %v761_v17 = vmul.f32 %v2095_v49, %v745_v55  ;;  %1432 = vrcp.f32 %v685_v28  ;;  %v920_v46 = vmul.f32 1.442695, %v892_v62  ;;  %v2224_v28 = vld [vmem:[#allocation5_spill] sm:$0xff] }
 0x27d   :  { %v824_v7 = vmul.f32 %v2064_v63, %v808_v21  ;;  %v750_v13 = vadd.f32 -1.4531521, %v734_v14  ;;  %1434 = vpow2.f32 %v924_v61  ;;  %v926_v27 = vmul.f32 1.442695, %v895_v25 }
 0x27e   :  { %v811_v53 = vadd.f32 -0.28449672, %v795_v12  ;;  %v777_v54 = vadd.f32 1.4214138, %v761_v17  ;;  %v2121_v15 = vpop.eup %1424  ;;  %1436 = vpow2.f32 %v920_v46  ;;  %vm969_vm12 = vcmp.ge.f32.partialorder %v2040_v30, 0.0 }
 0x27f   :  { %v840_v45 = vadd.f32 0.2548296, %v824_v7  ;;  %v766_v43 = vmul.f32 %v2108_v2, %v750_v13  ;;  %v1427_v37 = vpop.eup %1426  ;;  %1438 = vpow2.f32 %v926_v27  ;;  %vm974_vm13 = vcmp.ge.f32.partialorder %v2053_v56, 0.0 }
 0x280   :  { %v827_v5 = vmul.f32 %v2078_v11, %v811_v53  ;;  %v793_v40 = vmul.f32 %v2095_v49, %v777_v54  ;;  %vm972_vm14 = vcmp.ge.f32.partialorder %v2070_v9, 0.0  ;;  %vm975_vm15 = vcmp.ge.f32.partialorder %v2086_v47, 0.0 }
 0x281   :  { %v856_v35 = vmul.f32 %v2064_v63, %v840_v45  ;;  %v732_v63 = vmul.f32 1.0614054, %v2121_v15  ;;  %v782_v50 = vadd.f32 1.4214138, %v766_v43  ;;  %v2128_v22 = vpop.eup %1428  ;;  %vm973_vm0 = vcmp.ge.f32.partialorder %v2101_v52, 0.0 }
 0x282   :  { %v843_v58 = vadd.f32 0.2548296, %v827_v5  ;;  %v809_v18 = vadd.f32 -0.28449672, %v793_v40  ;;  %v735_v36 = vmul.f32 1.0614054, %v2128_v22  ;;  %v1431_v45 = vpop.eup %1430 }
 0x283   :  { %v936_v1 = vmul.f32 %v1423_v39, %v856_v35  ;;  %v748_v60 = vadd.f32 -1.4531521, %v732_v63  ;;  %v798_v21 = vmul.f32 %v2108_v2, %v782_v50 }
 0x284   :  { %v859_v51 = vmul.f32 %v2078_v11, %v843_v58  ;;  %v825_v0 = vmul.f32 %v2095_v49, %v809_v18  ;;  %v877_v11 = vsub.f32 0.0, %v2106_v48  ;;  %v751_v17 = vadd.f32 -1.4531521, %v735_v36 }
 0x285   :  { %v952_v3 = vsub.f32 1.0, %v936_v1  ;;  %v764_v55 = vmul.f32 %v2121_v15, %v748_v60  ;;  %v814_v8 = vadd.f32 -0.28449672, %v798_v21  ;;  %v469_v1 = vadd.f32 %v2224_v28, %v1808_v44  ;;  %v2225_v21 = vld [vmem:[#allocation6_spill] sm:$0xff] }
 0x286   :  { %v939_v33 = vmul.f32 %v1427_v37, %v859_v51  ;;  %v841_v42 = vadd.f32 0.2548296, %v825_v0  ;;  %v767_v54 = vmul.f32 %v2128_v22, %v751_v17  ;;  %v893_v6 = vmul.f32 %v877_v11, %v2106_v48  ;;  %v2143_v39 = vpop.eup %1432 }
 0x287   :  { %v984_v20 = vsub.f32 0.0, %v952_v3  ;;  %v780_v29 = vadd.f32 1.4214138, %v764_v55  ;;  %v830_v14 = vmul.f32 %v2108_v2, %v814_v8  ;;  %v733_v43 = vmul.f32 1.0614054, %v2143_v39  ;;  %v1435_v18 = vpop.eup %1434 }
 0x288   :  { %v955_v12 = vsub.f32 1.0, %v939_v33  ;;  %v857_v23 = vmul.f32 %v2095_v49, %v841_v42  ;;  %v783_v13 = vadd.f32 1.4214138, %v767_v54  ;;  %v617_v48 = vmul.f32 0.5, %v2035_v4  ;;  %v1437_v42 = vpop.eup %1436 }
 0x289   :  { %v1000_v7 = vsel %vm968_vm10, %v952_v3, %v984_v20  ;;  %v796_v16 = vmul.f32 %v2121_v15, %v780_v29  ;;  %v846_v5 = vadd.f32 0.2548296, %v830_v14  ;;  %v749_v51 = vadd.f32 -1.4531521, %v733_v43 }
 0x28a   :  { %v1016_v19 = vadd.f32 1.0, %v1000_v7  ;;  %v987_v53 = vsub.f32 0.0, %v955_v12  ;;  %v937_v57 = vmul.f32 %v1431_v45, %v857_v23  ;;  %v799_v58 = vmul.f32 %v2128_v22, %v783_v13 }
 0x28b   :  { %v812_v62 = vadd.f32 -0.28449672, %v796_v16  ;;  %v461_v36 = vadd.f32 %v1808_v44, %v2225_v21  ;;  %v622_v23 = vmul.f32 0.5, %v2049_v34  ;;  %v620_v13 = vmul.f32 0.5, %v2059_v32  ;;  %v2228_v32 = vld [vmem:[#allocation10_spill] sm:$0xff] }
 0x28c   :  { %v1032_v41 = vmul.f32 %v1016_v19, %v616_v10  ;;  %v1003_v35 = vsel %vm971_vm11, %v955_v12, %v987_v53  ;;  %v953_v61 = vsub.f32 1.0, %v937_v57  ;;  %v862_v10 = vmul.f32 %v2108_v2, %v846_v5  ;;  %v1439_v12 = vpop.eup %1438 }
 0x28d   :  { %v1019_v40 = vadd.f32 1.0, %v1003_v35  ;;  %v828_v37 = vmul.f32 %v2121_v15, %v812_v62  ;;  %v815_v3 = vadd.f32 -0.28449672, %v799_v58  ;;  %v922_v2 = vmul.f32 1.442695, %v893_v6 }
 0x28e   :  { %v1048_v49 = vmul.f32 %v1032_v41, %v2113_v24  ;;  %v985_v25 = vsub.f32 0.0, %v953_v61  ;;  %v942_v24 = vmul.f32 %v1435_v18, %v862_v10  ;;  %v2226_v41 = vld [vmem:[#allocation7_spill] sm:$0xff]  ;;  %v623_v58 = vmul.f32 0.5, %v2074_v31 }
 0x28f   :  { %v1035_v63 = vmul.f32 %v1019_v40, %v619_v59  ;;  %v844_v60 = vadd.f32 0.2548296, %v828_v37  ;;  %v831_v33 = vmul.f32 %v2128_v22, %v815_v3  ;;  %v765_v59 = vmul.f32 %v2143_v39, %v749_v51 }
 0x290   :  { %v1001_v0 = vsel %vm969_vm12, %v953_v61, %v985_v25  ;;  %v958_v20 = vsub.f32 1.0, %v942_v24  ;;  %1440 = vpow2.f32 %v922_v2  ;;  %v482_v57 = vadd.f32 %v2226_v41, %v1808_v44  ;;  %v2227_v61 = vld [vmem:[#allocation8_spill] sm:$0xff] }
 0x291   :  { %v1051_v50 = vmul.f32 %v1035_v63, %v469_v1  ;;  %v1017_v46 = vadd.f32 1.0, %v1001_v0  ;;  %v860_v30 = vmul.f32 %v2121_v15, %v844_v60  ;;  %v847_v11 = vadd.f32 0.2548296, %v831_v33 }
 0x292   :  { %v990_v27 = vsub.f32 0.0, %v958_v20  ;;  %v781_v7 = vadd.f32 1.4214138, %v765_v59  ;;  %v474_v62 = vadd.f32 %v1808_v44, %v2227_v61  ;;  %v621_v31 = vmul.f32 0.5, %v2093_v26 }
 0x293   :  { %v1256_v4 = vpack.c.bf16 %v1051_v50, %v2083_v38  ;;  %v1033_v55 = vmul.f32 %v1017_v46, %v617_v48  ;;  %v940_v8 = vmul.f32 %v1437_v42, %v860_v30  ;;  %v863_v19 = vmul.f32 %v2128_v22, %v847_v11  ;;  %v1442_v50 = vld [vmem:[%s2200_s5] ss:$0 sm:$0xff] }
 0x294   :  { %v1006_v17 = vsel %vm974_vm13, %v958_v20, %v990_v27  ;;  %v797_v15 = vmul.f32 %v2143_v39, %v781_v7  ;;  %v485_v48 = vadd.f32 %v2228_v32, %v1808_v44  ;;  %v2229_v44 = vld [vmem:[#allocation13_spill] sm:$0xff] }
 0x295   :  { %1279 = vst [vmem:[%s2201_s7 + $0x28] sm:$0xff] %v1256_v4   ;;  %v1049_v38 = vmul.f32 %v1033_v55, %v461_v36  ;;  %v1022_v29 = vadd.f32 1.0, %v1006_v17  ;;  %v956_v45 = vsub.f32 1.0, %v940_v8  ;;  %v943_v14 = vmul.f32 %v1439_v12, %v863_v19 }
 0x296   :  { %v813_v54 = vadd.f32 -0.28449672, %v797_v15  ;;  %v477_v0 = vadd.f32 %v1442_v50, %v2229_v44 }
 0x297   :  { %v1251_v53 = vpack.c.bf16 %v1049_v38, %v1048_v49  ;;  %v1038_v16 = vmul.f32 %v1022_v29, %v622_v23  ;;  %v988_v56 = vsub.f32 0.0, %v956_v45  ;;  %v959_v22 = vsub.f32 1.0, %v943_v14 }
 0x298   :  { %v829_v35 = vmul.f32 %v2143_v39, %v813_v54 }
 0x299   :  { %1278 = vst [vmem:[%s2201_s7 + $0x20] sm:$0xff] %v1251_v53   ;;  %v1054_v34 = vmul.f32 %v1038_v16, %v482_v57  ;;  %v1004_v5 = vsel %vm972_vm14, %v956_v45, %v988_v56  ;;  %v991_v49 = vsub.f32 0.0, %v959_v22 }
 0x29a   :  { %v1020_v6 = vadd.f32 1.0, %v1004_v5  ;;  %v845_v40 = vadd.f32 0.2548296, %v829_v35  ;;  %v1441_v9 = vpop.eup %1440 }
 0x29b   :  { %v1007_v1 = vsel %vm975_vm15, %v959_v22, %v991_v49 }
 0x29c   :  { %v1036_v28 = vmul.f32 %v1020_v6, %v620_v13  ;;  %v861_v10 = vmul.f32 %v2143_v39, %v845_v40  ;;  %v1023_v43 = vadd.f32 1.0, %v1007_v1 }
 0x29e   :  { %v1052_v18 = vmul.f32 %v1036_v28, %v474_v62  ;;  %v941_v63 = vmul.f32 %v1441_v9, %v861_v10  ;;  %v1039_v25 = vmul.f32 %v1023_v43, %v623_v58 }
 0x2a0   :  { %v957_v37 = vsub.f32 1.0, %v941_v63  ;;  %v1055_v24 = vmul.f32 %v1039_v25, %v485_v48 }
 0x2a2   :  { %v989_v47 = vsub.f32 0.0, %v957_v37  ;;  %v1266_v3 = vpack.c.bf16 %v1055_v24, %v1054_v34 }
 0x2a4   :  { %v1005_v51 = vsel %vm973_vm0, %v957_v37, %v989_v47  ;;  %1281 = vst [vmem:[%s2201_s7 + $0x38] sm:$0xff] %v1266_v3  }
 0x2a5   :  { %v1021_v39 = vadd.f32 1.0, %v1005_v51 }
 0x2a7   :  { %v1037_v60 = vmul.f32 %v1021_v39, %v621_v31 }
 0x2a9   :  { %v1053_v2 = vmul.f32 %v1037_v60, %v477_v0 }
 0x2ab   :  { %v1261_v46 = vpack.c.bf16 %v1053_v2, %v1052_v18 }
 0x2ad   :  { %1280 = vst [vmem:[%s2201_s7 + $0x30] sm:$0xff] %v1261_v46  }

</bundles_post_ra>
